<compile_context>
chip_gen: v7x
topology: tpu7x:2x2x1
jax: 0.10.0
libtpu: 0.0.40
codegen_flags: <defaults>
</compile_context>

<pallas_src>
import functools

import jax
import jax.numpy as jnp
from jax.experimental import pallas as pl
from jax.experimental.pallas import tpu as pltpu


# ----------------------------------------------------------------------------
# helpers
# ----------------------------------------------------------------------------
def _round_up(n, m):
    return ((n + m - 1) // m) * m


def _pick_unroll(tt, max_unroll=8):
    """Largest unroll factor <= max_unroll that divides the time tile."""
    u = max(1, min(max_unroll, tt))
    while u > 1 and tt % u != 0:
        u -= 1
    return u


def _vmem_limit_bytes():
    """Scoped-VMEM limit with headroom below physical VMEM."""
    try:
        cap = int(pltpu.get_tpu_info().vmem_capacity_bytes)
        return int(min(96 * 1024 * 1024, max(32 * 1024 * 1024, cap * 3 // 4)))
    except Exception:
        return 64 * 1024 * 1024


def _default_dir_parallel():
    """True on chips with >1 TensorCore per device (v7x / megacore v3/v4/v5p):
    keep direction as a 'parallel' grid axis so each core runs one direction.
    On single-TC chips (v5e/v6e) the two directions are interleaved inside one
    grid step instead."""
    try:
        kind = jax.devices()[0].device_kind.lower()
    except Exception:
        return False
    return any(tag in kind for tag in ("v7", "v4", "v3", "v5p"))


def _lstm_cell(gates, c_prev, H):
    """PyTorch gate order i, f, g, o.  gates: (B, 4H) float32."""
    i = jax.nn.sigmoid(gates[:, 0 * H:1 * H])
    f = jax.nn.sigmoid(gates[:, 1 * H:2 * H])
    g = jnp.tanh(gates[:, 2 * H:3 * H])
    o = jax.nn.sigmoid(gates[:, 3 * H:4 * H])
    c = f * c_prev + i * g
    h = o * jnp.tanh(c)
    return h, c


# ----------------------------------------------------------------------------
# Pallas kernels
# ----------------------------------------------------------------------------
def _make_lstm_dirsplit_kernel(n_parts, TT, H, T, T_pad, matmul_dtype, unroll):
    """Fused projection + recurrence; grid = (direction, time_block).
    The direction axis is squeezed out of all refs by the BlockSpecs."""
    needs_mask = (T_pad != T)

    def kernel(*refs):
        idx = 0
        x_refs = refs[idx:idx + n_parts]; idx += n_parts
        wih_refs = refs[idx:idx + n_parts]; idx += n_parts
        whh_ref = refs[idx]; bias_ref = refs[idx + 1]; idx += 2
        out_ref, hN_ref, cN_ref = refs[idx:idx + 3]; idx += 3
        g_scr, h_scr, c_scr = refs[idx:idx + 3]

        d = pl.program_id(0)
        t = pl.program_id(1)
        NT = pl.num_programs(1)
        B = h_scr.shape[0]

        @pl.when(t == 0)
        def _():
            h_scr[...] = jnp.zeros_like(h_scr)
            c_scr[...] = jnp.zeros_like(c_scr)

        # Fused input projection for this (direction, time-block):
        #   g = sum_k x_k @ W_ih_k + b     (one (TT*B, Din_k) GEMM per part).
        acc = None
        for xr, wr in zip(x_refs, wih_refs):
            p = jnp.dot(xr[...].reshape(TT * B, -1), wr[...],
                        preferred_element_type=jnp.float32)
            acc = p if acc is None else acc + p
        acc = acc + bias_ref[...]                      # bias added after dots
        g_scr[...] = acc.reshape(TT, B, 4 * H)

        w_hh = whh_ref[...]                            # (H, 4H), pre-cast

        def run_chain(reverse):
            # Direction-specialized (static) local time index.
            blk = (NT - 1 - t) if reverse else t       # global time block

            def step(s, carry):
                lt = (TT - 1 - s) if reverse else s
                h_prev = h_scr[...]
                c_prev = c_scr[...]
                gates = g_scr[lt] + jnp.dot(
                    h_prev.astype(matmul_dtype), w_hh,
                    preferred_element_type=jnp.float32)
                h_new, c_new = _lstm_cell(gates, c_prev, H)
                if needs_mask:
                    valid = (blk * TT + lt) < T
                    h_new = jnp.where(valid, h_new, h_prev)
                    c_new = jnp.where(valid, c_new, c_prev)
                h_scr[...] = h_new
                c_scr[...] = c_new
                out_ref[lt] = h_new.astype(out_ref.dtype)
                return carry

            jax.lax.fori_loop(0, TT, step, 0, unroll=unroll)

        @pl.when(d == 0)
        def _():
            run_chain(False)

        @pl.when(d == 1)
        def _():
            run_chain(True)

        @pl.when(t == NT - 1)
        def _():
            hN_ref[...] = h_scr[...]
            cN_ref[...] = c_scr[...]

    return kernel


def _make_lstm_interleaved_kernel(n_parts, TT, H, T, T_pad, matmul_dtype,
                                  unroll):
    """Fused projection + recurrence with BOTH directions interleaved per grid
    step (single-TC chips); grid = (time_block,)."""
    needs_mask = (T_pad != T)

    def kernel(*refs):
        idx = 0
        xf_refs = refs[idx:idx + n_parts]; idx += n_parts
        xb_refs = refs[idx:idx + n_parts]; idx += n_parts
        wih_refs = refs[idx:idx + n_parts]; idx += n_parts
        whh_ref = refs[idx]; bias_ref = refs[idx + 1]; idx += 2
        out_f_ref, out_b_ref, hN_ref, cN_ref = refs[idx:idx + 4]; idx += 4
        g_f, g_b, h_f, c_f, h_b, c_b = refs[idx:idx + 6]

        t = pl.program_id(0)
        NT = pl.num_programs(0)
        B = h_f.shape[0]

        @pl.when(t == 0)
        def _():
            h_f[...] = jnp.zeros_like(h_f)
            c_f[...] = jnp.zeros_like(c_f)
            h_b[...] = jnp.zeros_like(h_b)
            c_b[...] = jnp.zeros_like(c_b)

        def project(x_refs, dsel, g_ref):
            acc = None
            for xr, wr in zip(x_refs, wih_refs):
                p = jnp.dot(xr[...].reshape(TT * B, -1), wr[dsel],
                            preferred_element_type=jnp.float32)
                acc = p if acc is None else acc + p
            g_ref[...] = (acc + bias_ref[dsel]).reshape(TT, B, 4 * H)

        project(xf_refs, 0, g_f)
        project(xb_refs, 1, g_b)

        w_f = whh_ref[0]
        w_b = whh_ref[1]

        def step(s, carry):
            sb = TT - 1 - s
            h_prev_f = h_f[...]; c_prev_f = c_f[...]
            h_prev_b = h_b[...]; c_prev_b = c_b[...]
            # Two independent recurrences interleaved: each hides the other's
            # MXU fill/drain and sigmoid/tanh (EUP) latency.
            gf = g_f[s] + jnp.dot(h_prev_f.astype(matmul_dtype), w_f,
                                  preferred_element_type=jnp.float32)
            gb = g_b[sb] + jnp.dot(h_prev_b.astype(matmul_dtype), w_b,
                                   preferred_element_type=jnp.float32)
            hf, cf = _lstm_cell(gf, c_prev_f, H)
            hb, cb = _lstm_cell(gb, c_prev_b, H)
            if needs_mask:
                vf = (t * TT + s) < T
                vb = ((NT - 1 - t) * TT + sb) < T
                hf = jnp.where(vf, hf, h_prev_f)
                cf = jnp.where(vf, cf, c_prev_f)
                hb = jnp.where(vb, hb, h_prev_b)
                cb = jnp.where(vb, cb, c_prev_b)
            h_f[...] = hf; c_f[...] = cf
            h_b[...] = hb; c_b[...] = cb
            out_f_ref[s] = hf.astype(out_f_ref.dtype)
            out_b_ref[sb] = hb.astype(out_b_ref.dtype)
            return carry

        jax.lax.fori_loop(0, TT, step, 0, unroll=unroll)

        @pl.when(t == NT - 1)
        def _():
            hN_ref[0] = h_f[...]
            hN_ref[1] = h_b[...]
            cN_ref[0] = c_f[...]
            cN_ref[1] = c_b[...]

    return kernel


def _make_proj_kernel(n_parts):
    """Final linear: out = sum_k x_k @ W_k + b (fwd/bwd halves, never concat)."""
    def kernel(*refs):
        x_refs = refs[:n_parts]
        w_refs = refs[n_parts:2 * n_parts]
        b_ref = refs[2 * n_parts]
        o_ref = refs[2 * n_parts + 1]
        acc = None
        for xr, wr in zip(x_refs, w_refs):
            p = jnp.dot(xr[...].reshape(-1, xr.shape[-1]), wr[...],
                        preferred_element_type=jnp.float32)
            acc = p if acc is None else acc + p
        acc = acc + b_ref[...]
        o_ref[...] = acc.reshape(o_ref.shape).astype(o_ref.dtype)
    return kernel


# ----------------------------------------------------------------------------
# pallas_call wrappers
# ----------------------------------------------------------------------------
# x_parts: list of (array, dir_index); dir_index is None for a (T_pad, Bp, Din)
# array or 0/1 to select a half of a stacked (2, T_pad, Bp, Din) array.  This
# lets the next layer / final linear consume fwd & bwd halves via index maps
# without ever materializing a (T, B, 2H) concatenation.

def _lstm_layer_dirsplit(x_parts, wih, whh, bias, *, T, T_pad, TT, Bp, H,
                         act_dtype, matmul_dtype, unroll, vmem_limit):
    NT = T_pad // TT

    def t_idx(d, t):
        return t + d * (NT - 1 - 2 * t)      # fwd: t ; bwd: NT-1-t

    in_specs, args = [], []
    for arr, di in x_parts:
        if di is None:
            in_specs.append(pl.BlockSpec(
                (TT,) + arr.shape[1:],
                lambda d, t: (t_idx(d, t), 0, 0)))
        else:
            in_specs.append(pl.BlockSpec(
                (None, TT) + arr.shape[2:],
                lambda d, t, di=di: (di, t_idx(d, t), 0, 0)))
        args.append(arr)
    for w in wih:
        in_specs.append(pl.BlockSpec((None,) + w.shape[1:],
                                     lambda d, t: (d, 0, 0)))
        args.append(w)
    in_specs.append(pl.BlockSpec((None,) + whh.shape[1:],
                                 lambda d, t: (d, 0, 0)))
    args.append(whh)
    in_specs.append(pl.BlockSpec((None,) + bias.shape[1:],
                                 lambda d, t: (d, 0, 0)))
    args.append(bias)

    out, h_n, c_n = pl.pallas_call(
        _make_lstm_dirsplit_kernel(len(x_parts), TT, H, T, T_pad,
                                   matmul_dtype, unroll),
        grid=(2, NT),
        in_specs=in_specs,
        out_specs=[
            pl.BlockSpec((None, TT, Bp, H),
                         lambda d, t: (d, t_idx(d, t), 0, 0)),
            pl.BlockSpec((None, Bp, H), lambda d, t: (d, 0, 0)),
            pl.BlockSpec((None, Bp, H), lambda d, t: (d, 0, 0)),
        ],
        out_shape=[
            jax.ShapeDtypeStruct((2, T_pad, Bp, H), act_dtype),
            jax.ShapeDtypeStruct((2, Bp, H), jnp.float32),
            jax.ShapeDtypeStruct((2, Bp, H), jnp.float32),
        ],
        scratch_shapes=[
            pltpu.VMEM((TT, Bp, 4 * H), jnp.float32),   # fused gates
            pltpu.VMEM((Bp, H), jnp.float32),           # h carry
            pltpu.VMEM((Bp, H), jnp.float32),           # c carry
        ],
        compiler_params=pltpu.CompilerParams(
            dimension_semantics=("parallel", "arbitrary"),
            vmem_limit_bytes=vmem_limit),
    )(*args)
    return [(out, 0), (out, 1)], h_n, c_n


def _lstm_layer_interleaved(x_parts, wih, whh, bias, *, T, T_pad, TT, Bp, H,
                            act_dtype, matmul_dtype, unroll, vmem_limit):
    NT = T_pad // TT

    in_specs, args = [], []
    for rev in (False, True):
        if rev:
            def tmap(t, NT=NT):
                return NT - 1 - t
        else:
            def tmap(t):
                return t
        for arr, di in x_parts:
            if di is None:
                in_specs.append(pl.BlockSpec(
                    (TT,) + arr.shape[1:],
                    lambda t, tmap=tmap: (tmap(t), 0, 0)))
            else:
                in_specs.append(pl.BlockSpec(
                    (None, TT) + arr.shape[2:],
                    lambda t, tmap=tmap, di=di: (di, tmap(t), 0, 0)))
            args.append(arr)
    for w in wih:
        in_specs.append(pl.BlockSpec(w.shape, lambda t: (0, 0, 0)))
        args.append(w)
    in_specs.append(pl.BlockSpec(whh.shape, lambda t: (0, 0, 0)))
    args.append(whh)
    in_specs.append(pl.BlockSpec(bias.shape, lambda t: (0, 0, 0)))
    args.append(bias)

    out_f, out_b, h_n, c_n = pl.pallas_call(
        _make_lstm_interleaved_kernel(len(x_parts), TT, H, T, T_pad,
                                      matmul_dtype, unroll),
        grid=(NT,),
        in_specs=in_specs,
        out_specs=[
            pl.BlockSpec((TT, Bp, H), lambda t: (t, 0, 0)),
            pl.BlockSpec((TT, Bp, H), lambda t: (NT - 1 - t, 0, 0)),
            pl.BlockSpec((2, Bp, H), lambda t: (0, 0, 0)),
            pl.BlockSpec((2, Bp, H), lambda t: (0, 0, 0)),
        ],
        out_shape=[
            jax.ShapeDtypeStruct((T_pad, Bp, H), act_dtype),
            jax.ShapeDtypeStruct((T_pad, Bp, H), act_dtype),
            jax.ShapeDtypeStruct((2, Bp, H), jnp.float32),
            jax.ShapeDtypeStruct((2, Bp, H), jnp.float32),
        ],
        scratch_shapes=[
            pltpu.VMEM((TT, Bp, 4 * H), jnp.float32),   # fused gates (fwd)
            pltpu.VMEM((TT, Bp, 4 * H), jnp.float32),   # fused gates (bwd)
            pltpu.VMEM((Bp, H), jnp.float32),           # h fwd
            pltpu.VMEM((Bp, H), jnp.float32),           # c fwd
            pltpu.VMEM((Bp, H), jnp.float32),           # h bwd
            pltpu.VMEM((Bp, H), jnp.float32),           # c bwd
        ],
        compiler_params=pltpu.CompilerParams(
            dimension_semantics=("arbitrary",),
            vmem_limit_bytes=vmem_limit),
    )(*args)
    return [(out_f, None), (out_b, None)], h_n, c_n


def _proj(x_parts, weights, bias, *, T_pad, Bp, TT, Dout, vmem_limit):
    NT = T_pad // TT
    in_specs, args = [], []
    for arr, di in x_parts:
        if di is None:
            in_specs.append(pl.BlockSpec((TT,) + arr.shape[1:],
                                         lambda t: (t, 0, 0)))
        else:
            in_specs.append(pl.BlockSpec((None, TT) + arr.shape[2:],
                                         lambda t, di=di: (di, t, 0, 0)))
        args.append(arr)
    for w in weights:
        in_specs.append(pl.BlockSpec(w.shape, lambda t: (0, 0)))
        args.append(w)
    in_specs.append(pl.BlockSpec(bias.shape, lambda t: (0, 0)))
    args.append(bias)

    return pl.pallas_call(
        _make_proj_kernel(len(x_parts)),
        grid=(NT,),
        in_specs=in_specs,
        out_specs=pl.BlockSpec((TT, Bp, Dout), lambda t: (t, 0, 0)),
        out_shape=jax.ShapeDtypeStruct((T_pad, Bp, Dout), jnp.float32),
        compiler_params=pltpu.CompilerParams(
            dimension_semantics=("parallel",),
            vmem_limit_bytes=vmem_limit),
    )(*args)


# ----------------------------------------------------------------------------
# Forward pass (BLSTM.forward(x, hidden=None))
# ----------------------------------------------------------------------------
def blstm_forward(x, params, *, matmul_dtype=jnp.float32, dir_parallel=None,
                  time_cap=64, max_unroll=8):
    """x: (T, B, dim) -> (y: (T, B, dim), (h_n, c_n)) with
    h_n, c_n: (num_layers*2, B, dim), (fwd, bwd) interleaved per layer as in
    PyTorch.  matmul_dtype=bfloat16 is recommended on all TPU generations
    (h/c state, gate math and accumulation stay float32)."""
    # TODO(synk): only hidden=None (zero initial state) is supported.
    T, B, _ = x.shape
    H = params["lstm"][0]["fwd"][1].shape[1]      # w_hh: (4H, H)
    Hp = _round_up(H, 128)                        # lane-dense gates / outputs
    Bp = _round_up(B, 8)                          # sublane-dense rows
    TT = max(1, min(time_cap, T))
    T_pad = _round_up(T, TT)
    unroll = _pick_unroll(TT, max_unroll)
    act_dtype = matmul_dtype
    vmem_limit = _vmem_limit_bytes()
    if dir_parallel is None:
        dir_parallel = _default_dir_parallel()
    layer_fn = _lstm_layer_dirsplit if dir_parallel else _lstm_layer_interleaved

    x_p = x
    if T_pad != T or Bp != B:
        x_p = jnp.pad(x, ((0, T_pad - T), (0, Bp - B), (0, 0)))
    x_parts = [(x_p.astype(matmul_dtype), None)]

    h_list, c_list = [], []
    for li, layer_p in enumerate(params["lstm"]):
        wih_dirs, whh_dirs, bias_dirs = [], [], []
        for dname in ("fwd", "bwd"):
            w_ih, w_hh, b_ih, b_hh = layer_p[dname]
            b = b_ih + b_hh
            if Hp != H:
                # zero-pad each gate block: padded h/c entries stay exactly 0.
                w_ih = jnp.pad(w_ih.reshape(4, H, -1),
                               ((0, 0), (0, Hp - H), (0, 0))).reshape(4 * Hp, -1)
                w_hh = jnp.pad(w_hh.reshape(4, H, -1),
                               ((0, 0), (0, Hp - H), (0, 0))).reshape(4 * Hp, -1)
                w_hh = jnp.pad(w_hh, ((0, 0), (0, Hp - H)))         # (4Hp, Hp)
                b = jnp.pad(b.reshape(4, H),
                            ((0, 0), (0, Hp - H))).reshape(4 * Hp)
            if li == 0:
                w_parts = [w_ih]                                    # (4Hp, D)
            else:
                # consume the fwd/bwd halves of the previous layer directly
                w_parts = [w_ih[:, :H], w_ih[:, H:]]                # (4Hp, H)
                if Hp != H:
                    w_parts = [jnp.pad(p, ((0, 0), (0, Hp - H)))
                               for p in w_parts]                    # (4Hp, Hp)
            wih_dirs.append([p.T.astype(matmul_dtype) for p in w_parts])
            whh_dirs.append(w_hh.T.astype(matmul_dtype))            # (Hp, 4Hp)
            bias_dirs.append(b.astype(jnp.float32).reshape(1, 4 * Hp))
        n_parts = len(wih_dirs[0])
        wih = [jnp.stack([wih_dirs[0][k], wih_dirs[1][k]], axis=0)
               for k in range(n_parts)]                             # (2,Din,4Hp)
        whh = jnp.stack(whh_dirs, axis=0)                           # (2,Hp,4Hp)
        bias = jnp.stack(bias_dirs, axis=0)                         # (2,1,4Hp)

        x_parts, h_n, c_n = layer_fn(
            x_parts, wih, whh, bias, T=T, T_pad=T_pad, TT=TT, Bp=Bp, H=Hp,
            act_dtype=act_dtype, matmul_dtype=matmul_dtype, unroll=unroll,
            vmem_limit=vmem_limit)
        h_list.append(h_n)
        c_list.append(c_n)

    h_all = jnp.concatenate(h_list, axis=0)[:, :B, :H]
    c_all = jnp.concatenate(c_list, axis=0)[:, :B, :H]

    # Final Linear(2*dim, dim), consuming the two halves with split weights.
    W = params["linear_w"]                                          # (dim, 2H)
    w_halves = [W[:, :H].T, W[:, H:].T]                             # (H, dim)
    if Hp != H:
        w_halves = [jnp.pad(w, ((0, Hp - H), (0, 0))) for w in w_halves]
    w_halves = [w.astype(matmul_dtype) for w in w_halves]
    b_lin = params["linear_b"].astype(jnp.float32).reshape(1, -1)
    y = _proj(x_parts, w_halves, b_lin, T_pad=T_pad, Bp=Bp, TT=TT,
              Dout=W.shape[0], vmem_limit=vmem_limit)
    y = y[:T, :B]
    return y, (h_all, c_all)


# ----------------------------------------------------------------------------
# Deterministic parameter init (same shapes as nn.LSTM / nn.Linear)
# ----------------------------------------------------------------------------
def init_params(key, dim, layers=2):
    k = 1.0 / jnp.sqrt(dim)
    params = {"lstm": []}
    for layer in range(layers):
        in_dim = dim if layer == 0 else 2 * dim
        layer_p = {}
        for d in ("fwd", "bwd"):
            key, k1, k2, k3, k4 = jax.random.split(key, 5)
            layer_p[d] = (
                jax.random.uniform(k1, (4 * dim, in_dim), jnp.float32, -k, k),
                jax.random.uniform(k2, (4 * dim, dim), jnp.float32, -k, k),
                jax.random.uniform(k3, (4 * dim,), jnp.float32, -k, k),
                jax.random.uniform(k4, (4 * dim,), jnp.float32, -k, k),
            )
        params["lstm"].append(layer_p)
    key, k1, k2 = jax.random.split(key, 3)
    params["linear_w"] = jax.random.uniform(k1, (dim, 2 * dim),
                                            jnp.float32, -k, k)
    params["linear_b"] = jax.random.uniform(k2, (dim,), jnp.float32, -k, k)
    return params


# ----------------------------------------------------------------------------
# Pure-JAX reference (f32, highest matmul precision) for correctness check
# ----------------------------------------------------------------------------
def _ref_lstm_dir(x, w_ih, w_hh, b_ih, b_hh):
    H = w_hh.shape[1]
    B = x.shape[1]
    hp = jax.lax.Precision.HIGHEST

    def step(carry, x_t):
        h, c = carry
        gates = (jnp.dot(x_t, w_ih.T, precision=hp)
                 + jnp.dot(h, w_hh.T, precision=hp) + b_ih + b_hh)
        i = jax.nn.sigmoid(gates[:, :H])
        f = jax.nn.sigmoid(gates[:, H:2 * H])
        g = jnp.tanh(gates[:, 2 * H:3 * H])
        o = jax.nn.sigmoid(gates[:, 3 * H:4 * H])
        c = f * c + i * g
        h = o * jnp.tanh(c)
        return (h, c), h

    init = (jnp.zeros((B, H), jnp.float32), jnp.zeros((B, H), jnp.float32))
    (h_n, c_n), out = jax.lax.scan(step, init, x)
    return out, h_n, c_n


def ref_forward(x, params):
    hp = jax.lax.Precision.HIGHEST
    layer_in = x
    h_list, c_list = [], []
    for layer_p in params["lstm"]:
        out_f, h_f, c_f = _ref_lstm_dir(layer_in, *layer_p["fwd"])
        out_b_rev, h_b, c_b = _ref_lstm_dir(layer_in[::-1], *layer_p["bwd"])
        layer_in = jnp.concatenate([out_f, out_b_rev[::-1]], axis=-1)
        h_list += [h_f, h_b]
        c_list += [c_f, c_b]
    y = jnp.dot(layer_in, params["linear_w"].T, precision=hp) + params["linear_b"]
    return y, (jnp.stack(h_list, 0), jnp.stack(c_list, 0))


# ----------------------------------------------------------------------------
if __name__ == "__main__":
    DIM, T, B, LAYERS = 32, 8, 2, 2

    key = jax.random.PRNGKey(0)
    key, xk = jax.random.split(key)
    x = jax.random.normal(xk, (T, B, DIM), jnp.float32)   # (seq, batch, dim)
    params = init_params(key, DIM, LAYERS)

    y_ref, (h_ref, c_ref) = ref_forward(x, params)

    # f32 path: both kernel variants (interleaved + direction-parallel).
    for dp in (False, True):
        fwd = jax.jit(functools.partial(blstm_forward, dir_parallel=dp))
        y, (h_n, c_n) = fwd(x, params)
        jax.block_until_ready((y, h_n, c_n))
        assert y.shape == (T, B, DIM)
        assert h_n.shape == (2 * LAYERS, B, DIM)
        assert c_n.shape == (2 * LAYERS, B, DIM)
        assert jnp.allclose(y, y_ref, atol=5e-3, rtol=5e-3)
        assert jnp.allclose(h_n, h_ref, atol=5e-3, rtol=5e-3)
        assert jnp.allclose(c_n, c_ref, atol=5e-3, rtol=5e-3)

    # Time-padding / masking path (T not a multiple of the time tile).
    T2 = 11
    key, xk2 = jax.random.split(key)
    x2 = jax.random.normal(xk2, (T2, B, DIM), jnp.float32)
    y2_ref, (h2_ref, c2_ref) = ref_forward(x2, params)
    for dp in (False, True):
        fwd2 = jax.jit(functools.partial(blstm_forward, dir_parallel=dp,
                                         time_cap=4))
        y2, (h2, c2) = fwd2(x2, params)
        jax.block_until_ready((y2, h2, c2))
        assert y2.shape == (T2, B, DIM)
        assert jnp.allclose(y2, y2_ref, atol=5e-3, rtol=5e-3)
        assert jnp.allclose(h2, h2_ref, atol=5e-3, rtol=5e-3)
        assert jnp.allclose(c2, c2_ref, atol=5e-3, rtol=5e-3)

    # bf16 operand / bf16 activation path (f32 state & accumulation), all gens.
    fwd_bf16 = jax.jit(
        functools.partial(blstm_forward, matmul_dtype=jnp.bfloat16))
    y16, (h16, c16) = fwd_bf16(x, params)
    jax.block_until_ready((y16, h16, c16))
    assert bool(jnp.all(jnp.isfinite(y16)))
    assert jnp.allclose(y16, y_ref, atol=1e-1, rtol=1e-1)
    assert jnp.allclose(h16, h_ref, atol=1e-1, rtol=1e-1)

    print("KERNEL_OK")
</pallas_src>

<mosaic_0001>
module attributes {stable_mosaic.version = 11 : i64} {
  func.func @kernel(%arg0: i32, %arg1: memref<8x8x32xf32, #tpu.memory_space<vmem>>, %arg2: memref<8x8x32xf32, #tpu.memory_space<vmem>>, %arg3: memref<2x32x512xf32, #tpu.memory_space<vmem>>, %arg4: memref<2x128x512xf32, #tpu.memory_space<vmem>>, %arg5: memref<2x1x512xf32, #tpu.memory_space<vmem>>, %arg6: memref<8x8x128xf32, #tpu.memory_space<vmem>>, %arg7: memref<8x8x128xf32, #tpu.memory_space<vmem>>, %arg8: memref<2x8x128xf32, #tpu.memory_space<vmem>>, %arg9: memref<2x8x128xf32, #tpu.memory_space<vmem>>, %arg10: memref<8x8x512xf32, #tpu.memory_space<vmem>>, %arg11: memref<8x8x512xf32, #tpu.memory_space<vmem>>, %arg12: memref<8x128xf32, #tpu.memory_space<vmem>>, %arg13: memref<8x128xf32, #tpu.memory_space<vmem>>, %arg14: memref<8x128xf32, #tpu.memory_space<vmem>>, %arg15: memref<8x128xf32, #tpu.memory_space<vmem>>) attributes {dimension_semantics = [#tpu.dimension_semantics<arbitrary>], iteration_bounds = array<i64: 1>, scalar_prefetch = 0 : i64, scratch_operands = 6 : i64, tpu.core_type = #tpu.core_type<tc>, window_params = [{transform_indices = @transform_0, window_bounds = array<i64: 8, 8, 32>}, {transform_indices = @transform_1, window_bounds = array<i64: 8, 8, 32>}, {pipeline_mode = #tpu.pipeline_mode<synchronous>, transform_indices = @transform_2, window_bounds = array<i64: 2, 32, 512>}, {pipeline_mode = #tpu.pipeline_mode<synchronous>, transform_indices = @transform_3, window_bounds = array<i64: 2, 128, 512>}, {pipeline_mode = #tpu.pipeline_mode<synchronous>, transform_indices = @transform_4, window_bounds = array<i64: 2, 1, 512>}, {transform_indices = @transform_5, window_bounds = array<i64: 8, 8, 128>}, {transform_indices = @transform_6, window_bounds = array<i64: 8, 8, 128>}, {pipeline_mode = #tpu.pipeline_mode<synchronous>, transform_indices = @transform_7, window_bounds = array<i64: 2, 8, 128>}, {pipeline_mode = #tpu.pipeline_mode<synchronous>, transform_indices = @transform_8, window_bounds = array<i64: 2, 8, 128>}]} {
    %c0_i32 = arith.constant 0 : i32
    %0 = arith.cmpi eq, %arg0, %c0_i32 : i32
    %1 = arith.extui %0 : i1 to i32
    %c0_i32_0 = arith.constant 0 : i32
    %2 = arith.cmpi ne, %1, %c0_i32_0 : i32
    scf.if %2 {
      %cst_297 = arith.constant 0.000000e+00 : f32
      %648 = vector.broadcast %cst_297 : f32 to vector<8x128xf32>
      %c0_298 = arith.constant 0 : index
      %c0_299 = arith.constant 0 : index
      %649 = vector.load %arg12[%c0_298, %c0_299] : memref<8x128xf32, #tpu.memory_space<vmem>>, vector<8x128xf32>
      tpu.vector_store %arg12[%c0_298, %c0_299], %648 {strides = array<i32>} : memref<8x128xf32, #tpu.memory_space<vmem>>, vector<8x128xf32>,
      %cst_300 = arith.constant 0.000000e+00 : f32
      %650 = vector.broadcast %cst_300 : f32 to vector<8x128xf32>
      %c0_301 = arith.constant 0 : index
      %c0_302 = arith.constant 0 : index
      %651 = vector.load %arg13[%c0_301, %c0_302] : memref<8x128xf32, #tpu.memory_space<vmem>>, vector<8x128xf32>
      tpu.vector_store %arg13[%c0_301, %c0_302], %650 {strides = array<i32>} : memref<8x128xf32, #tpu.memory_space<vmem>>, vector<8x128xf32>,
      %cst_303 = arith.constant 0.000000e+00 : f32
      %652 = vector.broadcast %cst_303 : f32 to vector<8x128xf32>
      %c0_304 = arith.constant 0 : index
      %c0_305 = arith.constant 0 : index
      %653 = vector.load %arg14[%c0_304, %c0_305] : memref<8x128xf32, #tpu.memory_space<vmem>>, vector<8x128xf32>
      tpu.vector_store %arg14[%c0_304, %c0_305], %652 {strides = array<i32>} : memref<8x128xf32, #tpu.memory_space<vmem>>, vector<8x128xf32>,
      %cst_306 = arith.constant 0.000000e+00 : f32
      %654 = vector.broadcast %cst_306 : f32 to vector<8x128xf32>
      %c0_307 = arith.constant 0 : index
      %c0_308 = arith.constant 0 : index
      %655 = vector.load %arg15[%c0_307, %c0_308] : memref<8x128xf32, #tpu.memory_space<vmem>>, vector<8x128xf32>
      tpu.vector_store %arg15[%c0_307, %c0_308], %654 {strides = array<i32>} : memref<8x128xf32, #tpu.memory_space<vmem>>, vector<8x128xf32>,
    } else {
    }
    %c0 = arith.constant 0 : index
    %c0_1 = arith.constant 0 : index
    %c0_2 = arith.constant 0 : index
    %3 = vector.load %arg1[%c0, %c0_1, %c0_2] : memref<8x8x32xf32, #tpu.memory_space<vmem>>, vector<8x8x32xf32>
    %4 = vector.shape_cast %3 : vector<8x8x32xf32> to vector<64x32xf32>
    %c0_3 = arith.constant 0 : index
    %c0_4 = arith.constant 0 : index
    %c0_5 = arith.constant 0 : index
    %5 = vector.load %arg3[%c0_3, %c0_4, %c0_5] : memref<2x32x512xf32, #tpu.memory_space<vmem>>, vector<1x32x512xf32>
    %6 = vector.shape_cast %5 : vector<1x32x512xf32> to vector<32x512xf32>
    %cst = arith.constant dense<0.000000e+00> : vector<64x512xf32>
    %7 = tpu.matmul %4, %6, %cst {dimension_numbers = #tpu.dot_dimension_numbers<[1], [0], [0], [1], [0, 0, 1, 1], [], []>} : vector<64x32xf32>, vector<32x512xf32>, vector<64x512xf32> -> vector<64x512xf32>
    %c0_6 = arith.constant 0 : index
    %c0_7 = arith.constant 0 : index
    %c0_8 = arith.constant 0 : index
    %8 = vector.load %arg5[%c0_6, %c0_7, %c0_8] : memref<2x1x512xf32, #tpu.memory_space<vmem>>, vector<1x1x512xf32>
    %9 = vector.shape_cast %8 : vector<1x1x512xf32> to vector<1x512xf32>
    %10 = vector.broadcast %9 : vector<1x512xf32> to vector<64x512xf32>
    %11 = arith.addf %7, %10 : vector<64x512xf32>
    %12 = vector.shape_cast %11 : vector<64x512xf32> to vector<8x8x512xf32>
    %c0_9 = arith.constant 0 : index
    %c0_10 = arith.constant 0 : index
    %c0_11 = arith.constant 0 : index
    %13 = vector.load %arg10[%c0_9, %c0_10, %c0_11] : memref<8x8x512xf32, #tpu.memory_space<vmem>>, vector<8x8x512xf32>
    tpu.vector_store %arg10[%c0_9, %c0_10, %c0_11], %12 {strides = array<i32>} : memref<8x8x512xf32, #tpu.memory_space<vmem>>, vector<8x8x512xf32>,
    %c0_12 = arith.constant 0 : index
    %c0_13 = arith.constant 0 : index
    %c0_14 = arith.constant 0 : index
    %14 = vector.load %arg2[%c0_12, %c0_13, %c0_14] : memref<8x8x32xf32, #tpu.memory_space<vmem>>, vector<8x8x32xf32>
    %15 = vector.shape_cast %14 : vector<8x8x32xf32> to vector<64x32xf32>
    %c1 = arith.constant 1 : index
    %c0_15 = arith.constant 0 : index
    %c0_16 = arith.constant 0 : index
    %16 = vector.load %arg3[%c1, %c0_15, %c0_16] : memref<2x32x512xf32, #tpu.memory_space<vmem>>, vector<1x32x512xf32>
    %17 = vector.shape_cast %16 : vector<1x32x512xf32> to vector<32x512xf32>
    %cst_17 = arith.constant dense<0.000000e+00> : vector<64x512xf32>
    %18 = tpu.matmul %15, %17, %cst_17 {dimension_numbers = #tpu.dot_dimension_numbers<[1], [0], [0], [1], [0, 0, 1, 1], [], []>} : vector<64x32xf32>, vector<32x512xf32>, vector<64x512xf32> -> vector<64x512xf32>
    %c1_18 = arith.constant 1 : index
    %c0_19 = arith.constant 0 : index
    %c0_20 = arith.constant 0 : index
    %19 = vector.load %arg5[%c1_18, %c0_19, %c0_20] : memref<2x1x512xf32, #tpu.memory_space<vmem>>, vector<1x1x512xf32>
    %20 = vector.shape_cast %19 : vector<1x1x512xf32> to vector<1x512xf32>
    %21 = vector.broadcast %20 : vector<1x512xf32> to vector<64x512xf32>
    %22 = arith.addf %18, %21 : vector<64x512xf32>
    %23 = vector.shape_cast %22 : vector<64x512xf32> to vector<8x8x512xf32>
    %c0_21 = arith.constant 0 : index
    %c0_22 = arith.constant 0 : index
    %c0_23 = arith.constant 0 : index
    %24 = vector.load %arg11[%c0_21, %c0_22, %c0_23] : memref<8x8x512xf32, #tpu.memory_space<vmem>>, vector<8x8x512xf32>
    tpu.vector_store %arg11[%c0_21, %c0_22, %c0_23], %23 {strides = array<i32>} : memref<8x8x512xf32, #tpu.memory_space<vmem>>, vector<8x8x512xf32>,
    %c0_24 = arith.constant 0 : index
    %c0_25 = arith.constant 0 : index
    %c0_26 = arith.constant 0 : index
    %25 = vector.load %arg4[%c0_24, %c0_25, %c0_26] : memref<2x128x512xf32, #tpu.memory_space<vmem>>, vector<1x128x512xf32>
    %26 = vector.shape_cast %25 : vector<1x128x512xf32> to vector<128x512xf32>
    %c1_27 = arith.constant 1 : index
    %c0_28 = arith.constant 0 : index
    %c0_29 = arith.constant 0 : index
    %27 = vector.load %arg4[%c1_27, %c0_28, %c0_29] : memref<2x128x512xf32, #tpu.memory_space<vmem>>, vector<1x128x512xf32>
    %28 = vector.shape_cast %27 : vector<1x128x512xf32> to vector<128x512xf32>
    %c0_i32_30 = arith.constant 0 : i32
    %c7_i32 = arith.constant 7 : i32
    %29 = arith.subi %c7_i32, %c0_i32_30 : i32
    %c0_31 = arith.constant 0 : index
    %c0_32 = arith.constant 0 : index
    %30 = vector.load %arg12[%c0_31, %c0_32] : memref<8x128xf32, #tpu.memory_space<vmem>>, vector<8x128xf32>
    %c0_33 = arith.constant 0 : index
    %c0_34 = arith.constant 0 : index
    %31 = vector.load %arg13[%c0_33, %c0_34] : memref<8x128xf32, #tpu.memory_space<vmem>>, vector<8x128xf32>
    %c0_35 = arith.constant 0 : index
    %c0_36 = arith.constant 0 : index
    %32 = vector.load %arg14[%c0_35, %c0_36] : memref<8x128xf32, #tpu.memory_space<vmem>>, vector<8x128xf32>
    %c0_37 = arith.constant 0 : index
    %c0_38 = arith.constant 0 : index
    %33 = vector.load %arg15[%c0_37, %c0_38] : memref<8x128xf32, #tpu.memory_space<vmem>>, vector<8x128xf32>
    %34 = arith.index_cast %c0_i32_30 : i32 to index
    %c0_39 = arith.constant 0 : index
    %c0_40 = arith.constant 0 : index
    %35 = vector.load %arg10[%34, %c0_39, %c0_40] : memref<8x8x512xf32, #tpu.memory_space<vmem>>, vector<1x8x512xf32>
    %36 = vector.shape_cast %35 : vector<1x8x512xf32> to vector<8x512xf32>
    %cst_41 = arith.constant dense<0.000000e+00> : vector<8x512xf32>
    %37 = tpu.matmul %30, %26, %cst_41 {dimension_numbers = #tpu.dot_dimension_numbers<[1], [0], [0], [1], [0, 0, 1, 1], [], []>} : vector<8x128xf32>, vector<128x512xf32>, vector<8x512xf32> -> vector<8x512xf32>
    %38 = arith.addf %36, %37 : vector<8x512xf32>
    %39 = arith.index_cast %29 : i32 to index
    %c0_42 = arith.constant 0 : index
    %c0_43 = arith.constant 0 : index
    %40 = vector.load %arg11[%39, %c0_42, %c0_43] : memref<8x8x512xf32, #tpu.memory_space<vmem>>, vector<1x8x512xf32>
    %41 = vector.shape_cast %40 : vector<1x8x512xf32> to vector<8x512xf32>
    %cst_44 = arith.constant dense<0.000000e+00> : vector<8x512xf32>
    %42 = tpu.matmul %32, %28, %cst_44 {dimension_numbers = #tpu.dot_dimension_numbers<[1], [0], [0], [1], [0, 0, 1, 1], [], []>} : vector<8x128xf32>, vector<128x512xf32>, vector<8x512xf32> -> vector<8x512xf32>
    %43 = arith.addf %41, %42 : vector<8x512xf32>
    %44 = vector.extract_strided_slice %38 {offsets = [0, 0], sizes = [8, 128], strides = [1, 1]} : vector<8x512xf32> to vector<8x128xf32>
    %45 = arith.negf %44 : vector<8x128xf32>
    %46 = math.exp %45 : vector<8x128xf32>
    %cst_45 = arith.constant 1.000000e+00 : f32
    %47 = vector.broadcast %cst_45 : f32 to vector<8x128xf32>
    %48 = arith.addf %47, %46 : vector<8x128xf32>
    %49 = arith.divf %47, %48 : vector<8x128xf32>
    %50 = vector.extract_strided_slice %38 {offsets = [0, 128], sizes = [8, 128], strides = [1, 1]} : vector<8x512xf32> to vector<8x128xf32>
    %51 = arith.negf %50 : vector<8x128xf32>
    %52 = math.exp %51 : vector<8x128xf32>
    %cst_46 = arith.constant 1.000000e+00 : f32
    %53 = vector.broadcast %cst_46 : f32 to vector<8x128xf32>
    %54 = arith.addf %53, %52 : vector<8x128xf32>
    %55 = arith.divf %53, %54 : vector<8x128xf32>
    %56 = vector.extract_strided_slice %38 {offsets = [0, 256], sizes = [8, 128], strides = [1, 1]} : vector<8x512xf32> to vector<8x128xf32>
    %57 = math.tanh %56 : vector<8x128xf32>
    %58 = vector.extract_strided_slice %38 {offsets = [0, 384], sizes = [8, 128], strides = [1, 1]} : vector<8x512xf32> to vector<8x128xf32>
    %59 = arith.negf %58 : vector<8x128xf32>
    %60 = math.exp %59 : vector<8x128xf32>
    %cst_47 = arith.constant 1.000000e+00 : f32
    %61 = vector.broadcast %cst_47 : f32 to vector<8x128xf32>
    %62 = arith.addf %61, %60 : vector<8x128xf32>
    %63 = arith.divf %61, %62 : vector<8x128xf32>
    %64 = arith.mulf %55, %31 : vector<8x128xf32>
    %65 = arith.mulf %49, %57 : vector<8x128xf32>
    %66 = arith.addf %64, %65 : vector<8x128xf32>
    %67 = math.tanh %66 : vector<8x128xf32>
    %68 = arith.mulf %63, %67 : vector<8x128xf32>
    %69 = vector.extract_strided_slice %43 {offsets = [0, 0], sizes = [8, 128], strides = [1, 1]} : vector<8x512xf32> to vector<8x128xf32>
    %70 = arith.negf %69 : vector<8x128xf32>
    %71 = math.exp %70 : vector<8x128xf32>
    %cst_48 = arith.constant 1.000000e+00 : f32
    %72 = vector.broadcast %cst_48 : f32 to vector<8x128xf32>
    %73 = arith.addf %72, %71 : vector<8x128xf32>
    %74 = arith.divf %72, %73 : vector<8x128xf32>
    %75 = vector.extract_strided_slice %43 {offsets = [0, 128], sizes = [8, 128], strides = [1, 1]} : vector<8x512xf32> to vector<8x128xf32>
    %76 = arith.negf %75 : vector<8x128xf32>
    %77 = math.exp %76 : vector<8x128xf32>
    %cst_49 = arith.constant 1.000000e+00 : f32
    %78 = vector.broadcast %cst_49 : f32 to vector<8x128xf32>
    %79 = arith.addf %78, %77 : vector<8x128xf32>
    %80 = arith.divf %78, %79 : vector<8x128xf32>
    %81 = vector.extract_strided_slice %43 {offsets = [0, 256], sizes = [8, 128], strides = [1, 1]} : vector<8x512xf32> to vector<8x128xf32>
    %82 = math.tanh %81 : vector<8x128xf32>
    %83 = vector.extract_strided_slice %43 {offsets = [0, 384], sizes = [8, 128], strides = [1, 1]} : vector<8x512xf32> to vector<8x128xf32>
    %84 = arith.negf %83 : vector<8x128xf32>
    %85 = math.exp %84 : vector<8x128xf32>
    %cst_50 = arith.constant 1.000000e+00 : f32
    %86 = vector.broadcast %cst_50 : f32 to vector<8x128xf32>
    %87 = arith.addf %86, %85 : vector<8x128xf32>
    %88 = arith.divf %86, %87 : vector<8x128xf32>
    %89 = arith.mulf %80, %33 : vector<8x128xf32>
    %90 = arith.mulf %74, %82 : vector<8x128xf32>
    %91 = arith.addf %89, %90 : vector<8x128xf32>
    %92 = math.tanh %91 : vector<8x128xf32>
    %93 = arith.mulf %88, %92 : vector<8x128xf32>
    %c0_51 = arith.constant 0 : index
    %c0_52 = arith.constant 0 : index
    %94 = vector.load %arg12[%c0_51, %c0_52] : memref<8x128xf32, #tpu.memory_space<vmem>>, vector<8x128xf32>
    tpu.vector_store %arg12[%c0_51, %c0_52], %68 {strides = array<i32>} : memref<8x128xf32, #tpu.memory_space<vmem>>, vector<8x128xf32>,
    %c0_53 = arith.constant 0 : index
    %c0_54 = arith.constant 0 : index
    %95 = vector.load %arg13[%c0_53, %c0_54] : memref<8x128xf32, #tpu.memory_space<vmem>>, vector<8x128xf32>
    tpu.vector_store %arg13[%c0_53, %c0_54], %66 {strides = array<i32>} : memref<8x128xf32, #tpu.memory_space<vmem>>, vector<8x128xf32>,
    %c0_55 = arith.constant 0 : index
    %c0_56 = arith.constant 0 : index
    %96 = vector.load %arg14[%c0_55, %c0_56] : memref<8x128xf32, #tpu.memory_space<vmem>>, vector<8x128xf32>
    tpu.vector_store %arg14[%c0_55, %c0_56], %93 {strides = array<i32>} : memref<8x128xf32, #tpu.memory_space<vmem>>, vector<8x128xf32>,
    %c0_57 = arith.constant 0 : index
    %c0_58 = arith.constant 0 : index
    %97 = vector.load %arg15[%c0_57, %c0_58] : memref<8x128xf32, #tpu.memory_space<vmem>>, vector<8x128xf32>
    tpu.vector_store %arg15[%c0_57, %c0_58], %91 {strides = array<i32>} : memref<8x128xf32, #tpu.memory_space<vmem>>, vector<8x128xf32>,
    %98 = arith.index_cast %c0_i32_30 : i32 to index
    %c0_59 = arith.constant 0 : index
    %c0_60 = arith.constant 0 : index
    %99 = vector.load %arg6[%98, %c0_59, %c0_60] : memref<8x8x128xf32, #tpu.memory_space<vmem>>, vector<1x8x128xf32>
    %100 = vector.shape_cast %99 : vector<1x8x128xf32> to vector<8x128xf32>
    %101 = vector.shape_cast %68 : vector<8x128xf32> to vector<1x8x128xf32>
    tpu.vector_store %arg6[%98, %c0_59, %c0_60], %101 {strides = array<i32>} : memref<8x8x128xf32, #tpu.memory_space<vmem>>, vector<1x8x128xf32>,
    %102 = arith.index_cast %29 : i32 to index
    %c0_61 = arith.constant 0 : index
    %c0_62 = arith.constant 0 : index
    %103 = vector.load %arg7[%102, %c0_61, %c0_62] : memref<8x8x128xf32, #tpu.memory_space<vmem>>, vector<1x8x128xf32>
    %104 = vector.shape_cast %103 : vector<1x8x128xf32> to vector<8x128xf32>
    %105 = vector.shape_cast %93 : vector<8x128xf32> to vector<1x8x128xf32>
    tpu.vector_store %arg7[%102, %c0_61, %c0_62], %105 {strides = array<i32>} : memref<8x8x128xf32, #tpu.memory_space<vmem>>, vector<1x8x128xf32>,
    %c1_i32 = arith.constant 1 : i32
    %c7_i32_63 = arith.constant 7 : i32
    %106 = arith.subi %c7_i32_63, %c1_i32 : i32
    %c0_64 = arith.constant 0 : index
    %c0_65 = arith.constant 0 : index
    %107 = vector.load %arg12[%c0_64, %c0_65] : memref<8x128xf32, #tpu.memory_space<vmem>>, vector<8x128xf32>
    %c0_66 = arith.constant 0 : index
    %c0_67 = arith.constant 0 : index
    %108 = vector.load %arg13[%c0_66, %c0_67] : memref<8x128xf32, #tpu.memory_space<vmem>>, vector<8x128xf32>
    %c0_68 = arith.constant 0 : index
    %c0_69 = arith.constant 0 : index
    %109 = vector.load %arg14[%c0_68, %c0_69] : memref<8x128xf32, #tpu.memory_space<vmem>>, vector<8x128xf32>
    %c0_70 = arith.constant 0 : index
    %c0_71 = arith.constant 0 : index
    %110 = vector.load %arg15[%c0_70, %c0_71] : memref<8x128xf32, #tpu.memory_space<vmem>>, vector<8x128xf32>
    %111 = arith.index_cast %c1_i32 : i32 to index
    %c0_72 = arith.constant 0 : index
    %c0_73 = arith.constant 0 : index
    %112 = vector.load %arg10[%111, %c0_72, %c0_73] : memref<8x8x512xf32, #tpu.memory_space<vmem>>, vector<1x8x512xf32>
    %113 = vector.shape_cast %112 : vector<1x8x512xf32> to vector<8x512xf32>
    %cst_74 = arith.constant dense<0.000000e+00> : vector<8x512xf32>
    %114 = tpu.matmul %107, %26, %cst_74 {dimension_numbers = #tpu.dot_dimension_numbers<[1], [0], [0], [1], [0, 0, 1, 1], [], []>} : vector<8x128xf32>, vector<128x512xf32>, vector<8x512xf32> -> vector<8x512xf32>
    %115 = arith.addf %113, %114 : vector<8x512xf32>
    %116 = arith.index_cast %106 : i32 to index
    %c0_75 = arith.constant 0 : index
    %c0_76 = arith.constant 0 : index
    %117 = vector.load %arg11[%116, %c0_75, %c0_76] : memref<8x8x512xf32, #tpu.memory_space<vmem>>, vector<1x8x512xf32>
    %118 = vector.shape_cast %117 : vector<1x8x512xf32> to vector<8x512xf32>
    %cst_77 = arith.constant dense<0.000000e+00> : vector<8x512xf32>
    %119 = tpu.matmul %109, %28, %cst_77 {dimension_numbers = #tpu.dot_dimension_numbers<[1], [0], [0], [1], [0, 0, 1, 1], [], []>} : vector<8x128xf32>, vector<128x512xf32>, vector<8x512xf32> -> vector<8x512xf32>
    %120 = arith.addf %118, %119 : vector<8x512xf32>
    %121 = vector.extract_strided_slice %115 {offsets = [0, 0], sizes = [8, 128], strides = [1, 1]} : vector<8x512xf32> to vector<8x128xf32>
    %122 = arith.negf %121 : vector<8x128xf32>
    %123 = math.exp %122 : vector<8x128xf32>
    %cst_78 = arith.constant 1.000000e+00 : f32
    %124 = vector.broadcast %cst_78 : f32 to vector<8x128xf32>
    %125 = arith.addf %124, %123 : vector<8x128xf32>
    %126 = arith.divf %124, %125 : vector<8x128xf32>
    %127 = vector.extract_strided_slice %115 {offsets = [0, 128], sizes = [8, 128], strides = [1, 1]} : vector<8x512xf32> to vector<8x128xf32>
    %128 = arith.negf %127 : vector<8x128xf32>
    %129 = math.exp %128 : vector<8x128xf32>
    %cst_79 = arith.constant 1.000000e+00 : f32
    %130 = vector.broadcast %cst_79 : f32 to vector<8x128xf32>
    %131 = arith.addf %130, %129 : vector<8x128xf32>
    %132 = arith.divf %130, %131 : vector<8x128xf32>
    %133 = vector.extract_strided_slice %115 {offsets = [0, 256], sizes = [8, 128], strides = [1, 1]} : vector<8x512xf32> to vector<8x128xf32>
    %134 = math.tanh %133 : vector<8x128xf32>
    %135 = vector.extract_strided_slice %115 {offsets = [0, 384], sizes = [8, 128], strides = [1, 1]} : vector<8x512xf32> to vector<8x128xf32>
    %136 = arith.negf %135 : vector<8x128xf32>
    %137 = math.exp %136 : vector<8x128xf32>
    %cst_80 = arith.constant 1.000000e+00 : f32
    %138 = vector.broadcast %cst_80 : f32 to vector<8x128xf32>
    %139 = arith.addf %138, %137 : vector<8x128xf32>
    %140 = arith.divf %138, %139 : vector<8x128xf32>
    %141 = arith.mulf %132, %108 : vector<8x128xf32>
    %142 = arith.mulf %126, %134 : vector<8x128xf32>
    %143 = arith.addf %141, %142 : vector<8x128xf32>
    %144 = math.tanh %143 : vector<8x128xf32>
    %145 = arith.mulf %140, %144 : vector<8x128xf32>
    %146 = vector.extract_strided_slice %120 {offsets = [0, 0], sizes = [8, 128], strides = [1, 1]} : vector<8x512xf32> to vector<8x128xf32>
    %147 = arith.negf %146 : vector<8x128xf32>
    %148 = math.exp %147 : vector<8x128xf32>
    %cst_81 = arith.constant 1.000000e+00 : f32
    %149 = vector.broadcast %cst_81 : f32 to vector<8x128xf32>
    %150 = arith.addf %149, %148 : vector<8x128xf32>
    %151 = arith.divf %149, %150 : vector<8x128xf32>
    %152 = vector.extract_strided_slice %120 {offsets = [0, 128], sizes = [8, 128], strides = [1, 1]} : vector<8x512xf32> to vector<8x128xf32>
    %153 = arith.negf %152 : vector<8x128xf32>
    %154 = math.exp %153 : vector<8x128xf32>
    %cst_82 = arith.constant 1.000000e+00 : f32
    %155 = vector.broadcast %cst_82 : f32 to vector<8x128xf32>
    %156 = arith.addf %155, %154 : vector<8x128xf32>
    %157 = arith.divf %155, %156 : vector<8x128xf32>
    %158 = vector.extract_strided_slice %120 {offsets = [0, 256], sizes = [8, 128], strides = [1, 1]} : vector<8x512xf32> to vector<8x128xf32>
    %159 = math.tanh %158 : vector<8x128xf32>
    %160 = vector.extract_strided_slice %120 {offsets = [0, 384], sizes = [8, 128], strides = [1, 1]} : vector<8x512xf32> to vector<8x128xf32>
    %161 = arith.negf %160 : vector<8x128xf32>
    %162 = math.exp %161 : vector<8x128xf32>
    %cst_83 = arith.constant 1.000000e+00 : f32
    %163 = vector.broadcast %cst_83 : f32 to vector<8x128xf32>
    %164 = arith.addf %163, %162 : vector<8x128xf32>
    %165 = arith.divf %163, %164 : vector<8x128xf32>
    %166 = arith.mulf %157, %110 : vector<8x128xf32>
    %167 = arith.mulf %151, %159 : vector<8x128xf32>
    %168 = arith.addf %166, %167 : vector<8x128xf32>
    %169 = math.tanh %168 : vector<8x128xf32>
    %170 = arith.mulf %165, %169 : vector<8x128xf32>
    %c0_84 = arith.constant 0 : index
    %c0_85 = arith.constant 0 : index
    %171 = vector.load %arg12[%c0_84, %c0_85] : memref<8x128xf32, #tpu.memory_space<vmem>>, vector<8x128xf32>
    tpu.vector_store %arg12[%c0_84, %c0_85], %145 {strides = array<i32>} : memref<8x128xf32, #tpu.memory_space<vmem>>, vector<8x128xf32>,
    %c0_86 = arith.constant 0 : index
    %c0_87 = arith.constant 0 : index
    %172 = vector.load %arg13[%c0_86, %c0_87] : memref<8x128xf32, #tpu.memory_space<vmem>>, vector<8x128xf32>
    tpu.vector_store %arg13[%c0_86, %c0_87], %143 {strides = array<i32>} : memref<8x128xf32, #tpu.memory_space<vmem>>, vector<8x128xf32>,
    %c0_88 = arith.constant 0 : index
    %c0_89 = arith.constant 0 : index
    %173 = vector.load %arg14[%c0_88, %c0_89] : memref<8x128xf32, #tpu.memory_space<vmem>>, vector<8x128xf32>
    tpu.vector_store %arg14[%c0_88, %c0_89], %170 {strides = array<i32>} : memref<8x128xf32, #tpu.memory_space<vmem>>, vector<8x128xf32>,
    %c0_90 = arith.constant 0 : index
    %c0_91 = arith.constant 0 : index
    %174 = vector.load %arg15[%c0_90, %c0_91] : memref<8x128xf32, #tpu.memory_space<vmem>>, vector<8x128xf32>
    tpu.vector_store %arg15[%c0_90, %c0_91], %168 {strides = array<i32>} : memref<8x128xf32, #tpu.memory_space<vmem>>, vector<8x128xf32>,
    %175 = arith.index_cast %c1_i32 : i32 to index
    %c0_92 = arith.constant 0 : index
    %c0_93 = arith.constant 0 : index
    %176 = vector.load %arg6[%175, %c0_92, %c0_93] : memref<8x8x128xf32, #tpu.memory_space<vmem>>, vector<1x8x128xf32>
    %177 = vector.shape_cast %176 : vector<1x8x128xf32> to vector<8x128xf32>
    %178 = vector.shape_cast %145 : vector<8x128xf32> to vector<1x8x128xf32>
    tpu.vector_store %arg6[%175, %c0_92, %c0_93], %178 {strides = array<i32>} : memref<8x8x128xf32, #tpu.memory_space<vmem>>, vector<1x8x128xf32>,
    %179 = arith.index_cast %106 : i32 to index
    %c0_94 = arith.constant 0 : index
    %c0_95 = arith.constant 0 : index
    %180 = vector.load %arg7[%179, %c0_94, %c0_95] : memref<8x8x128xf32, #tpu.memory_space<vmem>>, vector<1x8x128xf32>
    %181 = vector.shape_cast %180 : vector<1x8x128xf32> to vector<8x128xf32>
    %182 = vector.shape_cast %170 : vector<8x128xf32> to vector<1x8x128xf32>
    tpu.vector_store %arg7[%179, %c0_94, %c0_95], %182 {strides = array<i32>} : memref<8x8x128xf32, #tpu.memory_space<vmem>>, vector<1x8x128xf32>,
    %c2_i32 = arith.constant 2 : i32
    %c7_i32_96 = arith.constant 7 : i32
    %183 = arith.subi %c7_i32_96, %c2_i32 : i32
    %c0_97 = arith.constant 0 : index
    %c0_98 = arith.constant 0 : index
    %184 = vector.load %arg12[%c0_97, %c0_98] : memref<8x128xf32, #tpu.memory_space<vmem>>, vector<8x128xf32>
    %c0_99 = arith.constant 0 : index
    %c0_100 = arith.constant 0 : index
    %185 = vector.load %arg13[%c0_99, %c0_100] : memref<8x128xf32, #tpu.memory_space<vmem>>, vector<8x128xf32>
    %c0_101 = arith.constant 0 : index
    %c0_102 = arith.constant 0 : index
    %186 = vector.load %arg14[%c0_101, %c0_102] : memref<8x128xf32, #tpu.memory_space<vmem>>, vector<8x128xf32>
    %c0_103 = arith.constant 0 : index
    %c0_104 = arith.constant 0 : index
    %187 = vector.load %arg15[%c0_103, %c0_104] : memref<8x128xf32, #tpu.memory_space<vmem>>, vector<8x128xf32>
    %188 = arith.index_cast %c2_i32 : i32 to index
    %c0_105 = arith.constant 0 : index
    %c0_106 = arith.constant 0 : index
    %189 = vector.load %arg10[%188, %c0_105, %c0_106] : memref<8x8x512xf32, #tpu.memory_space<vmem>>, vector<1x8x512xf32>
    %190 = vector.shape_cast %189 : vector<1x8x512xf32> to vector<8x512xf32>
    %cst_107 = arith.constant dense<0.000000e+00> : vector<8x512xf32>
    %191 = tpu.matmul %184, %26, %cst_107 {dimension_numbers = #tpu.dot_dimension_numbers<[1], [0], [0], [1], [0, 0, 1, 1], [], []>} : vector<8x128xf32>, vector<128x512xf32>, vector<8x512xf32> -> vector<8x512xf32>
    %192 = arith.addf %190, %191 : vector<8x512xf32>
    %193 = arith.index_cast %183 : i32 to index
    %c0_108 = arith.constant 0 : index
    %c0_109 = arith.constant 0 : index
    %194 = vector.load %arg11[%193, %c0_108, %c0_109] : memref<8x8x512xf32, #tpu.memory_space<vmem>>, vector<1x8x512xf32>
    %195 = vector.shape_cast %194 : vector<1x8x512xf32> to vector<8x512xf32>
    %cst_110 = arith.constant dense<0.000000e+00> : vector<8x512xf32>
    %196 = tpu.matmul %186, %28, %cst_110 {dimension_numbers = #tpu.dot_dimension_numbers<[1], [0], [0], [1], [0, 0, 1, 1], [], []>} : vector<8x128xf32>, vector<128x512xf32>, vector<8x512xf32> -> vector<8x512xf32>
    %197 = arith.addf %195, %196 : vector<8x512xf32>
    %198 = vector.extract_strided_slice %192 {offsets = [0, 0], sizes = [8, 128], strides = [1, 1]} : vector<8x512xf32> to vector<8x128xf32>
    %199 = arith.negf %198 : vector<8x128xf32>
    %200 = math.exp %199 : vector<8x128xf32>
    %cst_111 = arith.constant 1.000000e+00 : f32
    %201 = vector.broadcast %cst_111 : f32 to vector<8x128xf32>
    %202 = arith.addf %201, %200 : vector<8x128xf32>
    %203 = arith.divf %201, %202 : vector<8x128xf32>
    %204 = vector.extract_strided_slice %192 {offsets = [0, 128], sizes = [8, 128], strides = [1, 1]} : vector<8x512xf32> to vector<8x128xf32>
    %205 = arith.negf %204 : vector<8x128xf32>
    %206 = math.exp %205 : vector<8x128xf32>
    %cst_112 = arith.constant 1.000000e+00 : f32
    %207 = vector.broadcast %cst_112 : f32 to vector<8x128xf32>
    %208 = arith.addf %207, %206 : vector<8x128xf32>
    %209 = arith.divf %207, %208 : vector<8x128xf32>
    %210 = vector.extract_strided_slice %192 {offsets = [0, 256], sizes = [8, 128], strides = [1, 1]} : vector<8x512xf32> to vector<8x128xf32>
    %211 = math.tanh %210 : vector<8x128xf32>
    %212 = vector.extract_strided_slice %192 {offsets = [0, 384], sizes = [8, 128], strides = [1, 1]} : vector<8x512xf32> to vector<8x128xf32>
    %213 = arith.negf %212 : vector<8x128xf32>
    %214 = math.exp %213 : vector<8x128xf32>
    %cst_113 = arith.constant 1.000000e+00 : f32
    %215 = vector.broadcast %cst_113 : f32 to vector<8x128xf32>
    %216 = arith.addf %215, %214 : vector<8x128xf32>
    %217 = arith.divf %215, %216 : vector<8x128xf32>
    %218 = arith.mulf %209, %185 : vector<8x128xf32>
    %219 = arith.mulf %203, %211 : vector<8x128xf32>
    %220 = arith.addf %218, %219 : vector<8x128xf32>
    %221 = math.tanh %220 : vector<8x128xf32>
    %222 = arith.mulf %217, %221 : vector<8x128xf32>
    %223 = vector.extract_strided_slice %197 {offsets = [0, 0], sizes = [8, 128], strides = [1, 1]} : vector<8x512xf32> to vector<8x128xf32>
    %224 = arith.negf %223 : vector<8x128xf32>
    %225 = math.exp %224 : vector<8x128xf32>
    %cst_114 = arith.constant 1.000000e+00 : f32
    %226 = vector.broadcast %cst_114 : f32 to vector<8x128xf32>
    %227 = arith.addf %226, %225 : vector<8x128xf32>
    %228 = arith.divf %226, %227 : vector<8x128xf32>
    %229 = vector.extract_strided_slice %197 {offsets = [0, 128], sizes = [8, 128], strides = [1, 1]} : vector<8x512xf32> to vector<8x128xf32>
    %230 = arith.negf %229 : vector<8x128xf32>
    %231 = math.exp %230 : vector<8x128xf32>
    %cst_115 = arith.constant 1.000000e+00 : f32
    %232 = vector.broadcast %cst_115 : f32 to vector<8x128xf32>
    %233 = arith.addf %232, %231 : vector<8x128xf32>
    %234 = arith.divf %232, %233 : vector<8x128xf32>
    %235 = vector.extract_strided_slice %197 {offsets = [0, 256], sizes = [8, 128], strides = [1, 1]} : vector<8x512xf32> to vector<8x128xf32>
    %236 = math.tanh %235 : vector<8x128xf32>
    %237 = vector.extract_strided_slice %197 {offsets = [0, 384], sizes = [8, 128], strides = [1, 1]} : vector<8x512xf32> to vector<8x128xf32>
    %238 = arith.negf %237 : vector<8x128xf32>
    %239 = math.exp %238 : vector<8x128xf32>
    %cst_116 = arith.constant 1.000000e+00 : f32
    %240 = vector.broadcast %cst_116 : f32 to vector<8x128xf32>
    %241 = arith.addf %240, %239 : vector<8x128xf32>
    %242 = arith.divf %240, %241 : vector<8x128xf32>
    %243 = arith.mulf %234, %187 : vector<8x128xf32>
    %244 = arith.mulf %228, %236 : vector<8x128xf32>
    %245 = arith.addf %243, %244 : vector<8x128xf32>
    %246 = math.tanh %245 : vector<8x128xf32>
    %247 = arith.mulf %242, %246 : vector<8x128xf32>
    %c0_117 = arith.constant 0 : index
    %c0_118 = arith.constant 0 : index
    %248 = vector.load %arg12[%c0_117, %c0_118] : memref<8x128xf32, #tpu.memory_space<vmem>>, vector<8x128xf32>
    tpu.vector_store %arg12[%c0_117, %c0_118], %222 {strides = array<i32>} : memref<8x128xf32, #tpu.memory_space<vmem>>, vector<8x128xf32>,
    %c0_119 = arith.constant 0 : index
    %c0_120 = arith.constant 0 : index
    %249 = vector.load %arg13[%c0_119, %c0_120] : memref<8x128xf32, #tpu.memory_space<vmem>>, vector<8x128xf32>
    tpu.vector_store %arg13[%c0_119, %c0_120], %220 {strides = array<i32>} : memref<8x128xf32, #tpu.memory_space<vmem>>, vector<8x128xf32>,
    %c0_121 = arith.constant 0 : index
    %c0_122 = arith.constant 0 : index
    %250 = vector.load %arg14[%c0_121, %c0_122] : memref<8x128xf32, #tpu.memory_space<vmem>>, vector<8x128xf32>
    tpu.vector_store %arg14[%c0_121, %c0_122], %247 {strides = array<i32>} : memref<8x128xf32, #tpu.memory_space<vmem>>, vector<8x128xf32>,
    %c0_123 = arith.constant 0 : index
    %c0_124 = arith.constant 0 : index
    %251 = vector.load %arg15[%c0_123, %c0_124] : memref<8x128xf32, #tpu.memory_space<vmem>>, vector<8x128xf32>
    tpu.vector_store %arg15[%c0_123, %c0_124], %245 {strides = array<i32>} : memref<8x128xf32, #tpu.memory_space<vmem>>, vector<8x128xf32>,
    %252 = arith.index_cast %c2_i32 : i32 to index
    %c0_125 = arith.constant 0 : index
    %c0_126 = arith.constant 0 : index
    %253 = vector.load %arg6[%252, %c0_125, %c0_126] : memref<8x8x128xf32, #tpu.memory_space<vmem>>, vector<1x8x128xf32>
    %254 = vector.shape_cast %253 : vector<1x8x128xf32> to vector<8x128xf32>
    %255 = vector.shape_cast %222 : vector<8x128xf32> to vector<1x8x128xf32>
    tpu.vector_store %arg6[%252, %c0_125, %c0_126], %255 {strides = array<i32>} : memref<8x8x128xf32, #tpu.memory_space<vmem>>, vector<1x8x128xf32>,
    %256 = arith.index_cast %183 : i32 to index
    %c0_127 = arith.constant 0 : index
    %c0_128 = arith.constant 0 : index
    %257 = vector.load %arg7[%256, %c0_127, %c0_128] : memref<8x8x128xf32, #tpu.memory_space<vmem>>, vector<1x8x128xf32>
    %258 = vector.shape_cast %257 : vector<1x8x128xf32> to vector<8x128xf32>
    %259 = vector.shape_cast %247 : vector<8x128xf32> to vector<1x8x128xf32>
    tpu.vector_store %arg7[%256, %c0_127, %c0_128], %259 {strides = array<i32>} : memref<8x8x128xf32, #tpu.memory_space<vmem>>, vector<1x8x128xf32>,
    %c3_i32 = arith.constant 3 : i32
    %c7_i32_129 = arith.constant 7 : i32
    %260 = arith.subi %c7_i32_129, %c3_i32 : i32
    %c0_130 = arith.constant 0 : index
    %c0_131 = arith.constant 0 : index
    %261 = vector.load %arg12[%c0_130, %c0_131] : memref<8x128xf32, #tpu.memory_space<vmem>>, vector<8x128xf32>
    %c0_132 = arith.constant 0 : index
    %c0_133 = arith.constant 0 : index
    %262 = vector.load %arg13[%c0_132, %c0_133] : memref<8x128xf32, #tpu.memory_space<vmem>>, vector<8x128xf32>
    %c0_134 = arith.constant 0 : index
    %c0_135 = arith.constant 0 : index
    %263 = vector.load %arg14[%c0_134, %c0_135] : memref<8x128xf32, #tpu.memory_space<vmem>>, vector<8x128xf32>
    %c0_136 = arith.constant 0 : index
    %c0_137 = arith.constant 0 : index
    %264 = vector.load %arg15[%c0_136, %c0_137] : memref<8x128xf32, #tpu.memory_space<vmem>>, vector<8x128xf32>
    %265 = arith.index_cast %c3_i32 : i32 to index
    %c0_138 = arith.constant 0 : index
    %c0_139 = arith.constant 0 : index
    %266 = vector.load %arg10[%265, %c0_138, %c0_139] : memref<8x8x512xf32, #tpu.memory_space<vmem>>, vector<1x8x512xf32>
    %267 = vector.shape_cast %266 : vector<1x8x512xf32> to vector<8x512xf32>
    %cst_140 = arith.constant dense<0.000000e+00> : vector<8x512xf32>
    %268 = tpu.matmul %261, %26, %cst_140 {dimension_numbers = #tpu.dot_dimension_numbers<[1], [0], [0], [1], [0, 0, 1, 1], [], []>} : vector<8x128xf32>, vector<128x512xf32>, vector<8x512xf32> -> vector<8x512xf32>
    %269 = arith.addf %267, %268 : vector<8x512xf32>
    %270 = arith.index_cast %260 : i32 to index
    %c0_141 = arith.constant 0 : index
    %c0_142 = arith.constant 0 : index
    %271 = vector.load %arg11[%270, %c0_141, %c0_142] : memref<8x8x512xf32, #tpu.memory_space<vmem>>, vector<1x8x512xf32>
    %272 = vector.shape_cast %271 : vector<1x8x512xf32> to vector<8x512xf32>
    %cst_143 = arith.constant dense<0.000000e+00> : vector<8x512xf32>
    %273 = tpu.matmul %263, %28, %cst_143 {dimension_numbers = #tpu.dot_dimension_numbers<[1], [0], [0], [1], [0, 0, 1, 1], [], []>} : vector<8x128xf32>, vector<128x512xf32>, vector<8x512xf32> -> vector<8x512xf32>
    %274 = arith.addf %272, %273 : vector<8x512xf32>
    %275 = vector.extract_strided_slice %269 {offsets = [0, 0], sizes = [8, 128], strides = [1, 1]} : vector<8x512xf32> to vector<8x128xf32>
    %276 = arith.negf %275 : vector<8x128xf32>
    %277 = math.exp %276 : vector<8x128xf32>
    %cst_144 = arith.constant 1.000000e+00 : f32
    %278 = vector.broadcast %cst_144 : f32 to vector<8x128xf32>
    %279 = arith.addf %278, %277 : vector<8x128xf32>
    %280 = arith.divf %278, %279 : vector<8x128xf32>
    %281 = vector.extract_strided_slice %269 {offsets = [0, 128], sizes = [8, 128], strides = [1, 1]} : vector<8x512xf32> to vector<8x128xf32>
    %282 = arith.negf %281 : vector<8x128xf32>
    %283 = math.exp %282 : vector<8x128xf32>
    %cst_145 = arith.constant 1.000000e+00 : f32
    %284 = vector.broadcast %cst_145 : f32 to vector<8x128xf32>
    %285 = arith.addf %284, %283 : vector<8x128xf32>
    %286 = arith.divf %284, %285 : vector<8x128xf32>
    %287 = vector.extract_strided_slice %269 {offsets = [0, 256], sizes = [8, 128], strides = [1, 1]} : vector<8x512xf32> to vector<8x128xf32>
    %288 = math.tanh %287 : vector<8x128xf32>
    %289 = vector.extract_strided_slice %269 {offsets = [0, 384], sizes = [8, 128], strides = [1, 1]} : vector<8x512xf32> to vector<8x128xf32>
    %290 = arith.negf %289 : vector<8x128xf32>
    %291 = math.exp %290 : vector<8x128xf32>
    %cst_146 = arith.constant 1.000000e+00 : f32
    %292 = vector.broadcast %cst_146 : f32 to vector<8x128xf32>
    %293 = arith.addf %292, %291 : vector<8x128xf32>
    %294 = arith.divf %292, %293 : vector<8x128xf32>
    %295 = arith.mulf %286, %262 : vector<8x128xf32>
    %296 = arith.mulf %280, %288 : vector<8x128xf32>
    %297 = arith.addf %295, %296 : vector<8x128xf32>
    %298 = math.tanh %297 : vector<8x128xf32>
    %299 = arith.mulf %294, %298 : vector<8x128xf32>
    %300 = vector.extract_strided_slice %274 {offsets = [0, 0], sizes = [8, 128], strides = [1, 1]} : vector<8x512xf32> to vector<8x128xf32>
    %301 = arith.negf %300 : vector<8x128xf32>
    %302 = math.exp %301 : vector<8x128xf32>
    %cst_147 = arith.constant 1.000000e+00 : f32
    %303 = vector.broadcast %cst_147 : f32 to vector<8x128xf32>
    %304 = arith.addf %303, %302 : vector<8x128xf32>
    %305 = arith.divf %303, %304 : vector<8x128xf32>
    %306 = vector.extract_strided_slice %274 {offsets = [0, 128], sizes = [8, 128], strides = [1, 1]} : vector<8x512xf32> to vector<8x128xf32>
    %307 = arith.negf %306 : vector<8x128xf32>
    %308 = math.exp %307 : vector<8x128xf32>
    %cst_148 = arith.constant 1.000000e+00 : f32
    %309 = vector.broadcast %cst_148 : f32 to vector<8x128xf32>
    %310 = arith.addf %309, %308 : vector<8x128xf32>
    %311 = arith.divf %309, %310 : vector<8x128xf32>
    %312 = vector.extract_strided_slice %274 {offsets = [0, 256], sizes = [8, 128], strides = [1, 1]} : vector<8x512xf32> to vector<8x128xf32>
    %313 = math.tanh %312 : vector<8x128xf32>
    %314 = vector.extract_strided_slice %274 {offsets = [0, 384], sizes = [8, 128], strides = [1, 1]} : vector<8x512xf32> to vector<8x128xf32>
    %315 = arith.negf %314 : vector<8x128xf32>
    %316 = math.exp %315 : vector<8x128xf32>
    %cst_149 = arith.constant 1.000000e+00 : f32
    %317 = vector.broadcast %cst_149 : f32 to vector<8x128xf32>
    %318 = arith.addf %317, %316 : vector<8x128xf32>
    %319 = arith.divf %317, %318 : vector<8x128xf32>
    %320 = arith.mulf %311, %264 : vector<8x128xf32>
    %321 = arith.mulf %305, %313 : vector<8x128xf32>
    %322 = arith.addf %320, %321 : vector<8x128xf32>
    %323 = math.tanh %322 : vector<8x128xf32>
    %324 = arith.mulf %319, %323 : vector<8x128xf32>
    %c0_150 = arith.constant 0 : index
    %c0_151 = arith.constant 0 : index
    %325 = vector.load %arg12[%c0_150, %c0_151] : memref<8x128xf32, #tpu.memory_space<vmem>>, vector<8x128xf32>
    tpu.vector_store %arg12[%c0_150, %c0_151], %299 {strides = array<i32>} : memref<8x128xf32, #tpu.memory_space<vmem>>, vector<8x128xf32>,
    %c0_152 = arith.constant 0 : index
    %c0_153 = arith.constant 0 : index
    %326 = vector.load %arg13[%c0_152, %c0_153] : memref<8x128xf32, #tpu.memory_space<vmem>>, vector<8x128xf32>
    tpu.vector_store %arg13[%c0_152, %c0_153], %297 {strides = array<i32>} : memref<8x128xf32, #tpu.memory_space<vmem>>, vector<8x128xf32>,
    %c0_154 = arith.constant 0 : index
    %c0_155 = arith.constant 0 : index
    %327 = vector.load %arg14[%c0_154, %c0_155] : memref<8x128xf32, #tpu.memory_space<vmem>>, vector<8x128xf32>
    tpu.vector_store %arg14[%c0_154, %c0_155], %324 {strides = array<i32>} : memref<8x128xf32, #tpu.memory_space<vmem>>, vector<8x128xf32>,
    %c0_156 = arith.constant 0 : index
    %c0_157 = arith.constant 0 : index
    %328 = vector.load %arg15[%c0_156, %c0_157] : memref<8x128xf32, #tpu.memory_space<vmem>>, vector<8x128xf32>
    tpu.vector_store %arg15[%c0_156, %c0_157], %322 {strides = array<i32>} : memref<8x128xf32, #tpu.memory_space<vmem>>, vector<8x128xf32>,
    %329 = arith.index_cast %c3_i32 : i32 to index
    %c0_158 = arith.constant 0 : index
    %c0_159 = arith.constant 0 : index
    %330 = vector.load %arg6[%329, %c0_158, %c0_159] : memref<8x8x128xf32, #tpu.memory_space<vmem>>, vector<1x8x128xf32>
    %331 = vector.shape_cast %330 : vector<1x8x128xf32> to vector<8x128xf32>
    %332 = vector.shape_cast %299 : vector<8x128xf32> to vector<1x8x128xf32>
    tpu.vector_store %arg6[%329, %c0_158, %c0_159], %332 {strides = array<i32>} : memref<8x8x128xf32, #tpu.memory_space<vmem>>, vector<1x8x128xf32>,
    %333 = arith.index_cast %260 : i32 to index
    %c0_160 = arith.constant 0 : index
    %c0_161 = arith.constant 0 : index
    %334 = vector.load %arg7[%333, %c0_160, %c0_161] : memref<8x8x128xf32, #tpu.memory_space<vmem>>, vector<1x8x128xf32>
    %335 = vector.shape_cast %334 : vector<1x8x128xf32> to vector<8x128xf32>
    %336 = vector.shape_cast %324 : vector<8x128xf32> to vector<1x8x128xf32>
    tpu.vector_store %arg7[%333, %c0_160, %c0_161], %336 {strides = array<i32>} : memref<8x8x128xf32, #tpu.memory_space<vmem>>, vector<1x8x128xf32>,
    %c4_i32 = arith.constant 4 : i32
    %c7_i32_162 = arith.constant 7 : i32
    %337 = arith.subi %c7_i32_162, %c4_i32 : i32
    %c0_163 = arith.constant 0 : index
    %c0_164 = arith.constant 0 : index
    %338 = vector.load %arg12[%c0_163, %c0_164] : memref<8x128xf32, #tpu.memory_space<vmem>>, vector<8x128xf32>
    %c0_165 = arith.constant 0 : index
    %c0_166 = arith.constant 0 : index
    %339 = vector.load %arg13[%c0_165, %c0_166] : memref<8x128xf32, #tpu.memory_space<vmem>>, vector<8x128xf32>
    %c0_167 = arith.constant 0 : index
    %c0_168 = arith.constant 0 : index
    %340 = vector.load %arg14[%c0_167, %c0_168] : memref<8x128xf32, #tpu.memory_space<vmem>>, vector<8x128xf32>
    %c0_169 = arith.constant 0 : index
    %c0_170 = arith.constant 0 : index
    %341 = vector.load %arg15[%c0_169, %c0_170] : memref<8x128xf32, #tpu.memory_space<vmem>>, vector<8x128xf32>
    %342 = arith.index_cast %c4_i32 : i32 to index
    %c0_171 = arith.constant 0 : index
    %c0_172 = arith.constant 0 : index
    %343 = vector.load %arg10[%342, %c0_171, %c0_172] : memref<8x8x512xf32, #tpu.memory_space<vmem>>, vector<1x8x512xf32>
    %344 = vector.shape_cast %343 : vector<1x8x512xf32> to vector<8x512xf32>
    %cst_173 = arith.constant dense<0.000000e+00> : vector<8x512xf32>
    %345 = tpu.matmul %338, %26, %cst_173 {dimension_numbers = #tpu.dot_dimension_numbers<[1], [0], [0], [1], [0, 0, 1, 1], [], []>} : vector<8x128xf32>, vector<128x512xf32>, vector<8x512xf32> -> vector<8x512xf32>
    %346 = arith.addf %344, %345 : vector<8x512xf32>
    %347 = arith.index_cast %337 : i32 to index
    %c0_174 = arith.constant 0 : index
    %c0_175 = arith.constant 0 : index
    %348 = vector.load %arg11[%347, %c0_174, %c0_175] : memref<8x8x512xf32, #tpu.memory_space<vmem>>, vector<1x8x512xf32>
    %349 = vector.shape_cast %348 : vector<1x8x512xf32> to vector<8x512xf32>
    %cst_176 = arith.constant dense<0.000000e+00> : vector<8x512xf32>
    %350 = tpu.matmul %340, %28, %cst_176 {dimension_numbers = #tpu.dot_dimension_numbers<[1], [0], [0], [1], [0, 0, 1, 1], [], []>} : vector<8x128xf32>, vector<128x512xf32>, vector<8x512xf32> -> vector<8x512xf32>
    %351 = arith.addf %349, %350 : vector<8x512xf32>
    %352 = vector.extract_strided_slice %346 {offsets = [0, 0], sizes = [8, 128], strides = [1, 1]} : vector<8x512xf32> to vector<8x128xf32>
    %353 = arith.negf %352 : vector<8x128xf32>
    %354 = math.exp %353 : vector<8x128xf32>
    %cst_177 = arith.constant 1.000000e+00 : f32
    %355 = vector.broadcast %cst_177 : f32 to vector<8x128xf32>
    %356 = arith.addf %355, %354 : vector<8x128xf32>
    %357 = arith.divf %355, %356 : vector<8x128xf32>
    %358 = vector.extract_strided_slice %346 {offsets = [0, 128], sizes = [8, 128], strides = [1, 1]} : vector<8x512xf32> to vector<8x128xf32>
    %359 = arith.negf %358 : vector<8x128xf32>
    %360 = math.exp %359 : vector<8x128xf32>
    %cst_178 = arith.constant 1.000000e+00 : f32
    %361 = vector.broadcast %cst_178 : f32 to vector<8x128xf32>
    %362 = arith.addf %361, %360 : vector<8x128xf32>
    %363 = arith.divf %361, %362 : vector<8x128xf32>
    %364 = vector.extract_strided_slice %346 {offsets = [0, 256], sizes = [8, 128], strides = [1, 1]} : vector<8x512xf32> to vector<8x128xf32>
    %365 = math.tanh %364 : vector<8x128xf32>
    %366 = vector.extract_strided_slice %346 {offsets = [0, 384], sizes = [8, 128], strides = [1, 1]} : vector<8x512xf32> to vector<8x128xf32>
    %367 = arith.negf %366 : vector<8x128xf32>
    %368 = math.exp %367 : vector<8x128xf32>
    %cst_179 = arith.constant 1.000000e+00 : f32
    %369 = vector.broadcast %cst_179 : f32 to vector<8x128xf32>
    %370 = arith.addf %369, %368 : vector<8x128xf32>
    %371 = arith.divf %369, %370 : vector<8x128xf32>
    %372 = arith.mulf %363, %339 : vector<8x128xf32>
    %373 = arith.mulf %357, %365 : vector<8x128xf32>
    %374 = arith.addf %372, %373 : vector<8x128xf32>
    %375 = math.tanh %374 : vector<8x128xf32>
    %376 = arith.mulf %371, %375 : vector<8x128xf32>
    %377 = vector.extract_strided_slice %351 {offsets = [0, 0], sizes = [8, 128], strides = [1, 1]} : vector<8x512xf32> to vector<8x128xf32>
    %378 = arith.negf %377 : vector<8x128xf32>
    %379 = math.exp %378 : vector<8x128xf32>
    %cst_180 = arith.constant 1.000000e+00 : f32
    %380 = vector.broadcast %cst_180 : f32 to vector<8x128xf32>
    %381 = arith.addf %380, %379 : vector<8x128xf32>
    %382 = arith.divf %380, %381 : vector<8x128xf32>
    %383 = vector.extract_strided_slice %351 {offsets = [0, 128], sizes = [8, 128], strides = [1, 1]} : vector<8x512xf32> to vector<8x128xf32>
    %384 = arith.negf %383 : vector<8x128xf32>
    %385 = math.exp %384 : vector<8x128xf32>
    %cst_181 = arith.constant 1.000000e+00 : f32
    %386 = vector.broadcast %cst_181 : f32 to vector<8x128xf32>
    %387 = arith.addf %386, %385 : vector<8x128xf32>
    %388 = arith.divf %386, %387 : vector<8x128xf32>
    %389 = vector.extract_strided_slice %351 {offsets = [0, 256], sizes = [8, 128], strides = [1, 1]} : vector<8x512xf32> to vector<8x128xf32>
    %390 = math.tanh %389 : vector<8x128xf32>
    %391 = vector.extract_strided_slice %351 {offsets = [0, 384], sizes = [8, 128], strides = [1, 1]} : vector<8x512xf32> to vector<8x128xf32>
    %392 = arith.negf %391 : vector<8x128xf32>
    %393 = math.exp %392 : vector<8x128xf32>
    %cst_182 = arith.constant 1.000000e+00 : f32
    %394 = vector.broadcast %cst_182 : f32 to vector<8x128xf32>
    %395 = arith.addf %394, %393 : vector<8x128xf32>
    %396 = arith.divf %394, %395 : vector<8x128xf32>
    %397 = arith.mulf %388, %341 : vector<8x128xf32>
    %398 = arith.mulf %382, %390 : vector<8x128xf32>
    %399 = arith.addf %397, %398 : vector<8x128xf32>
    %400 = math.tanh %399 : vector<8x128xf32>
    %401 = arith.mulf %396, %400 : vector<8x128xf32>
    %c0_183 = arith.constant 0 : index
    %c0_184 = arith.constant 0 : index
    %402 = vector.load %arg12[%c0_183, %c0_184] : memref<8x128xf32, #tpu.memory_space<vmem>>, vector<8x128xf32>
    tpu.vector_store %arg12[%c0_183, %c0_184], %376 {strides = array<i32>} : memref<8x128xf32, #tpu.memory_space<vmem>>, vector<8x128xf32>,
    %c0_185 = arith.constant 0 : index
    %c0_186 = arith.constant 0 : index
    %403 = vector.load %arg13[%c0_185, %c0_186] : memref<8x128xf32, #tpu.memory_space<vmem>>, vector<8x128xf32>
    tpu.vector_store %arg13[%c0_185, %c0_186], %374 {strides = array<i32>} : memref<8x128xf32, #tpu.memory_space<vmem>>, vector<8x128xf32>,
    %c0_187 = arith.constant 0 : index
    %c0_188 = arith.constant 0 : index
    %404 = vector.load %arg14[%c0_187, %c0_188] : memref<8x128xf32, #tpu.memory_space<vmem>>, vector<8x128xf32>
    tpu.vector_store %arg14[%c0_187, %c0_188], %401 {strides = array<i32>} : memref<8x128xf32, #tpu.memory_space<vmem>>, vector<8x128xf32>,
    %c0_189 = arith.constant 0 : index
    %c0_190 = arith.constant 0 : index
    %405 = vector.load %arg15[%c0_189, %c0_190] : memref<8x128xf32, #tpu.memory_space<vmem>>, vector<8x128xf32>
    tpu.vector_store %arg15[%c0_189, %c0_190], %399 {strides = array<i32>} : memref<8x128xf32, #tpu.memory_space<vmem>>, vector<8x128xf32>,
    %406 = arith.index_cast %c4_i32 : i32 to index
    %c0_191 = arith.constant 0 : index
    %c0_192 = arith.constant 0 : index
    %407 = vector.load %arg6[%406, %c0_191, %c0_192] : memref<8x8x128xf32, #tpu.memory_space<vmem>>, vector<1x8x128xf32>
    %408 = vector.shape_cast %407 : vector<1x8x128xf32> to vector<8x128xf32>
    %409 = vector.shape_cast %376 : vector<8x128xf32> to vector<1x8x128xf32>
    tpu.vector_store %arg6[%406, %c0_191, %c0_192], %409 {strides = array<i32>} : memref<8x8x128xf32, #tpu.memory_space<vmem>>, vector<1x8x128xf32>,
    %410 = arith.index_cast %337 : i32 to index
    %c0_193 = arith.constant 0 : index
    %c0_194 = arith.constant 0 : index
    %411 = vector.load %arg7[%410, %c0_193, %c0_194] : memref<8x8x128xf32, #tpu.memory_space<vmem>>, vector<1x8x128xf32>
    %412 = vector.shape_cast %411 : vector<1x8x128xf32> to vector<8x128xf32>
    %413 = vector.shape_cast %401 : vector<8x128xf32> to vector<1x8x128xf32>
    tpu.vector_store %arg7[%410, %c0_193, %c0_194], %413 {strides = array<i32>} : memref<8x8x128xf32, #tpu.memory_space<vmem>>, vector<1x8x128xf32>,
    %c5_i32 = arith.constant 5 : i32
    %c7_i32_195 = arith.constant 7 : i32
    %414 = arith.subi %c7_i32_195, %c5_i32 : i32
    %c0_196 = arith.constant 0 : index
    %c0_197 = arith.constant 0 : index
    %415 = vector.load %arg12[%c0_196, %c0_197] : memref<8x128xf32, #tpu.memory_space<vmem>>, vector<8x128xf32>
    %c0_198 = arith.constant 0 : index
    %c0_199 = arith.constant 0 : index
    %416 = vector.load %arg13[%c0_198, %c0_199] : memref<8x128xf32, #tpu.memory_space<vmem>>, vector<8x128xf32>
    %c0_200 = arith.constant 0 : index
    %c0_201 = arith.constant 0 : index
    %417 = vector.load %arg14[%c0_200, %c0_201] : memref<8x128xf32, #tpu.memory_space<vmem>>, vector<8x128xf32>
    %c0_202 = arith.constant 0 : index
    %c0_203 = arith.constant 0 : index
    %418 = vector.load %arg15[%c0_202, %c0_203] : memref<8x128xf32, #tpu.memory_space<vmem>>, vector<8x128xf32>
    %419 = arith.index_cast %c5_i32 : i32 to index
    %c0_204 = arith.constant 0 : index
    %c0_205 = arith.constant 0 : index
    %420 = vector.load %arg10[%419, %c0_204, %c0_205] : memref<8x8x512xf32, #tpu.memory_space<vmem>>, vector<1x8x512xf32>
    %421 = vector.shape_cast %420 : vector<1x8x512xf32> to vector<8x512xf32>
    %cst_206 = arith.constant dense<0.000000e+00> : vector<8x512xf32>
    %422 = tpu.matmul %415, %26, %cst_206 {dimension_numbers = #tpu.dot_dimension_numbers<[1], [0], [0], [1], [0, 0, 1, 1], [], []>} : vector<8x128xf32>, vector<128x512xf32>, vector<8x512xf32> -> vector<8x512xf32>
    %423 = arith.addf %421, %422 : vector<8x512xf32>
    %424 = arith.index_cast %414 : i32 to index
    %c0_207 = arith.constant 0 : index
    %c0_208 = arith.constant 0 : index
    %425 = vector.load %arg11[%424, %c0_207, %c0_208] : memref<8x8x512xf32, #tpu.memory_space<vmem>>, vector<1x8x512xf32>
    %426 = vector.shape_cast %425 : vector<1x8x512xf32> to vector<8x512xf32>
    %cst_209 = arith.constant dense<0.000000e+00> : vector<8x512xf32>
    %427 = tpu.matmul %417, %28, %cst_209 {dimension_numbers = #tpu.dot_dimension_numbers<[1], [0], [0], [1], [0, 0, 1, 1], [], []>} : vector<8x128xf32>, vector<128x512xf32>, vector<8x512xf32> -> vector<8x512xf32>
    %428 = arith.addf %426, %427 : vector<8x512xf32>
    %429 = vector.extract_strided_slice %423 {offsets = [0, 0], sizes = [8, 128], strides = [1, 1]} : vector<8x512xf32> to vector<8x128xf32>
    %430 = arith.negf %429 : vector<8x128xf32>
    %431 = math.exp %430 : vector<8x128xf32>
    %cst_210 = arith.constant 1.000000e+00 : f32
    %432 = vector.broadcast %cst_210 : f32 to vector<8x128xf32>
    %433 = arith.addf %432, %431 : vector<8x128xf32>
    %434 = arith.divf %432, %433 : vector<8x128xf32>
    %435 = vector.extract_strided_slice %423 {offsets = [0, 128], sizes = [8, 128], strides = [1, 1]} : vector<8x512xf32> to vector<8x128xf32>
    %436 = arith.negf %435 : vector<8x128xf32>
    %437 = math.exp %436 : vector<8x128xf32>
    %cst_211 = arith.constant 1.000000e+00 : f32
    %438 = vector.broadcast %cst_211 : f32 to vector<8x128xf32>
    %439 = arith.addf %438, %437 : vector<8x128xf32>
    %440 = arith.divf %438, %439 : vector<8x128xf32>
    %441 = vector.extract_strided_slice %423 {offsets = [0, 256], sizes = [8, 128], strides = [1, 1]} : vector<8x512xf32> to vector<8x128xf32>
    %442 = math.tanh %441 : vector<8x128xf32>
    %443 = vector.extract_strided_slice %423 {offsets = [0, 384], sizes = [8, 128], strides = [1, 1]} : vector<8x512xf32> to vector<8x128xf32>
    %444 = arith.negf %443 : vector<8x128xf32>
    %445 = math.exp %444 : vector<8x128xf32>
    %cst_212 = arith.constant 1.000000e+00 : f32
    %446 = vector.broadcast %cst_212 : f32 to vector<8x128xf32>
    %447 = arith.addf %446, %445 : vector<8x128xf32>
    %448 = arith.divf %446, %447 : vector<8x128xf32>
    %449 = arith.mulf %440, %416 : vector<8x128xf32>
    %450 = arith.mulf %434, %442 : vector<8x128xf32>
    %451 = arith.addf %449, %450 : vector<8x128xf32>
    %452 = math.tanh %451 : vector<8x128xf32>
    %453 = arith.mulf %448, %452 : vector<8x128xf32>
    %454 = vector.extract_strided_slice %428 {offsets = [0, 0], sizes = [8, 128], strides = [1, 1]} : vector<8x512xf32> to vector<8x128xf32>
    %455 = arith.negf %454 : vector<8x128xf32>
    %456 = math.exp %455 : vector<8x128xf32>
    %cst_213 = arith.constant 1.000000e+00 : f32
    %457 = vector.broadcast %cst_213 : f32 to vector<8x128xf32>
    %458 = arith.addf %457, %456 : vector<8x128xf32>
    %459 = arith.divf %457, %458 : vector<8x128xf32>
    %460 = vector.extract_strided_slice %428 {offsets = [0, 128], sizes = [8, 128], strides = [1, 1]} : vector<8x512xf32> to vector<8x128xf32>
    %461 = arith.negf %460 : vector<8x128xf32>
    %462 = math.exp %461 : vector<8x128xf32>
    %cst_214 = arith.constant 1.000000e+00 : f32
    %463 = vector.broadcast %cst_214 : f32 to vector<8x128xf32>
    %464 = arith.addf %463, %462 : vector<8x128xf32>
    %465 = arith.divf %463, %464 : vector<8x128xf32>
    %466 = vector.extract_strided_slice %428 {offsets = [0, 256], sizes = [8, 128], strides = [1, 1]} : vector<8x512xf32> to vector<8x128xf32>
    %467 = math.tanh %466 : vector<8x128xf32>
    %468 = vector.extract_strided_slice %428 {offsets = [0, 384], sizes = [8, 128], strides = [1, 1]} : vector<8x512xf32> to vector<8x128xf32>
    %469 = arith.negf %468 : vector<8x128xf32>
    %470 = math.exp %469 : vector<8x128xf32>
    %cst_215 = arith.constant 1.000000e+00 : f32
    %471 = vector.broadcast %cst_215 : f32 to vector<8x128xf32>
    %472 = arith.addf %471, %470 : vector<8x128xf32>
    %473 = arith.divf %471, %472 : vector<8x128xf32>
    %474 = arith.mulf %465, %418 : vector<8x128xf32>
    %475 = arith.mulf %459, %467 : vector<8x128xf32>
    %476 = arith.addf %474, %475 : vector<8x128xf32>
    %477 = math.tanh %476 : vector<8x128xf32>
    %478 = arith.mulf %473, %477 : vector<8x128xf32>
    %c0_216 = arith.constant 0 : index
    %c0_217 = arith.constant 0 : index
    %479 = vector.load %arg12[%c0_216, %c0_217] : memref<8x128xf32, #tpu.memory_space<vmem>>, vector<8x128xf32>
    tpu.vector_store %arg12[%c0_216, %c0_217], %453 {strides = array<i32>} : memref<8x128xf32, #tpu.memory_space<vmem>>, vector<8x128xf32>,
    %c0_218 = arith.constant 0 : index
    %c0_219 = arith.constant 0 : index
    %480 = vector.load %arg13[%c0_218, %c0_219] : memref<8x128xf32, #tpu.memory_space<vmem>>, vector<8x128xf32>
    tpu.vector_store %arg13[%c0_218, %c0_219], %451 {strides = array<i32>} : memref<8x128xf32, #tpu.memory_space<vmem>>, vector<8x128xf32>,
    %c0_220 = arith.constant 0 : index
    %c0_221 = arith.constant 0 : index
    %481 = vector.load %arg14[%c0_220, %c0_221] : memref<8x128xf32, #tpu.memory_space<vmem>>, vector<8x128xf32>
    tpu.vector_store %arg14[%c0_220, %c0_221], %478 {strides = array<i32>} : memref<8x128xf32, #tpu.memory_space<vmem>>, vector<8x128xf32>,
    %c0_222 = arith.constant 0 : index
    %c0_223 = arith.constant 0 : index
    %482 = vector.load %arg15[%c0_222, %c0_223] : memref<8x128xf32, #tpu.memory_space<vmem>>, vector<8x128xf32>
    tpu.vector_store %arg15[%c0_222, %c0_223], %476 {strides = array<i32>} : memref<8x128xf32, #tpu.memory_space<vmem>>, vector<8x128xf32>,
    %483 = arith.index_cast %c5_i32 : i32 to index
    %c0_224 = arith.constant 0 : index
    %c0_225 = arith.constant 0 : index
    %484 = vector.load %arg6[%483, %c0_224, %c0_225] : memref<8x8x128xf32, #tpu.memory_space<vmem>>, vector<1x8x128xf32>
    %485 = vector.shape_cast %484 : vector<1x8x128xf32> to vector<8x128xf32>
    %486 = vector.shape_cast %453 : vector<8x128xf32> to vector<1x8x128xf32>
    tpu.vector_store %arg6[%483, %c0_224, %c0_225], %486 {strides = array<i32>} : memref<8x8x128xf32, #tpu.memory_space<vmem>>, vector<1x8x128xf32>,
    %487 = arith.index_cast %414 : i32 to index
    %c0_226 = arith.constant 0 : index
    %c0_227 = arith.constant 0 : index
    %488 = vector.load %arg7[%487, %c0_226, %c0_227] : memref<8x8x128xf32, #tpu.memory_space<vmem>>, vector<1x8x128xf32>
    %489 = vector.shape_cast %488 : vector<1x8x128xf32> to vector<8x128xf32>
    %490 = vector.shape_cast %478 : vector<8x128xf32> to vector<1x8x128xf32>
    tpu.vector_store %arg7[%487, %c0_226, %c0_227], %490 {strides = array<i32>} : memref<8x8x128xf32, #tpu.memory_space<vmem>>, vector<1x8x128xf32>,
    %c6_i32 = arith.constant 6 : i32
    %c7_i32_228 = arith.constant 7 : i32
    %491 = arith.subi %c7_i32_228, %c6_i32 : i32
    %c0_229 = arith.constant 0 : index
    %c0_230 = arith.constant 0 : index
    %492 = vector.load %arg12[%c0_229, %c0_230] : memref<8x128xf32, #tpu.memory_space<vmem>>, vector<8x128xf32>
    %c0_231 = arith.constant 0 : index
    %c0_232 = arith.constant 0 : index
    %493 = vector.load %arg13[%c0_231, %c0_232] : memref<8x128xf32, #tpu.memory_space<vmem>>, vector<8x128xf32>
    %c0_233 = arith.constant 0 : index
    %c0_234 = arith.constant 0 : index
    %494 = vector.load %arg14[%c0_233, %c0_234] : memref<8x128xf32, #tpu.memory_space<vmem>>, vector<8x128xf32>
    %c0_235 = arith.constant 0 : index
    %c0_236 = arith.constant 0 : index
    %495 = vector.load %arg15[%c0_235, %c0_236] : memref<8x128xf32, #tpu.memory_space<vmem>>, vector<8x128xf32>
    %496 = arith.index_cast %c6_i32 : i32 to index
    %c0_237 = arith.constant 0 : index
    %c0_238 = arith.constant 0 : index
    %497 = vector.load %arg10[%496, %c0_237, %c0_238] : memref<8x8x512xf32, #tpu.memory_space<vmem>>, vector<1x8x512xf32>
    %498 = vector.shape_cast %497 : vector<1x8x512xf32> to vector<8x512xf32>
    %cst_239 = arith.constant dense<0.000000e+00> : vector<8x512xf32>
    %499 = tpu.matmul %492, %26, %cst_239 {dimension_numbers = #tpu.dot_dimension_numbers<[1], [0], [0], [1], [0, 0, 1, 1], [], []>} : vector<8x128xf32>, vector<128x512xf32>, vector<8x512xf32> -> vector<8x512xf32>
    %500 = arith.addf %498, %499 : vector<8x512xf32>
    %501 = arith.index_cast %491 : i32 to index
    %c0_240 = arith.constant 0 : index
    %c0_241 = arith.constant 0 : index
    %502 = vector.load %arg11[%501, %c0_240, %c0_241] : memref<8x8x512xf32, #tpu.memory_space<vmem>>, vector<1x8x512xf32>
    %503 = vector.shape_cast %502 : vector<1x8x512xf32> to vector<8x512xf32>
    %cst_242 = arith.constant dense<0.000000e+00> : vector<8x512xf32>
    %504 = tpu.matmul %494, %28, %cst_242 {dimension_numbers = #tpu.dot_dimension_numbers<[1], [0], [0], [1], [0, 0, 1, 1], [], []>} : vector<8x128xf32>, vector<128x512xf32>, vector<8x512xf32> -> vector<8x512xf32>
    %505 = arith.addf %503, %504 : vector<8x512xf32>
    %506 = vector.extract_strided_slice %500 {offsets = [0, 0], sizes = [8, 128], strides = [1, 1]} : vector<8x512xf32> to vector<8x128xf32>
    %507 = arith.negf %506 : vector<8x128xf32>
    %508 = math.exp %507 : vector<8x128xf32>
    %cst_243 = arith.constant 1.000000e+00 : f32
    %509 = vector.broadcast %cst_243 : f32 to vector<8x128xf32>
    %510 = arith.addf %509, %508 : vector<8x128xf32>
    %511 = arith.divf %509, %510 : vector<8x128xf32>
    %512 = vector.extract_strided_slice %500 {offsets = [0, 128], sizes = [8, 128], strides = [1, 1]} : vector<8x512xf32> to vector<8x128xf32>
    %513 = arith.negf %512 : vector<8x128xf32>
    %514 = math.exp %513 : vector<8x128xf32>
    %cst_244 = arith.constant 1.000000e+00 : f32
    %515 = vector.broadcast %cst_244 : f32 to vector<8x128xf32>
    %516 = arith.addf %515, %514 : vector<8x128xf32>
    %517 = arith.divf %515, %516 : vector<8x128xf32>
    %518 = vector.extract_strided_slice %500 {offsets = [0, 256], sizes = [8, 128], strides = [1, 1]} : vector<8x512xf32> to vector<8x128xf32>
    %519 = math.tanh %518 : vector<8x128xf32>
    %520 = vector.extract_strided_slice %500 {offsets = [0, 384], sizes = [8, 128], strides = [1, 1]} : vector<8x512xf32> to vector<8x128xf32>
    %521 = arith.negf %520 : vector<8x128xf32>
    %522 = math.exp %521 : vector<8x128xf32>
    %cst_245 = arith.constant 1.000000e+00 : f32
    %523 = vector.broadcast %cst_245 : f32 to vector<8x128xf32>
    %524 = arith.addf %523, %522 : vector<8x128xf32>
    %525 = arith.divf %523, %524 : vector<8x128xf32>
    %526 = arith.mulf %517, %493 : vector<8x128xf32>
    %527 = arith.mulf %511, %519 : vector<8x128xf32>
    %528 = arith.addf %526, %527 : vector<8x128xf32>
    %529 = math.tanh %528 : vector<8x128xf32>
    %530 = arith.mulf %525, %529 : vector<8x128xf32>
    %531 = vector.extract_strided_slice %505 {offsets = [0, 0], sizes = [8, 128], strides = [1, 1]} : vector<8x512xf32> to vector<8x128xf32>
    %532 = arith.negf %531 : vector<8x128xf32>
    %533 = math.exp %532 : vector<8x128xf32>
    %cst_246 = arith.constant 1.000000e+00 : f32
    %534 = vector.broadcast %cst_246 : f32 to vector<8x128xf32>
    %535 = arith.addf %534, %533 : vector<8x128xf32>
    %536 = arith.divf %534, %535 : vector<8x128xf32>
    %537 = vector.extract_strided_slice %505 {offsets = [0, 128], sizes = [8, 128], strides = [1, 1]} : vector<8x512xf32> to vector<8x128xf32>
    %538 = arith.negf %537 : vector<8x128xf32>
    %539 = math.exp %538 : vector<8x128xf32>
    %cst_247 = arith.constant 1.000000e+00 : f32
    %540 = vector.broadcast %cst_247 : f32 to vector<8x128xf32>
    %541 = arith.addf %540, %539 : vector<8x128xf32>
    %542 = arith.divf %540, %541 : vector<8x128xf32>
    %543 = vector.extract_strided_slice %505 {offsets = [0, 256], sizes = [8, 128], strides = [1, 1]} : vector<8x512xf32> to vector<8x128xf32>
    %544 = math.tanh %543 : vector<8x128xf32>
    %545 = vector.extract_strided_slice %505 {offsets = [0, 384], sizes = [8, 128], strides = [1, 1]} : vector<8x512xf32> to vector<8x128xf32>
    %546 = arith.negf %545 : vector<8x128xf32>
    %547 = math.exp %546 : vector<8x128xf32>
    %cst_248 = arith.constant 1.000000e+00 : f32
    %548 = vector.broadcast %cst_248 : f32 to vector<8x128xf32>
    %549 = arith.addf %548, %547 : vector<8x128xf32>
    %550 = arith.divf %548, %549 : vector<8x128xf32>
    %551 = arith.mulf %542, %495 : vector<8x128xf32>
    %552 = arith.mulf %536, %544 : vector<8x128xf32>
    %553 = arith.addf %551, %552 : vector<8x128xf32>
    %554 = math.tanh %553 : vector<8x128xf32>
    %555 = arith.mulf %550, %554 : vector<8x128xf32>
    %c0_249 = arith.constant 0 : index
    %c0_250 = arith.constant 0 : index
    %556 = vector.load %arg12[%c0_249, %c0_250] : memref<8x128xf32, #tpu.memory_space<vmem>>, vector<8x128xf32>
    tpu.vector_store %arg12[%c0_249, %c0_250], %530 {strides = array<i32>} : memref<8x128xf32, #tpu.memory_space<vmem>>, vector<8x128xf32>,
    %c0_251 = arith.constant 0 : index
    %c0_252 = arith.constant 0 : index
    %557 = vector.load %arg13[%c0_251, %c0_252] : memref<8x128xf32, #tpu.memory_space<vmem>>, vector<8x128xf32>
    tpu.vector_store %arg13[%c0_251, %c0_252], %528 {strides = array<i32>} : memref<8x128xf32, #tpu.memory_space<vmem>>, vector<8x128xf32>,
    %c0_253 = arith.constant 0 : index
    %c0_254 = arith.constant 0 : index
    %558 = vector.load %arg14[%c0_253, %c0_254] : memref<8x128xf32, #tpu.memory_space<vmem>>, vector<8x128xf32>
    tpu.vector_store %arg14[%c0_253, %c0_254], %555 {strides = array<i32>} : memref<8x128xf32, #tpu.memory_space<vmem>>, vector<8x128xf32>,
    %c0_255 = arith.constant 0 : index
    %c0_256 = arith.constant 0 : index
    %559 = vector.load %arg15[%c0_255, %c0_256] : memref<8x128xf32, #tpu.memory_space<vmem>>, vector<8x128xf32>
    tpu.vector_store %arg15[%c0_255, %c0_256], %553 {strides = array<i32>} : memref<8x128xf32, #tpu.memory_space<vmem>>, vector<8x128xf32>,
    %560 = arith.index_cast %c6_i32 : i32 to index
    %c0_257 = arith.constant 0 : index
    %c0_258 = arith.constant 0 : index
    %561 = vector.load %arg6[%560, %c0_257, %c0_258] : memref<8x8x128xf32, #tpu.memory_space<vmem>>, vector<1x8x128xf32>
    %562 = vector.shape_cast %561 : vector<1x8x128xf32> to vector<8x128xf32>
    %563 = vector.shape_cast %530 : vector<8x128xf32> to vector<1x8x128xf32>
    tpu.vector_store %arg6[%560, %c0_257, %c0_258], %563 {strides = array<i32>} : memref<8x8x128xf32, #tpu.memory_space<vmem>>, vector<1x8x128xf32>,
    %564 = arith.index_cast %491 : i32 to index
    %c0_259 = arith.constant 0 : index
    %c0_260 = arith.constant 0 : index
    %565 = vector.load %arg7[%564, %c0_259, %c0_260] : memref<8x8x128xf32, #tpu.memory_space<vmem>>, vector<1x8x128xf32>
    %566 = vector.shape_cast %565 : vector<1x8x128xf32> to vector<8x128xf32>
    %567 = vector.shape_cast %555 : vector<8x128xf32> to vector<1x8x128xf32>
    tpu.vector_store %arg7[%564, %c0_259, %c0_260], %567 {strides = array<i32>} : memref<8x8x128xf32, #tpu.memory_space<vmem>>, vector<1x8x128xf32>,
    %c7_i32_261 = arith.constant 7 : i32
    %c7_i32_262 = arith.constant 7 : i32
    %568 = arith.subi %c7_i32_262, %c7_i32_261 : i32
    %c0_263 = arith.constant 0 : index
    %c0_264 = arith.constant 0 : index
    %569 = vector.load %arg12[%c0_263, %c0_264] : memref<8x128xf32, #tpu.memory_space<vmem>>, vector<8x128xf32>
    %c0_265 = arith.constant 0 : index
    %c0_266 = arith.constant 0 : index
    %570 = vector.load %arg13[%c0_265, %c0_266] : memref<8x128xf32, #tpu.memory_space<vmem>>, vector<8x128xf32>
    %c0_267 = arith.constant 0 : index
    %c0_268 = arith.constant 0 : index
    %571 = vector.load %arg14[%c0_267, %c0_268] : memref<8x128xf32, #tpu.memory_space<vmem>>, vector<8x128xf32>
    %c0_269 = arith.constant 0 : index
    %c0_270 = arith.constant 0 : index
    %572 = vector.load %arg15[%c0_269, %c0_270] : memref<8x128xf32, #tpu.memory_space<vmem>>, vector<8x128xf32>
    %573 = arith.index_cast %c7_i32_261 : i32 to index
    %c0_271 = arith.constant 0 : index
    %c0_272 = arith.constant 0 : index
    %574 = vector.load %arg10[%573, %c0_271, %c0_272] : memref<8x8x512xf32, #tpu.memory_space<vmem>>, vector<1x8x512xf32>
    %575 = vector.shape_cast %574 : vector<1x8x512xf32> to vector<8x512xf32>
    %cst_273 = arith.constant dense<0.000000e+00> : vector<8x512xf32>
    %576 = tpu.matmul %569, %26, %cst_273 {dimension_numbers = #tpu.dot_dimension_numbers<[1], [0], [0], [1], [0, 0, 1, 1], [], []>} : vector<8x128xf32>, vector<128x512xf32>, vector<8x512xf32> -> vector<8x512xf32>
    %577 = arith.addf %575, %576 : vector<8x512xf32>
    %578 = arith.index_cast %568 : i32 to index
    %c0_274 = arith.constant 0 : index
    %c0_275 = arith.constant 0 : index
    %579 = vector.load %arg11[%578, %c0_274, %c0_275] : memref<8x8x512xf32, #tpu.memory_space<vmem>>, vector<1x8x512xf32>
    %580 = vector.shape_cast %579 : vector<1x8x512xf32> to vector<8x512xf32>
    %cst_276 = arith.constant dense<0.000000e+00> : vector<8x512xf32>
    %581 = tpu.matmul %571, %28, %cst_276 {dimension_numbers = #tpu.dot_dimension_numbers<[1], [0], [0], [1], [0, 0, 1, 1], [], []>} : vector<8x128xf32>, vector<128x512xf32>, vector<8x512xf32> -> vector<8x512xf32>
    %582 = arith.addf %580, %581 : vector<8x512xf32>
    %583 = vector.extract_strided_slice %577 {offsets = [0, 0], sizes = [8, 128], strides = [1, 1]} : vector<8x512xf32> to vector<8x128xf32>
    %584 = arith.negf %583 : vector<8x128xf32>
    %585 = math.exp %584 : vector<8x128xf32>
    %cst_277 = arith.constant 1.000000e+00 : f32
    %586 = vector.broadcast %cst_277 : f32 to vector<8x128xf32>
    %587 = arith.addf %586, %585 : vector<8x128xf32>
    %588 = arith.divf %586, %587 : vector<8x128xf32>
    %589 = vector.extract_strided_slice %577 {offsets = [0, 128], sizes = [8, 128], strides = [1, 1]} : vector<8x512xf32> to vector<8x128xf32>
    %590 = arith.negf %589 : vector<8x128xf32>
    %591 = math.exp %590 : vector<8x128xf32>
    %cst_278 = arith.constant 1.000000e+00 : f32
    %592 = vector.broadcast %cst_278 : f32 to vector<8x128xf32>
    %593 = arith.addf %592, %591 : vector<8x128xf32>
    %594 = arith.divf %592, %593 : vector<8x128xf32>
    %595 = vector.extract_strided_slice %577 {offsets = [0, 256], sizes = [8, 128], strides = [1, 1]} : vector<8x512xf32> to vector<8x128xf32>
    %596 = math.tanh %595 : vector<8x128xf32>
    %597 = vector.extract_strided_slice %577 {offsets = [0, 384], sizes = [8, 128], strides = [1, 1]} : vector<8x512xf32> to vector<8x128xf32>
    %598 = arith.negf %597 : vector<8x128xf32>
    %599 = math.exp %598 : vector<8x128xf32>
    %cst_279 = arith.constant 1.000000e+00 : f32
    %600 = vector.broadcast %cst_279 : f32 to vector<8x128xf32>
    %601 = arith.addf %600, %599 : vector<8x128xf32>
    %602 = arith.divf %600, %601 : vector<8x128xf32>
    %603 = arith.mulf %594, %570 : vector<8x128xf32>
    %604 = arith.mulf %588, %596 : vector<8x128xf32>
    %605 = arith.addf %603, %604 : vector<8x128xf32>
    %606 = math.tanh %605 : vector<8x128xf32>
    %607 = arith.mulf %602, %606 : vector<8x128xf32>
    %608 = vector.extract_strided_slice %582 {offsets = [0, 0], sizes = [8, 128], strides = [1, 1]} : vector<8x512xf32> to vector<8x128xf32>
    %609 = arith.negf %608 : vector<8x128xf32>
    %610 = math.exp %609 : vector<8x128xf32>
    %cst_280 = arith.constant 1.000000e+00 : f32
    %611 = vector.broadcast %cst_280 : f32 to vector<8x128xf32>
    %612 = arith.addf %611, %610 : vector<8x128xf32>
    %613 = arith.divf %611, %612 : vector<8x128xf32>
    %614 = vector.extract_strided_slice %582 {offsets = [0, 128], sizes = [8, 128], strides = [1, 1]} : vector<8x512xf32> to vector<8x128xf32>
    %615 = arith.negf %614 : vector<8x128xf32>
    %616 = math.exp %615 : vector<8x128xf32>
    %cst_281 = arith.constant 1.000000e+00 : f32
    %617 = vector.broadcast %cst_281 : f32 to vector<8x128xf32>
    %618 = arith.addf %617, %616 : vector<8x128xf32>
    %619 = arith.divf %617, %618 : vector<8x128xf32>
    %620 = vector.extract_strided_slice %582 {offsets = [0, 256], sizes = [8, 128], strides = [1, 1]} : vector<8x512xf32> to vector<8x128xf32>
    %621 = math.tanh %620 : vector<8x128xf32>
    %622 = vector.extract_strided_slice %582 {offsets = [0, 384], sizes = [8, 128], strides = [1, 1]} : vector<8x512xf32> to vector<8x128xf32>
    %623 = arith.negf %622 : vector<8x128xf32>
    %624 = math.exp %623 : vector<8x128xf32>
    %cst_282 = arith.constant 1.000000e+00 : f32
    %625 = vector.broadcast %cst_282 : f32 to vector<8x128xf32>
    %626 = arith.addf %625, %624 : vector<8x128xf32>
    %627 = arith.divf %625, %626 : vector<8x128xf32>
    %628 = arith.mulf %619, %572 : vector<8x128xf32>
    %629 = arith.mulf %613, %621 : vector<8x128xf32>
    %630 = arith.addf %628, %629 : vector<8x128xf32>
    %631 = math.tanh %630 : vector<8x128xf32>
    %632 = arith.mulf %627, %631 : vector<8x128xf32>
    %c0_283 = arith.constant 0 : index
    %c0_284 = arith.constant 0 : index
    %633 = vector.load %arg12[%c0_283, %c0_284] : memref<8x128xf32, #tpu.memory_space<vmem>>, vector<8x128xf32>
    tpu.vector_store %arg12[%c0_283, %c0_284], %607 {strides = array<i32>} : memref<8x128xf32, #tpu.memory_space<vmem>>, vector<8x128xf32>,
    %c0_285 = arith.constant 0 : index
    %c0_286 = arith.constant 0 : index
    %634 = vector.load %arg13[%c0_285, %c0_286] : memref<8x128xf32, #tpu.memory_space<vmem>>, vector<8x128xf32>
    tpu.vector_store %arg13[%c0_285, %c0_286], %605 {strides = array<i32>} : memref<8x128xf32, #tpu.memory_space<vmem>>, vector<8x128xf32>,
    %c0_287 = arith.constant 0 : index
    %c0_288 = arith.constant 0 : index
    %635 = vector.load %arg14[%c0_287, %c0_288] : memref<8x128xf32, #tpu.memory_space<vmem>>, vector<8x128xf32>
    tpu.vector_store %arg14[%c0_287, %c0_288], %632 {strides = array<i32>} : memref<8x128xf32, #tpu.memory_space<vmem>>, vector<8x128xf32>,
    %c0_289 = arith.constant 0 : index
    %c0_290 = arith.constant 0 : index
    %636 = vector.load %arg15[%c0_289, %c0_290] : memref<8x128xf32, #tpu.memory_space<vmem>>, vector<8x128xf32>
    tpu.vector_store %arg15[%c0_289, %c0_290], %630 {strides = array<i32>} : memref<8x128xf32, #tpu.memory_space<vmem>>, vector<8x128xf32>,
    %637 = arith.index_cast %c7_i32_261 : i32 to index
    %c0_291 = arith.constant 0 : index
    %c0_292 = arith.constant 0 : index
    %638 = vector.load %arg6[%637, %c0_291, %c0_292] : memref<8x8x128xf32, #tpu.memory_space<vmem>>, vector<1x8x128xf32>
    %639 = vector.shape_cast %638 : vector<1x8x128xf32> to vector<8x128xf32>
    %640 = vector.shape_cast %607 : vector<8x128xf32> to vector<1x8x128xf32>
    tpu.vector_store %arg6[%637, %c0_291, %c0_292], %640 {strides = array<i32>} : memref<8x8x128xf32, #tpu.memory_space<vmem>>, vector<1x8x128xf32>,
    %641 = arith.index_cast %568 : i32 to index
    %c0_293 = arith.constant 0 : index
    %c0_294 = arith.constant 0 : index
    %642 = vector.load %arg7[%641, %c0_293, %c0_294] : memref<8x8x128xf32, #tpu.memory_space<vmem>>, vector<1x8x128xf32>
    %643 = vector.shape_cast %642 : vector<1x8x128xf32> to vector<8x128xf32>
    %644 = vector.shape_cast %632 : vector<8x128xf32> to vector<1x8x128xf32>
    tpu.vector_store %arg7[%641, %c0_293, %c0_294], %644 {strides = array<i32>} : memref<8x8x128xf32, #tpu.memory_space<vmem>>, vector<1x8x128xf32>,
    %c8_i32 = arith.constant 8 : i32
    %c0_i32_295 = arith.constant 0 : i32
    %645 = arith.cmpi eq, %arg0, %c0_i32_295 : i32
    %646 = arith.extui %645 : i1 to i32
    %c0_i32_296 = arith.constant 0 : i32
    %647 = arith.cmpi ne, %646, %c0_i32_296 : i32
    scf.if %647 {
      %c0_297 = arith.constant 0 : index
      %c0_298 = arith.constant 0 : index
      %648 = vector.load %arg12[%c0_297, %c0_298] : memref<8x128xf32, #tpu.memory_space<vmem>>, vector<8x128xf32>
      %c0_299 = arith.constant 0 : index
      %c0_300 = arith.constant 0 : index
      %c0_301 = arith.constant 0 : index
      %649 = vector.load %arg8[%c0_299, %c0_300, %c0_301] : memref<2x8x128xf32, #tpu.memory_space<vmem>>, vector<1x8x128xf32>
      %650 = vector.shape_cast %649 : vector<1x8x128xf32> to vector<8x128xf32>
      %651 = vector.shape_cast %648 : vector<8x128xf32> to vector<1x8x128xf32>
      tpu.vector_store %arg8[%c0_299, %c0_300, %c0_301], %651 {strides = array<i32>} : memref<2x8x128xf32, #tpu.memory_space<vmem>>, vector<1x8x128xf32>,
      %c0_302 = arith.constant 0 : index
      %c0_303 = arith.constant 0 : index
      %652 = vector.load %arg14[%c0_302, %c0_303] : memref<8x128xf32, #tpu.memory_space<vmem>>, vector<8x128xf32>
      %c1_304 = arith.constant 1 : index
      %c0_305 = arith.constant 0 : index
      %c0_306 = arith.constant 0 : index
      %653 = vector.load %arg8[%c1_304, %c0_305, %c0_306] : memref<2x8x128xf32, #tpu.memory_space<vmem>>, vector<1x8x128xf32>
      %654 = vector.shape_cast %653 : vector<1x8x128xf32> to vector<8x128xf32>
      %655 = vector.shape_cast %652 : vector<8x128xf32> to vector<1x8x128xf32>
      tpu.vector_store %arg8[%c1_304, %c0_305, %c0_306], %655 {strides = array<i32>} : memref<2x8x128xf32, #tpu.memory_space<vmem>>, vector<1x8x128xf32>,
      %c0_307 = arith.constant 0 : index
      %c0_308 = arith.constant 0 : index
      %656 = vector.load %arg13[%c0_307, %c0_308] : memref<8x128xf32, #tpu.memory_space<vmem>>, vector<8x128xf32>
      %c0_309 = arith.constant 0 : index
      %c0_310 = arith.constant 0 : index
      %c0_311 = arith.constant 0 : index
      %657 = vector.load %arg9[%c0_309, %c0_310, %c0_311] : memref<2x8x128xf32, #tpu.memory_space<vmem>>, vector<1x8x128xf32>
      %658 = vector.shape_cast %657 : vector<1x8x128xf32> to vector<8x128xf32>
      %659 = vector.shape_cast %656 : vector<8x128xf32> to vector<1x8x128xf32>
      tpu.vector_store %arg9[%c0_309, %c0_310, %c0_311], %659 {strides = array<i32>} : memref<2x8x128xf32, #tpu.memory_space<vmem>>, vector<1x8x128xf32>,
      %c0_312 = arith.constant 0 : index
      %c0_313 = arith.constant 0 : index
      %660 = vector.load %arg15[%c0_312, %c0_313] : memref<8x128xf32, #tpu.memory_space<vmem>>, vector<8x128xf32>
      %c1_314 = arith.constant 1 : index
      %c0_315 = arith.constant 0 : index
      %c0_316 = arith.constant 0 : index
      %661 = vector.load %arg9[%c1_314, %c0_315, %c0_316] : memref<2x8x128xf32, #tpu.memory_space<vmem>>, vector<1x8x128xf32>
      %662 = vector.shape_cast %661 : vector<1x8x128xf32> to vector<8x128xf32>
      %663 = vector.shape_cast %660 : vector<8x128xf32> to vector<1x8x128xf32>
      tpu.vector_store %arg9[%c1_314, %c0_315, %c0_316], %663 {strides = array<i32>} : memref<2x8x128xf32, #tpu.memory_space<vmem>>, vector<1x8x128xf32>,
    } else {
    }
    return
  }
  func.func @transform_0(%arg0: i32) -> (i32, i32, i32) {
    %c0_i32 = arith.constant 0 : i32
    %c0_i32_0 = arith.constant 0 : i32
    %c0_i32_1 = arith.constant 0 : i32
    return %arg0, %c0_i32, %c0_i32_0 : i32, i32, i32
  }
  func.func @transform_1(%arg0: i32) -> (i32, i32, i32) {
    %c0_i32 = arith.constant 0 : i32
    %0 = arith.subi %c0_i32, %arg0 : i32
    %c0_i32_0 = arith.constant 0 : i32
    %c0_i32_1 = arith.constant 0 : i32
    %c0_i32_2 = arith.constant 0 : i32
    return %0, %c0_i32_0, %c0_i32_1 : i32, i32, i32
  }
  func.func @transform_2(%arg0: i32) -> (i32, i32, i32) {
    %c0_i32 = arith.constant 0 : i32
    %c0_i32_0 = arith.constant 0 : i32
    %c0_i32_1 = arith.constant 0 : i32
    %c0_i32_2 = arith.constant 0 : i32
    return %c0_i32, %c0_i32_0, %c0_i32_1 : i32, i32, i32
  }
  func.func @transform_3(%arg0: i32) -> (i32, i32, i32) {
    %c0_i32 = arith.constant 0 : i32
    %c0_i32_0 = arith.constant 0 : i32
    %c0_i32_1 = arith.constant 0 : i32
    %c0_i32_2 = arith.constant 0 : i32
    return %c0_i32, %c0_i32_0, %c0_i32_1 : i32, i32, i32
  }
  func.func @transform_4(%arg0: i32) -> (i32, i32, i32) {
    %c0_i32 = arith.constant 0 : i32
    %c0_i32_0 = arith.constant 0 : i32
    %c0_i32_1 = arith.constant 0 : i32
    %c0_i32_2 = arith.constant 0 : i32
    return %c0_i32, %c0_i32_0, %c0_i32_1 : i32, i32, i32
  }
  func.func @transform_5(%arg0: i32) -> (i32, i32, i32) {
    %c0_i32 = arith.constant 0 : i32
    %c0_i32_0 = arith.constant 0 : i32
    %c0_i32_1 = arith.constant 0 : i32
    return %arg0, %c0_i32, %c0_i32_0 : i32, i32, i32
  }
  func.func @transform_6(%arg0: i32) -> (i32, i32, i32) {
    %c0_i32 = arith.constant 0 : i32
    %0 = arith.subi %c0_i32, %arg0 : i32
    %c0_i32_0 = arith.constant 0 : i32
    %c0_i32_1 = arith.constant 0 : i32
    %c0_i32_2 = arith.constant 0 : i32
    return %0, %c0_i32_0, %c0_i32_1 : i32, i32, i32
  }
  func.func @transform_7(%arg0: i32) -> (i32, i32, i32) {
    %c0_i32 = arith.constant 0 : i32
    %c0_i32_0 = arith.constant 0 : i32
    %c0_i32_1 = arith.constant 0 : i32
    %c0_i32_2 = arith.constant 0 : i32
    return %c0_i32, %c0_i32_0, %c0_i32_1 : i32, i32, i32
  }
  func.func @transform_8(%arg0: i32) -> (i32, i32, i32) {
    %c0_i32 = arith.constant 0 : i32
    %c0_i32_0 = arith.constant 0 : i32
    %c0_i32_1 = arith.constant 0 : i32
    %c0_i32_2 = arith.constant 0 : i32
    return %c0_i32, %c0_i32_0, %c0_i32_1 : i32, i32, i32
  }
}

module attributes {stable_mosaic.version = 11 : i64} {
  func.func @kernel(%arg0: i32, %arg1: memref<8x8x128xf32, #tpu.memory_space<vmem>>, %arg2: memref<8x8x128xf32, #tpu.memory_space<vmem>>, %arg3: memref<128x32xf32, #tpu.memory_space<vmem>>, %arg4: memref<128x32xf32, #tpu.memory_space<vmem>>, %arg5: memref<1x32xf32, #tpu.memory_space<vmem>>, %arg6: memref<8x8x32xf32, #tpu.memory_space<vmem>>) attributes {dimension_semantics = [#tpu.dimension_semantics<parallel>], iteration_bounds = array<i64: 1>, scalar_prefetch = 0 : i64, scratch_operands = 0 : i64, tpu.core_type = #tpu.core_type<tc>, window_params = [{transform_indices = @transform_0, window_bounds = array<i64: 8, 8, 128>}, {transform_indices = @transform_1, window_bounds = array<i64: 8, 8, 128>}, {pipeline_mode = #tpu.pipeline_mode<synchronous>, transform_indices = @transform_2, window_bounds = array<i64: 128, 32>}, {pipeline_mode = #tpu.pipeline_mode<synchronous>, transform_indices = @transform_3, window_bounds = array<i64: 128, 32>}, {pipeline_mode = #tpu.pipeline_mode<synchronous>, transform_indices = @transform_4, window_bounds = array<i64: 1, 32>}, {transform_indices = @transform_5, window_bounds = array<i64: 8, 8, 32>}]} {
    %c0 = arith.constant 0 : index
    %c0_0 = arith.constant 0 : index
    %c0_1 = arith.constant 0 : index
    %0 = vector.load %arg1[%c0, %c0_0, %c0_1] : memref<8x8x128xf32, #tpu.memory_space<vmem>>, vector<8x8x128xf32>
    %1 = vector.shape_cast %0 : vector<8x8x128xf32> to vector<64x128xf32>
    %c0_2 = arith.constant 0 : index
    %c0_3 = arith.constant 0 : index
    %2 = vector.load %arg3[%c0_2, %c0_3] : memref<128x32xf32, #tpu.memory_space<vmem>>, vector<128x32xf32>
    %cst = arith.constant dense<0.000000e+00> : vector<64x32xf32>
    %3 = tpu.matmul %1, %2, %cst {dimension_numbers = #tpu.dot_dimension_numbers<[1], [0], [0], [1], [0, 0, 1, 1], [], []>} : vector<64x128xf32>, vector<128x32xf32>, vector<64x32xf32> -> vector<64x32xf32>
    %c0_4 = arith.constant 0 : index
    %c0_5 = arith.constant 0 : index
    %c0_6 = arith.constant 0 : index
    %4 = vector.load %arg2[%c0_4, %c0_5, %c0_6] : memref<8x8x128xf32, #tpu.memory_space<vmem>>, vector<8x8x128xf32>
    %5 = vector.shape_cast %4 : vector<8x8x128xf32> to vector<64x128xf32>
    %c0_7 = arith.constant 0 : index
    %c0_8 = arith.constant 0 : index
    %6 = vector.load %arg4[%c0_7, %c0_8] : memref<128x32xf32, #tpu.memory_space<vmem>>, vector<128x32xf32>
    %cst_9 = arith.constant dense<0.000000e+00> : vector<64x32xf32>
    %7 = tpu.matmul %5, %6, %cst_9 {dimension_numbers = #tpu.dot_dimension_numbers<[1], [0], [0], [1], [0, 0, 1, 1], [], []>} : vector<64x128xf32>, vector<128x32xf32>, vector<64x32xf32> -> vector<64x32xf32>
    %8 = arith.addf %3, %7 : vector<64x32xf32>
    %c0_10 = arith.constant 0 : index
    %c0_11 = arith.constant 0 : index
    %9 = vector.load %arg5[%c0_10, %c0_11] : memref<1x32xf32, #tpu.memory_space<vmem>>, vector<1x32xf32>
    %10 = vector.broadcast %9 : vector<1x32xf32> to vector<64x32xf32>
    %11 = arith.addf %8, %10 : vector<64x32xf32>
    %12 = vector.shape_cast %11 : vector<64x32xf32> to vector<8x8x32xf32>
    %c0_12 = arith.constant 0 : index
    %c0_13 = arith.constant 0 : index
    %c0_14 = arith.constant 0 : index
    %13 = vector.load %arg6[%c0_12, %c0_13, %c0_14] : memref<8x8x32xf32, #tpu.memory_space<vmem>>, vector<8x8x32xf32>
    tpu.vector_store %arg6[%c0_12, %c0_13, %c0_14], %12 {strides = array<i32>} : memref<8x8x32xf32, #tpu.memory_space<vmem>>, vector<8x8x32xf32>,
    return
  }
  func.func @transform_0(%arg0: i32) -> (i32, i32, i32) {
    %c0_i32 = arith.constant 0 : i32
    %c0_i32_0 = arith.constant 0 : i32
    %c0_i32_1 = arith.constant 0 : i32
    return %arg0, %c0_i32, %c0_i32_0 : i32, i32, i32
  }
  func.func @transform_1(%arg0: i32) -> (i32, i32, i32) {
    %c0_i32 = arith.constant 0 : i32
    %c0_i32_0 = arith.constant 0 : i32
    %c0_i32_1 = arith.constant 0 : i32
    return %arg0, %c0_i32, %c0_i32_0 : i32, i32, i32
  }
  func.func @transform_2(%arg0: i32) -> (i32, i32) {
    %c0_i32 = arith.constant 0 : i32
    %c0_i32_0 = arith.constant 0 : i32
    %c0_i32_1 = arith.constant 0 : i32
    return %c0_i32, %c0_i32_0 : i32, i32
  }
  func.func @transform_3(%arg0: i32) -> (i32, i32) {
    %c0_i32 = arith.constant 0 : i32
    %c0_i32_0 = arith.constant 0 : i32
    %c0_i32_1 = arith.constant 0 : i32
    return %c0_i32, %c0_i32_0 : i32, i32
  }
  func.func @transform_4(%arg0: i32) -> (i32, i32) {
    %c0_i32 = arith.constant 0 : i32
    %c0_i32_0 = arith.constant 0 : i32
    %c0_i32_1 = arith.constant 0 : i32
    return %c0_i32, %c0_i32_0 : i32, i32
  }
  func.func @transform_5(%arg0: i32) -> (i32, i32, i32) {
    %c0_i32 = arith.constant 0 : i32
    %c0_i32_0 = arith.constant 0 : i32
    %c0_i32_1 = arith.constant 0 : i32
    return %arg0, %c0_i32, %c0_i32_0 : i32, i32, i32
  }
}

module attributes {stable_mosaic.version = 11 : i64} {
  func.func @kernel(%arg0: i32, %arg1: memref<8x8x128xf32, #tpu.memory_space<vmem>>, %arg2: memref<8x8x128xf32, #tpu.memory_space<vmem>>, %arg3: memref<8x8x128xf32, #tpu.memory_space<vmem>>, %arg4: memref<8x8x128xf32, #tpu.memory_space<vmem>>, %arg5: memref<2x128x512xf32, #tpu.memory_space<vmem>>, %arg6: memref<2x128x512xf32, #tpu.memory_space<vmem>>, %arg7: memref<2x128x512xf32, #tpu.memory_space<vmem>>, %arg8: memref<2x1x512xf32, #tpu.memory_space<vmem>>, %arg9: memref<8x8x128xf32, #tpu.memory_space<vmem>>, %arg10: memref<8x8x128xf32, #tpu.memory_space<vmem>>, %arg11: memref<2x8x128xf32, #tpu.memory_space<vmem>>, %arg12: memref<2x8x128xf32, #tpu.memory_space<vmem>>, %arg13: memref<8x8x512xf32, #tpu.memory_space<vmem>>, %arg14: memref<8x8x512xf32, #tpu.memory_space<vmem>>, %arg15: memref<8x128xf32, #tpu.memory_space<vmem>>, %arg16: memref<8x128xf32, #tpu.memory_space<vmem>>, %arg17: memref<8x128xf32, #tpu.memory_space<vmem>>, %arg18: memref<8x128xf32, #tpu.memory_space<vmem>>) attributes {dimension_semantics = [#tpu.dimension_semantics<arbitrary>], iteration_bounds = array<i64: 1>, scalar_prefetch = 0 : i64, scratch_operands = 6 : i64, tpu.core_type = #tpu.core_type<tc>, window_params = [{transform_indices = @transform_0, window_bounds = array<i64: 8, 8, 128>}, {transform_indices = @transform_1, window_bounds = array<i64: 8, 8, 128>}, {transform_indices = @transform_2, window_bounds = array<i64: 8, 8, 128>}, {transform_indices = @transform_3, window_bounds = array<i64: 8, 8, 128>}, {pipeline_mode = #tpu.pipeline_mode<synchronous>, transform_indices = @transform_4, window_bounds = array<i64: 2, 128, 512>}, {pipeline_mode = #tpu.pipeline_mode<synchronous>, transform_indices = @transform_5, window_bounds = array<i64: 2, 128, 512>}, {pipeline_mode = #tpu.pipeline_mode<synchronous>, transform_indices = @transform_6, window_bounds = array<i64: 2, 128, 512>}, {pipeline_mode = #tpu.pipeline_mode<synchronous>, transform_indices = @transform_7, window_bounds = array<i64: 2, 1, 512>}, {transform_indices = @transform_8, window_bounds = array<i64: 8, 8, 128>}, {transform_indices = @transform_9, window_bounds = array<i64: 8, 8, 128>}, {pipeline_mode = #tpu.pipeline_mode<synchronous>, transform_indices = @transform_10, window_bounds = array<i64: 2, 8, 128>}, {pipeline_mode = #tpu.pipeline_mode<synchronous>, transform_indices = @transform_11, window_bounds = array<i64: 2, 8, 128>}]} {
    %c0_i32 = arith.constant 0 : i32
    %0 = arith.cmpi eq, %arg0, %c0_i32 : i32
    %1 = arith.extui %0 : i1 to i32
    %c0_i32_0 = arith.constant 0 : i32
    %2 = arith.cmpi ne, %1, %c0_i32_0 : i32
    scf.if %2 {
      %cst_311 = arith.constant 0.000000e+00 : f32
      %660 = vector.broadcast %cst_311 : f32 to vector<8x128xf32>
      %c0_312 = arith.constant 0 : index
      %c0_313 = arith.constant 0 : index
      %661 = vector.load %arg15[%c0_312, %c0_313] : memref<8x128xf32, #tpu.memory_space<vmem>>, vector<8x128xf32>
      tpu.vector_store %arg15[%c0_312, %c0_313], %660 {strides = array<i32>} : memref<8x128xf32, #tpu.memory_space<vmem>>, vector<8x128xf32>,
      %cst_314 = arith.constant 0.000000e+00 : f32
      %662 = vector.broadcast %cst_314 : f32 to vector<8x128xf32>
      %c0_315 = arith.constant 0 : index
      %c0_316 = arith.constant 0 : index
      %663 = vector.load %arg16[%c0_315, %c0_316] : memref<8x128xf32, #tpu.memory_space<vmem>>, vector<8x128xf32>
      tpu.vector_store %arg16[%c0_315, %c0_316], %662 {strides = array<i32>} : memref<8x128xf32, #tpu.memory_space<vmem>>, vector<8x128xf32>,
      %cst_317 = arith.constant 0.000000e+00 : f32
      %664 = vector.broadcast %cst_317 : f32 to vector<8x128xf32>
      %c0_318 = arith.constant 0 : index
      %c0_319 = arith.constant 0 : index
      %665 = vector.load %arg17[%c0_318, %c0_319] : memref<8x128xf32, #tpu.memory_space<vmem>>, vector<8x128xf32>
      tpu.vector_store %arg17[%c0_318, %c0_319], %664 {strides = array<i32>} : memref<8x128xf32, #tpu.memory_space<vmem>>, vector<8x128xf32>,
      %cst_320 = arith.constant 0.000000e+00 : f32
      %666 = vector.broadcast %cst_320 : f32 to vector<8x128xf32>
      %c0_321 = arith.constant 0 : index
      %c0_322 = arith.constant 0 : index
      %667 = vector.load %arg18[%c0_321, %c0_322] : memref<8x128xf32, #tpu.memory_space<vmem>>, vector<8x128xf32>
      tpu.vector_store %arg18[%c0_321, %c0_322], %666 {strides = array<i32>} : memref<8x128xf32, #tpu.memory_space<vmem>>, vector<8x128xf32>,
    } else {
    }
    %c0 = arith.constant 0 : index
    %c0_1 = arith.constant 0 : index
    %c0_2 = arith.constant 0 : index
    %3 = vector.load %arg1[%c0, %c0_1, %c0_2] : memref<8x8x128xf32, #tpu.memory_space<vmem>>, vector<8x8x128xf32>
    %4 = vector.shape_cast %3 : vector<8x8x128xf32> to vector<64x128xf32>
    %c0_3 = arith.constant 0 : index
    %c0_4 = arith.constant 0 : index
    %c0_5 = arith.constant 0 : index
    %5 = vector.load %arg5[%c0_3, %c0_4, %c0_5] : memref<2x128x512xf32, #tpu.memory_space<vmem>>, vector<1x128x512xf32>
    %6 = vector.shape_cast %5 : vector<1x128x512xf32> to vector<128x512xf32>
    %cst = arith.constant dense<0.000000e+00> : vector<64x512xf32>
    %7 = tpu.matmul %4, %6, %cst {dimension_numbers = #tpu.dot_dimension_numbers<[1], [0], [0], [1], [0, 0, 1, 1], [], []>} : vector<64x128xf32>, vector<128x512xf32>, vector<64x512xf32> -> vector<64x512xf32>
    %c0_6 = arith.constant 0 : index
    %c0_7 = arith.constant 0 : index
    %c0_8 = arith.constant 0 : index
    %8 = vector.load %arg2[%c0_6, %c0_7, %c0_8] : memref<8x8x128xf32, #tpu.memory_space<vmem>>, vector<8x8x128xf32>
    %9 = vector.shape_cast %8 : vector<8x8x128xf32> to vector<64x128xf32>
    %c0_9 = arith.constant 0 : index
    %c0_10 = arith.constant 0 : index
    %c0_11 = arith.constant 0 : index
    %10 = vector.load %arg6[%c0_9, %c0_10, %c0_11] : memref<2x128x512xf32, #tpu.memory_space<vmem>>, vector<1x128x512xf32>
    %11 = vector.shape_cast %10 : vector<1x128x512xf32> to vector<128x512xf32>
    %cst_12 = arith.constant dense<0.000000e+00> : vector<64x512xf32>
    %12 = tpu.matmul %9, %11, %cst_12 {dimension_numbers = #tpu.dot_dimension_numbers<[1], [0], [0], [1], [0, 0, 1, 1], [], []>} : vector<64x128xf32>, vector<128x512xf32>, vector<64x512xf32> -> vector<64x512xf32>
    %13 = arith.addf %7, %12 : vector<64x512xf32>
    %c0_13 = arith.constant 0 : index
    %c0_14 = arith.constant 0 : index
    %c0_15 = arith.constant 0 : index
    %14 = vector.load %arg8[%c0_13, %c0_14, %c0_15] : memref<2x1x512xf32, #tpu.memory_space<vmem>>, vector<1x1x512xf32>
    %15 = vector.shape_cast %14 : vector<1x1x512xf32> to vector<1x512xf32>
    %16 = vector.broadcast %15 : vector<1x512xf32> to vector<64x512xf32>
    %17 = arith.addf %13, %16 : vector<64x512xf32>
    %18 = vector.shape_cast %17 : vector<64x512xf32> to vector<8x8x512xf32>
    %c0_16 = arith.constant 0 : index
    %c0_17 = arith.constant 0 : index
    %c0_18 = arith.constant 0 : index
    %19 = vector.load %arg13[%c0_16, %c0_17, %c0_18] : memref<8x8x512xf32, #tpu.memory_space<vmem>>, vector<8x8x512xf32>
    tpu.vector_store %arg13[%c0_16, %c0_17, %c0_18], %18 {strides = array<i32>} : memref<8x8x512xf32, #tpu.memory_space<vmem>>, vector<8x8x512xf32>,
    %c0_19 = arith.constant 0 : index
    %c0_20 = arith.constant 0 : index
    %c0_21 = arith.constant 0 : index
    %20 = vector.load %arg3[%c0_19, %c0_20, %c0_21] : memref<8x8x128xf32, #tpu.memory_space<vmem>>, vector<8x8x128xf32>
    %21 = vector.shape_cast %20 : vector<8x8x128xf32> to vector<64x128xf32>
    %c1 = arith.constant 1 : index
    %c0_22 = arith.constant 0 : index
    %c0_23 = arith.constant 0 : index
    %22 = vector.load %arg5[%c1, %c0_22, %c0_23] : memref<2x128x512xf32, #tpu.memory_space<vmem>>, vector<1x128x512xf32>
    %23 = vector.shape_cast %22 : vector<1x128x512xf32> to vector<128x512xf32>
    %cst_24 = arith.constant dense<0.000000e+00> : vector<64x512xf32>
    %24 = tpu.matmul %21, %23, %cst_24 {dimension_numbers = #tpu.dot_dimension_numbers<[1], [0], [0], [1], [0, 0, 1, 1], [], []>} : vector<64x128xf32>, vector<128x512xf32>, vector<64x512xf32> -> vector<64x512xf32>
    %c0_25 = arith.constant 0 : index
    %c0_26 = arith.constant 0 : index
    %c0_27 = arith.constant 0 : index
    %25 = vector.load %arg4[%c0_25, %c0_26, %c0_27] : memref<8x8x128xf32, #tpu.memory_space<vmem>>, vector<8x8x128xf32>
    %26 = vector.shape_cast %25 : vector<8x8x128xf32> to vector<64x128xf32>
    %c1_28 = arith.constant 1 : index
    %c0_29 = arith.constant 0 : index
    %c0_30 = arith.constant 0 : index
    %27 = vector.load %arg6[%c1_28, %c0_29, %c0_30] : memref<2x128x512xf32, #tpu.memory_space<vmem>>, vector<1x128x512xf32>
    %28 = vector.shape_cast %27 : vector<1x128x512xf32> to vector<128x512xf32>
    %cst_31 = arith.constant dense<0.000000e+00> : vector<64x512xf32>
    %29 = tpu.matmul %26, %28, %cst_31 {dimension_numbers = #tpu.dot_dimension_numbers<[1], [0], [0], [1], [0, 0, 1, 1], [], []>} : vector<64x128xf32>, vector<128x512xf32>, vector<64x512xf32> -> vector<64x512xf32>
    %30 = arith.addf %24, %29 : vector<64x512xf32>
    %c1_32 = arith.constant 1 : index
    %c0_33 = arith.constant 0 : index
    %c0_34 = arith.constant 0 : index
    %31 = vector.load %arg8[%c1_32, %c0_33, %c0_34] : memref<2x1x512xf32, #tpu.memory_space<vmem>>, vector<1x1x512xf32>
    %32 = vector.shape_cast %31 : vector<1x1x512xf32> to vector<1x512xf32>
    %33 = vector.broadcast %32 : vector<1x512xf32> to vector<64x512xf32>
    %34 = arith.addf %30, %33 : vector<64x512xf32>
    %35 = vector.shape_cast %34 : vector<64x512xf32> to vector<8x8x512xf32>
    %c0_35 = arith.constant 0 : index
    %c0_36 = arith.constant 0 : index
    %c0_37 = arith.constant 0 : index
    %36 = vector.load %arg14[%c0_35, %c0_36, %c0_37] : memref<8x8x512xf32, #tpu.memory_space<vmem>>, vector<8x8x512xf32>
    tpu.vector_store %arg14[%c0_35, %c0_36, %c0_37], %35 {strides = array<i32>} : memref<8x8x512xf32, #tpu.memory_space<vmem>>, vector<8x8x512xf32>,
    %c0_38 = arith.constant 0 : index
    %c0_39 = arith.constant 0 : index
    %c0_40 = arith.constant 0 : index
    %37 = vector.load %arg7[%c0_38, %c0_39, %c0_40] : memref<2x128x512xf32, #tpu.memory_space<vmem>>, vector<1x128x512xf32>
    %38 = vector.shape_cast %37 : vector<1x128x512xf32> to vector<128x512xf32>
    %c1_41 = arith.constant 1 : index
    %c0_42 = arith.constant 0 : index
    %c0_43 = arith.constant 0 : index
    %39 = vector.load %arg7[%c1_41, %c0_42, %c0_43] : memref<2x128x512xf32, #tpu.memory_space<vmem>>, vector<1x128x512xf32>
    %40 = vector.shape_cast %39 : vector<1x128x512xf32> to vector<128x512xf32>
    %c0_i32_44 = arith.constant 0 : i32
    %c7_i32 = arith.constant 7 : i32
    %41 = arith.subi %c7_i32, %c0_i32_44 : i32
    %c0_45 = arith.constant 0 : index
    %c0_46 = arith.constant 0 : index
    %42 = vector.load %arg15[%c0_45, %c0_46] : memref<8x128xf32, #tpu.memory_space<vmem>>, vector<8x128xf32>
    %c0_47 = arith.constant 0 : index
    %c0_48 = arith.constant 0 : index
    %43 = vector.load %arg16[%c0_47, %c0_48] : memref<8x128xf32, #tpu.memory_space<vmem>>, vector<8x128xf32>
    %c0_49 = arith.constant 0 : index
    %c0_50 = arith.constant 0 : index
    %44 = vector.load %arg17[%c0_49, %c0_50] : memref<8x128xf32, #tpu.memory_space<vmem>>, vector<8x128xf32>
    %c0_51 = arith.constant 0 : index
    %c0_52 = arith.constant 0 : index
    %45 = vector.load %arg18[%c0_51, %c0_52] : memref<8x128xf32, #tpu.memory_space<vmem>>, vector<8x128xf32>
    %46 = arith.index_cast %c0_i32_44 : i32 to index
    %c0_53 = arith.constant 0 : index
    %c0_54 = arith.constant 0 : index
    %47 = vector.load %arg13[%46, %c0_53, %c0_54] : memref<8x8x512xf32, #tpu.memory_space<vmem>>, vector<1x8x512xf32>
    %48 = vector.shape_cast %47 : vector<1x8x512xf32> to vector<8x512xf32>
    %cst_55 = arith.constant dense<0.000000e+00> : vector<8x512xf32>
    %49 = tpu.matmul %42, %38, %cst_55 {dimension_numbers = #tpu.dot_dimension_numbers<[1], [0], [0], [1], [0, 0, 1, 1], [], []>} : vector<8x128xf32>, vector<128x512xf32>, vector<8x512xf32> -> vector<8x512xf32>
    %50 = arith.addf %48, %49 : vector<8x512xf32>
    %51 = arith.index_cast %41 : i32 to index
    %c0_56 = arith.constant 0 : index
    %c0_57 = arith.constant 0 : index
    %52 = vector.load %arg14[%51, %c0_56, %c0_57] : memref<8x8x512xf32, #tpu.memory_space<vmem>>, vector<1x8x512xf32>
    %53 = vector.shape_cast %52 : vector<1x8x512xf32> to vector<8x512xf32>
    %cst_58 = arith.constant dense<0.000000e+00> : vector<8x512xf32>
    %54 = tpu.matmul %44, %40, %cst_58 {dimension_numbers = #tpu.dot_dimension_numbers<[1], [0], [0], [1], [0, 0, 1, 1], [], []>} : vector<8x128xf32>, vector<128x512xf32>, vector<8x512xf32> -> vector<8x512xf32>
    %55 = arith.addf %53, %54 : vector<8x512xf32>
    %56 = vector.extract_strided_slice %50 {offsets = [0, 0], sizes = [8, 128], strides = [1, 1]} : vector<8x512xf32> to vector<8x128xf32>
    %57 = arith.negf %56 : vector<8x128xf32>
    %58 = math.exp %57 : vector<8x128xf32>
    %cst_59 = arith.constant 1.000000e+00 : f32
    %59 = vector.broadcast %cst_59 : f32 to vector<8x128xf32>
    %60 = arith.addf %59, %58 : vector<8x128xf32>
    %61 = arith.divf %59, %60 : vector<8x128xf32>
    %62 = vector.extract_strided_slice %50 {offsets = [0, 128], sizes = [8, 128], strides = [1, 1]} : vector<8x512xf32> to vector<8x128xf32>
    %63 = arith.negf %62 : vector<8x128xf32>
    %64 = math.exp %63 : vector<8x128xf32>
    %cst_60 = arith.constant 1.000000e+00 : f32
    %65 = vector.broadcast %cst_60 : f32 to vector<8x128xf32>
    %66 = arith.addf %65, %64 : vector<8x128xf32>
    %67 = arith.divf %65, %66 : vector<8x128xf32>
    %68 = vector.extract_strided_slice %50 {offsets = [0, 256], sizes = [8, 128], strides = [1, 1]} : vector<8x512xf32> to vector<8x128xf32>
    %69 = math.tanh %68 : vector<8x128xf32>
    %70 = vector.extract_strided_slice %50 {offsets = [0, 384], sizes = [8, 128], strides = [1, 1]} : vector<8x512xf32> to vector<8x128xf32>
    %71 = arith.negf %70 : vector<8x128xf32>
    %72 = math.exp %71 : vector<8x128xf32>
    %cst_61 = arith.constant 1.000000e+00 : f32
    %73 = vector.broadcast %cst_61 : f32 to vector<8x128xf32>
    %74 = arith.addf %73, %72 : vector<8x128xf32>
    %75 = arith.divf %73, %74 : vector<8x128xf32>
    %76 = arith.mulf %67, %43 : vector<8x128xf32>
    %77 = arith.mulf %61, %69 : vector<8x128xf32>
    %78 = arith.addf %76, %77 : vector<8x128xf32>
    %79 = math.tanh %78 : vector<8x128xf32>
    %80 = arith.mulf %75, %79 : vector<8x128xf32>
    %81 = vector.extract_strided_slice %55 {offsets = [0, 0], sizes = [8, 128], strides = [1, 1]} : vector<8x512xf32> to vector<8x128xf32>
    %82 = arith.negf %81 : vector<8x128xf32>
    %83 = math.exp %82 : vector<8x128xf32>
    %cst_62 = arith.constant 1.000000e+00 : f32
    %84 = vector.broadcast %cst_62 : f32 to vector<8x128xf32>
    %85 = arith.addf %84, %83 : vector<8x128xf32>
    %86 = arith.divf %84, %85 : vector<8x128xf32>
    %87 = vector.extract_strided_slice %55 {offsets = [0, 128], sizes = [8, 128], strides = [1, 1]} : vector<8x512xf32> to vector<8x128xf32>
    %88 = arith.negf %87 : vector<8x128xf32>
    %89 = math.exp %88 : vector<8x128xf32>
    %cst_63 = arith.constant 1.000000e+00 : f32
    %90 = vector.broadcast %cst_63 : f32 to vector<8x128xf32>
    %91 = arith.addf %90, %89 : vector<8x128xf32>
    %92 = arith.divf %90, %91 : vector<8x128xf32>
    %93 = vector.extract_strided_slice %55 {offsets = [0, 256], sizes = [8, 128], strides = [1, 1]} : vector<8x512xf32> to vector<8x128xf32>
    %94 = math.tanh %93 : vector<8x128xf32>
    %95 = vector.extract_strided_slice %55 {offsets = [0, 384], sizes = [8, 128], strides = [1, 1]} : vector<8x512xf32> to vector<8x128xf32>
    %96 = arith.negf %95 : vector<8x128xf32>
    %97 = math.exp %96 : vector<8x128xf32>
    %cst_64 = arith.constant 1.000000e+00 : f32
    %98 = vector.broadcast %cst_64 : f32 to vector<8x128xf32>
    %99 = arith.addf %98, %97 : vector<8x128xf32>
    %100 = arith.divf %98, %99 : vector<8x128xf32>
    %101 = arith.mulf %92, %45 : vector<8x128xf32>
    %102 = arith.mulf %86, %94 : vector<8x128xf32>
    %103 = arith.addf %101, %102 : vector<8x128xf32>
    %104 = math.tanh %103 : vector<8x128xf32>
    %105 = arith.mulf %100, %104 : vector<8x128xf32>
    %c0_65 = arith.constant 0 : index
    %c0_66 = arith.constant 0 : index
    %106 = vector.load %arg15[%c0_65, %c0_66] : memref<8x128xf32, #tpu.memory_space<vmem>>, vector<8x128xf32>
    tpu.vector_store %arg15[%c0_65, %c0_66], %80 {strides = array<i32>} : memref<8x128xf32, #tpu.memory_space<vmem>>, vector<8x128xf32>,
    %c0_67 = arith.constant 0 : index
    %c0_68 = arith.constant 0 : index
    %107 = vector.load %arg16[%c0_67, %c0_68] : memref<8x128xf32, #tpu.memory_space<vmem>>, vector<8x128xf32>
    tpu.vector_store %arg16[%c0_67, %c0_68], %78 {strides = array<i32>} : memref<8x128xf32, #tpu.memory_space<vmem>>, vector<8x128xf32>,
    %c0_69 = arith.constant 0 : index
    %c0_70 = arith.constant 0 : index
    %108 = vector.load %arg17[%c0_69, %c0_70] : memref<8x128xf32, #tpu.memory_space<vmem>>, vector<8x128xf32>
    tpu.vector_store %arg17[%c0_69, %c0_70], %105 {strides = array<i32>} : memref<8x128xf32, #tpu.memory_space<vmem>>, vector<8x128xf32>,
    %c0_71 = arith.constant 0 : index
    %c0_72 = arith.constant 0 : index
    %109 = vector.load %arg18[%c0_71, %c0_72] : memref<8x128xf32, #tpu.memory_space<vmem>>, vector<8x128xf32>
    tpu.vector_store %arg18[%c0_71, %c0_72], %103 {strides = array<i32>} : memref<8x128xf32, #tpu.memory_space<vmem>>, vector<8x128xf32>,
    %110 = arith.index_cast %c0_i32_44 : i32 to index
    %c0_73 = arith.constant 0 : index
    %c0_74 = arith.constant 0 : index
    %111 = vector.load %arg9[%110, %c0_73, %c0_74] : memref<8x8x128xf32, #tpu.memory_space<vmem>>, vector<1x8x128xf32>
    %112 = vector.shape_cast %111 : vector<1x8x128xf32> to vector<8x128xf32>
    %113 = vector.shape_cast %80 : vector<8x128xf32> to vector<1x8x128xf32>
    tpu.vector_store %arg9[%110, %c0_73, %c0_74], %113 {strides = array<i32>} : memref<8x8x128xf32, #tpu.memory_space<vmem>>, vector<1x8x128xf32>,
    %114 = arith.index_cast %41 : i32 to index
    %c0_75 = arith.constant 0 : index
    %c0_76 = arith.constant 0 : index
    %115 = vector.load %arg10[%114, %c0_75, %c0_76] : memref<8x8x128xf32, #tpu.memory_space<vmem>>, vector<1x8x128xf32>
    %116 = vector.shape_cast %115 : vector<1x8x128xf32> to vector<8x128xf32>
    %117 = vector.shape_cast %105 : vector<8x128xf32> to vector<1x8x128xf32>
    tpu.vector_store %arg10[%114, %c0_75, %c0_76], %117 {strides = array<i32>} : memref<8x8x128xf32, #tpu.memory_space<vmem>>, vector<1x8x128xf32>,
    %c1_i32 = arith.constant 1 : i32
    %c7_i32_77 = arith.constant 7 : i32
    %118 = arith.subi %c7_i32_77, %c1_i32 : i32
    %c0_78 = arith.constant 0 : index
    %c0_79 = arith.constant 0 : index
    %119 = vector.load %arg15[%c0_78, %c0_79] : memref<8x128xf32, #tpu.memory_space<vmem>>, vector<8x128xf32>
    %c0_80 = arith.constant 0 : index
    %c0_81 = arith.constant 0 : index
    %120 = vector.load %arg16[%c0_80, %c0_81] : memref<8x128xf32, #tpu.memory_space<vmem>>, vector<8x128xf32>
    %c0_82 = arith.constant 0 : index
    %c0_83 = arith.constant 0 : index
    %121 = vector.load %arg17[%c0_82, %c0_83] : memref<8x128xf32, #tpu.memory_space<vmem>>, vector<8x128xf32>
    %c0_84 = arith.constant 0 : index
    %c0_85 = arith.constant 0 : index
    %122 = vector.load %arg18[%c0_84, %c0_85] : memref<8x128xf32, #tpu.memory_space<vmem>>, vector<8x128xf32>
    %123 = arith.index_cast %c1_i32 : i32 to index
    %c0_86 = arith.constant 0 : index
    %c0_87 = arith.constant 0 : index
    %124 = vector.load %arg13[%123, %c0_86, %c0_87] : memref<8x8x512xf32, #tpu.memory_space<vmem>>, vector<1x8x512xf32>
    %125 = vector.shape_cast %124 : vector<1x8x512xf32> to vector<8x512xf32>
    %cst_88 = arith.constant dense<0.000000e+00> : vector<8x512xf32>
    %126 = tpu.matmul %119, %38, %cst_88 {dimension_numbers = #tpu.dot_dimension_numbers<[1], [0], [0], [1], [0, 0, 1, 1], [], []>} : vector<8x128xf32>, vector<128x512xf32>, vector<8x512xf32> -> vector<8x512xf32>
    %127 = arith.addf %125, %126 : vector<8x512xf32>
    %128 = arith.index_cast %118 : i32 to index
    %c0_89 = arith.constant 0 : index
    %c0_90 = arith.constant 0 : index
    %129 = vector.load %arg14[%128, %c0_89, %c0_90] : memref<8x8x512xf32, #tpu.memory_space<vmem>>, vector<1x8x512xf32>
    %130 = vector.shape_cast %129 : vector<1x8x512xf32> to vector<8x512xf32>
    %cst_91 = arith.constant dense<0.000000e+00> : vector<8x512xf32>
    %131 = tpu.matmul %121, %40, %cst_91 {dimension_numbers = #tpu.dot_dimension_numbers<[1], [0], [0], [1], [0, 0, 1, 1], [], []>} : vector<8x128xf32>, vector<128x512xf32>, vector<8x512xf32> -> vector<8x512xf32>
    %132 = arith.addf %130, %131 : vector<8x512xf32>
    %133 = vector.extract_strided_slice %127 {offsets = [0, 0], sizes = [8, 128], strides = [1, 1]} : vector<8x512xf32> to vector<8x128xf32>
    %134 = arith.negf %133 : vector<8x128xf32>
    %135 = math.exp %134 : vector<8x128xf32>
    %cst_92 = arith.constant 1.000000e+00 : f32
    %136 = vector.broadcast %cst_92 : f32 to vector<8x128xf32>
    %137 = arith.addf %136, %135 : vector<8x128xf32>
    %138 = arith.divf %136, %137 : vector<8x128xf32>
    %139 = vector.extract_strided_slice %127 {offsets = [0, 128], sizes = [8, 128], strides = [1, 1]} : vector<8x512xf32> to vector<8x128xf32>
    %140 = arith.negf %139 : vector<8x128xf32>
    %141 = math.exp %140 : vector<8x128xf32>
    %cst_93 = arith.constant 1.000000e+00 : f32
    %142 = vector.broadcast %cst_93 : f32 to vector<8x128xf32>
    %143 = arith.addf %142, %141 : vector<8x128xf32>
    %144 = arith.divf %142, %143 : vector<8x128xf32>
    %145 = vector.extract_strided_slice %127 {offsets = [0, 256], sizes = [8, 128], strides = [1, 1]} : vector<8x512xf32> to vector<8x128xf32>
    %146 = math.tanh %145 : vector<8x128xf32>
    %147 = vector.extract_strided_slice %127 {offsets = [0, 384], sizes = [8, 128], strides = [1, 1]} : vector<8x512xf32> to vector<8x128xf32>
    %148 = arith.negf %147 : vector<8x128xf32>
    %149 = math.exp %148 : vector<8x128xf32>
    %cst_94 = arith.constant 1.000000e+00 : f32
    %150 = vector.broadcast %cst_94 : f32 to vector<8x128xf32>
    %151 = arith.addf %150, %149 : vector<8x128xf32>
    %152 = arith.divf %150, %151 : vector<8x128xf32>
    %153 = arith.mulf %144, %120 : vector<8x128xf32>
    %154 = arith.mulf %138, %146 : vector<8x128xf32>
    %155 = arith.addf %153, %154 : vector<8x128xf32>
    %156 = math.tanh %155 : vector<8x128xf32>
    %157 = arith.mulf %152, %156 : vector<8x128xf32>
    %158 = vector.extract_strided_slice %132 {offsets = [0, 0], sizes = [8, 128], strides = [1, 1]} : vector<8x512xf32> to vector<8x128xf32>
    %159 = arith.negf %158 : vector<8x128xf32>
    %160 = math.exp %159 : vector<8x128xf32>
    %cst_95 = arith.constant 1.000000e+00 : f32
    %161 = vector.broadcast %cst_95 : f32 to vector<8x128xf32>
    %162 = arith.addf %161, %160 : vector<8x128xf32>
    %163 = arith.divf %161, %162 : vector<8x128xf32>
    %164 = vector.extract_strided_slice %132 {offsets = [0, 128], sizes = [8, 128], strides = [1, 1]} : vector<8x512xf32> to vector<8x128xf32>
    %165 = arith.negf %164 : vector<8x128xf32>
    %166 = math.exp %165 : vector<8x128xf32>
    %cst_96 = arith.constant 1.000000e+00 : f32
    %167 = vector.broadcast %cst_96 : f32 to vector<8x128xf32>
    %168 = arith.addf %167, %166 : vector<8x128xf32>
    %169 = arith.divf %167, %168 : vector<8x128xf32>
    %170 = vector.extract_strided_slice %132 {offsets = [0, 256], sizes = [8, 128], strides = [1, 1]} : vector<8x512xf32> to vector<8x128xf32>
    %171 = math.tanh %170 : vector<8x128xf32>
    %172 = vector.extract_strided_slice %132 {offsets = [0, 384], sizes = [8, 128], strides = [1, 1]} : vector<8x512xf32> to vector<8x128xf32>
    %173 = arith.negf %172 : vector<8x128xf32>
    %174 = math.exp %173 : vector<8x128xf32>
    %cst_97 = arith.constant 1.000000e+00 : f32
    %175 = vector.broadcast %cst_97 : f32 to vector<8x128xf32>
    %176 = arith.addf %175, %174 : vector<8x128xf32>
    %177 = arith.divf %175, %176 : vector<8x128xf32>
    %178 = arith.mulf %169, %122 : vector<8x128xf32>
    %179 = arith.mulf %163, %171 : vector<8x128xf32>
    %180 = arith.addf %178, %179 : vector<8x128xf32>
    %181 = math.tanh %180 : vector<8x128xf32>
    %182 = arith.mulf %177, %181 : vector<8x128xf32>
    %c0_98 = arith.constant 0 : index
    %c0_99 = arith.constant 0 : index
    %183 = vector.load %arg15[%c0_98, %c0_99] : memref<8x128xf32, #tpu.memory_space<vmem>>, vector<8x128xf32>
    tpu.vector_store %arg15[%c0_98, %c0_99], %157 {strides = array<i32>} : memref<8x128xf32, #tpu.memory_space<vmem>>, vector<8x128xf32>,
    %c0_100 = arith.constant 0 : index
    %c0_101 = arith.constant 0 : index
    %184 = vector.load %arg16[%c0_100, %c0_101] : memref<8x128xf32, #tpu.memory_space<vmem>>, vector<8x128xf32>
    tpu.vector_store %arg16[%c0_100, %c0_101], %155 {strides = array<i32>} : memref<8x128xf32, #tpu.memory_space<vmem>>, vector<8x128xf32>,
    %c0_102 = arith.constant 0 : index
    %c0_103 = arith.constant 0 : index
    %185 = vector.load %arg17[%c0_102, %c0_103] : memref<8x128xf32, #tpu.memory_space<vmem>>, vector<8x128xf32>
    tpu.vector_store %arg17[%c0_102, %c0_103], %182 {strides = array<i32>} : memref<8x128xf32, #tpu.memory_space<vmem>>, vector<8x128xf32>,
    %c0_104 = arith.constant 0 : index
    %c0_105 = arith.constant 0 : index
    %186 = vector.load %arg18[%c0_104, %c0_105] : memref<8x128xf32, #tpu.memory_space<vmem>>, vector<8x128xf32>
    tpu.vector_store %arg18[%c0_104, %c0_105], %180 {strides = array<i32>} : memref<8x128xf32, #tpu.memory_space<vmem>>, vector<8x128xf32>,
    %187 = arith.index_cast %c1_i32 : i32 to index
    %c0_106 = arith.constant 0 : index
    %c0_107 = arith.constant 0 : index
    %188 = vector.load %arg9[%187, %c0_106, %c0_107] : memref<8x8x128xf32, #tpu.memory_space<vmem>>, vector<1x8x128xf32>
    %189 = vector.shape_cast %188 : vector<1x8x128xf32> to vector<8x128xf32>
    %190 = vector.shape_cast %157 : vector<8x128xf32> to vector<1x8x128xf32>
    tpu.vector_store %arg9[%187, %c0_106, %c0_107], %190 {strides = array<i32>} : memref<8x8x128xf32, #tpu.memory_space<vmem>>, vector<1x8x128xf32>,
    %191 = arith.index_cast %118 : i32 to index
    %c0_108 = arith.constant 0 : index
    %c0_109 = arith.constant 0 : index
    %192 = vector.load %arg10[%191, %c0_108, %c0_109] : memref<8x8x128xf32, #tpu.memory_space<vmem>>, vector<1x8x128xf32>
    %193 = vector.shape_cast %192 : vector<1x8x128xf32> to vector<8x128xf32>
    %194 = vector.shape_cast %182 : vector<8x128xf32> to vector<1x8x128xf32>
    tpu.vector_store %arg10[%191, %c0_108, %c0_109], %194 {strides = array<i32>} : memref<8x8x128xf32, #tpu.memory_space<vmem>>, vector<1x8x128xf32>,
    %c2_i32 = arith.constant 2 : i32
    %c7_i32_110 = arith.constant 7 : i32
    %195 = arith.subi %c7_i32_110, %c2_i32 : i32
    %c0_111 = arith.constant 0 : index
    %c0_112 = arith.constant 0 : index
    %196 = vector.load %arg15[%c0_111, %c0_112] : memref<8x128xf32, #tpu.memory_space<vmem>>, vector<8x128xf32>
    %c0_113 = arith.constant 0 : index
    %c0_114 = arith.constant 0 : index
    %197 = vector.load %arg16[%c0_113, %c0_114] : memref<8x128xf32, #tpu.memory_space<vmem>>, vector<8x128xf32>
    %c0_115 = arith.constant 0 : index
    %c0_116 = arith.constant 0 : index
    %198 = vector.load %arg17[%c0_115, %c0_116] : memref<8x128xf32, #tpu.memory_space<vmem>>, vector<8x128xf32>
    %c0_117 = arith.constant 0 : index
    %c0_118 = arith.constant 0 : index
    %199 = vector.load %arg18[%c0_117, %c0_118] : memref<8x128xf32, #tpu.memory_space<vmem>>, vector<8x128xf32>
    %200 = arith.index_cast %c2_i32 : i32 to index
    %c0_119 = arith.constant 0 : index
    %c0_120 = arith.constant 0 : index
    %201 = vector.load %arg13[%200, %c0_119, %c0_120] : memref<8x8x512xf32, #tpu.memory_space<vmem>>, vector<1x8x512xf32>
    %202 = vector.shape_cast %201 : vector<1x8x512xf32> to vector<8x512xf32>
    %cst_121 = arith.constant dense<0.000000e+00> : vector<8x512xf32>
    %203 = tpu.matmul %196, %38, %cst_121 {dimension_numbers = #tpu.dot_dimension_numbers<[1], [0], [0], [1], [0, 0, 1, 1], [], []>} : vector<8x128xf32>, vector<128x512xf32>, vector<8x512xf32> -> vector<8x512xf32>
    %204 = arith.addf %202, %203 : vector<8x512xf32>
    %205 = arith.index_cast %195 : i32 to index
    %c0_122 = arith.constant 0 : index
    %c0_123 = arith.constant 0 : index
    %206 = vector.load %arg14[%205, %c0_122, %c0_123] : memref<8x8x512xf32, #tpu.memory_space<vmem>>, vector<1x8x512xf32>
    %207 = vector.shape_cast %206 : vector<1x8x512xf32> to vector<8x512xf32>
    %cst_124 = arith.constant dense<0.000000e+00> : vector<8x512xf32>
    %208 = tpu.matmul %198, %40, %cst_124 {dimension_numbers = #tpu.dot_dimension_numbers<[1], [0], [0], [1], [0, 0, 1, 1], [], []>} : vector<8x128xf32>, vector<128x512xf32>, vector<8x512xf32> -> vector<8x512xf32>
    %209 = arith.addf %207, %208 : vector<8x512xf32>
    %210 = vector.extract_strided_slice %204 {offsets = [0, 0], sizes = [8, 128], strides = [1, 1]} : vector<8x512xf32> to vector<8x128xf32>
    %211 = arith.negf %210 : vector<8x128xf32>
    %212 = math.exp %211 : vector<8x128xf32>
    %cst_125 = arith.constant 1.000000e+00 : f32
    %213 = vector.broadcast %cst_125 : f32 to vector<8x128xf32>
    %214 = arith.addf %213, %212 : vector<8x128xf32>
    %215 = arith.divf %213, %214 : vector<8x128xf32>
    %216 = vector.extract_strided_slice %204 {offsets = [0, 128], sizes = [8, 128], strides = [1, 1]} : vector<8x512xf32> to vector<8x128xf32>
    %217 = arith.negf %216 : vector<8x128xf32>
    %218 = math.exp %217 : vector<8x128xf32>
    %cst_126 = arith.constant 1.000000e+00 : f32
    %219 = vector.broadcast %cst_126 : f32 to vector<8x128xf32>
    %220 = arith.addf %219, %218 : vector<8x128xf32>
    %221 = arith.divf %219, %220 : vector<8x128xf32>
    %222 = vector.extract_strided_slice %204 {offsets = [0, 256], sizes = [8, 128], strides = [1, 1]} : vector<8x512xf32> to vector<8x128xf32>
    %223 = math.tanh %222 : vector<8x128xf32>
    %224 = vector.extract_strided_slice %204 {offsets = [0, 384], sizes = [8, 128], strides = [1, 1]} : vector<8x512xf32> to vector<8x128xf32>
    %225 = arith.negf %224 : vector<8x128xf32>
    %226 = math.exp %225 : vector<8x128xf32>
    %cst_127 = arith.constant 1.000000e+00 : f32
    %227 = vector.broadcast %cst_127 : f32 to vector<8x128xf32>
    %228 = arith.addf %227, %226 : vector<8x128xf32>
    %229 = arith.divf %227, %228 : vector<8x128xf32>
    %230 = arith.mulf %221, %197 : vector<8x128xf32>
    %231 = arith.mulf %215, %223 : vector<8x128xf32>
    %232 = arith.addf %230, %231 : vector<8x128xf32>
    %233 = math.tanh %232 : vector<8x128xf32>
    %234 = arith.mulf %229, %233 : vector<8x128xf32>
    %235 = vector.extract_strided_slice %209 {offsets = [0, 0], sizes = [8, 128], strides = [1, 1]} : vector<8x512xf32> to vector<8x128xf32>
    %236 = arith.negf %235 : vector<8x128xf32>
    %237 = math.exp %236 : vector<8x128xf32>
    %cst_128 = arith.constant 1.000000e+00 : f32
    %238 = vector.broadcast %cst_128 : f32 to vector<8x128xf32>
    %239 = arith.addf %238, %237 : vector<8x128xf32>
    %240 = arith.divf %238, %239 : vector<8x128xf32>
    %241 = vector.extract_strided_slice %209 {offsets = [0, 128], sizes = [8, 128], strides = [1, 1]} : vector<8x512xf32> to vector<8x128xf32>
    %242 = arith.negf %241 : vector<8x128xf32>
    %243 = math.exp %242 : vector<8x128xf32>
    %cst_129 = arith.constant 1.000000e+00 : f32
    %244 = vector.broadcast %cst_129 : f32 to vector<8x128xf32>
    %245 = arith.addf %244, %243 : vector<8x128xf32>
    %246 = arith.divf %244, %245 : vector<8x128xf32>
    %247 = vector.extract_strided_slice %209 {offsets = [0, 256], sizes = [8, 128], strides = [1, 1]} : vector<8x512xf32> to vector<8x128xf32>
    %248 = math.tanh %247 : vector<8x128xf32>
    %249 = vector.extract_strided_slice %209 {offsets = [0, 384], sizes = [8, 128], strides = [1, 1]} : vector<8x512xf32> to vector<8x128xf32>
    %250 = arith.negf %249 : vector<8x128xf32>
    %251 = math.exp %250 : vector<8x128xf32>
    %cst_130 = arith.constant 1.000000e+00 : f32
    %252 = vector.broadcast %cst_130 : f32 to vector<8x128xf32>
    %253 = arith.addf %252, %251 : vector<8x128xf32>
    %254 = arith.divf %252, %253 : vector<8x128xf32>
    %255 = arith.mulf %246, %199 : vector<8x128xf32>
    %256 = arith.mulf %240, %248 : vector<8x128xf32>
    %257 = arith.addf %255, %256 : vector<8x128xf32>
    %258 = math.tanh %257 : vector<8x128xf32>
    %259 = arith.mulf %254, %258 : vector<8x128xf32>
    %c0_131 = arith.constant 0 : index
    %c0_132 = arith.constant 0 : index
    %260 = vector.load %arg15[%c0_131, %c0_132] : memref<8x128xf32, #tpu.memory_space<vmem>>, vector<8x128xf32>
    tpu.vector_store %arg15[%c0_131, %c0_132], %234 {strides = array<i32>} : memref<8x128xf32, #tpu.memory_space<vmem>>, vector<8x128xf32>,
    %c0_133 = arith.constant 0 : index
    %c0_134 = arith.constant 0 : index
    %261 = vector.load %arg16[%c0_133, %c0_134] : memref<8x128xf32, #tpu.memory_space<vmem>>, vector<8x128xf32>
    tpu.vector_store %arg16[%c0_133, %c0_134], %232 {strides = array<i32>} : memref<8x128xf32, #tpu.memory_space<vmem>>, vector<8x128xf32>,
    %c0_135 = arith.constant 0 : index
    %c0_136 = arith.constant 0 : index
    %262 = vector.load %arg17[%c0_135, %c0_136] : memref<8x128xf32, #tpu.memory_space<vmem>>, vector<8x128xf32>
    tpu.vector_store %arg17[%c0_135, %c0_136], %259 {strides = array<i32>} : memref<8x128xf32, #tpu.memory_space<vmem>>, vector<8x128xf32>,
    %c0_137 = arith.constant 0 : index
    %c0_138 = arith.constant 0 : index
    %263 = vector.load %arg18[%c0_137, %c0_138] : memref<8x128xf32, #tpu.memory_space<vmem>>, vector<8x128xf32>
    tpu.vector_store %arg18[%c0_137, %c0_138], %257 {strides = array<i32>} : memref<8x128xf32, #tpu.memory_space<vmem>>, vector<8x128xf32>,
    %264 = arith.index_cast %c2_i32 : i32 to index
    %c0_139 = arith.constant 0 : index
    %c0_140 = arith.constant 0 : index
    %265 = vector.load %arg9[%264, %c0_139, %c0_140] : memref<8x8x128xf32, #tpu.memory_space<vmem>>, vector<1x8x128xf32>
    %266 = vector.shape_cast %265 : vector<1x8x128xf32> to vector<8x128xf32>
    %267 = vector.shape_cast %234 : vector<8x128xf32> to vector<1x8x128xf32>
    tpu.vector_store %arg9[%264, %c0_139, %c0_140], %267 {strides = array<i32>} : memref<8x8x128xf32, #tpu.memory_space<vmem>>, vector<1x8x128xf32>,
    %268 = arith.index_cast %195 : i32 to index
    %c0_141 = arith.constant 0 : index
    %c0_142 = arith.constant 0 : index
    %269 = vector.load %arg10[%268, %c0_141, %c0_142] : memref<8x8x128xf32, #tpu.memory_space<vmem>>, vector<1x8x128xf32>
    %270 = vector.shape_cast %269 : vector<1x8x128xf32> to vector<8x128xf32>
    %271 = vector.shape_cast %259 : vector<8x128xf32> to vector<1x8x128xf32>
    tpu.vector_store %arg10[%268, %c0_141, %c0_142], %271 {strides = array<i32>} : memref<8x8x128xf32, #tpu.memory_space<vmem>>, vector<1x8x128xf32>,
    %c3_i32 = arith.constant 3 : i32
    %c7_i32_143 = arith.constant 7 : i32
    %272 = arith.subi %c7_i32_143, %c3_i32 : i32
    %c0_144 = arith.constant 0 : index
    %c0_145 = arith.constant 0 : index
    %273 = vector.load %arg15[%c0_144, %c0_145] : memref<8x128xf32, #tpu.memory_space<vmem>>, vector<8x128xf32>
    %c0_146 = arith.constant 0 : index
    %c0_147 = arith.constant 0 : index
    %274 = vector.load %arg16[%c0_146, %c0_147] : memref<8x128xf32, #tpu.memory_space<vmem>>, vector<8x128xf32>
    %c0_148 = arith.constant 0 : index
    %c0_149 = arith.constant 0 : index
    %275 = vector.load %arg17[%c0_148, %c0_149] : memref<8x128xf32, #tpu.memory_space<vmem>>, vector<8x128xf32>
    %c0_150 = arith.constant 0 : index
    %c0_151 = arith.constant 0 : index
    %276 = vector.load %arg18[%c0_150, %c0_151] : memref<8x128xf32, #tpu.memory_space<vmem>>, vector<8x128xf32>
    %277 = arith.index_cast %c3_i32 : i32 to index
    %c0_152 = arith.constant 0 : index
    %c0_153 = arith.constant 0 : index
    %278 = vector.load %arg13[%277, %c0_152, %c0_153] : memref<8x8x512xf32, #tpu.memory_space<vmem>>, vector<1x8x512xf32>
    %279 = vector.shape_cast %278 : vector<1x8x512xf32> to vector<8x512xf32>
    %cst_154 = arith.constant dense<0.000000e+00> : vector<8x512xf32>
    %280 = tpu.matmul %273, %38, %cst_154 {dimension_numbers = #tpu.dot_dimension_numbers<[1], [0], [0], [1], [0, 0, 1, 1], [], []>} : vector<8x128xf32>, vector<128x512xf32>, vector<8x512xf32> -> vector<8x512xf32>
    %281 = arith.addf %279, %280 : vector<8x512xf32>
    %282 = arith.index_cast %272 : i32 to index
    %c0_155 = arith.constant 0 : index
    %c0_156 = arith.constant 0 : index
    %283 = vector.load %arg14[%282, %c0_155, %c0_156] : memref<8x8x512xf32, #tpu.memory_space<vmem>>, vector<1x8x512xf32>
    %284 = vector.shape_cast %283 : vector<1x8x512xf32> to vector<8x512xf32>
    %cst_157 = arith.constant dense<0.000000e+00> : vector<8x512xf32>
    %285 = tpu.matmul %275, %40, %cst_157 {dimension_numbers = #tpu.dot_dimension_numbers<[1], [0], [0], [1], [0, 0, 1, 1], [], []>} : vector<8x128xf32>, vector<128x512xf32>, vector<8x512xf32> -> vector<8x512xf32>
    %286 = arith.addf %284, %285 : vector<8x512xf32>
    %287 = vector.extract_strided_slice %281 {offsets = [0, 0], sizes = [8, 128], strides = [1, 1]} : vector<8x512xf32> to vector<8x128xf32>
    %288 = arith.negf %287 : vector<8x128xf32>
    %289 = math.exp %288 : vector<8x128xf32>
    %cst_158 = arith.constant 1.000000e+00 : f32
    %290 = vector.broadcast %cst_158 : f32 to vector<8x128xf32>
    %291 = arith.addf %290, %289 : vector<8x128xf32>
    %292 = arith.divf %290, %291 : vector<8x128xf32>
    %293 = vector.extract_strided_slice %281 {offsets = [0, 128], sizes = [8, 128], strides = [1, 1]} : vector<8x512xf32> to vector<8x128xf32>
    %294 = arith.negf %293 : vector<8x128xf32>
    %295 = math.exp %294 : vector<8x128xf32>
    %cst_159 = arith.constant 1.000000e+00 : f32
    %296 = vector.broadcast %cst_159 : f32 to vector<8x128xf32>
    %297 = arith.addf %296, %295 : vector<8x128xf32>
    %298 = arith.divf %296, %297 : vector<8x128xf32>
    %299 = vector.extract_strided_slice %281 {offsets = [0, 256], sizes = [8, 128], strides = [1, 1]} : vector<8x512xf32> to vector<8x128xf32>
    %300 = math.tanh %299 : vector<8x128xf32>
    %301 = vector.extract_strided_slice %281 {offsets = [0, 384], sizes = [8, 128], strides = [1, 1]} : vector<8x512xf32> to vector<8x128xf32>
    %302 = arith.negf %301 : vector<8x128xf32>
    %303 = math.exp %302 : vector<8x128xf32>
    %cst_160 = arith.constant 1.000000e+00 : f32
    %304 = vector.broadcast %cst_160 : f32 to vector<8x128xf32>
    %305 = arith.addf %304, %303 : vector<8x128xf32>
    %306 = arith.divf %304, %305 : vector<8x128xf32>
    %307 = arith.mulf %298, %274 : vector<8x128xf32>
    %308 = arith.mulf %292, %300 : vector<8x128xf32>
    %309 = arith.addf %307, %308 : vector<8x128xf32>
    %310 = math.tanh %309 : vector<8x128xf32>
    %311 = arith.mulf %306, %310 : vector<8x128xf32>
    %312 = vector.extract_strided_slice %286 {offsets = [0, 0], sizes = [8, 128], strides = [1, 1]} : vector<8x512xf32> to vector<8x128xf32>
    %313 = arith.negf %312 : vector<8x128xf32>
    %314 = math.exp %313 : vector<8x128xf32>
    %cst_161 = arith.constant 1.000000e+00 : f32
    %315 = vector.broadcast %cst_161 : f32 to vector<8x128xf32>
    %316 = arith.addf %315, %314 : vector<8x128xf32>
    %317 = arith.divf %315, %316 : vector<8x128xf32>
    %318 = vector.extract_strided_slice %286 {offsets = [0, 128], sizes = [8, 128], strides = [1, 1]} : vector<8x512xf32> to vector<8x128xf32>
    %319 = arith.negf %318 : vector<8x128xf32>
    %320 = math.exp %319 : vector<8x128xf32>
    %cst_162 = arith.constant 1.000000e+00 : f32
    %321 = vector.broadcast %cst_162 : f32 to vector<8x128xf32>
    %322 = arith.addf %321, %320 : vector<8x128xf32>
    %323 = arith.divf %321, %322 : vector<8x128xf32>
    %324 = vector.extract_strided_slice %286 {offsets = [0, 256], sizes = [8, 128], strides = [1, 1]} : vector<8x512xf32> to vector<8x128xf32>
    %325 = math.tanh %324 : vector<8x128xf32>
    %326 = vector.extract_strided_slice %286 {offsets = [0, 384], sizes = [8, 128], strides = [1, 1]} : vector<8x512xf32> to vector<8x128xf32>
    %327 = arith.negf %326 : vector<8x128xf32>
    %328 = math.exp %327 : vector<8x128xf32>
    %cst_163 = arith.constant 1.000000e+00 : f32
    %329 = vector.broadcast %cst_163 : f32 to vector<8x128xf32>
    %330 = arith.addf %329, %328 : vector<8x128xf32>
    %331 = arith.divf %329, %330 : vector<8x128xf32>
    %332 = arith.mulf %323, %276 : vector<8x128xf32>
    %333 = arith.mulf %317, %325 : vector<8x128xf32>
    %334 = arith.addf %332, %333 : vector<8x128xf32>
    %335 = math.tanh %334 : vector<8x128xf32>
    %336 = arith.mulf %331, %335 : vector<8x128xf32>
    %c0_164 = arith.constant 0 : index
    %c0_165 = arith.constant 0 : index
    %337 = vector.load %arg15[%c0_164, %c0_165] : memref<8x128xf32, #tpu.memory_space<vmem>>, vector<8x128xf32>
    tpu.vector_store %arg15[%c0_164, %c0_165], %311 {strides = array<i32>} : memref<8x128xf32, #tpu.memory_space<vmem>>, vector<8x128xf32>,
    %c0_166 = arith.constant 0 : index
    %c0_167 = arith.constant 0 : index
    %338 = vector.load %arg16[%c0_166, %c0_167] : memref<8x128xf32, #tpu.memory_space<vmem>>, vector<8x128xf32>
    tpu.vector_store %arg16[%c0_166, %c0_167], %309 {strides = array<i32>} : memref<8x128xf32, #tpu.memory_space<vmem>>, vector<8x128xf32>,
    %c0_168 = arith.constant 0 : index
    %c0_169 = arith.constant 0 : index
    %339 = vector.load %arg17[%c0_168, %c0_169] : memref<8x128xf32, #tpu.memory_space<vmem>>, vector<8x128xf32>
    tpu.vector_store %arg17[%c0_168, %c0_169], %336 {strides = array<i32>} : memref<8x128xf32, #tpu.memory_space<vmem>>, vector<8x128xf32>,
    %c0_170 = arith.constant 0 : index
    %c0_171 = arith.constant 0 : index
    %340 = vector.load %arg18[%c0_170, %c0_171] : memref<8x128xf32, #tpu.memory_space<vmem>>, vector<8x128xf32>
    tpu.vector_store %arg18[%c0_170, %c0_171], %334 {strides = array<i32>} : memref<8x128xf32, #tpu.memory_space<vmem>>, vector<8x128xf32>,
    %341 = arith.index_cast %c3_i32 : i32 to index
    %c0_172 = arith.constant 0 : index
    %c0_173 = arith.constant 0 : index
    %342 = vector.load %arg9[%341, %c0_172, %c0_173] : memref<8x8x128xf32, #tpu.memory_space<vmem>>, vector<1x8x128xf32>
    %343 = vector.shape_cast %342 : vector<1x8x128xf32> to vector<8x128xf32>
    %344 = vector.shape_cast %311 : vector<8x128xf32> to vector<1x8x128xf32>
    tpu.vector_store %arg9[%341, %c0_172, %c0_173], %344 {strides = array<i32>} : memref<8x8x128xf32, #tpu.memory_space<vmem>>, vector<1x8x128xf32>,
    %345 = arith.index_cast %272 : i32 to index
    %c0_174 = arith.constant 0 : index
    %c0_175 = arith.constant 0 : index
    %346 = vector.load %arg10[%345, %c0_174, %c0_175] : memref<8x8x128xf32, #tpu.memory_space<vmem>>, vector<1x8x128xf32>
    %347 = vector.shape_cast %346 : vector<1x8x128xf32> to vector<8x128xf32>
    %348 = vector.shape_cast %336 : vector<8x128xf32> to vector<1x8x128xf32>
    tpu.vector_store %arg10[%345, %c0_174, %c0_175], %348 {strides = array<i32>} : memref<8x8x128xf32, #tpu.memory_space<vmem>>, vector<1x8x128xf32>,
    %c4_i32 = arith.constant 4 : i32
    %c7_i32_176 = arith.constant 7 : i32
    %349 = arith.subi %c7_i32_176, %c4_i32 : i32
    %c0_177 = arith.constant 0 : index
    %c0_178 = arith.constant 0 : index
    %350 = vector.load %arg15[%c0_177, %c0_178] : memref<8x128xf32, #tpu.memory_space<vmem>>, vector<8x128xf32>
    %c0_179 = arith.constant 0 : index
    %c0_180 = arith.constant 0 : index
    %351 = vector.load %arg16[%c0_179, %c0_180] : memref<8x128xf32, #tpu.memory_space<vmem>>, vector<8x128xf32>
    %c0_181 = arith.constant 0 : index
    %c0_182 = arith.constant 0 : index
    %352 = vector.load %arg17[%c0_181, %c0_182] : memref<8x128xf32, #tpu.memory_space<vmem>>, vector<8x128xf32>
    %c0_183 = arith.constant 0 : index
    %c0_184 = arith.constant 0 : index
    %353 = vector.load %arg18[%c0_183, %c0_184] : memref<8x128xf32, #tpu.memory_space<vmem>>, vector<8x128xf32>
    %354 = arith.index_cast %c4_i32 : i32 to index
    %c0_185 = arith.constant 0 : index
    %c0_186 = arith.constant 0 : index
    %355 = vector.load %arg13[%354, %c0_185, %c0_186] : memref<8x8x512xf32, #tpu.memory_space<vmem>>, vector<1x8x512xf32>
    %356 = vector.shape_cast %355 : vector<1x8x512xf32> to vector<8x512xf32>
    %cst_187 = arith.constant dense<0.000000e+00> : vector<8x512xf32>
    %357 = tpu.matmul %350, %38, %cst_187 {dimension_numbers = #tpu.dot_dimension_numbers<[1], [0], [0], [1], [0, 0, 1, 1], [], []>} : vector<8x128xf32>, vector<128x512xf32>, vector<8x512xf32> -> vector<8x512xf32>
    %358 = arith.addf %356, %357 : vector<8x512xf32>
    %359 = arith.index_cast %349 : i32 to index
    %c0_188 = arith.constant 0 : index
    %c0_189 = arith.constant 0 : index
    %360 = vector.load %arg14[%359, %c0_188, %c0_189] : memref<8x8x512xf32, #tpu.memory_space<vmem>>, vector<1x8x512xf32>
    %361 = vector.shape_cast %360 : vector<1x8x512xf32> to vector<8x512xf32>
    %cst_190 = arith.constant dense<0.000000e+00> : vector<8x512xf32>
    %362 = tpu.matmul %352, %40, %cst_190 {dimension_numbers = #tpu.dot_dimension_numbers<[1], [0], [0], [1], [0, 0, 1, 1], [], []>} : vector<8x128xf32>, vector<128x512xf32>, vector<8x512xf32> -> vector<8x512xf32>
    %363 = arith.addf %361, %362 : vector<8x512xf32>
    %364 = vector.extract_strided_slice %358 {offsets = [0, 0], sizes = [8, 128], strides = [1, 1]} : vector<8x512xf32> to vector<8x128xf32>
    %365 = arith.negf %364 : vector<8x128xf32>
    %366 = math.exp %365 : vector<8x128xf32>
    %cst_191 = arith.constant 1.000000e+00 : f32
    %367 = vector.broadcast %cst_191 : f32 to vector<8x128xf32>
    %368 = arith.addf %367, %366 : vector<8x128xf32>
    %369 = arith.divf %367, %368 : vector<8x128xf32>
    %370 = vector.extract_strided_slice %358 {offsets = [0, 128], sizes = [8, 128], strides = [1, 1]} : vector<8x512xf32> to vector<8x128xf32>
    %371 = arith.negf %370 : vector<8x128xf32>
    %372 = math.exp %371 : vector<8x128xf32>
    %cst_192 = arith.constant 1.000000e+00 : f32
    %373 = vector.broadcast %cst_192 : f32 to vector<8x128xf32>
    %374 = arith.addf %373, %372 : vector<8x128xf32>
    %375 = arith.divf %373, %374 : vector<8x128xf32>
    %376 = vector.extract_strided_slice %358 {offsets = [0, 256], sizes = [8, 128], strides = [1, 1]} : vector<8x512xf32> to vector<8x128xf32>
    %377 = math.tanh %376 : vector<8x128xf32>
    %378 = vector.extract_strided_slice %358 {offsets = [0, 384], sizes = [8, 128], strides = [1, 1]} : vector<8x512xf32> to vector<8x128xf32>
    %379 = arith.negf %378 : vector<8x128xf32>
    %380 = math.exp %379 : vector<8x128xf32>
    %cst_193 = arith.constant 1.000000e+00 : f32
    %381 = vector.broadcast %cst_193 : f32 to vector<8x128xf32>
    %382 = arith.addf %381, %380 : vector<8x128xf32>
    %383 = arith.divf %381, %382 : vector<8x128xf32>
    %384 = arith.mulf %375, %351 : vector<8x128xf32>
    %385 = arith.mulf %369, %377 : vector<8x128xf32>
    %386 = arith.addf %384, %385 : vector<8x128xf32>
    %387 = math.tanh %386 : vector<8x128xf32>
    %388 = arith.mulf %383, %387 : vector<8x128xf32>
    %389 = vector.extract_strided_slice %363 {offsets = [0, 0], sizes = [8, 128], strides = [1, 1]} : vector<8x512xf32> to vector<8x128xf32>
    %390 = arith.negf %389 : vector<8x128xf32>
    %391 = math.exp %390 : vector<8x128xf32>
    %cst_194 = arith.constant 1.000000e+00 : f32
    %392 = vector.broadcast %cst_194 : f32 to vector<8x128xf32>
    %393 = arith.addf %392, %391 : vector<8x128xf32>
    %394 = arith.divf %392, %393 : vector<8x128xf32>
    %395 = vector.extract_strided_slice %363 {offsets = [0, 128], sizes = [8, 128], strides = [1, 1]} : vector<8x512xf32> to vector<8x128xf32>
    %396 = arith.negf %395 : vector<8x128xf32>
    %397 = math.exp %396 : vector<8x128xf32>
    %cst_195 = arith.constant 1.000000e+00 : f32
    %398 = vector.broadcast %cst_195 : f32 to vector<8x128xf32>
    %399 = arith.addf %398, %397 : vector<8x128xf32>
    %400 = arith.divf %398, %399 : vector<8x128xf32>
    %401 = vector.extract_strided_slice %363 {offsets = [0, 256], sizes = [8, 128], strides = [1, 1]} : vector<8x512xf32> to vector<8x128xf32>
    %402 = math.tanh %401 : vector<8x128xf32>
    %403 = vector.extract_strided_slice %363 {offsets = [0, 384], sizes = [8, 128], strides = [1, 1]} : vector<8x512xf32> to vector<8x128xf32>
    %404 = arith.negf %403 : vector<8x128xf32>
    %405 = math.exp %404 : vector<8x128xf32>
    %cst_196 = arith.constant 1.000000e+00 : f32
    %406 = vector.broadcast %cst_196 : f32 to vector<8x128xf32>
    %407 = arith.addf %406, %405 : vector<8x128xf32>
    %408 = arith.divf %406, %407 : vector<8x128xf32>
    %409 = arith.mulf %400, %353 : vector<8x128xf32>
    %410 = arith.mulf %394, %402 : vector<8x128xf32>
    %411 = arith.addf %409, %410 : vector<8x128xf32>
    %412 = math.tanh %411 : vector<8x128xf32>
    %413 = arith.mulf %408, %412 : vector<8x128xf32>
    %c0_197 = arith.constant 0 : index
    %c0_198 = arith.constant 0 : index
    %414 = vector.load %arg15[%c0_197, %c0_198] : memref<8x128xf32, #tpu.memory_space<vmem>>, vector<8x128xf32>
    tpu.vector_store %arg15[%c0_197, %c0_198], %388 {strides = array<i32>} : memref<8x128xf32, #tpu.memory_space<vmem>>, vector<8x128xf32>,
    %c0_199 = arith.constant 0 : index
    %c0_200 = arith.constant 0 : index
    %415 = vector.load %arg16[%c0_199, %c0_200] : memref<8x128xf32, #tpu.memory_space<vmem>>, vector<8x128xf32>
    tpu.vector_store %arg16[%c0_199, %c0_200], %386 {strides = array<i32>} : memref<8x128xf32, #tpu.memory_space<vmem>>, vector<8x128xf32>,
    %c0_201 = arith.constant 0 : index
    %c0_202 = arith.constant 0 : index
    %416 = vector.load %arg17[%c0_201, %c0_202] : memref<8x128xf32, #tpu.memory_space<vmem>>, vector<8x128xf32>
    tpu.vector_store %arg17[%c0_201, %c0_202], %413 {strides = array<i32>} : memref<8x128xf32, #tpu.memory_space<vmem>>, vector<8x128xf32>,
    %c0_203 = arith.constant 0 : index
    %c0_204 = arith.constant 0 : index
    %417 = vector.load %arg18[%c0_203, %c0_204] : memref<8x128xf32, #tpu.memory_space<vmem>>, vector<8x128xf32>
    tpu.vector_store %arg18[%c0_203, %c0_204], %411 {strides = array<i32>} : memref<8x128xf32, #tpu.memory_space<vmem>>, vector<8x128xf32>,
    %418 = arith.index_cast %c4_i32 : i32 to index
    %c0_205 = arith.constant 0 : index
    %c0_206 = arith.constant 0 : index
    %419 = vector.load %arg9[%418, %c0_205, %c0_206] : memref<8x8x128xf32, #tpu.memory_space<vmem>>, vector<1x8x128xf32>
    %420 = vector.shape_cast %419 : vector<1x8x128xf32> to vector<8x128xf32>
    %421 = vector.shape_cast %388 : vector<8x128xf32> to vector<1x8x128xf32>
    tpu.vector_store %arg9[%418, %c0_205, %c0_206], %421 {strides = array<i32>} : memref<8x8x128xf32, #tpu.memory_space<vmem>>, vector<1x8x128xf32>,
    %422 = arith.index_cast %349 : i32 to index
    %c0_207 = arith.constant 0 : index
    %c0_208 = arith.constant 0 : index
    %423 = vector.load %arg10[%422, %c0_207, %c0_208] : memref<8x8x128xf32, #tpu.memory_space<vmem>>, vector<1x8x128xf32>
    %424 = vector.shape_cast %423 : vector<1x8x128xf32> to vector<8x128xf32>
    %425 = vector.shape_cast %413 : vector<8x128xf32> to vector<1x8x128xf32>
    tpu.vector_store %arg10[%422, %c0_207, %c0_208], %425 {strides = array<i32>} : memref<8x8x128xf32, #tpu.memory_space<vmem>>, vector<1x8x128xf32>,
    %c5_i32 = arith.constant 5 : i32
    %c7_i32_209 = arith.constant 7 : i32
    %426 = arith.subi %c7_i32_209, %c5_i32 : i32
    %c0_210 = arith.constant 0 : index
    %c0_211 = arith.constant 0 : index
    %427 = vector.load %arg15[%c0_210, %c0_211] : memref<8x128xf32, #tpu.memory_space<vmem>>, vector<8x128xf32>
    %c0_212 = arith.constant 0 : index
    %c0_213 = arith.constant 0 : index
    %428 = vector.load %arg16[%c0_212, %c0_213] : memref<8x128xf32, #tpu.memory_space<vmem>>, vector<8x128xf32>
    %c0_214 = arith.constant 0 : index
    %c0_215 = arith.constant 0 : index
    %429 = vector.load %arg17[%c0_214, %c0_215] : memref<8x128xf32, #tpu.memory_space<vmem>>, vector<8x128xf32>
    %c0_216 = arith.constant 0 : index
    %c0_217 = arith.constant 0 : index
    %430 = vector.load %arg18[%c0_216, %c0_217] : memref<8x128xf32, #tpu.memory_space<vmem>>, vector<8x128xf32>
    %431 = arith.index_cast %c5_i32 : i32 to index
    %c0_218 = arith.constant 0 : index
    %c0_219 = arith.constant 0 : index
    %432 = vector.load %arg13[%431, %c0_218, %c0_219] : memref<8x8x512xf32, #tpu.memory_space<vmem>>, vector<1x8x512xf32>
    %433 = vector.shape_cast %432 : vector<1x8x512xf32> to vector<8x512xf32>
    %cst_220 = arith.constant dense<0.000000e+00> : vector<8x512xf32>
    %434 = tpu.matmul %427, %38, %cst_220 {dimension_numbers = #tpu.dot_dimension_numbers<[1], [0], [0], [1], [0, 0, 1, 1], [], []>} : vector<8x128xf32>, vector<128x512xf32>, vector<8x512xf32> -> vector<8x512xf32>
    %435 = arith.addf %433, %434 : vector<8x512xf32>
    %436 = arith.index_cast %426 : i32 to index
    %c0_221 = arith.constant 0 : index
    %c0_222 = arith.constant 0 : index
    %437 = vector.load %arg14[%436, %c0_221, %c0_222] : memref<8x8x512xf32, #tpu.memory_space<vmem>>, vector<1x8x512xf32>
    %438 = vector.shape_cast %437 : vector<1x8x512xf32> to vector<8x512xf32>
    %cst_223 = arith.constant dense<0.000000e+00> : vector<8x512xf32>
    %439 = tpu.matmul %429, %40, %cst_223 {dimension_numbers = #tpu.dot_dimension_numbers<[1], [0], [0], [1], [0, 0, 1, 1], [], []>} : vector<8x128xf32>, vector<128x512xf32>, vector<8x512xf32> -> vector<8x512xf32>
    %440 = arith.addf %438, %439 : vector<8x512xf32>
    %441 = vector.extract_strided_slice %435 {offsets = [0, 0], sizes = [8, 128], strides = [1, 1]} : vector<8x512xf32> to vector<8x128xf32>
    %442 = arith.negf %441 : vector<8x128xf32>
    %443 = math.exp %442 : vector<8x128xf32>
    %cst_224 = arith.constant 1.000000e+00 : f32
    %444 = vector.broadcast %cst_224 : f32 to vector<8x128xf32>
    %445 = arith.addf %444, %443 : vector<8x128xf32>
    %446 = arith.divf %444, %445 : vector<8x128xf32>
    %447 = vector.extract_strided_slice %435 {offsets = [0, 128], sizes = [8, 128], strides = [1, 1]} : vector<8x512xf32> to vector<8x128xf32>
    %448 = arith.negf %447 : vector<8x128xf32>
    %449 = math.exp %448 : vector<8x128xf32>
    %cst_225 = arith.constant 1.000000e+00 : f32
    %450 = vector.broadcast %cst_225 : f32 to vector<8x128xf32>
    %451 = arith.addf %450, %449 : vector<8x128xf32>
    %452 = arith.divf %450, %451 : vector<8x128xf32>
    %453 = vector.extract_strided_slice %435 {offsets = [0, 256], sizes = [8, 128], strides = [1, 1]} : vector<8x512xf32> to vector<8x128xf32>
    %454 = math.tanh %453 : vector<8x128xf32>
    %455 = vector.extract_strided_slice %435 {offsets = [0, 384], sizes = [8, 128], strides = [1, 1]} : vector<8x512xf32> to vector<8x128xf32>
    %456 = arith.negf %455 : vector<8x128xf32>
    %457 = math.exp %456 : vector<8x128xf32>
    %cst_226 = arith.constant 1.000000e+00 : f32
    %458 = vector.broadcast %cst_226 : f32 to vector<8x128xf32>
    %459 = arith.addf %458, %457 : vector<8x128xf32>
    %460 = arith.divf %458, %459 : vector<8x128xf32>
    %461 = arith.mulf %452, %428 : vector<8x128xf32>
    %462 = arith.mulf %446, %454 : vector<8x128xf32>
    %463 = arith.addf %461, %462 : vector<8x128xf32>
    %464 = math.tanh %463 : vector<8x128xf32>
    %465 = arith.mulf %460, %464 : vector<8x128xf32>
    %466 = vector.extract_strided_slice %440 {offsets = [0, 0], sizes = [8, 128], strides = [1, 1]} : vector<8x512xf32> to vector<8x128xf32>
    %467 = arith.negf %466 : vector<8x128xf32>
    %468 = math.exp %467 : vector<8x128xf32>
    %cst_227 = arith.constant 1.000000e+00 : f32
    %469 = vector.broadcast %cst_227 : f32 to vector<8x128xf32>
    %470 = arith.addf %469, %468 : vector<8x128xf32>
    %471 = arith.divf %469, %470 : vector<8x128xf32>
    %472 = vector.extract_strided_slice %440 {offsets = [0, 128], sizes = [8, 128], strides = [1, 1]} : vector<8x512xf32> to vector<8x128xf32>
    %473 = arith.negf %472 : vector<8x128xf32>
    %474 = math.exp %473 : vector<8x128xf32>
    %cst_228 = arith.constant 1.000000e+00 : f32
    %475 = vector.broadcast %cst_228 : f32 to vector<8x128xf32>
    %476 = arith.addf %475, %474 : vector<8x128xf32>
    %477 = arith.divf %475, %476 : vector<8x128xf32>
    %478 = vector.extract_strided_slice %440 {offsets = [0, 256], sizes = [8, 128], strides = [1, 1]} : vector<8x512xf32> to vector<8x128xf32>
    %479 = math.tanh %478 : vector<8x128xf32>
    %480 = vector.extract_strided_slice %440 {offsets = [0, 384], sizes = [8, 128], strides = [1, 1]} : vector<8x512xf32> to vector<8x128xf32>
    %481 = arith.negf %480 : vector<8x128xf32>
    %482 = math.exp %481 : vector<8x128xf32>
    %cst_229 = arith.constant 1.000000e+00 : f32
    %483 = vector.broadcast %cst_229 : f32 to vector<8x128xf32>
    %484 = arith.addf %483, %482 : vector<8x128xf32>
    %485 = arith.divf %483, %484 : vector<8x128xf32>
    %486 = arith.mulf %477, %430 : vector<8x128xf32>
    %487 = arith.mulf %471, %479 : vector<8x128xf32>
    %488 = arith.addf %486, %487 : vector<8x128xf32>
    %489 = math.tanh %488 : vector<8x128xf32>
    %490 = arith.mulf %485, %489 : vector<8x128xf32>
    %c0_230 = arith.constant 0 : index
    %c0_231 = arith.constant 0 : index
    %491 = vector.load %arg15[%c0_230, %c0_231] : memref<8x128xf32, #tpu.memory_space<vmem>>, vector<8x128xf32>
    tpu.vector_store %arg15[%c0_230, %c0_231], %465 {strides = array<i32>} : memref<8x128xf32, #tpu.memory_space<vmem>>, vector<8x128xf32>,
    %c0_232 = arith.constant 0 : index
    %c0_233 = arith.constant 0 : index
    %492 = vector.load %arg16[%c0_232, %c0_233] : memref<8x128xf32, #tpu.memory_space<vmem>>, vector<8x128xf32>
    tpu.vector_store %arg16[%c0_232, %c0_233], %463 {strides = array<i32>} : memref<8x128xf32, #tpu.memory_space<vmem>>, vector<8x128xf32>,
    %c0_234 = arith.constant 0 : index
    %c0_235 = arith.constant 0 : index
    %493 = vector.load %arg17[%c0_234, %c0_235] : memref<8x128xf32, #tpu.memory_space<vmem>>, vector<8x128xf32>
    tpu.vector_store %arg17[%c0_234, %c0_235], %490 {strides = array<i32>} : memref<8x128xf32, #tpu.memory_space<vmem>>, vector<8x128xf32>,
    %c0_236 = arith.constant 0 : index
    %c0_237 = arith.constant 0 : index
    %494 = vector.load %arg18[%c0_236, %c0_237] : memref<8x128xf32, #tpu.memory_space<vmem>>, vector<8x128xf32>
    tpu.vector_store %arg18[%c0_236, %c0_237], %488 {strides = array<i32>} : memref<8x128xf32, #tpu.memory_space<vmem>>, vector<8x128xf32>,
    %495 = arith.index_cast %c5_i32 : i32 to index
    %c0_238 = arith.constant 0 : index
    %c0_239 = arith.constant 0 : index
    %496 = vector.load %arg9[%495, %c0_238, %c0_239] : memref<8x8x128xf32, #tpu.memory_space<vmem>>, vector<1x8x128xf32>
    %497 = vector.shape_cast %496 : vector<1x8x128xf32> to vector<8x128xf32>
    %498 = vector.shape_cast %465 : vector<8x128xf32> to vector<1x8x128xf32>
    tpu.vector_store %arg9[%495, %c0_238, %c0_239], %498 {strides = array<i32>} : memref<8x8x128xf32, #tpu.memory_space<vmem>>, vector<1x8x128xf32>,
    %499 = arith.index_cast %426 : i32 to index
    %c0_240 = arith.constant 0 : index
    %c0_241 = arith.constant 0 : index
    %500 = vector.load %arg10[%499, %c0_240, %c0_241] : memref<8x8x128xf32, #tpu.memory_space<vmem>>, vector<1x8x128xf32>
    %501 = vector.shape_cast %500 : vector<1x8x128xf32> to vector<8x128xf32>
    %502 = vector.shape_cast %490 : vector<8x128xf32> to vector<1x8x128xf32>
    tpu.vector_store %arg10[%499, %c0_240, %c0_241], %502 {strides = array<i32>} : memref<8x8x128xf32, #tpu.memory_space<vmem>>, vector<1x8x128xf32>,
    %c6_i32 = arith.constant 6 : i32
    %c7_i32_242 = arith.constant 7 : i32
    %503 = arith.subi %c7_i32_242, %c6_i32 : i32
    %c0_243 = arith.constant 0 : index
    %c0_244 = arith.constant 0 : index
    %504 = vector.load %arg15[%c0_243, %c0_244] : memref<8x128xf32, #tpu.memory_space<vmem>>, vector<8x128xf32>
    %c0_245 = arith.constant 0 : index
    %c0_246 = arith.constant 0 : index
    %505 = vector.load %arg16[%c0_245, %c0_246] : memref<8x128xf32, #tpu.memory_space<vmem>>, vector<8x128xf32>
    %c0_247 = arith.constant 0 : index
    %c0_248 = arith.constant 0 : index
    %506 = vector.load %arg17[%c0_247, %c0_248] : memref<8x128xf32, #tpu.memory_space<vmem>>, vector<8x128xf32>
    %c0_249 = arith.constant 0 : index
    %c0_250 = arith.constant 0 : index
    %507 = vector.load %arg18[%c0_249, %c0_250] : memref<8x128xf32, #tpu.memory_space<vmem>>, vector<8x128xf32>
    %508 = arith.index_cast %c6_i32 : i32 to index
    %c0_251 = arith.constant 0 : index
    %c0_252 = arith.constant 0 : index
    %509 = vector.load %arg13[%508, %c0_251, %c0_252] : memref<8x8x512xf32, #tpu.memory_space<vmem>>, vector<1x8x512xf32>
    %510 = vector.shape_cast %509 : vector<1x8x512xf32> to vector<8x512xf32>
    %cst_253 = arith.constant dense<0.000000e+00> : vector<8x512xf32>
    %511 = tpu.matmul %504, %38, %cst_253 {dimension_numbers = #tpu.dot_dimension_numbers<[1], [0], [0], [1], [0, 0, 1, 1], [], []>} : vector<8x128xf32>, vector<128x512xf32>, vector<8x512xf32> -> vector<8x512xf32>
    %512 = arith.addf %510, %511 : vector<8x512xf32>
    %513 = arith.index_cast %503 : i32 to index
    %c0_254 = arith.constant 0 : index
    %c0_255 = arith.constant 0 : index
    %514 = vector.load %arg14[%513, %c0_254, %c0_255] : memref<8x8x512xf32, #tpu.memory_space<vmem>>, vector<1x8x512xf32>
    %515 = vector.shape_cast %514 : vector<1x8x512xf32> to vector<8x512xf32>
    %cst_256 = arith.constant dense<0.000000e+00> : vector<8x512xf32>
    %516 = tpu.matmul %506, %40, %cst_256 {dimension_numbers = #tpu.dot_dimension_numbers<[1], [0], [0], [1], [0, 0, 1, 1], [], []>} : vector<8x128xf32>, vector<128x512xf32>, vector<8x512xf32> -> vector<8x512xf32>
    %517 = arith.addf %515, %516 : vector<8x512xf32>
    %518 = vector.extract_strided_slice %512 {offsets = [0, 0], sizes = [8, 128], strides = [1, 1]} : vector<8x512xf32> to vector<8x128xf32>
    %519 = arith.negf %518 : vector<8x128xf32>
    %520 = math.exp %519 : vector<8x128xf32>
    %cst_257 = arith.constant 1.000000e+00 : f32
    %521 = vector.broadcast %cst_257 : f32 to vector<8x128xf32>
    %522 = arith.addf %521, %520 : vector<8x128xf32>
    %523 = arith.divf %521, %522 : vector<8x128xf32>
    %524 = vector.extract_strided_slice %512 {offsets = [0, 128], sizes = [8, 128], strides = [1, 1]} : vector<8x512xf32> to vector<8x128xf32>
    %525 = arith.negf %524 : vector<8x128xf32>
    %526 = math.exp %525 : vector<8x128xf32>
    %cst_258 = arith.constant 1.000000e+00 : f32
    %527 = vector.broadcast %cst_258 : f32 to vector<8x128xf32>
    %528 = arith.addf %527, %526 : vector<8x128xf32>
    %529 = arith.divf %527, %528 : vector<8x128xf32>
    %530 = vector.extract_strided_slice %512 {offsets = [0, 256], sizes = [8, 128], strides = [1, 1]} : vector<8x512xf32> to vector<8x128xf32>
    %531 = math.tanh %530 : vector<8x128xf32>
    %532 = vector.extract_strided_slice %512 {offsets = [0, 384], sizes = [8, 128], strides = [1, 1]} : vector<8x512xf32> to vector<8x128xf32>
    %533 = arith.negf %532 : vector<8x128xf32>
    %534 = math.exp %533 : vector<8x128xf32>
    %cst_259 = arith.constant 1.000000e+00 : f32
    %535 = vector.broadcast %cst_259 : f32 to vector<8x128xf32>
    %536 = arith.addf %535, %534 : vector<8x128xf32>
    %537 = arith.divf %535, %536 : vector<8x128xf32>
    %538 = arith.mulf %529, %505 : vector<8x128xf32>
    %539 = arith.mulf %523, %531 : vector<8x128xf32>
    %540 = arith.addf %538, %539 : vector<8x128xf32>
    %541 = math.tanh %540 : vector<8x128xf32>
    %542 = arith.mulf %537, %541 : vector<8x128xf32>
    %543 = vector.extract_strided_slice %517 {offsets = [0, 0], sizes = [8, 128], strides = [1, 1]} : vector<8x512xf32> to vector<8x128xf32>
    %544 = arith.negf %543 : vector<8x128xf32>
    %545 = math.exp %544 : vector<8x128xf32>
    %cst_260 = arith.constant 1.000000e+00 : f32
    %546 = vector.broadcast %cst_260 : f32 to vector<8x128xf32>
    %547 = arith.addf %546, %545 : vector<8x128xf32>
    %548 = arith.divf %546, %547 : vector<8x128xf32>
    %549 = vector.extract_strided_slice %517 {offsets = [0, 128], sizes = [8, 128], strides = [1, 1]} : vector<8x512xf32> to vector<8x128xf32>
    %550 = arith.negf %549 : vector<8x128xf32>
    %551 = math.exp %550 : vector<8x128xf32>
    %cst_261 = arith.constant 1.000000e+00 : f32
    %552 = vector.broadcast %cst_261 : f32 to vector<8x128xf32>
    %553 = arith.addf %552, %551 : vector<8x128xf32>
    %554 = arith.divf %552, %553 : vector<8x128xf32>
    %555 = vector.extract_strided_slice %517 {offsets = [0, 256], sizes = [8, 128], strides = [1, 1]} : vector<8x512xf32> to vector<8x128xf32>
    %556 = math.tanh %555 : vector<8x128xf32>
    %557 = vector.extract_strided_slice %517 {offsets = [0, 384], sizes = [8, 128], strides = [1, 1]} : vector<8x512xf32> to vector<8x128xf32>
    %558 = arith.negf %557 : vector<8x128xf32>
    %559 = math.exp %558 : vector<8x128xf32>
    %cst_262 = arith.constant 1.000000e+00 : f32
    %560 = vector.broadcast %cst_262 : f32 to vector<8x128xf32>
    %561 = arith.addf %560, %559 : vector<8x128xf32>
    %562 = arith.divf %560, %561 : vector<8x128xf32>
    %563 = arith.mulf %554, %507 : vector<8x128xf32>
    %564 = arith.mulf %548, %556 : vector<8x128xf32>
    %565 = arith.addf %563, %564 : vector<8x128xf32>
    %566 = math.tanh %565 : vector<8x128xf32>
    %567 = arith.mulf %562, %566 : vector<8x128xf32>
    %c0_263 = arith.constant 0 : index
    %c0_264 = arith.constant 0 : index
    %568 = vector.load %arg15[%c0_263, %c0_264] : memref<8x128xf32, #tpu.memory_space<vmem>>, vector<8x128xf32>
    tpu.vector_store %arg15[%c0_263, %c0_264], %542 {strides = array<i32>} : memref<8x128xf32, #tpu.memory_space<vmem>>, vector<8x128xf32>,
    %c0_265 = arith.constant 0 : index
    %c0_266 = arith.constant 0 : index
    %569 = vector.load %arg16[%c0_265, %c0_266] : memref<8x128xf32, #tpu.memory_space<vmem>>, vector<8x128xf32>
    tpu.vector_store %arg16[%c0_265, %c0_266], %540 {strides = array<i32>} : memref<8x128xf32, #tpu.memory_space<vmem>>, vector<8x128xf32>,
    %c0_267 = arith.constant 0 : index
    %c0_268 = arith.constant 0 : index
    %570 = vector.load %arg17[%c0_267, %c0_268] : memref<8x128xf32, #tpu.memory_space<vmem>>, vector<8x128xf32>
    tpu.vector_store %arg17[%c0_267, %c0_268], %567 {strides = array<i32>} : memref<8x128xf32, #tpu.memory_space<vmem>>, vector<8x128xf32>,
    %c0_269 = arith.constant 0 : index
    %c0_270 = arith.constant 0 : index
    %571 = vector.load %arg18[%c0_269, %c0_270] : memref<8x128xf32, #tpu.memory_space<vmem>>, vector<8x128xf32>
    tpu.vector_store %arg18[%c0_269, %c0_270], %565 {strides = array<i32>} : memref<8x128xf32, #tpu.memory_space<vmem>>, vector<8x128xf32>,
    %572 = arith.index_cast %c6_i32 : i32 to index
    %c0_271 = arith.constant 0 : index
    %c0_272 = arith.constant 0 : index
    %573 = vector.load %arg9[%572, %c0_271, %c0_272] : memref<8x8x128xf32, #tpu.memory_space<vmem>>, vector<1x8x128xf32>
    %574 = vector.shape_cast %573 : vector<1x8x128xf32> to vector<8x128xf32>
    %575 = vector.shape_cast %542 : vector<8x128xf32> to vector<1x8x128xf32>
    tpu.vector_store %arg9[%572, %c0_271, %c0_272], %575 {strides = array<i32>} : memref<8x8x128xf32, #tpu.memory_space<vmem>>, vector<1x8x128xf32>,
    %576 = arith.index_cast %503 : i32 to index
    %c0_273 = arith.constant 0 : index
    %c0_274 = arith.constant 0 : index
    %577 = vector.load %arg10[%576, %c0_273, %c0_274] : memref<8x8x128xf32, #tpu.memory_space<vmem>>, vector<1x8x128xf32>
    %578 = vector.shape_cast %577 : vector<1x8x128xf32> to vector<8x128xf32>
    %579 = vector.shape_cast %567 : vector<8x128xf32> to vector<1x8x128xf32>
    tpu.vector_store %arg10[%576, %c0_273, %c0_274], %579 {strides = array<i32>} : memref<8x8x128xf32, #tpu.memory_space<vmem>>, vector<1x8x128xf32>,
    %c7_i32_275 = arith.constant 7 : i32
    %c7_i32_276 = arith.constant 7 : i32
    %580 = arith.subi %c7_i32_276, %c7_i32_275 : i32
    %c0_277 = arith.constant 0 : index
    %c0_278 = arith.constant 0 : index
    %581 = vector.load %arg15[%c0_277, %c0_278] : memref<8x128xf32, #tpu.memory_space<vmem>>, vector<8x128xf32>
    %c0_279 = arith.constant 0 : index
    %c0_280 = arith.constant 0 : index
    %582 = vector.load %arg16[%c0_279, %c0_280] : memref<8x128xf32, #tpu.memory_space<vmem>>, vector<8x128xf32>
    %c0_281 = arith.constant 0 : index
    %c0_282 = arith.constant 0 : index
    %583 = vector.load %arg17[%c0_281, %c0_282] : memref<8x128xf32, #tpu.memory_space<vmem>>, vector<8x128xf32>
    %c0_283 = arith.constant 0 : index
    %c0_284 = arith.constant 0 : index
    %584 = vector.load %arg18[%c0_283, %c0_284] : memref<8x128xf32, #tpu.memory_space<vmem>>, vector<8x128xf32>
    %585 = arith.index_cast %c7_i32_275 : i32 to index
    %c0_285 = arith.constant 0 : index
    %c0_286 = arith.constant 0 : index
    %586 = vector.load %arg13[%585, %c0_285, %c0_286] : memref<8x8x512xf32, #tpu.memory_space<vmem>>, vector<1x8x512xf32>
    %587 = vector.shape_cast %586 : vector<1x8x512xf32> to vector<8x512xf32>
    %cst_287 = arith.constant dense<0.000000e+00> : vector<8x512xf32>
    %588 = tpu.matmul %581, %38, %cst_287 {dimension_numbers = #tpu.dot_dimension_numbers<[1], [0], [0], [1], [0, 0, 1, 1], [], []>} : vector<8x128xf32>, vector<128x512xf32>, vector<8x512xf32> -> vector<8x512xf32>
    %589 = arith.addf %587, %588 : vector<8x512xf32>
    %590 = arith.index_cast %580 : i32 to index
    %c0_288 = arith.constant 0 : index
    %c0_289 = arith.constant 0 : index
    %591 = vector.load %arg14[%590, %c0_288, %c0_289] : memref<8x8x512xf32, #tpu.memory_space<vmem>>, vector<1x8x512xf32>
    %592 = vector.shape_cast %591 : vector<1x8x512xf32> to vector<8x512xf32>
    %cst_290 = arith.constant dense<0.000000e+00> : vector<8x512xf32>
    %593 = tpu.matmul %583, %40, %cst_290 {dimension_numbers = #tpu.dot_dimension_numbers<[1], [0], [0], [1], [0, 0, 1, 1], [], []>} : vector<8x128xf32>, vector<128x512xf32>, vector<8x512xf32> -> vector<8x512xf32>
    %594 = arith.addf %592, %593 : vector<8x512xf32>
    %595 = vector.extract_strided_slice %589 {offsets = [0, 0], sizes = [8, 128], strides = [1, 1]} : vector<8x512xf32> to vector<8x128xf32>
    %596 = arith.negf %595 : vector<8x128xf32>
    %597 = math.exp %596 : vector<8x128xf32>
    %cst_291 = arith.constant 1.000000e+00 : f32
    %598 = vector.broadcast %cst_291 : f32 to vector<8x128xf32>
    %599 = arith.addf %598, %597 : vector<8x128xf32>
    %600 = arith.divf %598, %599 : vector<8x128xf32>
    %601 = vector.extract_strided_slice %589 {offsets = [0, 128], sizes = [8, 128], strides = [1, 1]} : vector<8x512xf32> to vector<8x128xf32>
    %602 = arith.negf %601 : vector<8x128xf32>
    %603 = math.exp %602 : vector<8x128xf32>
    %cst_292 = arith.constant 1.000000e+00 : f32
    %604 = vector.broadcast %cst_292 : f32 to vector<8x128xf32>
    %605 = arith.addf %604, %603 : vector<8x128xf32>
    %606 = arith.divf %604, %605 : vector<8x128xf32>
    %607 = vector.extract_strided_slice %589 {offsets = [0, 256], sizes = [8, 128], strides = [1, 1]} : vector<8x512xf32> to vector<8x128xf32>
    %608 = math.tanh %607 : vector<8x128xf32>
    %609 = vector.extract_strided_slice %589 {offsets = [0, 384], sizes = [8, 128], strides = [1, 1]} : vector<8x512xf32> to vector<8x128xf32>
    %610 = arith.negf %609 : vector<8x128xf32>
    %611 = math.exp %610 : vector<8x128xf32>
    %cst_293 = arith.constant 1.000000e+00 : f32
    %612 = vector.broadcast %cst_293 : f32 to vector<8x128xf32>
    %613 = arith.addf %612, %611 : vector<8x128xf32>
    %614 = arith.divf %612, %613 : vector<8x128xf32>
    %615 = arith.mulf %606, %582 : vector<8x128xf32>
    %616 = arith.mulf %600, %608 : vector<8x128xf32>
    %617 = arith.addf %615, %616 : vector<8x128xf32>
    %618 = math.tanh %617 : vector<8x128xf32>
    %619 = arith.mulf %614, %618 : vector<8x128xf32>
    %620 = vector.extract_strided_slice %594 {offsets = [0, 0], sizes = [8, 128], strides = [1, 1]} : vector<8x512xf32> to vector<8x128xf32>
    %621 = arith.negf %620 : vector<8x128xf32>
    %622 = math.exp %621 : vector<8x128xf32>
    %cst_294 = arith.constant 1.000000e+00 : f32
    %623 = vector.broadcast %cst_294 : f32 to vector<8x128xf32>
    %624 = arith.addf %623, %622 : vector<8x128xf32>
    %625 = arith.divf %623, %624 : vector<8x128xf32>
    %626 = vector.extract_strided_slice %594 {offsets = [0, 128], sizes = [8, 128], strides = [1, 1]} : vector<8x512xf32> to vector<8x128xf32>
    %627 = arith.negf %626 : vector<8x128xf32>
    %628 = math.exp %627 : vector<8x128xf32>
    %cst_295 = arith.constant 1.000000e+00 : f32
    %629 = vector.broadcast %cst_295 : f32 to vector<8x128xf32>
    %630 = arith.addf %629, %628 : vector<8x128xf32>
    %631 = arith.divf %629, %630 : vector<8x128xf32>
    %632 = vector.extract_strided_slice %594 {offsets = [0, 256], sizes = [8, 128], strides = [1, 1]} : vector<8x512xf32> to vector<8x128xf32>
    %633 = math.tanh %632 : vector<8x128xf32>
    %634 = vector.extract_strided_slice %594 {offsets = [0, 384], sizes = [8, 128], strides = [1, 1]} : vector<8x512xf32> to vector<8x128xf32>
    %635 = arith.negf %634 : vector<8x128xf32>
    %636 = math.exp %635 : vector<8x128xf32>
    %cst_296 = arith.constant 1.000000e+00 : f32
    %637 = vector.broadcast %cst_296 : f32 to vector<8x128xf32>
    %638 = arith.addf %637, %636 : vector<8x128xf32>
    %639 = arith.divf %637, %638 : vector<8x128xf32>
    %640 = arith.mulf %631, %584 : vector<8x128xf32>
    %641 = arith.mulf %625, %633 : vector<8x128xf32>
    %642 = arith.addf %640, %641 : vector<8x128xf32>
    %643 = math.tanh %642 : vector<8x128xf32>
    %644 = arith.mulf %639, %643 : vector<8x128xf32>
    %c0_297 = arith.constant 0 : index
    %c0_298 = arith.constant 0 : index
    %645 = vector.load %arg15[%c0_297, %c0_298] : memref<8x128xf32, #tpu.memory_space<vmem>>, vector<8x128xf32>
    tpu.vector_store %arg15[%c0_297, %c0_298], %619 {strides = array<i32>} : memref<8x128xf32, #tpu.memory_space<vmem>>, vector<8x128xf32>,
    %c0_299 = arith.constant 0 : index
    %c0_300 = arith.constant 0 : index
    %646 = vector.load %arg16[%c0_299, %c0_300] : memref<8x128xf32, #tpu.memory_space<vmem>>, vector<8x128xf32>
    tpu.vector_store %arg16[%c0_299, %c0_300], %617 {strides = array<i32>} : memref<8x128xf32, #tpu.memory_space<vmem>>, vector<8x128xf32>,
    %c0_301 = arith.constant 0 : index
    %c0_302 = arith.constant 0 : index
    %647 = vector.load %arg17[%c0_301, %c0_302] : memref<8x128xf32, #tpu.memory_space<vmem>>, vector<8x128xf32>
    tpu.vector_store %arg17[%c0_301, %c0_302], %644 {strides = array<i32>} : memref<8x128xf32, #tpu.memory_space<vmem>>, vector<8x128xf32>,
    %c0_303 = arith.constant 0 : index
    %c0_304 = arith.constant 0 : index
    %648 = vector.load %arg18[%c0_303, %c0_304] : memref<8x128xf32, #tpu.memory_space<vmem>>, vector<8x128xf32>
    tpu.vector_store %arg18[%c0_303, %c0_304], %642 {strides = array<i32>} : memref<8x128xf32, #tpu.memory_space<vmem>>, vector<8x128xf32>,
    %649 = arith.index_cast %c7_i32_275 : i32 to index
    %c0_305 = arith.constant 0 : index
    %c0_306 = arith.constant 0 : index
    %650 = vector.load %arg9[%649, %c0_305, %c0_306] : memref<8x8x128xf32, #tpu.memory_space<vmem>>, vector<1x8x128xf32>
    %651 = vector.shape_cast %650 : vector<1x8x128xf32> to vector<8x128xf32>
    %652 = vector.shape_cast %619 : vector<8x128xf32> to vector<1x8x128xf32>
    tpu.vector_store %arg9[%649, %c0_305, %c0_306], %652 {strides = array<i32>} : memref<8x8x128xf32, #tpu.memory_space<vmem>>, vector<1x8x128xf32>,
    %653 = arith.index_cast %580 : i32 to index
    %c0_307 = arith.constant 0 : index
    %c0_308 = arith.constant 0 : index
    %654 = vector.load %arg10[%653, %c0_307, %c0_308] : memref<8x8x128xf32, #tpu.memory_space<vmem>>, vector<1x8x128xf32>
    %655 = vector.shape_cast %654 : vector<1x8x128xf32> to vector<8x128xf32>
    %656 = vector.shape_cast %644 : vector<8x128xf32> to vector<1x8x128xf32>
    tpu.vector_store %arg10[%653, %c0_307, %c0_308], %656 {strides = array<i32>} : memref<8x8x128xf32, #tpu.memory_space<vmem>>, vector<1x8x128xf32>,
    %c8_i32 = arith.constant 8 : i32
    %c0_i32_309 = arith.constant 0 : i32
    %657 = arith.cmpi eq, %arg0, %c0_i32_309 : i32
    %658 = arith.extui %657 : i1 to i32
    %c0_i32_310 = arith.constant 0 : i32
    %659 = arith.cmpi ne, %658, %c0_i32_310 : i32
    scf.if %659 {
      %c0_311 = arith.constant 0 : index
      %c0_312 = arith.constant 0 : index
      %660 = vector.load %arg15[%c0_311, %c0_312] : memref<8x128xf32, #tpu.memory_space<vmem>>, vector<8x128xf32>
      %c0_313 = arith.constant 0 : index
      %c0_314 = arith.constant 0 : index
      %c0_315 = arith.constant 0 : index
      %661 = vector.load %arg11[%c0_313, %c0_314, %c0_315] : memref<2x8x128xf32, #tpu.memory_space<vmem>>, vector<1x8x128xf32>
      %662 = vector.shape_cast %661 : vector<1x8x128xf32> to vector<8x128xf32>
      %663 = vector.shape_cast %660 : vector<8x128xf32> to vector<1x8x128xf32>
      tpu.vector_store %arg11[%c0_313, %c0_314, %c0_315], %663 {strides = array<i32>} : memref<2x8x128xf32, #tpu.memory_space<vmem>>, vector<1x8x128xf32>,
      %c0_316 = arith.constant 0 : index
      %c0_317 = arith.constant 0 : index
      %664 = vector.load %arg17[%c0_316, %c0_317] : memref<8x128xf32, #tpu.memory_space<vmem>>, vector<8x128xf32>
      %c1_318 = arith.constant 1 : index
      %c0_319 = arith.constant 0 : index
      %c0_320 = arith.constant 0 : index
      %665 = vector.load %arg11[%c1_318, %c0_319, %c0_320] : memref<2x8x128xf32, #tpu.memory_space<vmem>>, vector<1x8x128xf32>
      %666 = vector.shape_cast %665 : vector<1x8x128xf32> to vector<8x128xf32>
      %667 = vector.shape_cast %664 : vector<8x128xf32> to vector<1x8x128xf32>
      tpu.vector_store %arg11[%c1_318, %c0_319, %c0_320], %667 {strides = array<i32>} : memref<2x8x128xf32, #tpu.memory_space<vmem>>, vector<1x8x128xf32>,
      %c0_321 = arith.constant 0 : index
      %c0_322 = arith.constant 0 : index
      %668 = vector.load %arg16[%c0_321, %c0_322] : memref<8x128xf32, #tpu.memory_space<vmem>>, vector<8x128xf32>
      %c0_323 = arith.constant 0 : index
      %c0_324 = arith.constant 0 : index
      %c0_325 = arith.constant 0 : index
      %669 = vector.load %arg12[%c0_323, %c0_324, %c0_325] : memref<2x8x128xf32, #tpu.memory_space<vmem>>, vector<1x8x128xf32>
      %670 = vector.shape_cast %669 : vector<1x8x128xf32> to vector<8x128xf32>
      %671 = vector.shape_cast %668 : vector<8x128xf32> to vector<1x8x128xf32>
      tpu.vector_store %arg12[%c0_323, %c0_324, %c0_325], %671 {strides = array<i32>} : memref<2x8x128xf32, #tpu.memory_space<vmem>>, vector<1x8x128xf32>,
      %c0_326 = arith.constant 0 : index
      %c0_327 = arith.constant 0 : index
      %672 = vector.load %arg18[%c0_326, %c0_327] : memref<8x128xf32, #tpu.memory_space<vmem>>, vector<8x128xf32>
      %c1_328 = arith.constant 1 : index
      %c0_329 = arith.constant 0 : index
      %c0_330 = arith.constant 0 : index
      %673 = vector.load %arg12[%c1_328, %c0_329, %c0_330] : memref<2x8x128xf32, #tpu.memory_space<vmem>>, vector<1x8x128xf32>
      %674 = vector.shape_cast %673 : vector<1x8x128xf32> to vector<8x128xf32>
      %675 = vector.shape_cast %672 : vector<8x128xf32> to vector<1x8x128xf32>
      tpu.vector_store %arg12[%c1_328, %c0_329, %c0_330], %675 {strides = array<i32>} : memref<2x8x128xf32, #tpu.memory_space<vmem>>, vector<1x8x128xf32>,
    } else {
    }
    return
  }
  func.func @transform_0(%arg0: i32) -> (i32, i32, i32) {
    %c0_i32 = arith.constant 0 : i32
    %c0_i32_0 = arith.constant 0 : i32
    %c0_i32_1 = arith.constant 0 : i32
    return %arg0, %c0_i32, %c0_i32_0 : i32, i32, i32
  }
  func.func @transform_1(%arg0: i32) -> (i32, i32, i32) {
    %c0_i32 = arith.constant 0 : i32
    %c0_i32_0 = arith.constant 0 : i32
    %c0_i32_1 = arith.constant 0 : i32
    return %arg0, %c0_i32, %c0_i32_0 : i32, i32, i32
  }
  func.func @transform_2(%arg0: i32) -> (i32, i32, i32) {
    %c0_i32 = arith.constant 0 : i32
    %0 = arith.subi %c0_i32, %arg0 : i32
    %c0_i32_0 = arith.constant 0 : i32
    %c0_i32_1 = arith.constant 0 : i32
    %c0_i32_2 = arith.constant 0 : i32
    return %0, %c0_i32_0, %c0_i32_1 : i32, i32, i32
  }
  func.func @transform_3(%arg0: i32) -> (i32, i32, i32) {
    %c0_i32 = arith.constant 0 : i32
    %0 = arith.subi %c0_i32, %arg0 : i32
    %c0_i32_0 = arith.constant 0 : i32
    %c0_i32_1 = arith.constant 0 : i32
    %c0_i32_2 = arith.constant 0 : i32
    return %0, %c0_i32_0, %c0_i32_1 : i32, i32, i32
  }
  func.func @transform_4(%arg0: i32) -> (i32, i32, i32) {
    %c0_i32 = arith.constant 0 : i32
    %c0_i32_0 = arith.constant 0 : i32
    %c0_i32_1 = arith.constant 0 : i32
    %c0_i32_2 = arith.constant 0 : i32
    return %c0_i32, %c0_i32_0, %c0_i32_1 : i32, i32, i32
  }
  func.func @transform_5(%arg0: i32) -> (i32, i32, i32) {
    %c0_i32 = arith.constant 0 : i32
    %c0_i32_0 = arith.constant 0 : i32
    %c0_i32_1 = arith.constant 0 : i32
    %c0_i32_2 = arith.constant 0 : i32
    return %c0_i32, %c0_i32_0, %c0_i32_1 : i32, i32, i32
  }
  func.func @transform_6(%arg0: i32) -> (i32, i32, i32) {
    %c0_i32 = arith.constant 0 : i32
    %c0_i32_0 = arith.constant 0 : i32
    %c0_i32_1 = arith.constant 0 : i32
    %c0_i32_2 = arith.constant 0 : i32
    return %c0_i32, %c0_i32_0, %c0_i32_1 : i32, i32, i32
  }
  func.func @transform_7(%arg0: i32) -> (i32, i32, i32) {
    %c0_i32 = arith.constant 0 : i32
    %c0_i32_0 = arith.constant 0 : i32
    %c0_i32_1 = arith.constant 0 : i32
    %c0_i32_2 = arith.constant 0 : i32
    return %c0_i32, %c0_i32_0, %c0_i32_1 : i32, i32, i32
  }
  func.func @transform_8(%arg0: i32) -> (i32, i32, i32) {
    %c0_i32 = arith.constant 0 : i32
    %c0_i32_0 = arith.constant 0 : i32
    %c0_i32_1 = arith.constant 0 : i32
    return %arg0, %c0_i32, %c0_i32_0 : i32, i32, i32
  }
  func.func @transform_9(%arg0: i32) -> (i32, i32, i32) {
    %c0_i32 = arith.constant 0 : i32
    %0 = arith.subi %c0_i32, %arg0 : i32
    %c0_i32_0 = arith.constant 0 : i32
    %c0_i32_1 = arith.constant 0 : i32
    %c0_i32_2 = arith.constant 0 : i32
    return %0, %c0_i32_0, %c0_i32_1 : i32, i32, i32
  }
  func.func @transform_10(%arg0: i32) -> (i32, i32, i32) {
    %c0_i32 = arith.constant 0 : i32
    %c0_i32_0 = arith.constant 0 : i32
    %c0_i32_1 = arith.constant 0 : i32
    %c0_i32_2 = arith.constant 0 : i32
    return %c0_i32, %c0_i32_0, %c0_i32_1 : i32, i32, i32
  }
  func.func @transform_11(%arg0: i32) -> (i32, i32, i32) {
    %c0_i32 = arith.constant 0 : i32
    %c0_i32_0 = arith.constant 0 : i32
    %c0_i32_1 = arith.constant 0 : i32
    %c0_i32_2 = arith.constant 0 : i32
    return %c0_i32, %c0_i32_0, %c0_i32_1 : i32, i32, i32
  }
}

</mosaic_0001>

<bundles_post_ra>
// kernel: blstm_forward.5
= control target key start
LH: loop header
LB: loop body
LE: loop exit
PB: predicated region body
PF: predicated region fallthrough
CT: control target
= control target key end

     0   :  { %10 = vsyncpa [#allocation3], 0  ;;  %s892_s0 = inlined_call_operand.hbm [shape: f32[8,8,128], index: 0, kind: input, shape index: {}]   ;;  %s893_s1 = inlined_call_operand.hbm [shape: f32[8,8,128], index: 1, kind: input, shape index: {}]   ;;  %s894_s2 = inlined_call_operand.hbm [shape: f32[128,32], index: 2, kind: input, shape index: {}]   ;;  %s895_s3 = inlined_call_operand.hbm [shape: f32[128,32], index: 3, kind: input, shape index: {}]   ;;  %s896_s4 = inlined_call_operand.hbm [shape: f32[1,32], index: 4, kind: input, shape index: {}]   ;;  %s897_s5 = inlined_call_operand.hbm [shape: f32[8,8,32], index: 5, kind: output, shape index: {}]  }
   0x1   :  { %11 = vsyncpa [#allocation6], 0 }
   0x2   :  { %12 = vsyncpa [#allocation9], 0 }
   0x3   :  { %13 = vsyncpa [#allocation4], 0  ;;  %s745_s18 = smov [#allocation5]   ;;  %s746_s20 = smov [#allocation8]  }
   0x4   :  { %s31_s19 = sshll.u32 %s745_s18, 4  ;;  %s55_s21 = sshll.u32 %s746_s20, 4  ;;  %s32_s19 = int_to_ptr.vmem [resolvable:$true] %s31_s19  ;;  %s783_s21 = int_to_ptr.vmem [resolvable:$true] %s55_s21 }
   0x5   :  { %s605_s24 = scalar_lea.hbm %s893_s1, 1024 }
   0x6   :  { %p606_p0 = scmp.ne.s32.totalorder %s893_s1, %s605_s24  ;;  %p609_p1 = scmp.lt.u32.totalorder %s605_s24, %s893_s1 }
   0x8   :  { %p611_p2 = pnand %p609_p1, %p606_p0 }
   0xa   :  { %614 = shalt.err (!%p611_p2)
}
   0xb   :  { %s615_s29 = scalar_lea.vmem %s32_s19, 1024  ;;  %p620_p4 = scmp.lt.s32.totalorder %s32_s19, %s32_s19 }
   0xc   :  { %p616_p3 = scmp.ne.s32.totalorder %s32_s19, %s615_s29  ;;  %p621_p5 = scmp.lt.s32.totalorder %s615_s29, %s615_s29 }
   0xe   :  { %p622_p6 = por %p621_p5, %p620_p4 }
  0x10   :  { %p623_p7 = pnand %p622_p6, %p616_p3 }
  0x12   :  { %626 = shalt.err (!%p623_p7)
}
  0x13   :  { %s747_s30 = smov 128   ;;  %s748_s6 = smov 8  }
  0x14   :  { %37 = dma.hbm_to_vmem [thread:$0]  %s893_s1, 1024, %s32_s19, [#allocation6], %s747_s30, %s747_s30, %s748_s6  }
  0x15   :  { %s627_s11 = scalar_lea.hbm %s895_s3, 2048 }
  0x16   :  { %p628_p8 = scmp.ne.s32.totalorder %s895_s3, %s627_s11  ;;  %p631_p9 = scmp.lt.u32.totalorder %s627_s11, %s895_s3 }
  0x18   :  { %p633_p10 = pnand %p631_p9, %p628_p8 }
  0x1a   :  { %636 = shalt.err (!%p633_p10)
}
  0x1b   :  { %s637_s16 = scalar_lea.vmem %s783_s21, 2048  ;;  %p642_p12 = scmp.lt.s32.totalorder %s783_s21, %s783_s21 }
  0x1c   :  { %p638_p11 = scmp.ne.s32.totalorder %s783_s21, %s637_s16  ;;  %p643_p13 = scmp.lt.s32.totalorder %s637_s16, %s637_s16 }
  0x1e   :  { %p644_p0 = por %p643_p13, %p642_p12 }
  0x20   :  { %p645_p1 = pnand %p644_p0, %p638_p11 }
  0x22   :  { %648 = shalt.err (!%p645_p1)
}
  0x23   :  { %61 = dma.hbm_to_vmem [thread:$0]  %s895_s3, 2048, %s783_s21, [#allocation9], %s747_s30, %s747_s30, %s748_s6  }
  0x24   :  { %s749_s18 = smov [#allocation2]   ;;  %s750_s20 = smov [#allocation7]  }
  0x25   :  { %s19_s19 = sshll.u32 %s749_s18, 4  ;;  %s43_s22 = sshll.u32 %s750_s20, 4  ;;  %s20_s19 = int_to_ptr.vmem [resolvable:$true] %s19_s19  ;;  %s820_s22 = int_to_ptr.vmem [resolvable:$true] %s43_s22 }
  0x26   :  { %s649_s25 = scalar_lea.hbm %s892_s0, 1024 }
  0x27   :  { %p650_p2 = scmp.ne.s32.totalorder %s892_s0, %s649_s25  ;;  %p653_p3 = scmp.lt.u32.totalorder %s649_s25, %s892_s0 }
  0x29   :  { %p655_p4 = pnand %p653_p3, %p650_p2 }
  0x2b   :  { %658 = shalt.err (!%p655_p4)
}
  0x2c   :  { %s659_s3 = scalar_lea.vmem %s20_s19, 1024  ;;  %p664_p6 = scmp.lt.s32.totalorder %s20_s19, %s20_s19 }
  0x2d   :  { %p660_p5 = scmp.ne.s32.totalorder %s20_s19, %s659_s3  ;;  %p665_p7 = scmp.lt.s32.totalorder %s659_s3, %s659_s3 }
  0x2f   :  { %p666_p8 = por %p665_p7, %p664_p6 }
  0x31   :  { %p667_p9 = pnand %p666_p8, %p660_p5 }
  0x33   :  { %670 = shalt.err (!%p667_p9)
}
  0x34   :  { %25 = dma.hbm_to_vmem [thread:$0]  %s892_s0, 1024, %s20_s19, [#allocation3], %s747_s30, %s747_s30, %s748_s6  }
  0x35   :  { %s671_s10 = scalar_lea.hbm %s894_s2, 2048 }
  0x36   :  { %p672_p10 = scmp.ne.s32.totalorder %s894_s2, %s671_s10  ;;  %p675_p11 = scmp.lt.u32.totalorder %s671_s10, %s894_s2 }
  0x38   :  { %p677_p12 = pnand %p675_p11, %p672_p10 }
  0x3a   :  { %680 = shalt.err (!%p677_p12)
}
  0x3b   :  { %s681_s15 = scalar_lea.vmem %s820_s22, 2048  ;;  %p686_p0 = scmp.lt.s32.totalorder %s820_s22, %s820_s22 }
  0x3c   :  { %p682_p13 = scmp.ne.s32.totalorder %s820_s22, %s681_s15  ;;  %p687_p1 = scmp.lt.s32.totalorder %s681_s15, %s681_s15 }
  0x3e   :  { %p688_p2 = por %p687_p1, %p686_p0 }
  0x40   :  { %p689_p3 = pnand %p688_p2, %p682_p13 }
  0x42   :  { %692 = shalt.err (!%p689_p3)
}
  0x43   :  { %49 = dma.hbm_to_vmem [thread:$0]  %s894_s2, 2048, %s820_s22, [#allocation6], %s747_s30, %s747_s30, %s748_s6  }
  0x44   :  { %s751_s1 = smov [#allocation10]   ;;  %s693_s20 = scalar_lea.hbm %s896_s4, 16 }
  0x45   :  { %s68_s17 = sshll.u32 %s751_s1, 4  ;;  %p694_p4 = scmp.ne.s32.totalorder %s896_s4, %s693_s20  ;;  %s69_s17 = int_to_ptr.vmem [resolvable:$true] %s68_s17 }
  0x46   :  { %p697_p5 = scmp.lt.u32.totalorder %s693_s20, %s896_s4 }
  0x48   :  { %p699_p6 = pnand %p697_p5, %p694_p4 }
  0x4a   :  { %702 = shalt.err (!%p699_p6)
}
  0x4b   :  { %s703_s27 = scalar_lea.vmem %s69_s17, 16  ;;  %s707_s2 = scalar_lea.vmem %s69_s17, 32 }
  0x4c   :  { %p704_p7 = scmp.ne.s32.totalorder %s69_s17, %s703_s27  ;;  %p708_p8 = scmp.lt.s32.totalorder %s69_s17, %s69_s17 }
  0x4d   :  { %p709_p9 = scmp.lt.s32.totalorder %s707_s2, %s703_s27 }
  0x4f   :  { %p710_p10 = por %p709_p9, %p708_p8 }
  0x51   :  { %p711_p11 = pnand %p710_p10, %p704_p7 }
  0x53   :  { %714 = shalt.err (!%p711_p11)
}
  0x54   :  { %71 = dma.hbm_to_vmem [thread:$0]  %s896_s4, 16, %s69_s17, [#allocation9]  }
  0x55   :  { %737 = dma.done.wait [#allocation3], 1024  }
  0x56   :  { %738 = vsyncadd [#allocation3], 4294966272 }
  0x57   :  { %739 = dma.done.wait [#allocation6], 3072  }
  0x58   :  { %740 = vsyncadd [#allocation6], 4294964224 }
  0x59   :  { %741 = dma.done.wait [#allocation9], 2064  }
  0x5a   :  { %742 = vsyncadd [#allocation9], 4294965232  ;;  %v119_v0 = vld [vmem:[#allocation8] sm:$0xff]  ;;  %v120_v1 = vld [vmem:[#allocation8 + $0x8] sm:$0xff]  ;;  %vm360_vm0 = vcmask 261120   ;;  %s752_s4 = smov [#allocation11]  }
  0x5b   :  { %v95_v2 = vld [vmem:[#allocation7] sm:$0xff]  ;;  %v525_v3 = vpack.c.bf16 %v120_v1, %v119_v0  ;;  %v96_v4 = vld [vmem:[#allocation7 + $0x8] sm:$0xff]  ;;  %v121_v5 = vld [vmem:[#allocation8 + $0x10] sm:$0xff]  ;;  %s374_s29 = sshll.u32 %s752_s4, 4  ;;  %s375_s29 = int_to_ptr.vmem [resolvable:$true] %s374_s29 }
  0x5c   :  { %v122_v6 = vld [vmem:[#allocation8 + $0x18] sm:$0xff]  ;;  %v557_v7 = vpack.c.bf16 %v96_v4, %v95_v2  ;;  %v97_v9 = vld [vmem:[#allocation7 + $0x10] sm:$0xff]  ;;  %v123_v11 = vld [vmem:[#allocation8 + $0x20] sm:$0xff]  ;;  %s715_s3 = scalar_lea.vmem %s375_s29, 1024  ;;  %p720_p13 = scmp.lt.s32.totalorder %s375_s29, %s375_s29 }
  0x5d   :  { %v529_v8 = vpack.c.bf16 %v122_v6, %v121_v5  ;;  %v98_v10 = vld [vmem:[#allocation7 + $0x18] sm:$0xff]  ;;  %526 = vmatprep.subr.bf16.mxu1 %v525_v3  ;;  %v124_v13 = vld [vmem:[#allocation8 + $0x28] sm:$0xff]  ;;  %v99_v14 = vld [vmem:[#allocation7 + $0x20] sm:$0xff]  ;;  %p716_p12 = scmp.ne.s32.totalorder %s375_s29, %s715_s3  ;;  %p721_p0 = scmp.lt.s32.totalorder %s715_s3, %s715_s3 }
  0x5e   :  { %v561_v12 = vpack.c.bf16 %v98_v10, %v97_v9  ;;  %v100_v15 = vld [vmem:[#allocation7 + $0x28] sm:$0xff]  ;;  %558 = vmatprep.subr.bf16.mxu0 %v557_v7  ;;  %528 = vmatpush3.bf16.msra.mxu1 %v525_v3  ;;  %v533_v16 = vpack.c.bf16 %v124_v13, %v123_v11  ;;  %v125_v18 = vld [vmem:[#allocation8 + $0x30] sm:$0xff]  ;;  %v126_v19 = vld [vmem:[#allocation8 + $0x38] sm:$0xff] }
  0x5f   :  { %560 = vmatpush3.bf16.msra.mxu0 %v557_v7  ;;  %530 = vmatprep.subr.bf16.mxu1 %v529_v8  ;;  %v565_v17 = vpack.c.bf16 %v100_v15, %v99_v14  ;;  %v101_v20 = vld [vmem:[#allocation7 + $0x30] sm:$0xff]  ;;  %v102_v21 = vld [vmem:[#allocation7 + $0x38] sm:$0xff]  ;;  %v537_v22 = vpack.c.bf16 %v126_v19, %v125_v18  ;;  %v127_v24 = vld [vmem:[#allocation8 + $0x40] sm:$0xff]  ;;  %p722_p1 = por %p721_p0, %p720_p13 }
  0x60   :  { %562 = vmatprep.subr.bf16.mxu0 %v561_v12  ;;  %v569_v23 = vpack.c.bf16 %v102_v21, %v101_v20  ;;  %v128_v25 = vld [vmem:[#allocation8 + $0x48] sm:$0xff]  ;;  %v111_v26 = vld [vmem:[#allocation5] sm:$0xff]  ;;  %v129_v32 = vld [vmem:[#allocation8 + $0x50] sm:$0xff] }
  0x61   :  { %v103_v27 = vld [vmem:[#allocation7 + $0x40] sm:$0xff]  ;;  %v104_v28 = vld [vmem:[#allocation7 + $0x48] sm:$0xff]  ;;  %469 = vmatprep.mubr.f32.mxu1 %v111_v26  ;;  %v541_v30 = vpack.c.bf16 %v128_v25, %v127_v24  ;;  %v130_v33 = vld [vmem:[#allocation8 + $0x58] sm:$0xff]  ;;  %p723_p2 = pnand %p722_p1, %p716_p12 }
  0x62   :  { %532 = vmatpush3.bf16.msra.mxu1 %v529_v8  ;;  %v87_v29 = vld [vmem:[#allocation2] sm:$0xff]  ;;  %v573_v31 = vpack.c.bf16 %v104_v28, %v103_v27  ;;  %v105_v34 = vld [vmem:[#allocation7 + $0x50] sm:$0xff]  ;;  %v106_v35 = vld [vmem:[#allocation7 + $0x58] sm:$0xff]  ;;  %v545_v36 = vpack.c.bf16 %v130_v33, %v129_v32 }
  0x63   :  { %564 = vmatpush3.bf16.msra.mxu0 %v561_v12  ;;  %534 = vmatprep.subr.bf16.mxu1 %v533_v16  ;;  %v577_v37 = vpack.c.bf16 %v106_v35, %v105_v34  ;;  %v131_v38 = vld [vmem:[#allocation8 + $0x60] sm:$0xff]  ;;  %v132_v39 = vld [vmem:[#allocation8 + $0x68] sm:$0xff]  ;;  %v133_v44 = vld [vmem:[#allocation8 + $0x70] sm:$0xff] }
  0x64   :  { %566 = vmatprep.subr.bf16.mxu0 %v565_v17  ;;  %513 = vmatprep.mubr.f32.mxu0 %v87_v29  ;;  %v107_v40 = vld [vmem:[#allocation7 + $0x60] sm:$0xff]  ;;  %v108_v41 = vld [vmem:[#allocation7 + $0x68] sm:$0xff]  ;;  %v549_v42 = vpack.c.bf16 %v132_v39, %v131_v38  ;;  %v134_v45 = vld [vmem:[#allocation8 + $0x78] sm:$0xff] }
  0x65   :  { %v581_v43 = vpack.c.bf16 %v108_v41, %v107_v40  ;;  %v109_v46 = vld [vmem:[#allocation7 + $0x70] sm:$0xff]  ;;  %v110_v47 = vld [vmem:[#allocation7 + $0x78] sm:$0xff]  ;;  %v553_v48 = vpack.c.bf16 %v134_v45, %v133_v44  ;;  %v112_v50 = vld [vmem:[#allocation5 + $0x8] sm:$0xff] }
  0x66   :  { %536 = vmatpush3.bf16.msra.mxu1 %v533_v16  ;;  %v585_v49 = vpack.c.bf16 %v110_v47, %v109_v46  ;;  %v88_v51 = vld [vmem:[#allocation2 + $0x8] sm:$0xff]  ;;  %v113_v52 = vld [vmem:[#allocation5 + $0x10] sm:$0xff]  ;;  %v114_v54 = vld [vmem:[#allocation5 + $0x18] sm:$0xff] }
  0x67   :  { %568 = vmatpush3.bf16.msra.mxu0 %v565_v17  ;;  %538 = vmatprep.subr.bf16.mxu1 %v537_v22  ;;  %v89_v53 = vld [vmem:[#allocation2 + $0x10] sm:$0xff]  ;;  %v90_v55 = vld [vmem:[#allocation2 + $0x18] sm:$0xff]  ;;  %v115_v56 = vld [vmem:[#allocation5 + $0x20] sm:$0xff] }
  0x68   :  { %570 = vmatprep.subr.bf16.mxu0 %v569_v23  ;;  %v91_v57 = vld [vmem:[#allocation2 + $0x20] sm:$0xff]  ;;  %v116_v58 = vld [vmem:[#allocation5 + $0x28] sm:$0xff]  ;;  %v117_v60 = vld [vmem:[#allocation5 + $0x30] sm:$0xff] }
  0x69   :  { %v92_v59 = vld [vmem:[#allocation2 + $0x28] sm:$0xff]  ;;  %v93_v61 = vld [vmem:[#allocation2 + $0x30] sm:$0xff]  ;;  %v118_v62 = vld [vmem:[#allocation5 + $0x38] sm:$0xff] }
  0x6a   :  { %540 = vmatpush3.bf16.msra.mxu1 %v537_v22  ;;  %v94_v63 = vld [vmem:[#allocation2 + $0x38] sm:$0xff]  ;;  %v388_v2 = vld [vmem:[#allocation10] ss:$0 sm:$0xff] }
  0x6b   :  { %572 = vmatpush3.bf16.msra.mxu0 %v569_v23  ;;  %542 = vmatprep.subr.bf16.mxu1 %v541_v30 }
  0x6c   :  { %574 = vmatprep.subr.bf16.mxu0 %v573_v31 }
  0x6e   :  { %544 = vmatpush3.bf16.msra.mxu1 %v541_v30 }
  0x6f   :  { %576 = vmatpush3.bf16.msra.mxu0 %v573_v31  ;;  %546 = vmatprep.subr.bf16.mxu1 %v545_v36 }
  0x70   :  { %578 = vmatprep.subr.bf16.mxu0 %v577_v37 }
  0x72   :  { %548 = vmatpush3.bf16.msra.mxu1 %v545_v36 }
  0x73   :  { %580 = vmatpush3.bf16.msra.mxu0 %v577_v37  ;;  %550 = vmatprep.subr.bf16.mxu1 %v549_v42 }
  0x74   :  { %582 = vmatprep.subr.bf16.mxu0 %v581_v43 }
  0x76   :  { %552 = vmatpush3.bf16.msra.mxu1 %v549_v42 }
  0x77   :  { %584 = vmatpush3.bf16.msra.mxu0 %v581_v43  ;;  %554 = vmatprep.subr.bf16.mxu1 %v553_v48 }
  0x78   :  { %586 = vmatprep.subr.bf16.mxu0 %v585_v49 }
  0x7a   :  { %556 = vmatpush3.bf16.msra.mxu1 %v553_v48 }
  0x7b   :  { %588 = vmatpush3.bf16.msra.mxu0 %v585_v49 }
  0x7d   :  { %470 = vmatmul.mubr.f32.vlgmr.msra.gmra.mrb[0].mxu1 %v112_v50 }
  0x7e   :  { %514 = vmatmul.mubr.f32.vlgmr.msra.gmra.mrb[0].mxu0 %v88_v51  ;;  %472 = vmatprep.mubr.f32.mxu1 %v113_v52 }
  0x7f   :  { %516 = vmatprep.mubr.f32.mxu0 %v89_v53 }
  0x81   :  { %473 = vmatmul.mubr.f32.gmra.mrb[2].mxu1 %v114_v54 }
  0x82   :  { %517 = vmatmul.mubr.f32.gmra.mrb[2].mxu0 %v90_v55  ;;  %475 = vmatprep.mubr.f32.mxu1 %v115_v56 }
  0x83   :  { %519 = vmatprep.mubr.f32.mxu0 %v91_v57 }
  0x85   :  { %476 = vmatmul.mubr.f32.gmra.mrb[4].mxu1 %v116_v58 }
  0x86   :  { %520 = vmatmul.mubr.f32.gmra.mrb[4].mxu0 %v92_v59  ;;  %478 = vmatprep.mubr.f32.mxu1 %v117_v60 }
  0x87   :  { %522 = vmatprep.mubr.f32.mxu0 %v93_v61 }
  0x89   :  { %479 = vmatmul.mubr.f32.gmra.mrb[6].mxu1 %v118_v62 }
  0x8a   :  { %523 = vmatmul.mubr.f32.gmra.mrb[6].mxu0 %v94_v63 }
 0x150   :  { %v471_v0 = vpop.f32.mrb[0].mxu1 }
 0x151   :  { %v515_v1 = vpop.f32.mrb[0].mxu0  ;;  %v201_v3 = vpop.f32.mrb[1].mxu1 }
 0x152   :  { %v312_v4 = vadd.f32 %v515_v1, %v471_v0  ;;  %v306_v5 = vpop.f32.mrb[1].mxu0 }
 0x153   :  { %v307_v6 = vadd.f32 %v306_v5, %v201_v3 }
 0x154   :  { %v353_v7 = vadd.f32 %v388_v2, %v312_v4  ;;  %v474_v8 = vpop.f32.mrb[2].mxu1 }
 0x155   :  { %v352_v9 = vadd.f32 %v388_v2, %v307_v6  ;;  %v518_v10 = vpop.f32.mrb[2].mxu0  ;;  %v211_v11 = vpop.f32.mrb[3].mxu1 }
 0x156   :  { %362 = vst.msk [vmem:[#allocation11 + $0x8] sm:$0xff] %vm360_vm0, %v353_v7  ;;  %v322_v12 = vadd.f32 %v518_v10, %v474_v8  ;;  %v316_v13 = vpop.f32.mrb[3].mxu0 }
 0x157   :  { %361 = vst.msk [vmem:[#allocation11] sm:$0xff] %vm360_vm0, %v352_v9  ;;  %v317_v14 = vadd.f32 %v316_v13, %v211_v11 }
 0x158   :  { %v355_v15 = vadd.f32 %v388_v2, %v322_v12  ;;  %v477_v16 = vpop.f32.mrb[4].mxu1 }
 0x159   :  { %v354_v17 = vadd.f32 %v388_v2, %v317_v14  ;;  %v521_v18 = vpop.f32.mrb[4].mxu0  ;;  %v221_v19 = vpop.f32.mrb[5].mxu1 }
 0x15a   :  { %364 = vst.msk [vmem:[#allocation11 + $0x18] sm:$0xff] %vm360_vm0, %v355_v15  ;;  %v332_v20 = vadd.f32 %v521_v18, %v477_v16  ;;  %v326_v21 = vpop.f32.mrb[5].mxu0 }
 0x15b   :  { %363 = vst.msk [vmem:[#allocation11 + $0x10] sm:$0xff] %vm360_vm0, %v354_v17  ;;  %v327_v22 = vadd.f32 %v326_v21, %v221_v19 }
 0x15c   :  { %v357_v23 = vadd.f32 %v388_v2, %v332_v20  ;;  %v480_v24 = vpop.f32.mrb[6].mxu1 }
 0x15d   :  { %v356_v25 = vadd.f32 %v388_v2, %v327_v22  ;;  %v524_v26 = vpop.f32.mrb[6].mxu0  ;;  %v231_v27 = vpop.f32.mrb[7].mxu1 }
 0x15e   :  { %366 = vst.msk [vmem:[#allocation11 + $0x28] sm:$0xff] %vm360_vm0, %v357_v23  ;;  %v342_v28 = vadd.f32 %v524_v26, %v480_v24  ;;  %v336_v29 = vpop.f32.mrb[7].mxu0 }
 0x15f   :  { %365 = vst.msk [vmem:[#allocation11 + $0x20] sm:$0xff] %vm360_vm0, %v356_v25  ;;  %v337_v30 = vadd.f32 %v336_v29, %v231_v27 }
 0x160   :  { %v359_v31 = vadd.f32 %v388_v2, %v342_v28 }
 0x161   :  { %v358_v32 = vadd.f32 %v388_v2, %v337_v30 }
 0x162   :  { %368 = vst.msk [vmem:[#allocation11 + $0x38] sm:$0xff] %vm360_vm0, %v359_v31 }
 0x163   :  { %367 = vst.msk [vmem:[#allocation11 + $0x30] sm:$0xff] %vm360_vm0, %v358_v32 }
 0x164   :  { %726 = shalt.err (!%p723_p2)
}
 0x165   :  { %s727_s8 = scalar_lea.hbm %s897_s5, 1024 }
 0x166   :  { %p728_p3 = scmp.ne.s32.totalorder %s897_s5, %s727_s8  ;;  %p731_p4 = scmp.lt.u32.totalorder %s727_s8, %s897_s5 }
 0x168   :  { %p733_p5 = pnand %p731_p4, %p728_p3 }
 0x16a   :  { %736 = shalt.err (!%p733_p5)
}
 0x16b   :  { %380 = dma.vmem_to_hbm [thread:$0]  %s375_s29, 1024, %s897_s5, [#allocation4], %s747_s30, %s747_s30, %s748_s6  }
 0x16c   :  { %743 = dma.done.wait [#allocation4], 1024  }
 0x16d   :  { %744 = vsyncadd [#allocation4], 4294966272 }
 0x16e   :  { %384 = vsyncpa [#allocation3], 1 }
 0x16f   :  { %385 = vsyncpa [#allocation6], 1 }
 0x170   :  { %386 = vsyncpa [#allocation9], 1 }
 0x171   :  { %387 = vsyncpa [#allocation4], 1 }

// kernel: blstm_forward.3
= control target key start
LH: loop header
LB: loop body
LE: loop exit
PB: predicated region body
PF: predicated region fallthrough
CT: control target
= control target key end

     0   :  { %14 = vsyncpa [#allocation9], 0  ;;  %s6700_s0 = inlined_call_operand.hbm [shape: f32[8,8,32], index: 0, kind: input, shape index: {}, may-alias: {0,1}]   ;;  %s6701_s1 = inlined_call_operand.hbm [shape: f32[8,8,32], index: 1, kind: input, shape index: {}, may-alias: {0,1}]   ;;  %s6702_s2 = inlined_call_operand.hbm [shape: f32[2,32,512], index: 2, kind: input, shape index: {}]   ;;  %s6703_s3 = inlined_call_operand.hbm [shape: f32[2,128,512], index: 3, kind: input, shape index: {}]   ;;  %s6704_s4 = inlined_call_operand.hbm [shape: f32[2,1,512], index: 4, kind: input, shape index: {}]   ;;  %s6705_s5 = inlined_call_operand.hbm [shape: f32[8,8,128], index: 5, kind: output, shape index: {0}]   ;;  %s6706_s6 = inlined_call_operand.hbm [shape: f32[8,8,128], index: 6, kind: output, shape index: {1}]   ;;  %s6707_s7 = inlined_call_operand.hbm [shape: f32[2,8,128], index: 7, kind: output, shape index: {2}]   ;;  %s6708_s8 = inlined_call_operand.hbm [shape: f32[2,8,128], index: 8, kind: output, shape index: {3}]  }
   0x1   :  { %15 = vsyncpa [#allocation12], 0 }
   0x2   :  { %16 = vsyncpa [#allocation15], 0 }
   0x3   :  { %17 = vsyncpa [#allocation10], 0 }
   0x4   :  { %18 = vsyncpa [#allocation19], 0 }
   0x5   :  { %19 = vsyncpa [#allocation22], 0  ;;  %s5624_s27 = smov [#allocation11]   ;;  %s5414_s9 = scalar_lea.hbm %s6701_s1, 1024 }
   0x6   :  { %s41_s28 = sshll.u32 %s5624_s27, 4  ;;  %p5415_p0 = scmp.ne.s32.totalorder %s6701_s1, %s5414_s9  ;;  %s42_s28 = int_to_ptr.vmem [resolvable:$true] %s41_s28 }
   0x7   :  { %p5418_p1 = scmp.lt.u32.totalorder %s5414_s9, %s6701_s1 }
   0x9   :  { %p5420_p2 = pnand %p5418_p1, %p5415_p0 }
   0xb   :  { %5423 = shalt.err (!%p5420_p2)
}
   0xc   :  { %s5424_s14 = scalar_lea.vmem %s42_s28, 1024  ;;  %p5429_p4 = scmp.lt.s32.totalorder %s42_s28, %s42_s28 }
   0xd   :  { %p5425_p3 = scmp.ne.s32.totalorder %s42_s28, %s5424_s14  ;;  %p5430_p5 = scmp.lt.s32.totalorder %s5424_s14, %s5424_s14 }
   0xf   :  { %p5431_p6 = por %p5430_p5, %p5429_p4 }
  0x11   :  { %p5432_p7 = pnand %p5431_p6, %p5425_p3 }
  0x13   :  { %5435 = shalt.err (!%p5432_p7)
}
  0x14   :  { %s5625_s15 = smov 128   ;;  %s5626_s16 = smov 8  }
  0x15   :  { %47 = dma.hbm_to_vmem [thread:$0]  %s6701_s1, 1024, %s42_s28, [#allocation12], %s5625_s15, %s5625_s15, %s5626_s16  }
  0x16   :  { %s5627_s19 = smov [#allocation14]   ;;  %s5628_s21 = smov [#allocation8]  }
  0x17   :  { %s65_s20 = sshll.u32 %s5627_s19, 4  ;;  %s25_s22 = sshll.u32 %s5628_s21, 4  ;;  %s66_s20 = int_to_ptr.vmem [resolvable:$true] %s65_s20  ;;  %s26_s22 = int_to_ptr.vmem [resolvable:$true] %s25_s22 }
  0x18   :  { %s5436_s25 = scalar_lea.hbm %s6703_s3, 16384 }
  0x19   :  { %p5437_p8 = scmp.ne.s32.totalorder %s6703_s3, %s5436_s25  ;;  %p5440_p9 = scmp.lt.u32.totalorder %s5436_s25, %s6703_s3 }
  0x1b   :  { %p5442_p10 = pnand %p5440_p9, %p5437_p8 }
  0x1d   :  { %5445 = shalt.err (!%p5442_p10)
}
  0x1e   :  { %s5446_s1 = scalar_lea.vmem %s66_s20, 16384  ;;  %p5451_p12 = scmp.lt.s32.totalorder %s66_s20, %s66_s20 }
  0x1f   :  { %p5447_p11 = scmp.ne.s32.totalorder %s66_s20, %s5446_s1  ;;  %p5452_p13 = scmp.lt.s32.totalorder %s5446_s1, %s5446_s1 }
  0x21   :  { %p5453_p0 = por %p5452_p13, %p5451_p12 }
  0x23   :  { %p5454_p1 = pnand %p5453_p0, %p5447_p11 }
  0x25   :  { %5457 = shalt.err (!%p5454_p1)
}
  0x26   :  { %s5629_s28 = smov 512   ;;  %s5630_s9 = smov 32  }
  0x27   :  { %71 = dma.hbm_to_vmem [thread:$0]  %s6703_s3, 16384, %s66_s20, [#allocation15], %s5629_s28, %s5629_s28, %s5630_s9  }
  0x28   :  { %s5458_s14 = scalar_lea.hbm %s6700_s0, 1024 }
  0x29   :  { %p5459_p2 = scmp.ne.s32.totalorder %s6700_s0, %s5458_s14  ;;  %p5462_p3 = scmp.lt.u32.totalorder %s5458_s14, %s6700_s0 }
  0x2b   :  { %p5464_p4 = pnand %p5462_p3, %p5459_p2 }
  0x2d   :  { %5467 = shalt.err (!%p5464_p4)
}
  0x2e   :  { %s5468_s23 = scalar_lea.vmem %s26_s22, 1024  ;;  %p5473_p6 = scmp.lt.s32.totalorder %s26_s22, %s26_s22 }
  0x2f   :  { %p5469_p5 = scmp.ne.s32.totalorder %s26_s22, %s5468_s23  ;;  %p5474_p7 = scmp.lt.s32.totalorder %s5468_s23, %s5468_s23 }
  0x31   :  { %p5475_p8 = por %p5474_p7, %p5473_p6 }
  0x33   :  { %p5476_p9 = pnand %p5475_p8, %p5469_p5 }
  0x35   :  { %5479 = shalt.err (!%p5476_p9)
}
  0x36   :  { %31 = dma.hbm_to_vmem [thread:$0]  %s6700_s0, 1024, %s26_s22, [#allocation9], %s5625_s15, %s5625_s15, %s5626_s16  }
  0x37   :  { %s5631_s24 = smov [#allocation13]   ;;  %s5632_s26 = smov [#allocation16]  }
  0x38   :  { %s53_s25 = sshll.u32 %s5631_s24, 4  ;;  %s77_s27 = sshll.u32 %s5632_s26, 4  ;;  %s54_s25 = int_to_ptr.vmem [resolvable:$true] %s53_s25  ;;  %s78_s27 = int_to_ptr.vmem [resolvable:$true] %s77_s27 }
  0x39   :  { %s5480_s1 = scalar_lea.hbm %s6702_s2, 4096 }
  0x3a   :  { %p5481_p10 = scmp.ne.s32.totalorder %s6702_s2, %s5480_s1  ;;  %p5484_p11 = scmp.lt.u32.totalorder %s5480_s1, %s6702_s2 }
  0x3c   :  { %p5486_p12 = pnand %p5484_p11, %p5481_p10 }
  0x3e   :  { %5489 = shalt.err (!%p5486_p12)
}
  0x3f   :  { %s5490_s0 = scalar_lea.vmem %s54_s25, 4096  ;;  %p5495_p0 = scmp.lt.s32.totalorder %s54_s25, %s54_s25 }
  0x40   :  { %p5491_p13 = scmp.ne.s32.totalorder %s54_s25, %s5490_s0  ;;  %p5496_p1 = scmp.lt.s32.totalorder %s5490_s0, %s5490_s0 }
  0x42   :  { %p5497_p2 = por %p5496_p1, %p5495_p0 }
  0x44   :  { %p5498_p3 = pnand %p5497_p2, %p5491_p13 }
  0x46   :  { %5501 = shalt.err (!%p5498_p3)
}
  0x47   :  { %59 = dma.hbm_to_vmem [thread:$0]  %s6702_s2, 4096, %s54_s25, [#allocation12], %s5629_s28, %s5629_s28, %s5630_s9  }
  0x48   :  { %s5502_s19 = scalar_lea.hbm %s6704_s4, 128 }
  0x49   :  { %p5503_p4 = scmp.ne.s32.totalorder %s6704_s4, %s5502_s19  ;;  %p5506_p5 = scmp.lt.u32.totalorder %s5502_s19, %s6704_s4 }
  0x4b   :  { %p5508_p6 = pnand %p5506_p5, %p5503_p4 }
  0x4d   :  { %5511 = shalt.err (!%p5508_p6)
}
  0x4e   :  { %s5512_s24 = scalar_lea.vmem %s78_s27, 128  ;;  %p5517_p8 = scmp.lt.s32.totalorder %s78_s27, %s78_s27 }
  0x4f   :  { %p5513_p7 = scmp.ne.s32.totalorder %s78_s27, %s5512_s24  ;;  %p5518_p9 = scmp.lt.s32.totalorder %s5512_s24, %s5512_s24 }
  0x51   :  { %p5519_p10 = por %p5518_p9, %p5517_p8 }
  0x53   :  { %p5520_p11 = pnand %p5519_p10, %p5513_p7 }
  0x55   :  { %5523 = shalt.err (!%p5520_p11)
}
  0x56   :  { %s5633_s2 = smov 64   ;;  %s5634_s28 = smov 4  }
  0x57   :  { %83 = dma.hbm_to_vmem [thread:$0]  %s6704_s4, 128, %s78_s27, [#allocation15], %s5633_s2, %s5633_s2, %s5634_s28  }
  0x58   :  { %5612 = dma.done.wait [#allocation9], 1024  }
  0x59   :  { %5613 = vsyncadd [#allocation9], 4294966272 }
  0x5a   :  { %5614 = dma.done.wait [#allocation12], 5120  }
  0x5b   :  { %5615 = vsyncadd [#allocation12], 4294962176 }
  0x5c   :  { %5616 = dma.done.wait [#allocation15], 16512  }
  0x5d   :  { %5617 = vsyncadd [#allocation15], 4294950784  ;;  %v6709_v0 = vmov 0.0   ;;  %v120_v1 = vld [vmem:[#allocation13 + $0x8] sm:$0xff]  ;;  %v122_v3 = vld [vmem:[#allocation13 + $0x18] sm:$0xff]  ;;  %vm157_vm0 = vcmask 261120  }
  0x5e   :  { %246 = vmatprep.mubr.f32.mxu0 %v6709_v0  ;;  %359 = vmatprep.mubr.f32.mxu1 %v6709_v0  ;;  %v124_v2 = vld [vmem:[#allocation13 + $0x28] sm:$0xff]  ;;  %v126_v5 = vld [vmem:[#allocation13 + $0x38] sm:$0xff]  ;;  %v119_v6 = vld [vmem:[#allocation13] sm:$0xff]  ;;  %s5636_s4 = smov [#allocation17]  }
  0x5f   :  { %v3958_v4 = vpack.c.bf16 %v124_v2, %v120_v1  ;;  %v123_v7 = vld [vmem:[#allocation13 + $0x20] sm:$0xff]  ;;  %v3966_v8 = vpack.c.bf16 %v126_v5, %v122_v3  ;;  %v121_v10 = vld [vmem:[#allocation13 + $0x10] sm:$0xff]  ;;  %v128_v12 = vld [vmem:[#allocation13 + $0x48] sm:$0xff]  ;;  %s3809_s26 = sshll.u32 %s5636_s4, 4  ;;  %s3810_s26 = int_to_ptr.vmem [resolvable:$true] %s3809_s26 }
  0x60   :  { %v3960_v9 = vpack.c.bf16 %v123_v7, %v119_v6  ;;  %v125_v11 = vld [vmem:[#allocation13 + $0x30] sm:$0xff]  ;;  %v132_v14 = vld [vmem:[#allocation13 + $0x68] sm:$0xff]  ;;  %v130_v15 = vld [vmem:[#allocation13 + $0x58] sm:$0xff]  ;;  %s5524_s27 = scalar_lea.vmem %s3810_s26, 1024  ;;  %p5529_p13 = scmp.lt.s32.totalorder %s3810_s26, %s3810_s26 }
  0x61   :  { %3959 = vmatprep.subr.bf16.mxu0 %v3958_v4  ;;  %v3968_v13 = vpack.c.bf16 %v125_v11, %v121_v10  ;;  %v134_v16 = vld [vmem:[#allocation13 + $0x78] sm:$0xff]  ;;  %3967 = vmatprep.subr.bf16.mxu1 %v3966_v8  ;;  %v3962_v17 = vpack.c.bf16 %v132_v14, %v128_v12  ;;  %v127_v19 = vld [vmem:[#allocation13 + $0x40] sm:$0xff]  ;;  %v129_v21 = vld [vmem:[#allocation13 + $0x50] sm:$0xff]  ;;  %p5525_p12 = scmp.ne.s32.totalorder %s3810_s26, %s5524_s27  ;;  %p5530_p0 = scmp.lt.s32.totalorder %s5524_s27, %s5524_s27 }
  0x62   :  { %3961 = vmatpush1.bf16.msra.mxu0 %v3960_v9  ;;  %v3970_v18 = vpack.c.bf16 %v134_v16, %v130_v15  ;;  %v131_v20 = vld [vmem:[#allocation13 + $0x60] sm:$0xff]  ;;  %v133_v23 = vld [vmem:[#allocation13 + $0x70] sm:$0xff]  ;;  %v450_v24 = vld [vmem:[#allocation13 + $0x88] sm:$0xff] }
  0x63   :  { %3969 = vmatpush1.bf16.msra.mxu1 %v3968_v13  ;;  %v3964_v22 = vpack.c.bf16 %v131_v20, %v127_v19  ;;  %3963 = vmatprep.subr.bf16.mxu0 %v3962_v17  ;;  %v3972_v25 = vpack.c.bf16 %v133_v23, %v129_v21  ;;  %v454_v26 = vld [vmem:[#allocation13 + $0xa8] sm:$0xff]  ;;  %v449_v27 = vld [vmem:[#allocation13 + $0x80] sm:$0xff]  ;;  %v452_v32 = vld [vmem:[#allocation13 + $0x98] sm:$0xff]  ;;  %p5531_p1 = por %p5530_p0, %p5529_p13 }
  0x64   :  { %3971 = vmatprep.subr.bf16.mxu1 %v3970_v18  ;;  %v453_v28 = vld [vmem:[#allocation13 + $0xa0] sm:$0xff]  ;;  %v3974_v29 = vpack.c.bf16 %v454_v26, %v450_v24  ;;  %v456_v33 = vld [vmem:[#allocation13 + $0xb8] sm:$0xff]  ;;  %v458_v35 = vld [vmem:[#allocation13 + $0xc8] sm:$0xff] }
  0x65   :  { %v111_v30 = vld [vmem:[#allocation8] sm:$0xff]  ;;  %v3976_v31 = vpack.c.bf16 %v453_v28, %v449_v27  ;;  %v3982_v34 = vpack.c.bf16 %v456_v33, %v452_v32  ;;  %v462_v36 = vld [vmem:[#allocation13 + $0xe8] sm:$0xff]  ;;  %v451_v37 = vld [vmem:[#allocation13 + $0x90] sm:$0xff]  ;;  %p5532_p2 = pnand %p5531_p1, %p5525_p12 }
  0x66   :  { %3965 = vmatpush1.bf16.msra.mxu0 %v3964_v22  ;;  %v3978_v38 = vpack.c.bf16 %v462_v36, %v458_v35  ;;  %v455_v39 = vld [vmem:[#allocation13 + $0xb0] sm:$0xff]  ;;  %v457_v40 = vld [vmem:[#allocation13 + $0xc0] sm:$0xff]  ;;  %v460_v43 = vld [vmem:[#allocation13 + $0xd8] sm:$0xff] }
  0x67   :  { %3973 = vmatpush1.bf16.msra.mxu1 %v3972_v25  ;;  %3975 = vmatprep.subr.bf16.mxu0 %v3974_v29  ;;  %v461_v41 = vld [vmem:[#allocation13 + $0xe0] sm:$0xff]  ;;  %v3984_v42 = vpack.c.bf16 %v455_v39, %v451_v37  ;;  %v112_v44 = vld [vmem:[#allocation8 + $0x8] sm:$0xff]  ;;  %v464_v45 = vld [vmem:[#allocation13 + $0xf8] sm:$0xff] }
  0x68   :  { %3983 = vmatprep.subr.bf16.mxu1 %v3982_v34  ;;  %v459_v46 = vld [vmem:[#allocation13 + $0xd0] sm:$0xff]  ;;  %v3980_v47 = vpack.c.bf16 %v461_v41, %v457_v40  ;;  %v3986_v48 = vpack.c.bf16 %v464_v45, %v460_v43  ;;  %v771_v50 = vld [vmem:[#allocation14 + $0x8] sm:$0xff]  ;;  %v773_v54 = vld [vmem:[#allocation14 + $0x18] sm:$0xff] }
  0x69   :  { %3878 = vmatmul.mubr.msk.f32.vlgmr.msra.gmra.mrb[0].mxu0 %vm157_vm0, %v111_v30  ;;  %v463_v49 = vld [vmem:[#allocation13 + $0xf0] sm:$0xff]  ;;  %v775_v51 = vld [vmem:[#allocation14 + $0x28] sm:$0xff]  ;;  %v777_v55 = vld [vmem:[#allocation14 + $0x38] sm:$0xff] }
  0x6a   :  { %3886 = vmatmul.mubr.msk.f32.vlgmr.msra.gmra.mrb[0].mxu1 %vm157_vm0, %v111_v30  ;;  %3977 = vmatpush1.bf16.msra.mxu0 %v3976_v31  ;;  %v3988_v52 = vpack.c.bf16 %v463_v49, %v459_v46  ;;  %v5763_v53 = vpack.c.bf16 %v775_v51, %v771_v50  ;;  %v5766_v56 = vpack.c.bf16 %v777_v55, %v773_v54  ;;  %v113_v57 = vld [vmem:[#allocation8 + $0x10] sm:$0xff]  ;;  %v114_v58 = vld [vmem:[#allocation8 + $0x18] sm:$0xff]  ;;  %v115_v59 = vld [vmem:[#allocation8 + $0x20] sm:$0xff] }
  0x6b   :  { %252 = vmatprep.mubr.f32.mxu0 %v6709_v0  ;;  %365 = vmatprep.mubr.f32.mxu1 %v6709_v0  ;;  %v116_v60 = vld [vmem:[#allocation8 + $0x28] sm:$0xff]  ;;  %v117_v61 = vld [vmem:[#allocation8 + $0x30] sm:$0xff]  ;;  %v118_v62 = vld [vmem:[#allocation8 + $0x38] sm:$0xff] }
  0x6c   :  { %3979 = vmatprep.subr.bf16.mxu0 %v3978_v38  ;;  %3985 = vmatpush1.bf16.msra.mxu1 %v3984_v42  ;;  %v770_v63 = vld [vmem:[#allocation14] sm:$0xff]  ;;  %v772_v2 = vld [vmem:[#allocation14 + $0x10] sm:$0xff]  ;;  %v779_v4 = vld [vmem:[#allocation14 + $0x48] sm:$0xff] }
  0x6d   :  { %3879 = vmatmul.mubr.msk.f32.gmra.mrb[2].mxu0 %vm157_vm0, %v112_v44  ;;  %3987 = vmatprep.subr.bf16.mxu1 %v3986_v48  ;;  %v774_v1 = vld [vmem:[#allocation14 + $0x20] sm:$0xff]  ;;  %v776_v3 = vld [vmem:[#allocation14 + $0x30] sm:$0xff]  ;;  %v783_v5 = vld [vmem:[#allocation14 + $0x68] sm:$0xff] }
  0x6e   :  { %3887 = vmatmul.mubr.msk.f32.gmra.mrb[2].mxu1 %vm157_vm0, %v112_v44  ;;  %258 = vmatprep.mubr.f32.mxu0 %v6709_v0  ;;  %v440_v6 = vld [vmem:[#allocation11] sm:$0xff]  ;;  %v5796_v7 = vpack.c.bf16 %v774_v1, %v770_v63  ;;  %v781_v8 = vld [vmem:[#allocation14 + $0x58] sm:$0xff]  ;;  %v5799_v10 = vpack.c.bf16 %v776_v3, %v772_v2  ;;  %v5801_v13 = vpack.c.bf16 %v783_v5, %v779_v4  ;;  %v780_v14 = vld [vmem:[#allocation14 + $0x50] sm:$0xff] }
  0x6f   :  { %371 = vmatprep.mubr.f32.mxu1 %v6709_v0  ;;  %3981 = vmatpush1.bf16.msra.mxu0 %v3980_v47  ;;  %v785_v9 = vld [vmem:[#allocation14 + $0x78] sm:$0xff]  ;;  %v778_v11 = vld [vmem:[#allocation14 + $0x40] sm:$0xff]  ;;  %v784_v15 = vld [vmem:[#allocation14 + $0x70] sm:$0xff] }
  0x70   :  { %3989 = vmatpush1.bf16.msra.mxu1 %v3988_v52  ;;  %3991 = vmatprep.subr.bf16.mxu0 %v5763_v53  ;;  %v782_v12 = vld [vmem:[#allocation14 + $0x60] sm:$0xff]  ;;  %v5804_v16 = vpack.c.bf16 %v785_v9, %v781_v8  ;;  %v787_v17 = vld [vmem:[#allocation14 + $0x88] sm:$0xff]  ;;  %v789_v21 = vld [vmem:[#allocation14 + $0x98] sm:$0xff]  ;;  %v5812_v23 = vpack.c.bf16 %v784_v15, %v780_v14 }
  0x71   :  { %3880 = vmatmul.mubr.msk.f32.gmra.mrb[4].mxu0 %vm157_vm0, %v113_v57  ;;  %4023 = vmatprep.subr.bf16.mxu1 %v5766_v56  ;;  %v791_v18 = vld [vmem:[#allocation14 + $0xa8] sm:$0xff]  ;;  %v5808_v20 = vpack.c.bf16 %v782_v12, %v778_v11  ;;  %v793_v22 = vld [vmem:[#allocation14 + $0xb8] sm:$0xff]  ;;  %v786_v24 = vld [vmem:[#allocation14 + $0x80] sm:$0xff] }
  0x72   :  { %3888 = vmatmul.mubr.msk.f32.gmra.mrb[4].mxu1 %vm157_vm0, %v113_v57  ;;  %264 = vmatprep.mubr.f32.mxu0 %v6709_v0  ;;  %v441_v19 = vld [vmem:[#allocation11 + $0x8] sm:$0xff]  ;;  %v790_v25 = vld [vmem:[#allocation14 + $0xa0] sm:$0xff]  ;;  %v5816_v26 = vpack.c.bf16 %v791_v18, %v787_v17  ;;  %v788_v27 = vld [vmem:[#allocation14 + $0x90] sm:$0xff]  ;;  %v5820_v29 = vpack.c.bf16 %v793_v22, %v789_v21 }
  0x73   :  { %377 = vmatprep.mubr.f32.mxu1 %v6709_v0  ;;  %v792_v28 = vld [vmem:[#allocation14 + $0xb0] sm:$0xff]  ;;  %v795_v30 = vld [vmem:[#allocation14 + $0xc8] sm:$0xff]  ;;  %v5824_v33 = vpack.c.bf16 %v790_v25, %v786_v24  ;;  %v797_v34 = vld [vmem:[#allocation14 + $0xd8] sm:$0xff] }
  0x74   :  { %6793 = vst [vmem:[#allocation29_spill] sm:$0xff] %v5816_v26  ;;  %6794 = vst [vmem:[#allocation30_spill] sm:$0xff] %v5820_v29  ;;  %v799_v31 = vld [vmem:[#allocation14 + $0xe8] sm:$0xff]  ;;  %v442_v32 = vld [vmem:[#allocation11 + $0x10] sm:$0xff]  ;;  %v5828_v36 = vpack.c.bf16 %v792_v28, %v788_v27 }
  0x75   :  { %3881 = vmatmul.mubr.msk.f32.gmra.mrb[6].mxu0 %vm157_vm0, %v114_v58  ;;  %6795 = vst [vmem:[#allocation31_spill] sm:$0xff] %v5824_v33  ;;  %v801_v35 = vld [vmem:[#allocation14 + $0xf8] sm:$0xff]  ;;  %v794_v37 = vld [vmem:[#allocation14 + $0xc0] sm:$0xff]  ;;  %v5832_v39 = vpack.c.bf16 %v799_v31, %v795_v30  ;;  %v796_v40 = vld [vmem:[#allocation14 + $0xd0] sm:$0xff] }
  0x76   :  { %3889 = vmatmul.mubr.msk.f32.gmra.mrb[6].mxu1 %vm157_vm0, %v114_v58  ;;  %270 = vmatprep.mubr.f32.mxu0 %v6709_v0  ;;  %6796 = vst [vmem:[#allocation32_spill] sm:$0xff] %v5828_v36  ;;  %v798_v38 = vld [vmem:[#allocation14 + $0xe0] sm:$0xff]  ;;  %v800_v41 = vld [vmem:[#allocation14 + $0xf0] sm:$0xff]  ;;  %v5836_v42 = vpack.c.bf16 %v801_v35, %v797_v34  ;;  %v803_v43 = vld [vmem:[#allocation14 + $0x108] sm:$0xff] }
  0x77   :  { %383 = vmatprep.mubr.f32.mxu1 %v6709_v0  ;;  %6797 = vst [vmem:[#allocation33_spill] sm:$0xff] %v5832_v39  ;;  %v807_v44 = vld [vmem:[#allocation14 + $0x128] sm:$0xff]  ;;  %v443_v45 = vld [vmem:[#allocation11 + $0x18] sm:$0xff]  ;;  %v5840_v46 = vpack.c.bf16 %v798_v38, %v794_v37  ;;  %v5844_v49 = vpack.c.bf16 %v800_v41, %v796_v40  ;;  %v802_v50 = vld [vmem:[#allocation14 + $0x100] sm:$0xff] }
  0x78   :  { %6798 = vst [vmem:[#allocation34_spill] sm:$0xff] %v5836_v42  ;;  %v805_v47 = vld [vmem:[#allocation14 + $0x118] sm:$0xff]  ;;  %v806_v51 = vld [vmem:[#allocation14 + $0x120] sm:$0xff]  ;;  %v5848_v52 = vpack.c.bf16 %v807_v44, %v803_v43  ;;  %v804_v54 = vld [vmem:[#allocation14 + $0x110] sm:$0xff] }
  0x79   :  { %3882 = vmatmul.mubr.msk.f32.gmra.mrb[8].mxu0 %vm157_vm0, %v115_v59  ;;  %6799 = vst [vmem:[#allocation35_spill] sm:$0xff] %v5840_v46  ;;  %v809_v48 = vld [vmem:[#allocation14 + $0x138] sm:$0xff]  ;;  %6800 = vst [vmem:[#allocation36_spill] sm:$0xff] %v5844_v49  ;;  %v808_v55 = vld [vmem:[#allocation14 + $0x130] sm:$0xff] }
  0x7a   :  { %3890 = vmatmul.mubr.msk.f32.gmra.mrb[8].mxu1 %vm157_vm0, %v115_v59  ;;  %276 = vmatprep.mubr.f32.mxu0 %v6709_v0  ;;  %6801 = vst [vmem:[#allocation37_spill] sm:$0xff] %v5848_v52  ;;  %v5852_v57 = vpack.c.bf16 %v809_v48, %v805_v47  ;;  %v811_v58 = vld [vmem:[#allocation14 + $0x148] sm:$0xff]  ;;  %v817_v63 = vld [vmem:[#allocation14 + $0x178] sm:$0xff]  ;;  %v5860_v1 = vpack.c.bf16 %v808_v55, %v804_v54  ;;  %v810_v2 = vld [vmem:[#allocation14 + $0x140] sm:$0xff] }
  0x7b   :  { %389 = vmatprep.mubr.f32.mxu1 %v6709_v0  ;;  %v815_v59 = vld [vmem:[#allocation14 + $0x168] sm:$0xff]  ;;  %v814_v3 = vld [vmem:[#allocation14 + $0x160] sm:$0xff]  ;;  %v812_v5 = vld [vmem:[#allocation14 + $0x150] sm:$0xff] }
  0x7c   :  { %6802 = vst [vmem:[#allocation38_spill] sm:$0xff] %v5852_v57  ;;  %6804 = vst [vmem:[#allocation40_spill] sm:$0xff] %v5860_v1  ;;  %v5864_v4 = vpack.c.bf16 %v815_v59, %v811_v58  ;;  %v819_v9 = vld [vmem:[#allocation14 + $0x188] sm:$0xff]  ;;  %v5872_v14 = vpack.c.bf16 %v814_v3, %v810_v2  ;;  %v821_v15 = vld [vmem:[#allocation14 + $0x198] sm:$0xff] }
  0x7d   :  { %3883 = vmatmul.mubr.msk.f32.gmra.mrb[10].mxu0 %vm157_vm0, %v116_v60  ;;  %v823_v11 = vld [vmem:[#allocation14 + $0x1a8] sm:$0xff]  ;;  %v825_v17 = vld [vmem:[#allocation14 + $0x1b8] sm:$0xff]  ;;  %v822_v21 = vld [vmem:[#allocation14 + $0x1a0] sm:$0xff] }
  0x7e   :  { %3891 = vmatmul.mubr.msk.f32.gmra.mrb[10].mxu1 %vm157_vm0, %v116_v60  ;;  %282 = vmatprep.mubr.f32.mxu0 %v6709_v0  ;;  %v444_v60 = vld [vmem:[#allocation11 + $0x20] sm:$0xff]  ;;  %6805 = vst [vmem:[#allocation41_spill] sm:$0xff] %v5864_v4  ;;  %v445_v12 = vld [vmem:[#allocation11 + $0x28] sm:$0xff]  ;;  %6807 = vst [vmem:[#allocation43_spill] sm:$0xff] %v5872_v14  ;;  %v5880_v22 = vpack.c.bf16 %v823_v11, %v819_v9  ;;  %v5884_v27 = vpack.c.bf16 %v825_v17, %v821_v15 }
  0x7f   :  { %395 = vmatprep.mubr.f32.mxu1 %v6709_v0  ;;  %v820_v24 = vld [vmem:[#allocation14 + $0x190] sm:$0xff]  ;;  %v827_v28 = vld [vmem:[#allocation14 + $0x1c8] sm:$0xff]  ;;  %v829_v34 = vld [vmem:[#allocation14 + $0x1d8] sm:$0xff] }
  0x80   :  { %6809 = vst [vmem:[#allocation45_spill] sm:$0xff] %v5880_v22  ;;  %v824_v25 = vld [vmem:[#allocation14 + $0x1b0] sm:$0xff]  ;;  %6810 = vst [vmem:[#allocation46_spill] sm:$0xff] %v5884_v27  ;;  %v831_v30 = vld [vmem:[#allocation14 + $0x1e8] sm:$0xff] }
  0x81   :  { %3884 = vmatmul.mubr.msk.f32.gmra.mrb[12].mxu0 %vm157_vm0, %v117_v61  ;;  %v446_v31 = vld [vmem:[#allocation11 + $0x30] sm:$0xff]  ;;  %v833_v35 = vld [vmem:[#allocation14 + $0x1f8] sm:$0xff]  ;;  %v5892_v37 = vpack.c.bf16 %v824_v25, %v820_v24  ;;  %v826_v38 = vld [vmem:[#allocation14 + $0x1c0] sm:$0xff]  ;;  %v5896_v41 = vpack.c.bf16 %v831_v30, %v827_v28 }
  0x82   :  { %3892 = vmatmul.mubr.msk.f32.gmra.mrb[12].mxu1 %vm157_vm0, %v117_v61  ;;  %288 = vmatprep.mubr.f32.mxu0 %v6709_v0  ;;  %v5856_v61 = vpack.c.bf16 %v806_v51, %v802_v50  ;;  %v830_v40 = vld [vmem:[#allocation14 + $0x1e0] sm:$0xff]  ;;  %v828_v43 = vld [vmem:[#allocation14 + $0x1d0] sm:$0xff]  ;;  %v836_v47 = vld [vmem:[#allocation14 + $0x208] sm:$0xff] }
  0x83   :  { %401 = vmatprep.mubr.f32.mxu1 %v6709_v0  ;;  %6812 = vst [vmem:[#allocation48_spill] sm:$0xff] %v5892_v37  ;;  %6813 = vst [vmem:[#allocation49_spill] sm:$0xff] %v5896_v41  ;;  %v832_v44 = vld [vmem:[#allocation14 + $0x1f0] sm:$0xff]  ;;  %v840_v48 = vld [vmem:[#allocation14 + $0x228] sm:$0xff]  ;;  %v5904_v51 = vpack.c.bf16 %v830_v40, %v826_v38 }
  0x84   :  { %6803 = vst [vmem:[#allocation39_spill] sm:$0xff] %v5856_v61  ;;  %v447_v50 = vld [vmem:[#allocation11 + $0x38] sm:$0xff]  ;;  %v5908_v58 = vpack.c.bf16 %v832_v44, %v828_v43  ;;  %v835_v59 = vld [vmem:[#allocation14 + $0x200] sm:$0xff]  ;;  %v841_v2 = vld [vmem:[#allocation14 + $0x230] sm:$0xff] }
  0x85   :  { %3885 = vmatmul.mubr.msk.f32.gmra.mrb[14].mxu0 %vm157_vm0, %v118_v62  ;;  %6815 = vst [vmem:[#allocation51_spill] sm:$0xff] %v5904_v51  ;;  %v838_v54 = vld [vmem:[#allocation14 + $0x218] sm:$0xff]  ;;  %v844_v3 = vld [vmem:[#allocation14 + $0x248] sm:$0xff]  ;;  %v845_v24 = vld [vmem:[#allocation14 + $0x250] sm:$0xff] }
  0x86   :  { %3893 = vmatmul.mubr.msk.f32.gmra.mrb[14].mxu1 %vm157_vm0, %v118_v62  ;;  %576 = vmatprep.mubr.f32.mxu0 %v6709_v0  ;;  %v813_v62 = vld [vmem:[#allocation14 + $0x158] sm:$0xff]  ;;  %6816 = vst [vmem:[#allocation52_spill] sm:$0xff] %v5908_v58  ;;  %v849_v28 = vld [vmem:[#allocation14 + $0x270] sm:$0xff]  ;;  %v852_v30 = vld [vmem:[#allocation14 + $0x288] sm:$0xff] }
  0x87   :  { %689 = vmatprep.mubr.f32.mxu1 %v6709_v0  ;;  %v5868_v8 = vpack.c.bf16 %v817_v63, %v813_v62  ;;  %v842_v55 = vld [vmem:[#allocation14 + $0x238] sm:$0xff]  ;;  %v837_v62 = vld [vmem:[#allocation14 + $0x210] sm:$0xff]  ;;  %v5912_v63 = vpack.c.bf16 %v840_v48, %v836_v47  ;;  %v5940_v40 = vpack.c.bf16 %v849_v28, %v845_v24  ;;  %v851_v44 = vld [vmem:[#allocation14 + $0x280] sm:$0xff] }
  0x88   :  { %v846_v9 = vld [vmem:[#allocation14 + $0x258] sm:$0xff]  ;;  %v5924_v15 = vpack.c.bf16 %v841_v2, %v837_v62  ;;  %v855_v47 = vld [vmem:[#allocation14 + $0x2a0] sm:$0xff]  ;;  %v853_v48 = vld [vmem:[#allocation14 + $0x290] sm:$0xff] }
  0x89   :  { %3894 = vmatmul.mubr.msk.f32.vlgmr.msra.gmra.mrb[16].mxu0 %vm157_vm0, %v440_v6  ;;  %6806 = vst [vmem:[#allocation42_spill] sm:$0xff] %v5868_v8  ;;  %6817 = vst [vmem:[#allocation53_spill] sm:$0xff] %v5912_v63  ;;  %v850_v11 = vld [vmem:[#allocation14 + $0x278] sm:$0xff]  ;;  %v5950_v2 = vpack.c.bf16 %v855_v47, %v851_v44  ;;  %v865_v24 = vld [vmem:[#allocation14 + $0x2f0] sm:$0xff] }
  0x8a   :  { %3902 = vmatmul.mubr.msk.f32.vlgmr.msra.gmra.mrb[16].mxu1 %vm157_vm0, %v440_v6  ;;  %3993 = vmatpush1.bf16.msra.mxu0 %v5796_v7  ;;  %v816_v6 = vld [vmem:[#allocation14 + $0x170] sm:$0xff]  ;;  %v5930_v25 = vpack.c.bf16 %v850_v11, %v846_v9  ;;  %v866_v62 = vld [vmem:[#allocation14 + $0x2f8] sm:$0xff]  ;;  %v859_v9 = vld [vmem:[#allocation14 + $0x2c0] sm:$0xff] }
  0x8b   :  { %4025 = vmatpush1.bf16.msra.mxu1 %v5799_v10  ;;  %582 = vmatprep.mubr.f32.mxu0 %v6709_v0  ;;  %v5876_v18 = vpack.c.bf16 %v816_v6, %v812_v5  ;;  %v848_v5 = vld [vmem:[#allocation14 + $0x268] sm:$0xff]  ;;  %v5916_v6 = vpack.c.bf16 %v842_v55, %v838_v54  ;;  %v857_v54 = vld [vmem:[#allocation14 + $0x2b0] sm:$0xff]  ;;  %v863_v11 = vld [vmem:[#allocation14 + $0x2e0] sm:$0xff] }
  0x8c   :  { %695 = vmatprep.mubr.f32.mxu1 %v6709_v0  ;;  %3995 = vmatprep.subr.bf16.mxu0 %v5801_v13  ;;  %v5926_v17 = vpack.c.bf16 %v848_v5, %v844_v3  ;;  %v860_v55 = vld [vmem:[#allocation14 + $0x2c8] sm:$0xff]  ;;  %v5954_v3 = vpack.c.bf16 %v857_v54, %v853_v48  ;;  %v867_v48 = vld [vmem:[#allocation14 + $0x300] sm:$0xff] }
  0x8d   :  { %4027 = vmatprep.subr.bf16.mxu1 %v5804_v16  ;;  %3895 = vmatmul.mubr.msk.f32.gmra.mrb[18].mxu0 %vm157_vm0, %v441_v19  ;;  %6808 = vst [vmem:[#allocation44_spill] sm:$0xff] %v5876_v18  ;;  %6818 = vst [vmem:[#allocation54_spill] sm:$0xff] %v5916_v6  ;;  %v868_v28 = vld [vmem:[#allocation14 + $0x308] sm:$0xff]  ;;  %v871_v54 = vld [vmem:[#allocation14 + $0x320] sm:$0xff] }
  0x8e   :  { %3903 = vmatmul.mubr.msk.f32.gmra.mrb[18].mxu1 %vm157_vm0, %v441_v19  ;;  %3997 = vmatpush1.bf16.msra.mxu0 %v5808_v20  ;;  %v818_v19 = vld [vmem:[#allocation14 + $0x180] sm:$0xff]  ;;  %6819 = vst [vmem:[#allocation55_spill] sm:$0xff] %v5954_v3 }
  0x8f   :  { %4029 = vmatpush1.bf16.msra.mxu1 %v5812_v23  ;;  %588 = vmatprep.mubr.f32.mxu0 %v6709_v0 }
  0x90   :  { %701 = vmatprep.mubr.f32.mxu1 %v6709_v0  ;;  %3999 = vmatprep.subr.bf16.mxu0 %v5816_v26 }
  0x91   :  { %4031 = vmatprep.subr.bf16.mxu1 %v5820_v29  ;;  %3896 = vmatmul.mubr.msk.f32.gmra.mrb[20].mxu0 %vm157_vm0, %v442_v32 }
  0x92   :  { %3904 = vmatmul.mubr.msk.f32.gmra.mrb[20].mxu1 %vm157_vm0, %v442_v32  ;;  %4001 = vmatpush1.bf16.msra.mxu0 %v5824_v33  ;;  %v5888_v32 = vpack.c.bf16 %v822_v21, %v818_v19  ;;  %v843_v19 = vld [vmem:[#allocation14 + $0x240] sm:$0xff] }
  0x93   :  { %4033 = vmatpush1.bf16.msra.mxu1 %v5828_v36  ;;  %594 = vmatprep.mubr.f32.mxu0 %v6709_v0  ;;  %v847_v21 = vld [vmem:[#allocation14 + $0x260] sm:$0xff] }
  0x94   :  { %707 = vmatprep.mubr.f32.mxu1 %v6709_v0  ;;  %4003 = vmatprep.subr.bf16.mxu0 %v5832_v39  ;;  %6811 = vst [vmem:[#allocation47_spill] sm:$0xff] %v5888_v32  ;;  %v5936_v38 = vpack.c.bf16 %v847_v21, %v843_v19  ;;  %v861_v19 = vld [vmem:[#allocation14 + $0x2d0] sm:$0xff] }
  0x95   :  { %4035 = vmatprep.subr.bf16.mxu1 %v5836_v42  ;;  %3897 = vmatmul.mubr.msk.f32.gmra.mrb[22].mxu0 %vm157_vm0, %v443_v45  ;;  %v5966_v44 = vpack.c.bf16 %v865_v24, %v861_v19 }
  0x96   :  { %3905 = vmatmul.mubr.msk.f32.gmra.mrb[22].mxu1 %vm157_vm0, %v443_v45  ;;  %4005 = vmatpush1.bf16.msra.mxu0 %v5840_v46  ;;  %v5900_v45 = vpack.c.bf16 %v833_v35, %v829_v34  ;;  %v854_v34 = vld [vmem:[#allocation14 + $0x298] sm:$0xff] }
  0x97   :  { %4037 = vmatpush1.bf16.msra.mxu1 %v5844_v49  ;;  %600 = vmatprep.mubr.f32.mxu0 %v6709_v0  ;;  %v858_v35 = vld [vmem:[#allocation14 + $0x2b8] sm:$0xff]  ;;  %6823 = vst [vmem:[#allocation59_spill] sm:$0xff] %v5966_v44 }
  0x98   :  { %713 = vmatprep.mubr.f32.mxu1 %v6709_v0  ;;  %4007 = vmatprep.subr.bf16.mxu0 %v5848_v52  ;;  %6814 = vst [vmem:[#allocation50_spill] sm:$0xff] %v5900_v45 }
  0x99   :  { %4039 = vmatprep.subr.bf16.mxu1 %v5852_v57  ;;  %3898 = vmatmul.mubr.msk.f32.gmra.mrb[24].mxu0 %vm157_vm0, %v444_v60 }
  0x9a   :  { %3906 = vmatmul.mubr.msk.f32.gmra.mrb[24].mxu1 %vm157_vm0, %v444_v60  ;;  %4009 = vmatpush1.bf16.msra.mxu0 %v5856_v61  ;;  %v839_v60 = vld [vmem:[#allocation14 + $0x220] sm:$0xff] }
  0x9b   :  { %4041 = vmatpush1.bf16.msra.mxu1 %v5860_v1  ;;  %606 = vmatprep.mubr.f32.mxu0 %v6709_v0 }
  0x9c   :  { %719 = vmatprep.mubr.f32.mxu1 %v6709_v0  ;;  %4011 = vmatprep.subr.bf16.mxu0 %v5864_v4 }
  0x9d   :  { %4043 = vmatprep.subr.bf16.mxu1 %v5868_v8  ;;  %3899 = vmatmul.mubr.msk.f32.gmra.mrb[26].mxu0 %vm157_vm0, %v445_v12 }
  0x9e   :  { %3907 = vmatmul.mubr.msk.f32.gmra.mrb[26].mxu1 %vm157_vm0, %v445_v12  ;;  %4013 = vmatpush1.bf16.msra.mxu0 %v5872_v14  ;;  %v5920_v12 = vpack.c.bf16 %v839_v60, %v835_v59  ;;  %v864_v59 = vld [vmem:[#allocation14 + $0x2e8] sm:$0xff]  ;;  %v862_v60 = vld [vmem:[#allocation14 + $0x2d8] sm:$0xff] }
  0x9f   :  { %4045 = vmatpush1.bf16.msra.mxu1 %v5876_v18  ;;  %612 = vmatprep.mubr.f32.mxu0 %v6709_v0  ;;  %v5956_v5 = vpack.c.bf16 %v864_v59, %v860_v55  ;;  %v5959_v21 = vpack.c.bf16 %v866_v62, %v862_v60  ;;  %v869_v55 = vld [vmem:[#allocation14 + $0x310] sm:$0xff]  ;;  %v876_v62 = vld [vmem:[#allocation14 + $0x348] sm:$0xff] }
  0xa0   :  { %725 = vmatprep.mubr.f32.mxu1 %v6709_v0  ;;  %4015 = vmatprep.subr.bf16.mxu0 %v5880_v22  ;;  %v873_v60 = vld [vmem:[#allocation14 + $0x330] sm:$0xff] }
  0xa1   :  { %4047 = vmatprep.subr.bf16.mxu1 %v5884_v27  ;;  %3900 = vmatmul.mubr.msk.f32.gmra.mrb[28].mxu0 %vm157_vm0, %v446_v31  ;;  %6820 = vst [vmem:[#allocation56_spill] sm:$0xff] %v5956_v5  ;;  %6821 = vst [vmem:[#allocation57_spill] sm:$0xff] %v5959_v21  ;;  %v5978_v19 = vpack.c.bf16 %v873_v60, %v869_v55  ;;  %v883_v60 = vld [vmem:[#allocation14 + $0x380] sm:$0xff] }
  0xa2   :  { %3908 = vmatmul.mubr.msk.f32.gmra.mrb[28].mxu1 %vm157_vm0, %v446_v31  ;;  %4017 = vmatpush1.bf16.msra.mxu0 %v5888_v32  ;;  %v856_v31 = vld [vmem:[#allocation14 + $0x2a8] sm:$0xff] }
  0xa3   :  { %4049 = vmatpush1.bf16.msra.mxu1 %v5892_v37  ;;  %618 = vmatprep.mubr.f32.mxu0 %v6709_v0  ;;  %v5942_v43 = vpack.c.bf16 %v856_v31, %v852_v30  ;;  %v872_v30 = vld [vmem:[#allocation14 + $0x328] sm:$0xff]  ;;  %v870_v31 = vld [vmem:[#allocation14 + $0x318] sm:$0xff]  ;;  %6827 = vst [vmem:[#allocation63_spill] sm:$0xff] %v5978_v19 }
  0xa4   :  { %731 = vmatprep.mubr.f32.mxu1 %v6709_v0  ;;  %4019 = vmatprep.subr.bf16.mxu0 %v5896_v41  ;;  %v5968_v47 = vpack.c.bf16 %v872_v30, %v868_v28  ;;  %v875_v28 = vld [vmem:[#allocation14 + $0x340] sm:$0xff] }
  0xa5   :  { %4051 = vmatprep.subr.bf16.mxu1 %v5900_v45  ;;  %3901 = vmatmul.mubr.msk.f32.gmra.mrb[30].mxu0 %vm157_vm0, %v447_v50  ;;  %v879_v30 = vld [vmem:[#allocation14 + $0x360] sm:$0xff] }
  0xa6   :  { %3909 = vmatmul.mubr.msk.f32.gmra.mrb[30].mxu1 %vm157_vm0, %v447_v50  ;;  %4021 = vmatpush1.bf16.msra.mxu0 %v5904_v51  ;;  %v5945_v50 = vpack.c.bf16 %v858_v35, %v854_v34  ;;  %v874_v34 = vld [vmem:[#allocation14 + $0x338] sm:$0xff]  ;;  %v5962_v35 = vpack.c.bf16 %v863_v11, %v859_v9  ;;  %6824 = vst [vmem:[#allocation60_spill] sm:$0xff] %v5968_v47 }
  0xa7   :  { %4053 = vmatpush1.bf16.msra.mxu1 %v5908_v58  ;;  %971 = vmatprep.mubr.f32.mxu0 %v6709_v0  ;;  %v5971_v59 = vpack.c.bf16 %v874_v34, %v870_v31  ;;  %v878_v9 = vld [vmem:[#allocation14 + $0x358] sm:$0xff]  ;;  %v877_v31 = vld [vmem:[#allocation14 + $0x350] sm:$0xff] }
  0xa8   :  { %1042 = vmatprep.mubr.f32.mxu1 %v6709_v0  ;;  %4055 = vmatprep.subr.bf16.mxu0 %v5912_v63  ;;  %6822 = vst [vmem:[#allocation58_spill] sm:$0xff] %v5962_v35  ;;  %v882_v11 = vld [vmem:[#allocation14 + $0x378] sm:$0xff] }
  0xa9   :  { %4087 = vmatprep.subr.bf16.mxu1 %v5916_v6  ;;  %972 = vmatmul.mubr.f32.vlgmr.msra.gmra.mrb[0].mxu0 %v6709_v0  ;;  %6825 = vst [vmem:[#allocation61_spill] sm:$0xff] %v5971_v59  ;;  %v5983_v34 = vpack.c.bf16 %v882_v11, %v878_v9  ;;  %v885_v9 = vld [vmem:[#allocation14 + $0x390] sm:$0xff] }
  0xaa   :  { %1043 = vmatmul.mubr.f32.vlgmr.msra.gmra.mrb[0].mxu1 %v6709_v0  ;;  %4057 = vmatpush1.bf16.msra.mxu0 %v5920_v12 }
  0xab   :  { %4089 = vmatpush1.bf16.msra.mxu1 %v5924_v15  ;;  %4059 = vmatprep.subr.bf16.mxu0 %v5926_v17  ;;  %6828 = vst [vmem:[#allocation64_spill] sm:$0xff] %v5983_v34 }
  0xac   :  { %4091 = vmatprep.subr.bf16.mxu1 %v5930_v25  ;;  %1122 = vmatprep.mubr.f32.mxu0 %v6709_v0 }
  0xad   :  { %1193 = vmatprep.mubr.f32.mxu1 %v6709_v0  ;;  %v880_v0 = vld [vmem:[#allocation14 + $0x368] sm:$0xff] }
  0xae   :  { %4061 = vmatpush1.bf16.msra.mxu0 %v5936_v38  ;;  %v5980_v24 = vpack.c.bf16 %v880_v0, %v876_v62  ;;  %v887_v62 = vld [vmem:[#allocation14 + $0x3a0] sm:$0xff] }
  0xaf   :  { %4093 = vmatpush1.bf16.msra.mxu1 %v5940_v40  ;;  %4063 = vmatprep.subr.bf16.mxu0 %v5942_v43 }
  0xb0   :  { %4095 = vmatprep.subr.bf16.mxu1 %v5945_v50 }
  0xb2   :  { %4065 = vmatpush1.bf16.msra.mxu0 %v5950_v2 }
  0xb3   :  { %4097 = vmatpush1.bf16.msra.mxu1 %v5954_v3  ;;  %4067 = vmatprep.subr.bf16.mxu0 %v5956_v5  ;;  %v5974_v3 = vpack.c.bf16 %v871_v54, %v867_v48  ;;  %v884_v5 = vld [vmem:[#allocation14 + $0x388] sm:$0xff]  ;;  %v886_v48 = vld [vmem:[#allocation14 + $0x398] sm:$0xff] }
  0xb4   :  { %4099 = vmatprep.subr.bf16.mxu1 %v5959_v21  ;;  %v881_v21 = vld [vmem:[#allocation14 + $0x370] sm:$0xff]  ;;  %v890_v54 = vld [vmem:[#allocation14 + $0x3b8] sm:$0xff] }
  0xb5   :  { %6826 = vst [vmem:[#allocation62_spill] sm:$0xff] %v5974_v3  ;;  %v5990_v0 = vpack.c.bf16 %v881_v21, %v877_v31  ;;  %v5995_v11 = vpack.c.bf16 %v890_v54, %v886_v48  ;;  %v895_v31 = vld [vmem:[#allocation14 + $0x3e0] sm:$0xff]  ;;  %v893_v54 = vld [vmem:[#allocation14 + $0x3d0] sm:$0xff] }
  0xb6   :  { %4069 = vmatpush1.bf16.msra.mxu0 %v5962_v35  ;;  %v888_v35 = vld [vmem:[#allocation14 + $0x3a8] sm:$0xff] }
  0xb7   :  { %4101 = vmatpush1.bf16.msra.mxu1 %v5966_v44  ;;  %4071 = vmatprep.subr.bf16.mxu0 %v5968_v47  ;;  %v5986_v44 = vpack.c.bf16 %v879_v30, %v875_v28  ;;  %v5992_v55 = vpack.c.bf16 %v888_v35, %v884_v5  ;;  %v892_v47 = vld [vmem:[#allocation14 + $0x3c8] sm:$0xff]  ;;  %v894_v28 = vld [vmem:[#allocation14 + $0x3d8] sm:$0xff]  ;;  %v891_v35 = vld [vmem:[#allocation14 + $0x3c0] sm:$0xff] }
  0xb8   :  { %4103 = vmatprep.subr.bf16.mxu1 %v5971_v59  ;;  %v889_v59 = vld [vmem:[#allocation14 + $0x3b0] sm:$0xff]  ;;  %v898_v30 = vld [vmem:[#allocation14 + $0x3f8] sm:$0xff] }
  0xb9   :  { %v6002_v5 = vpack.c.bf16 %v889_v59, %v885_v9  ;;  %v6007_v48 = vpack.c.bf16 %v898_v30, %v894_v28  ;;  %v135_v9 = vld [vmem:[#allocation16] sm:$0xf] }
  0xba   :  { %4073 = vmatpush1.bf16.msra.mxu0 %v5974_v3  ;;  %v896_v3 = vld [vmem:[#allocation14 + $0x3e8] sm:$0xff] }
  0xbb   :  { %4105 = vmatpush1.bf16.msra.mxu1 %v5978_v19  ;;  %4075 = vmatprep.subr.bf16.mxu0 %v5980_v24  ;;  %v5998_v19 = vpack.c.bf16 %v887_v62, %v883_v60  ;;  %v6004_v21 = vpack.c.bf16 %v896_v3, %v892_v47  ;;  %v6010_v60 = vpack.c.bf16 %v895_v31, %v891_v35  ;;  %v6829_v3 = vmov 0.0  }
  0xbc   :  { %4107 = vmatprep.subr.bf16.mxu1 %v5983_v34  ;;  %v897_v34 = vld [vmem:[#allocation14 + $0x3f0] sm:$0xff]  ;;  %v137_v47 = vlaneseq }
  0xbd   :  { %v6014_v59 = vpack.c.bf16 %v897_v34, %v893_v54 }
  0xbe   :  { %4077 = vmatpush1.bf16.msra.mxu0 %v5986_v44  ;;  %v138_v34 = vshrl.u32 %v137_v47, 7 }
  0xbf   :  { %4109 = vmatpush1.bf16.msra.mxu1 %v5990_v0  ;;  %4079 = vmatprep.subr.bf16.mxu0 %v5992_v55 }
  0xc0   :  { %4111 = vmatprep.subr.bf16.mxu1 %v5995_v11  ;;  %v139_v62 = vsub.s32 0, %v138_v34  ;;  %v143_v28 = vsub.s32 1, %v138_v34  ;;  %v151_v54 = vsub.s32 3, %v138_v34  ;;  %v147_v47 = vsub.s32 2, %v138_v34 }
  0xc2   :  { %4081 = vmatpush1.bf16.msra.mxu0 %v5998_v19  ;;  %v6057_v30 = vrot.slane %v135_v9, %v139_v62  ;;  %v6059_v35 = vrot.slane %v135_v9, %v143_v28 }
  0xc3   :  { %4113 = vmatpush1.bf16.msra.mxu1 %v6002_v5  ;;  %4083 = vmatprep.subr.bf16.mxu0 %v6004_v21 }
  0xc4   :  { %4115 = vmatprep.subr.bf16.mxu1 %v6007_v48  ;;  %6830 = vst [vmem:[#allocation65_spill] sm:$0xff] %v6057_v30  ;;  %6831 = vst [vmem:[#allocation66_spill] sm:$0xff] %v6059_v35 }
  0xc6   :  { %4085 = vmatpush1.bf16.msra.mxu0 %v6010_v60 }
  0xc7   :  { %4117 = vmatpush1.bf16.msra.mxu1 %v6014_v59  ;;  %4119 = vmatprep.subr.bf16.mxu0 %v5763_v53 }
  0xc8   :  { %4151 = vmatprep.subr.bf16.mxu1 %v5766_v56 }
  0xc9   :  { %1123 = vmatmul.mubr.f32.vlgmr.msra.gmra.mrb[30].mxu0 %v6829_v3 }
  0xca   :  { %1194 = vmatmul.mubr.f32.vlgmr.msra.gmra.mrb[30].mxu1 %v6829_v3  ;;  %4121 = vmatpush1.bf16.msra.mxu0 %v5796_v7 }
  0xcb   :  { %4153 = vmatpush1.bf16.msra.mxu1 %v5799_v10  ;;  %4123 = vmatprep.subr.bf16.mxu0 %v5801_v13 }
  0xcc   :  { %4155 = vmatprep.subr.bf16.mxu1 %v5804_v16  ;;  %1332 = vmatprep.mubr.f32.mxu0 %v6829_v3 }
  0xcd   :  { %1403 = vmatprep.mubr.f32.mxu1 %v6829_v3 }
  0xce   :  { %4125 = vmatpush1.bf16.msra.mxu0 %v5808_v20 }
  0xcf   :  { %4157 = vmatpush1.bf16.msra.mxu1 %v5812_v23  ;;  %4127 = vmatprep.subr.bf16.mxu0 %v5816_v26 }
  0xd0   :  { %4159 = vmatprep.subr.bf16.mxu1 %v5820_v29 }
  0xd2   :  { %4129 = vmatpush1.bf16.msra.mxu0 %v5824_v33 }
  0xd3   :  { %4161 = vmatpush1.bf16.msra.mxu1 %v5828_v36  ;;  %4131 = vmatprep.subr.bf16.mxu0 %v5832_v39 }
  0xd4   :  { %4163 = vmatprep.subr.bf16.mxu1 %v5836_v42 }
  0xd6   :  { %4133 = vmatpush1.bf16.msra.mxu0 %v5840_v46 }
  0xd7   :  { %4165 = vmatpush1.bf16.msra.mxu1 %v5844_v49  ;;  %4135 = vmatprep.subr.bf16.mxu0 %v5848_v52 }
  0xd8   :  { %4167 = vmatprep.subr.bf16.mxu1 %v5852_v57 }
  0xda   :  { %4137 = vmatpush1.bf16.msra.mxu0 %v5856_v61 }
  0xdb   :  { %4169 = vmatpush1.bf16.msra.mxu1 %v5860_v1  ;;  %4139 = vmatprep.subr.bf16.mxu0 %v5864_v4 }
  0xdc   :  { %4171 = vmatprep.subr.bf16.mxu1 %v5868_v8 }
  0xde   :  { %4141 = vmatpush1.bf16.msra.mxu0 %v5872_v14 }
  0xdf   :  { %4173 = vmatpush1.bf16.msra.mxu1 %v5876_v18  ;;  %4143 = vmatprep.subr.bf16.mxu0 %v5880_v22  ;;  %v6066_v22 = vrot.slane %v135_v9, %v147_v47 }
  0xe0   :  { %4175 = vmatprep.subr.bf16.mxu1 %v5884_v27 }
  0xe1   :  { %6833 = vst [vmem:[#allocation68_spill] sm:$0xff] %v6066_v22 }
  0xe2   :  { %4145 = vmatpush1.bf16.msra.mxu0 %v5888_v32  ;;  %v6063_v32 = vrot.slane %v135_v9, %v151_v54 }
  0xe3   :  { %4177 = vmatpush1.bf16.msra.mxu1 %v5892_v37  ;;  %4147 = vmatprep.subr.bf16.mxu0 %v5896_v41 }
  0xe4   :  { %4179 = vmatprep.subr.bf16.mxu1 %v5900_v45  ;;  %6832 = vst [vmem:[#allocation67_spill] sm:$0xff] %v6063_v32 }
  0xe6   :  { %4149 = vmatpush1.bf16.msra.mxu0 %v5904_v51 }
  0xe7   :  { %4181 = vmatpush1.bf16.msra.mxu1 %v5908_v58  ;;  %4183 = vmatprep.subr.bf16.mxu0 %v5912_v63 }
  0xe8   :  { %4215 = vmatprep.subr.bf16.mxu1 %v5916_v6 }
 0x17c   :  { %v973_v31 = vpop.f32.mrb[0].mxu0 }
 0x17d   :  { %v5014_v45 = vadd.f32 %v973_v31, %v6057_v30  ;;  %v1044_v51 = vpop.f32.mrb[0].mxu1  ;;  %v975_v41 = vpop.f32.mrb[1].mxu0 }
 0x17e   :  { %v5015_v58 = vadd.f32 %v975_v41, %v6059_v35  ;;  %v1046_v63 = vpop.f32.mrb[1].mxu1  ;;  %v5030_v14 = vadd.f32 %v1044_v51, %v6066_v22 }
 0x17f   :  { %v3910_v37 = vmul.f32 -1.442695, %v5014_v45  ;;  %v5031_v27 = vadd.f32 %v1046_v63, %v6063_v32 }
 0x180   :  { %v3911_v6 = vmul.f32 -1.442695, %v5015_v58  ;;  %v466_v58 = vld [vmem:[#allocation16 + $0x4] sm:$0xf] }
 0x181   :  { %5158 = vpow2.f32 %v3910_v37  ;;  %v3912_v18 = vmul.f32 -1.442695, %v5031_v27  ;;  %v6069_v9 = vrot.slane %v466_v58, %v139_v62  ;;  %v6071_v32 = vrot.slane %v466_v58, %v143_v28 }
 0x182   :  { %5160 = vpow2.f32 %v3911_v6  ;;  %v6078_v62 = vrot.slane %v466_v58, %v151_v54 }
 0x183   :  { %5162 = vpow2.f32 %v3912_v18  ;;  %6834 = vst [vmem:[#allocation69_spill] sm:$0xff] %v6069_v9 }
 0x184   :  { %5164 = vtanh.f32 %v5030_v14 }
 0x18b   :  { %v5159_v31 = vpop.eup %5158 }
 0x18c   :  { %v5161_v30 = vpop.eup %5160  ;;  %v1207_v8 = vadd.f32 1.0, %v5159_v31 }
 0x18d   :  { %v1213_v41 = vadd.f32 1.0, %v5161_v30  ;;  %v5163_v45 = vpop.eup %5162 }
 0x18e   :  { %5166 = vrcp.f32 %v1207_v8  ;;  %v5165_v37 = vpop.eup %5164  ;;  %v1220_v63 = vadd.f32 1.0, %v5163_v45 }
 0x18f   :  { %5168 = vrcp.f32 %v1213_v41 }
 0x190   :  { %5170 = vrcp.f32 %v1220_v63 }
 0x198   :  { %v5167_v34 = vpop.eup %5166 }
 0x199   :  { %v5169_v6 = vpop.eup %5168  ;;  %v1224_v35 = vmul.f32 %v5167_v34, %v5165_v37 }
 0x19a   :  { %v1223_v27 = vmul.f32 0.0, %v5169_v6  ;;  %v5171_v34 = vpop.eup %5170 }
 0x19c   :  { %v6073_v51 = vadd.f32 %v1224_v35, %v1223_v27  ;;  %v1124_v31 = vpop.f32.mrb[30].mxu0  ;;  %v6081_v35 = vrot.slane %v466_v58, %v147_v47  ;;  %v6835_v47 = vld [vmem:[#allocation55_spill] sm:$0xff]  ;;  %v6836_v58 = vld [vmem:[#allocation56_spill] sm:$0xff] }
 0x19d   :  { %v5060_v14 = vadd.f32 %v1124_v31, %v6069_v9  ;;  %v1195_v8 = vpop.f32.mrb[30].mxu1  ;;  %v1126_v18 = vpop.f32.mrb[31].mxu0 }
 0x19e   :  { %5172 = vtanh.f32 %v6073_v51  ;;  %v5061_v30 = vadd.f32 %v1126_v18, %v6071_v32  ;;  %v1197_v41 = vpop.f32.mrb[31].mxu1  ;;  %v5076_v27 = vadd.f32 %v1195_v8, %v6081_v35 }
 0x19f   :  { %v3913_v37 = vmul.f32 -1.442695, %v5060_v14  ;;  %v5077_v28 = vadd.f32 %v1197_v41, %v6078_v62 }
 0x1a0   :  { %v3914_v45 = vmul.f32 -1.442695, %v5061_v30 }
 0x1a1   :  { %5174 = vpow2.f32 %v3913_v37  ;;  %v3915_v63 = vmul.f32 -1.442695, %v5077_v28  ;;  %v6838_v37 = vld [vmem:[#allocation58_spill] sm:$0xff] }
 0x1a2   :  { %5176 = vpow2.f32 %v3914_v45  ;;  %v6839_v45 = vld [vmem:[#allocation59_spill] sm:$0xff] }
 0x1a3   :  { %5178 = vpow2.f32 %v3915_v63  ;;  %v6840_v63 = vld [vmem:[#allocation60_spill] sm:$0xff] }
 0x1a4   :  { %5180 = vtanh.f32 %v5076_v27  ;;  %v6841_v27 = vld [vmem:[#allocation61_spill] sm:$0xff] }
 0x1a8   :  { %v5173_v6 = vpop.eup %5172 }
 0x1a9   :  { %v1227_v31 = vmul.f32 %v5173_v6, %v5171_v34 }
 0x1ab   :  { %v5175_v9 = vpop.eup %5174  ;;  %1256 = vst [vmem:[#allocation17] sm:$0xff] %v1227_v31  ;;  %1333 = vmatmul.mubr.f32.vlgmr.msra.gmra.mrb[2].mxu0 %v1227_v31  ;;  %1404 = vmatmul.mubr.f32.vlgmr.msra.gmra.mrb[2].mxu1 %v1227_v31 }
 0x1ac   :  { %v5177_v14 = vpop.eup %5176  ;;  %v1231_v18 = vadd.f32 1.0, %v5175_v9  ;;  %4185 = vmatpush1.bf16.msra.mxu0 %v5920_v12  ;;  %4217 = vmatpush1.bf16.msra.mxu1 %v5924_v15  ;;  %v6837_v9 = vld [vmem:[#allocation57_spill] sm:$0xff] }
 0x1ad   :  { %v1237_v54 = vadd.f32 1.0, %v5177_v14  ;;  %4187 = vmatprep.subr.bf16.mxu0 %v5926_v17  ;;  %4219 = vmatprep.subr.bf16.mxu1 %v5930_v25  ;;  %v5179_v8 = vpop.eup %5178 }
 0x1ae   :  { %5182 = vrcp.f32 %v1231_v18  ;;  %1483 = vmatprep.mubr.f32.mxu0 %v6829_v3  ;;  %1554 = vmatprep.mubr.f32.mxu1 %v6829_v3  ;;  %v5181_v30 = vpop.eup %5180  ;;  %v1244_v6 = vadd.f32 1.0, %v5179_v8  ;;  %v6842_v18 = vld [vmem:[#allocation62_spill] sm:$0xff] }
 0x1af   :  { %5184 = vrcp.f32 %v1237_v54  ;;  %v6843_v54 = vld [vmem:[#allocation63_spill] sm:$0xff] }
 0x1b0   :  { %4189 = vmatpush1.bf16.msra.mxu0 %v5936_v38  ;;  %4221 = vmatpush1.bf16.msra.mxu1 %v5940_v40  ;;  %5186 = vrcp.f32 %v1244_v6  ;;  %v6847_v6 = vld [vmem:[#allocation44_spill] sm:$0xff] }
 0x1b1   :  { %4191 = vmatprep.subr.bf16.mxu0 %v5942_v43  ;;  %4223 = vmatprep.subr.bf16.mxu1 %v5945_v50 }
 0x1b4   :  { %4193 = vmatpush1.bf16.msra.mxu0 %v5950_v2  ;;  %4225 = vmatpush1.bf16.msra.mxu1 %v6835_v47 }
 0x1b5   :  { %4195 = vmatprep.subr.bf16.mxu0 %v6836_v58  ;;  %4227 = vmatprep.subr.bf16.mxu1 %v6837_v9 }
 0x1b8   :  { %v5183_v41 = vpop.eup %5182  ;;  %4197 = vmatpush1.bf16.msra.mxu0 %v6838_v37  ;;  %4229 = vmatpush1.bf16.msra.mxu1 %v6839_v45  ;;  %v6844_v37 = vld [vmem:[#allocation64_spill] sm:$0xff] }
 0x1b9   :  { %v5185_v28 = vpop.eup %5184  ;;  %v1248_v34 = vmul.f32 %v5183_v41, %v5181_v30  ;;  %4199 = vmatprep.subr.bf16.mxu0 %v6840_v63  ;;  %4231 = vmatprep.subr.bf16.mxu1 %v6841_v27 }
 0x1ba   :  { %v1247_v31 = vmul.f32 0.0, %v5185_v28  ;;  %v5187_v8 = vpop.eup %5186  ;;  %v6845_v28 = vld [vmem:[#allocation42_spill] sm:$0xff] }
 0x1bc   :  { %v6102_v14 = vadd.f32 %v1248_v34, %v1247_v31  ;;  %4201 = vmatpush1.bf16.msra.mxu0 %v6842_v18  ;;  %4233 = vmatpush1.bf16.msra.mxu1 %v6843_v54  ;;  %v6846_v34 = vld [vmem:[#allocation43_spill] sm:$0xff]  ;;  %v6848_v31 = vld [vmem:[#allocation45_spill] sm:$0xff] }
 0x1bd   :  { %4203 = vmatprep.subr.bf16.mxu0 %v5980_v24  ;;  %4235 = vmatprep.subr.bf16.mxu1 %v6844_v37 }
 0x1be   :  { %5188 = vtanh.f32 %v6102_v14 }
 0x1c0   :  { %4205 = vmatpush1.bf16.msra.mxu0 %v5986_v44  ;;  %4237 = vmatpush1.bf16.msra.mxu1 %v5990_v0 }
 0x1c1   :  { %4207 = vmatprep.subr.bf16.mxu0 %v5992_v55  ;;  %4239 = vmatprep.subr.bf16.mxu1 %v5995_v11 }
 0x1c4   :  { %4209 = vmatpush1.bf16.msra.mxu0 %v5998_v19  ;;  %4241 = vmatpush1.bf16.msra.mxu1 %v6002_v5 }
 0x1c5   :  { %4211 = vmatprep.subr.bf16.mxu0 %v6004_v21  ;;  %4243 = vmatprep.subr.bf16.mxu1 %v6007_v48 }
 0x1c8   :  { %v5189_v30 = vpop.eup %5188  ;;  %4213 = vmatpush1.bf16.msra.mxu0 %v6010_v60  ;;  %4245 = vmatpush1.bf16.msra.mxu1 %v6014_v59 }
 0x1c9   :  { %v1251_v41 = vmul.f32 %v5189_v30, %v5187_v8  ;;  %4247 = vmatprep.subr.bf16.mxu0 %v5763_v53  ;;  %4279 = vmatprep.subr.bf16.mxu1 %v5766_v56  ;;  %v6849_v8 = vld [vmem:[#allocation46_spill] sm:$0xff]  ;;  %v6850_v30 = vld [vmem:[#allocation47_spill] sm:$0xff] }
 0x1cb   :  { %1258 = vst [vmem:[#allocation18 + $0x38] sm:$0xff] %v1251_v41  ;;  %1484 = vmatmul.mubr.f32.vlgmr.msra.gmra.mrb[28].mxu0 %v1251_v41  ;;  %1555 = vmatmul.mubr.f32.vlgmr.msra.gmra.mrb[28].mxu1 %v1251_v41  ;;  %v6851_v41 = vld [vmem:[#allocation48_spill] sm:$0xff] }
 0x1cc   :  { %4249 = vmatpush1.bf16.msra.mxu0 %v5796_v7  ;;  %4281 = vmatpush1.bf16.msra.mxu1 %v5799_v10 }
 0x1cd   :  { %4251 = vmatprep.subr.bf16.mxu0 %v5801_v13  ;;  %4283 = vmatprep.subr.bf16.mxu1 %v5804_v16 }
 0x1ce   :  { %1694 = vmatprep.mubr.f32.mxu0 %v6829_v3  ;;  %1765 = vmatprep.mubr.f32.mxu1 %v6829_v3 }
 0x1d0   :  { %4253 = vmatpush1.bf16.msra.mxu0 %v5808_v20  ;;  %4285 = vmatpush1.bf16.msra.mxu1 %v5812_v23 }
 0x1d1   :  { %4255 = vmatprep.subr.bf16.mxu0 %v5816_v26  ;;  %4287 = vmatprep.subr.bf16.mxu1 %v5820_v29 }
 0x1d4   :  { %4257 = vmatpush1.bf16.msra.mxu0 %v5824_v33  ;;  %4289 = vmatpush1.bf16.msra.mxu1 %v5828_v36 }
 0x1d5   :  { %4259 = vmatprep.subr.bf16.mxu0 %v5832_v39  ;;  %4291 = vmatprep.subr.bf16.mxu1 %v5836_v42 }
 0x1d8   :  { %4261 = vmatpush1.bf16.msra.mxu0 %v5840_v46  ;;  %4293 = vmatpush1.bf16.msra.mxu1 %v5844_v49  ;;  %v6859_v46 = vld [vmem:[#allocation66_spill] sm:$0xff] }
 0x1d9   :  { %4263 = vmatprep.subr.bf16.mxu0 %v5848_v52  ;;  %4295 = vmatprep.subr.bf16.mxu1 %v5852_v57  ;;  %v6852_v57 = vld [vmem:[#allocation49_spill] sm:$0xff] }
 0x1da   :  { %v6858_v52 = vld [vmem:[#allocation65_spill] sm:$0xff] }
 0x1dc   :  { %4265 = vmatpush1.bf16.msra.mxu0 %v5856_v61  ;;  %4297 = vmatpush1.bf16.msra.mxu1 %v5860_v1  ;;  %v6853_v61 = vld [vmem:[#allocation50_spill] sm:$0xff]  ;;  %v6854_v1 = vld [vmem:[#allocation51_spill] sm:$0xff] }
 0x1dd   :  { %4267 = vmatprep.subr.bf16.mxu0 %v5864_v4  ;;  %4299 = vmatprep.subr.bf16.mxu1 %v6845_v28  ;;  %v6855_v4 = vld [vmem:[#allocation52_spill] sm:$0xff]  ;;  %v6856_v28 = vld [vmem:[#allocation53_spill] sm:$0xff] }
 0x1e0   :  { %4269 = vmatpush1.bf16.msra.mxu0 %v6846_v34  ;;  %4301 = vmatpush1.bf16.msra.mxu1 %v6847_v6  ;;  %v6857_v34 = vld [vmem:[#allocation54_spill] sm:$0xff] }
 0x1e1   :  { %4271 = vmatprep.subr.bf16.mxu0 %v6848_v31  ;;  %4303 = vmatprep.subr.bf16.mxu1 %v6849_v8 }
 0x1e4   :  { %4273 = vmatpush1.bf16.msra.mxu0 %v6850_v30  ;;  %4305 = vmatpush1.bf16.msra.mxu1 %v6851_v41 }
 0x1e5   :  { %4275 = vmatprep.subr.bf16.mxu0 %v6852_v57  ;;  %4307 = vmatprep.subr.bf16.mxu1 %v6853_v61  ;;  %v6860_v61 = vld [vmem:[#allocation67_spill] sm:$0xff] }
 0x1e8   :  { %4277 = vmatpush1.bf16.msra.mxu0 %v6854_v1  ;;  %4309 = vmatpush1.bf16.msra.mxu1 %v6855_v4 }
 0x1e9   :  { %4311 = vmatprep.subr.bf16.mxu0 %v6856_v28  ;;  %4343 = vmatprep.subr.bf16.mxu1 %v6857_v34 }
 0x27e   :  { %v1334_v6 = vpop.f32.mrb[2].mxu0  ;;  %v1405_v31 = vpop.f32.mrb[2].mxu1 }
 0x27f   :  { %v5016_v8 = vadd.f32 %v1334_v6, %v6858_v52  ;;  %v1336_v49 = vpop.f32.mrb[3].mxu0  ;;  %v1407_v30 = vpop.f32.mrb[3].mxu1  ;;  %v5032_v4 = vadd.f32 %v1405_v31, %v6066_v22  ;;  %v6861_v22 = vld [vmem:[#allocation69_spill] sm:$0xff] }
 0x280   :  { %v5017_v41 = vadd.f32 %v1336_v49, %v6859_v46  ;;  %v5033_v1 = vadd.f32 %v1407_v30, %v6860_v61 }
 0x281   :  { %v3916_v42 = vmul.f32 -1.442695, %v5016_v8 }
 0x282   :  { %v3917_v57 = vmul.f32 -1.442695, %v5017_v41  ;;  %v3918_v39 = vmul.f32 -1.442695, %v5033_v1 }
 0x283   :  { %5190 = vpow2.f32 %v3916_v42 }
 0x284   :  { %5192 = vpow2.f32 %v3917_v57 }
 0x285   :  { %5194 = vpow2.f32 %v3918_v39 }
 0x286   :  { %5196 = vtanh.f32 %v5032_v4 }
 0x28d   :  { %v5191_v28 = vpop.eup %5190 }
 0x28e   :  { %v5193_v36 = vpop.eup %5192  ;;  %v1568_v34 = vadd.f32 1.0, %v5191_v28 }
 0x28f   :  { %v1574_v33 = vadd.f32 1.0, %v5193_v36  ;;  %v5195_v6 = vpop.eup %5194 }
 0x290   :  { %5198 = vrcp.f32 %v1568_v34  ;;  %v5197_v52 = vpop.eup %5196  ;;  %v1581_v42 = vadd.f32 1.0, %v5195_v6 }
 0x291   :  { %5200 = vrcp.f32 %v1574_v33 }
 0x292   :  { %5202 = vrcp.f32 %v1581_v42 }
 0x29a   :  { %v5199_v49 = vpop.eup %5198 }
 0x29b   :  { %v5201_v8 = vpop.eup %5200  ;;  %v1585_v41 = vmul.f32 %v5199_v49, %v5197_v52 }
 0x29c   :  { %v1584_v57 = vmul.f32 %v5201_v8, %v6073_v51  ;;  %v5203_v51 = vpop.eup %5202 }
 0x29e   :  { %v6160_v30 = vadd.f32 %v1585_v41, %v1584_v57  ;;  %v1485_v1 = vpop.f32.mrb[28].mxu0  ;;  %v1556_v31 = vpop.f32.mrb[28].mxu1 }
 0x29f   :  { %v5058_v28 = vadd.f32 %v1485_v1, %v6861_v22  ;;  %v1487_v39 = vpop.f32.mrb[29].mxu0  ;;  %v1558_v4 = vpop.f32.mrb[29].mxu1  ;;  %v5074_v8 = vadd.f32 %v1556_v31, %v6081_v35 }
 0x2a0   :  { %v5059_v36 = vadd.f32 %v1487_v39, %v6071_v32  ;;  %5204 = vtanh.f32 %v6160_v30  ;;  %v5075_v52 = vadd.f32 %v1558_v4, %v6078_v62 }
 0x2a1   :  { %v3919_v33 = vmul.f32 -1.442695, %v5058_v28 }
 0x2a2   :  { %v3920_v34 = vmul.f32 -1.442695, %v5059_v36  ;;  %v3921_v49 = vmul.f32 -1.442695, %v5075_v52  ;;  %v6862_v36 = vld [vmem:[#allocation58_spill] sm:$0xff] }
 0x2a3   :  { %5206 = vpow2.f32 %v3919_v33 }
 0x2a4   :  { %5208 = vpow2.f32 %v3920_v34 }
 0x2a5   :  { %5210 = vpow2.f32 %v3921_v49 }
 0x2a6   :  { %5212 = vtanh.f32 %v5074_v8 }
 0x2aa   :  { %v5205_v6 = vpop.eup %5204 }
 0x2ab   :  { %v1588_v41 = vmul.f32 %v5205_v6, %v5203_v51 }
 0x2ad   :  { %v5207_v42 = vpop.eup %5206  ;;  %1618 = vst [vmem:[#allocation17 + $0x8] sm:$0xff] %v1588_v41  ;;  %1695 = vmatmul.mubr.f32.vlgmr.msra.gmra.mrb[4].mxu0 %v1588_v41  ;;  %1766 = vmatmul.mubr.f32.vlgmr.msra.gmra.mrb[4].mxu1 %v1588_v41  ;;  %v6863_v41 = vld [vmem:[#allocation31_spill] sm:$0xff] }
 0x2ae   :  { %v5209_v57 = vpop.eup %5208  ;;  %v1592_v1 = vadd.f32 1.0, %v5207_v42  ;;  %4313 = vmatpush1.bf16.msra.mxu0 %v5920_v12  ;;  %4345 = vmatpush1.bf16.msra.mxu1 %v5924_v15  ;;  %v6864_v42 = vld [vmem:[#allocation32_spill] sm:$0xff] }
 0x2af   :  { %v1598_v28 = vadd.f32 1.0, %v5209_v57  ;;  %4315 = vmatprep.subr.bf16.mxu0 %v5926_v17  ;;  %4347 = vmatprep.subr.bf16.mxu1 %v5930_v25  ;;  %v5211_v31 = vpop.eup %5210  ;;  %v6865_v57 = vld [vmem:[#allocation33_spill] sm:$0xff] }
 0x2b0   :  { %5214 = vrcp.f32 %v1592_v1  ;;  %1845 = vmatprep.mubr.f32.mxu0 %v6829_v3  ;;  %1916 = vmatprep.mubr.f32.mxu1 %v6829_v3  ;;  %v5213_v39 = vpop.eup %5212  ;;  %v1605_v52 = vadd.f32 1.0, %v5211_v31  ;;  %v6866_v1 = vld [vmem:[#allocation34_spill] sm:$0xff]  ;;  %v6868_v31 = vld [vmem:[#allocation36_spill] sm:$0xff] }
 0x2b1   :  { %5216 = vrcp.f32 %v1598_v28  ;;  %v6867_v28 = vld [vmem:[#allocation35_spill] sm:$0xff] }
 0x2b2   :  { %4317 = vmatpush1.bf16.msra.mxu0 %v5936_v38  ;;  %4349 = vmatpush1.bf16.msra.mxu1 %v5940_v40  ;;  %5218 = vrcp.f32 %v1605_v52  ;;  %v6873_v52 = vld [vmem:[#allocation41_spill] sm:$0xff] }
 0x2b3   :  { %4319 = vmatprep.subr.bf16.mxu0 %v5942_v43  ;;  %4351 = vmatprep.subr.bf16.mxu1 %v5945_v50 }
 0x2b6   :  { %4321 = vmatpush1.bf16.msra.mxu0 %v5950_v2  ;;  %4353 = vmatpush1.bf16.msra.mxu1 %v6835_v47 }
 0x2b7   :  { %4323 = vmatprep.subr.bf16.mxu0 %v6836_v58  ;;  %4355 = vmatprep.subr.bf16.mxu1 %v6837_v9 }
 0x2ba   :  { %v5215_v4 = vpop.eup %5214  ;;  %4325 = vmatpush1.bf16.msra.mxu0 %v6862_v36  ;;  %4357 = vmatpush1.bf16.msra.mxu1 %v6839_v45 }
 0x2bb   :  { %v5217_v33 = vpop.eup %5216  ;;  %v1609_v34 = vmul.f32 %v5215_v4, %v5213_v39  ;;  %4327 = vmatprep.subr.bf16.mxu0 %v6840_v63  ;;  %4359 = vmatprep.subr.bf16.mxu1 %v6841_v27  ;;  %v6869_v39 = vld [vmem:[#allocation37_spill] sm:$0xff]  ;;  %v6870_v4 = vld [vmem:[#allocation38_spill] sm:$0xff] }
 0x2bc   :  { %v1608_v51 = vmul.f32 %v5217_v33, %v6102_v14  ;;  %v5219_v14 = vpop.eup %5218  ;;  %v6871_v33 = vld [vmem:[#allocation39_spill] sm:$0xff] }
 0x2be   :  { %v6186_v6 = vadd.f32 %v1609_v34, %v1608_v51  ;;  %4329 = vmatpush1.bf16.msra.mxu0 %v6842_v18  ;;  %4361 = vmatpush1.bf16.msra.mxu1 %v6843_v54  ;;  %v6872_v34 = vld [vmem:[#allocation40_spill] sm:$0xff]  ;;  %v6874_v51 = vld [vmem:[#allocation42_spill] sm:$0xff] }
 0x2bf   :  { %4331 = vmatprep.subr.bf16.mxu0 %v5980_v24  ;;  %4363 = vmatprep.subr.bf16.mxu1 %v6844_v37 }
 0x2c0   :  { %5220 = vtanh.f32 %v6186_v6 }
 0x2c2   :  { %4333 = vmatpush1.bf16.msra.mxu0 %v5986_v44  ;;  %4365 = vmatpush1.bf16.msra.mxu1 %v5990_v0 }
 0x2c3   :  { %4335 = vmatprep.subr.bf16.mxu0 %v5992_v55  ;;  %4367 = vmatprep.subr.bf16.mxu1 %v5995_v11 }
 0x2c6   :  { %4337 = vmatpush1.bf16.msra.mxu0 %v5998_v19  ;;  %4369 = vmatpush1.bf16.msra.mxu1 %v6002_v5 }
 0x2c7   :  { %4339 = vmatprep.subr.bf16.mxu0 %v6004_v21  ;;  %4371 = vmatprep.subr.bf16.mxu1 %v6007_v48 }
 0x2ca   :  { %v5221_v49 = vpop.eup %5220  ;;  %4341 = vmatpush1.bf16.msra.mxu0 %v6010_v60  ;;  %4373 = vmatpush1.bf16.msra.mxu1 %v6014_v59 }
 0x2cb   :  { %v1612_v8 = vmul.f32 %v5221_v49, %v5219_v14  ;;  %4375 = vmatprep.subr.bf16.mxu0 %v5763_v53  ;;  %4407 = vmatprep.subr.bf16.mxu1 %v5766_v56  ;;  %v6875_v14 = vld [vmem:[#allocation43_spill] sm:$0xff]  ;;  %v6876_v49 = vld [vmem:[#allocation44_spill] sm:$0xff] }
 0x2cd   :  { %1620 = vst [vmem:[#allocation18 + $0x30] sm:$0xff] %v1612_v8  ;;  %1846 = vmatmul.mubr.f32.vlgmr.msra.gmra.mrb[26].mxu0 %v1612_v8  ;;  %1917 = vmatmul.mubr.f32.vlgmr.msra.gmra.mrb[26].mxu1 %v1612_v8  ;;  %v6877_v8 = vld [vmem:[#allocation45_spill] sm:$0xff] }
 0x2ce   :  { %4377 = vmatpush1.bf16.msra.mxu0 %v5796_v7  ;;  %4409 = vmatpush1.bf16.msra.mxu1 %v5799_v10 }
 0x2cf   :  { %4379 = vmatprep.subr.bf16.mxu0 %v5801_v13  ;;  %4411 = vmatprep.subr.bf16.mxu1 %v5804_v16 }
 0x2d0   :  { %2056 = vmatprep.mubr.f32.mxu0 %v6829_v3  ;;  %2127 = vmatprep.mubr.f32.mxu1 %v6829_v3 }
 0x2d2   :  { %4381 = vmatpush1.bf16.msra.mxu0 %v5808_v20  ;;  %4413 = vmatpush1.bf16.msra.mxu1 %v5812_v23 }
 0x2d3   :  { %4383 = vmatprep.subr.bf16.mxu0 %v5816_v26  ;;  %4415 = vmatprep.subr.bf16.mxu1 %v5820_v29 }
 0x2d6   :  { %4385 = vmatpush1.bf16.msra.mxu0 %v6863_v41  ;;  %4417 = vmatpush1.bf16.msra.mxu1 %v6864_v42 }
 0x2d7   :  { %4387 = vmatprep.subr.bf16.mxu0 %v6865_v57  ;;  %4419 = vmatprep.subr.bf16.mxu1 %v6866_v1  ;;  %v6887_v1 = vld [vmem:[#allocation65_spill] sm:$0xff] }
 0x2da   :  { %4389 = vmatpush1.bf16.msra.mxu0 %v6867_v28  ;;  %4421 = vmatpush1.bf16.msra.mxu1 %v6868_v31  ;;  %v6878_v28 = vld [vmem:[#allocation46_spill] sm:$0xff]  ;;  %v6879_v31 = vld [vmem:[#allocation47_spill] sm:$0xff] }
 0x2db   :  { %4391 = vmatprep.subr.bf16.mxu0 %v6869_v39  ;;  %4423 = vmatprep.subr.bf16.mxu1 %v6870_v4  ;;  %v6880_v39 = vld [vmem:[#allocation48_spill] sm:$0xff]  ;;  %v6881_v4 = vld [vmem:[#allocation49_spill] sm:$0xff] }
 0x2de   :  { %4393 = vmatpush1.bf16.msra.mxu0 %v6871_v33  ;;  %4425 = vmatpush1.bf16.msra.mxu1 %v6872_v34  ;;  %v6882_v33 = vld [vmem:[#allocation50_spill] sm:$0xff]  ;;  %v6883_v34 = vld [vmem:[#allocation51_spill] sm:$0xff] }
 0x2df   :  { %4395 = vmatprep.subr.bf16.mxu0 %v6873_v52  ;;  %4427 = vmatprep.subr.bf16.mxu1 %v6874_v51  ;;  %v6884_v52 = vld [vmem:[#allocation52_spill] sm:$0xff]  ;;  %v6885_v51 = vld [vmem:[#allocation53_spill] sm:$0xff] }
 0x2e2   :  { %4397 = vmatpush1.bf16.msra.mxu0 %v6875_v14  ;;  %4429 = vmatpush1.bf16.msra.mxu1 %v6876_v49  ;;  %v6886_v14 = vld [vmem:[#allocation54_spill] sm:$0xff] }
 0x2e3   :  { %4399 = vmatprep.subr.bf16.mxu0 %v6877_v8  ;;  %4431 = vmatprep.subr.bf16.mxu1 %v6878_v28 }
 0x2e6   :  { %4401 = vmatpush1.bf16.msra.mxu0 %v6879_v31  ;;  %4433 = vmatpush1.bf16.msra.mxu1 %v6880_v39 }
 0x2e7   :  { %4403 = vmatprep.subr.bf16.mxu0 %v6881_v4  ;;  %4435 = vmatprep.subr.bf16.mxu1 %v6882_v33 }
 0x2ea   :  { %4405 = vmatpush1.bf16.msra.mxu0 %v6883_v34  ;;  %4437 = vmatpush1.bf16.msra.mxu1 %v6884_v52  ;;  %v6888_v52 = vld [vmem:[#allocation68_spill] sm:$0xff] }
 0x2eb   :  { %4439 = vmatprep.subr.bf16.mxu0 %v6885_v51  ;;  %4471 = vmatprep.subr.bf16.mxu1 %v6886_v14 }
 0x380   :  { %v1696_v49 = vpop.f32.mrb[4].mxu0  ;;  %v1767_v8 = vpop.f32.mrb[4].mxu1 }
 0x381   :  { %v5018_v28 = vadd.f32 %v1696_v49, %v6887_v1  ;;  %v1698_v57 = vpop.f32.mrb[5].mxu0  ;;  %v1769_v31 = vpop.f32.mrb[5].mxu1  ;;  %v5034_v41 = vadd.f32 %v1767_v8, %v6888_v52 }
 0x382   :  { %v5019_v39 = vadd.f32 %v1698_v57, %v6859_v46  ;;  %v5035_v34 = vadd.f32 %v1769_v31, %v6860_v61 }
 0x383   :  { %v3922_v42 = vmul.f32 -1.442695, %v5018_v28 }
 0x384   :  { %v3923_v4 = vmul.f32 -1.442695, %v5019_v39  ;;  %v3924_v33 = vmul.f32 -1.442695, %v5035_v34 }
 0x385   :  { %5222 = vpow2.f32 %v3922_v42 }
 0x386   :  { %5224 = vpow2.f32 %v3923_v4 }
 0x387   :  { %5226 = vpow2.f32 %v3924_v33 }
 0x388   :  { %5228 = vtanh.f32 %v5034_v41 }
 0x38f   :  { %v5223_v51 = vpop.eup %5222 }
 0x390   :  { %v5225_v29 = vpop.eup %5224  ;;  %v1930_v14 = vadd.f32 1.0, %v5223_v51 }
 0x391   :  { %v1936_v26 = vadd.f32 1.0, %v5225_v29  ;;  %v5227_v49 = vpop.eup %5226 }
 0x392   :  { %5230 = vrcp.f32 %v1930_v14  ;;  %v5229_v1 = vpop.eup %5228  ;;  %v1943_v42 = vadd.f32 1.0, %v5227_v49 }
 0x393   :  { %5232 = vrcp.f32 %v1936_v26 }
 0x394   :  { %5234 = vrcp.f32 %v1943_v42 }
 0x39c   :  { %v5231_v57 = vpop.eup %5230 }
 0x39d   :  { %v5233_v28 = vpop.eup %5232  ;;  %v1947_v39 = vmul.f32 %v5231_v57, %v5229_v1 }
 0x39e   :  { %v1946_v4 = vmul.f32 %v5233_v28, %v6160_v30  ;;  %v5235_v30 = vpop.eup %5234 }
 0x3a0   :  { %v6244_v31 = vadd.f32 %v1947_v39, %v1946_v4  ;;  %v1847_v34 = vpop.f32.mrb[26].mxu0  ;;  %v1918_v8 = vpop.f32.mrb[26].mxu1 }
 0x3a1   :  { %v5056_v51 = vadd.f32 %v1847_v34, %v6861_v22  ;;  %v1849_v33 = vpop.f32.mrb[27].mxu0  ;;  %v1920_v41 = vpop.f32.mrb[27].mxu1  ;;  %v5072_v28 = vadd.f32 %v1918_v8, %v6081_v35 }
 0x3a2   :  { %v5057_v29 = vadd.f32 %v1849_v33, %v6071_v32  ;;  %5236 = vtanh.f32 %v6244_v31  ;;  %v5073_v1 = vadd.f32 %v1920_v41, %v6078_v62 }
 0x3a3   :  { %v3925_v26 = vmul.f32 -1.442695, %v5056_v51 }
 0x3a4   :  { %v3926_v14 = vmul.f32 -1.442695, %v5057_v29  ;;  %v3927_v57 = vmul.f32 -1.442695, %v5073_v1 }
 0x3a5   :  { %5238 = vpow2.f32 %v3925_v26 }
 0x3a6   :  { %5240 = vpow2.f32 %v3926_v14 }
 0x3a7   :  { %5242 = vpow2.f32 %v3927_v57 }
 0x3a8   :  { %5244 = vtanh.f32 %v5072_v28  ;;  %v6889_v28 = vld [vmem:[#allocation29_spill] sm:$0xff] }
 0x3ac   :  { %v5237_v49 = vpop.eup %5236 }
 0x3ad   :  { %v1950_v39 = vmul.f32 %v5237_v49, %v5235_v30 }
 0x3af   :  { %v5239_v42 = vpop.eup %5238  ;;  %1980 = vst [vmem:[#allocation17 + $0x10] sm:$0xff] %v1950_v39  ;;  %2057 = vmatmul.mubr.f32.vlgmr.msra.gmra.mrb[6].mxu0 %v1950_v39  ;;  %2128 = vmatmul.mubr.f32.vlgmr.msra.gmra.mrb[6].mxu1 %v1950_v39  ;;  %v6890_v39 = vld [vmem:[#allocation30_spill] sm:$0xff] }
 0x3b0   :  { %v5241_v4 = vpop.eup %5240  ;;  %v1954_v34 = vadd.f32 1.0, %v5239_v42  ;;  %4441 = vmatpush1.bf16.msra.mxu0 %v5920_v12  ;;  %4473 = vmatpush1.bf16.msra.mxu1 %v5924_v15  ;;  %v6891_v42 = vld [vmem:[#allocation31_spill] sm:$0xff] }
 0x3b1   :  { %v1960_v51 = vadd.f32 1.0, %v5241_v4  ;;  %4443 = vmatprep.subr.bf16.mxu0 %v5926_v17  ;;  %4475 = vmatprep.subr.bf16.mxu1 %v5930_v25  ;;  %v5243_v8 = vpop.eup %5242  ;;  %v6892_v4 = vld [vmem:[#allocation32_spill] sm:$0xff] }
 0x3b2   :  { %5246 = vrcp.f32 %v1954_v34  ;;  %2207 = vmatprep.mubr.f32.mxu0 %v6829_v3  ;;  %2278 = vmatprep.mubr.f32.mxu1 %v6829_v3  ;;  %v5245_v33 = vpop.eup %5244  ;;  %v1967_v14 = vadd.f32 1.0, %v5243_v8  ;;  %v6893_v34 = vld [vmem:[#allocation33_spill] sm:$0xff]  ;;  %v6895_v8 = vld [vmem:[#allocation35_spill] sm:$0xff] }
 0x3b3   :  { %5248 = vrcp.f32 %v1960_v51  ;;  %v6894_v51 = vld [vmem:[#allocation34_spill] sm:$0xff] }
 0x3b4   :  { %4445 = vmatpush1.bf16.msra.mxu0 %v5936_v38  ;;  %4477 = vmatpush1.bf16.msra.mxu1 %v5940_v40  ;;  %5250 = vrcp.f32 %v1967_v14  ;;  %v6900_v14 = vld [vmem:[#allocation40_spill] sm:$0xff] }
 0x3b5   :  { %4447 = vmatprep.subr.bf16.mxu0 %v5942_v43  ;;  %4479 = vmatprep.subr.bf16.mxu1 %v5945_v50 }
 0x3b8   :  { %4449 = vmatpush1.bf16.msra.mxu0 %v5950_v2  ;;  %4481 = vmatpush1.bf16.msra.mxu1 %v6835_v47 }
 0x3b9   :  { %4451 = vmatprep.subr.bf16.mxu0 %v6836_v58  ;;  %4483 = vmatprep.subr.bf16.mxu1 %v6837_v9 }
 0x3bc   :  { %v5247_v41 = vpop.eup %5246  ;;  %4453 = vmatpush1.bf16.msra.mxu0 %v6862_v36  ;;  %4485 = vmatpush1.bf16.msra.mxu1 %v6839_v45 }
 0x3bd   :  { %v5249_v29 = vpop.eup %5248  ;;  %v1971_v26 = vmul.f32 %v5247_v41, %v5245_v33  ;;  %4455 = vmatprep.subr.bf16.mxu0 %v6840_v63  ;;  %4487 = vmatprep.subr.bf16.mxu1 %v6841_v27  ;;  %v6896_v33 = vld [vmem:[#allocation36_spill] sm:$0xff]  ;;  %v6897_v41 = vld [vmem:[#allocation37_spill] sm:$0xff] }
 0x3be   :  { %v1970_v1 = vmul.f32 %v5249_v29, %v6186_v6  ;;  %v5251_v6 = vpop.eup %5250  ;;  %v6898_v29 = vld [vmem:[#allocation38_spill] sm:$0xff] }
 0x3c0   :  { %v6270_v30 = vadd.f32 %v1971_v26, %v1970_v1  ;;  %4457 = vmatpush1.bf16.msra.mxu0 %v6842_v18  ;;  %4489 = vmatpush1.bf16.msra.mxu1 %v6843_v54  ;;  %v6899_v26 = vld [vmem:[#allocation39_spill] sm:$0xff]  ;;  %v6901_v1 = vld [vmem:[#allocation41_spill] sm:$0xff] }
 0x3c1   :  { %4459 = vmatprep.subr.bf16.mxu0 %v5980_v24  ;;  %4491 = vmatprep.subr.bf16.mxu1 %v6844_v37 }
 0x3c2   :  { %5252 = vtanh.f32 %v6270_v30 }
 0x3c4   :  { %4461 = vmatpush1.bf16.msra.mxu0 %v5986_v44  ;;  %4493 = vmatpush1.bf16.msra.mxu1 %v5990_v0 }
 0x3c5   :  { %4463 = vmatprep.subr.bf16.mxu0 %v5992_v55  ;;  %4495 = vmatprep.subr.bf16.mxu1 %v5995_v11 }
 0x3c8   :  { %4465 = vmatpush1.bf16.msra.mxu0 %v5998_v19  ;;  %4497 = vmatpush1.bf16.msra.mxu1 %v6002_v5 }
 0x3c9   :  { %4467 = vmatprep.subr.bf16.mxu0 %v6004_v21  ;;  %4499 = vmatprep.subr.bf16.mxu1 %v6007_v48 }
 0x3cc   :  { %v5253_v49 = vpop.eup %5252  ;;  %4469 = vmatpush1.bf16.msra.mxu0 %v6010_v60  ;;  %4501 = vmatpush1.bf16.msra.mxu1 %v6014_v59 }
 0x3cd   :  { %v1974_v57 = vmul.f32 %v5253_v49, %v5251_v6  ;;  %4503 = vmatprep.subr.bf16.mxu0 %v5763_v53  ;;  %4535 = vmatprep.subr.bf16.mxu1 %v5766_v56  ;;  %v6902_v6 = vld [vmem:[#allocation42_spill] sm:$0xff]  ;;  %v6903_v49 = vld [vmem:[#allocation43_spill] sm:$0xff] }
 0x3cf   :  { %1982 = vst [vmem:[#allocation18 + $0x28] sm:$0xff] %v1974_v57  ;;  %2208 = vmatmul.mubr.f32.vlgmr.msra.gmra.mrb[24].mxu0 %v1974_v57  ;;  %2279 = vmatmul.mubr.f32.vlgmr.msra.gmra.mrb[24].mxu1 %v1974_v57  ;;  %v6904_v57 = vld [vmem:[#allocation44_spill] sm:$0xff] }
 0x3d0   :  { %4505 = vmatpush1.bf16.msra.mxu0 %v5796_v7  ;;  %4537 = vmatpush1.bf16.msra.mxu1 %v5799_v10 }
 0x3d1   :  { %4507 = vmatprep.subr.bf16.mxu0 %v5801_v13  ;;  %4539 = vmatprep.subr.bf16.mxu1 %v5804_v16 }
 0x3d2   :  { %2418 = vmatprep.mubr.f32.mxu0 %v6829_v3  ;;  %2489 = vmatprep.mubr.f32.mxu1 %v6829_v3 }
 0x3d4   :  { %4509 = vmatpush1.bf16.msra.mxu0 %v5808_v20  ;;  %4541 = vmatpush1.bf16.msra.mxu1 %v5812_v23 }
 0x3d5   :  { %4511 = vmatprep.subr.bf16.mxu0 %v6889_v28  ;;  %4543 = vmatprep.subr.bf16.mxu1 %v6890_v39 }
 0x3d8   :  { %4513 = vmatpush1.bf16.msra.mxu0 %v6891_v42  ;;  %4545 = vmatpush1.bf16.msra.mxu1 %v6892_v4 }
 0x3d9   :  { %4515 = vmatprep.subr.bf16.mxu0 %v6893_v34  ;;  %4547 = vmatprep.subr.bf16.mxu1 %v6894_v51  ;;  %v6905_v51 = vld [vmem:[#allocation45_spill] sm:$0xff] }
 0x3da   :  { %v6915_v34 = vld [vmem:[#allocation65_spill] sm:$0xff] }
 0x3dc   :  { %4517 = vmatpush1.bf16.msra.mxu0 %v6895_v8  ;;  %4549 = vmatpush1.bf16.msra.mxu1 %v6896_v33  ;;  %v6906_v8 = vld [vmem:[#allocation46_spill] sm:$0xff]  ;;  %v6907_v33 = vld [vmem:[#allocation47_spill] sm:$0xff] }
 0x3dd   :  { %4519 = vmatprep.subr.bf16.mxu0 %v6897_v41  ;;  %4551 = vmatprep.subr.bf16.mxu1 %v6898_v29  ;;  %v6908_v41 = vld [vmem:[#allocation48_spill] sm:$0xff]  ;;  %v6909_v29 = vld [vmem:[#allocation49_spill] sm:$0xff] }
 0x3e0   :  { %4521 = vmatpush1.bf16.msra.mxu0 %v6899_v26  ;;  %4553 = vmatpush1.bf16.msra.mxu1 %v6900_v14  ;;  %v6910_v26 = vld [vmem:[#allocation50_spill] sm:$0xff]  ;;  %v6911_v14 = vld [vmem:[#allocation51_spill] sm:$0xff] }
 0x3e1   :  { %4523 = vmatprep.subr.bf16.mxu0 %v6901_v1  ;;  %4555 = vmatprep.subr.bf16.mxu1 %v6902_v6  ;;  %v6912_v1 = vld [vmem:[#allocation52_spill] sm:$0xff]  ;;  %v6913_v6 = vld [vmem:[#allocation53_spill] sm:$0xff] }
 0x3e4   :  { %4525 = vmatpush1.bf16.msra.mxu0 %v6903_v49  ;;  %4557 = vmatpush1.bf16.msra.mxu1 %v6904_v57  ;;  %v6914_v49 = vld [vmem:[#allocation54_spill] sm:$0xff] }
 0x3e5   :  { %4527 = vmatprep.subr.bf16.mxu0 %v6905_v51  ;;  %4559 = vmatprep.subr.bf16.mxu1 %v6906_v8 }
 0x3e8   :  { %4529 = vmatpush1.bf16.msra.mxu0 %v6907_v33  ;;  %4561 = vmatpush1.bf16.msra.mxu1 %v6908_v41 }
 0x3e9   :  { %4531 = vmatprep.subr.bf16.mxu0 %v6909_v29  ;;  %4563 = vmatprep.subr.bf16.mxu1 %v6910_v26 }
 0x3ec   :  { %4533 = vmatpush1.bf16.msra.mxu0 %v6911_v14  ;;  %4565 = vmatpush1.bf16.msra.mxu1 %v6912_v1 }
 0x3ed   :  { %4567 = vmatprep.subr.bf16.mxu0 %v6913_v6  ;;  %4599 = vmatprep.subr.bf16.mxu1 %v6914_v49 }
 0x482   :  { %v2058_v57 = vpop.f32.mrb[6].mxu0  ;;  %v2129_v51 = vpop.f32.mrb[6].mxu1 }
 0x483   :  { %v5020_v8 = vadd.f32 %v2058_v57, %v6915_v34  ;;  %v2060_v4 = vpop.f32.mrb[7].mxu0  ;;  %v2131_v33 = vpop.f32.mrb[7].mxu1  ;;  %v5036_v1 = vadd.f32 %v2129_v51, %v6888_v52 }
 0x484   :  { %v5021_v41 = vadd.f32 %v2060_v4, %v6859_v46  ;;  %v5037_v14 = vadd.f32 %v2131_v33, %v6860_v61 }
 0x485   :  { %v3928_v42 = vmul.f32 -1.442695, %v5020_v8 }
 0x486   :  { %v3929_v29 = vmul.f32 -1.442695, %v5021_v41  ;;  %v3930_v26 = vmul.f32 -1.442695, %v5037_v14 }
 0x487   :  { %5254 = vpow2.f32 %v3928_v42 }
 0x488   :  { %5256 = vpow2.f32 %v3929_v29 }
 0x489   :  { %5258 = vpow2.f32 %v3930_v26 }
 0x48a   :  { %5260 = vtanh.f32 %v5036_v1 }
 0x491   :  { %v5255_v6 = vpop.eup %5254 }
 0x492   :  { %v5257_v39 = vpop.eup %5256  ;;  %v2292_v49 = vadd.f32 1.0, %v5255_v6 }
 0x493   :  { %v2298_v28 = vadd.f32 1.0, %v5257_v39  ;;  %v5259_v57 = vpop.eup %5258 }
 0x494   :  { %5262 = vrcp.f32 %v2292_v49  ;;  %v5261_v34 = vpop.eup %5260  ;;  %v2305_v42 = vadd.f32 1.0, %v5259_v57 }
 0x495   :  { %5264 = vrcp.f32 %v2298_v28 }
 0x496   :  { %5266 = vrcp.f32 %v2305_v42 }
 0x49e   :  { %v5263_v4 = vpop.eup %5262 }
 0x49f   :  { %v5265_v8 = vpop.eup %5264  ;;  %v2309_v41 = vmul.f32 %v5263_v4, %v5261_v34 }
 0x4a0   :  { %v2308_v29 = vmul.f32 %v5265_v8, %v6244_v31  ;;  %v5267_v31 = vpop.eup %5266 }
 0x4a2   :  { %v6328_v33 = vadd.f32 %v2309_v41, %v2308_v29  ;;  %v2209_v14 = vpop.f32.mrb[24].mxu0  ;;  %v2280_v51 = vpop.f32.mrb[24].mxu1 }
 0x4a3   :  { %v5054_v6 = vadd.f32 %v2209_v14, %v6861_v22  ;;  %v2211_v26 = vpop.f32.mrb[25].mxu0  ;;  %v2282_v1 = vpop.f32.mrb[25].mxu1  ;;  %v5070_v8 = vadd.f32 %v2280_v51, %v6081_v35 }
 0x4a4   :  { %v5055_v39 = vadd.f32 %v2211_v26, %v6071_v32  ;;  %5268 = vtanh.f32 %v6328_v33  ;;  %v5071_v34 = vadd.f32 %v2282_v1, %v6078_v62 }
 0x4a5   :  { %v3931_v28 = vmul.f32 -1.442695, %v5054_v6 }
 0x4a6   :  { %v3932_v49 = vmul.f32 -1.442695, %v5055_v39  ;;  %v3933_v4 = vmul.f32 -1.442695, %v5071_v34 }
 0x4a7   :  { %5270 = vpow2.f32 %v3931_v28 }
 0x4a8   :  { %5272 = vpow2.f32 %v3932_v49 }
 0x4a9   :  { %5274 = vpow2.f32 %v3933_v4 }
 0x4aa   :  { %5276 = vtanh.f32 %v5070_v8  ;;  %v6916_v8 = vld [vmem:[#allocation29_spill] sm:$0xff] }
 0x4ae   :  { %v5269_v57 = vpop.eup %5268 }
 0x4af   :  { %v2312_v41 = vmul.f32 %v5269_v57, %v5267_v31 }
 0x4b1   :  { %v5271_v42 = vpop.eup %5270  ;;  %2342 = vst [vmem:[#allocation17 + $0x18] sm:$0xff] %v2312_v41  ;;  %2419 = vmatmul.mubr.f32.vlgmr.msra.gmra.mrb[8].mxu0 %v2312_v41  ;;  %2490 = vmatmul.mubr.f32.vlgmr.msra.gmra.mrb[8].mxu1 %v2312_v41  ;;  %v6917_v41 = vld [vmem:[#allocation30_spill] sm:$0xff] }
 0x4b2   :  { %v5273_v29 = vpop.eup %5272  ;;  %v2316_v14 = vadd.f32 1.0, %v5271_v42  ;;  %4569 = vmatpush1.bf16.msra.mxu0 %v5920_v12  ;;  %4601 = vmatpush1.bf16.msra.mxu1 %v5924_v15  ;;  %v6918_v42 = vld [vmem:[#allocation31_spill] sm:$0xff] }
 0x4b3   :  { %v2322_v6 = vadd.f32 1.0, %v5273_v29  ;;  %4571 = vmatprep.subr.bf16.mxu0 %v5926_v17  ;;  %4603 = vmatprep.subr.bf16.mxu1 %v5930_v25  ;;  %v5275_v51 = vpop.eup %5274  ;;  %v6919_v29 = vld [vmem:[#allocation32_spill] sm:$0xff] }
 0x4b4   :  { %5278 = vrcp.f32 %v2316_v14  ;;  %2569 = vmatprep.mubr.f32.mxu0 %v6829_v3  ;;  %2640 = vmatprep.mubr.f32.mxu1 %v6829_v3  ;;  %v5277_v26 = vpop.eup %5276  ;;  %v2329_v49 = vadd.f32 1.0, %v5275_v51  ;;  %v6920_v14 = vld [vmem:[#allocation33_spill] sm:$0xff]  ;;  %v6922_v51 = vld [vmem:[#allocation35_spill] sm:$0xff] }
 0x4b5   :  { %5280 = vrcp.f32 %v2322_v6  ;;  %v6921_v6 = vld [vmem:[#allocation34_spill] sm:$0xff] }
 0x4b6   :  { %4573 = vmatpush1.bf16.msra.mxu0 %v5936_v38  ;;  %4605 = vmatpush1.bf16.msra.mxu1 %v5940_v40  ;;  %5282 = vrcp.f32 %v2329_v49  ;;  %v6927_v49 = vld [vmem:[#allocation40_spill] sm:$0xff] }
 0x4b7   :  { %4575 = vmatprep.subr.bf16.mxu0 %v5942_v43  ;;  %4607 = vmatprep.subr.bf16.mxu1 %v5945_v50 }
 0x4ba   :  { %4577 = vmatpush1.bf16.msra.mxu0 %v5950_v2  ;;  %4609 = vmatpush1.bf16.msra.mxu1 %v6835_v47 }
 0x4bb   :  { %4579 = vmatprep.subr.bf16.mxu0 %v6836_v58  ;;  %4611 = vmatprep.subr.bf16.mxu1 %v6837_v9 }
 0x4be   :  { %v5279_v1 = vpop.eup %5278  ;;  %4581 = vmatpush1.bf16.msra.mxu0 %v6862_v36  ;;  %4613 = vmatpush1.bf16.msra.mxu1 %v6839_v45 }
 0x4bf   :  { %v5281_v39 = vpop.eup %5280  ;;  %v2333_v28 = vmul.f32 %v5279_v1, %v5277_v26  ;;  %4583 = vmatprep.subr.bf16.mxu0 %v6840_v63  ;;  %4615 = vmatprep.subr.bf16.mxu1 %v6841_v27  ;;  %v6923_v26 = vld [vmem:[#allocation36_spill] sm:$0xff]  ;;  %v6924_v1 = vld [vmem:[#allocation37_spill] sm:$0xff] }
 0x4c0   :  { %v2332_v34 = vmul.f32 %v5281_v39, %v6270_v30  ;;  %v5283_v30 = vpop.eup %5282  ;;  %v6925_v39 = vld [vmem:[#allocation38_spill] sm:$0xff] }
 0x4c2   :  { %v6354_v31 = vadd.f32 %v2333_v28, %v2332_v34  ;;  %4585 = vmatpush1.bf16.msra.mxu0 %v6842_v18  ;;  %4617 = vmatpush1.bf16.msra.mxu1 %v6843_v54  ;;  %v6926_v28 = vld [vmem:[#allocation39_spill] sm:$0xff]  ;;  %v6928_v34 = vld [vmem:[#allocation41_spill] sm:$0xff] }
 0x4c3   :  { %4587 = vmatprep.subr.bf16.mxu0 %v5980_v24  ;;  %4619 = vmatprep.subr.bf16.mxu1 %v6844_v37 }
 0x4c4   :  { %5284 = vtanh.f32 %v6354_v31 }
 0x4c6   :  { %4589 = vmatpush1.bf16.msra.mxu0 %v5986_v44  ;;  %4621 = vmatpush1.bf16.msra.mxu1 %v5990_v0 }
 0x4c7   :  { %4591 = vmatprep.subr.bf16.mxu0 %v5992_v55  ;;  %4623 = vmatprep.subr.bf16.mxu1 %v5995_v11 }
 0x4ca   :  { %4593 = vmatpush1.bf16.msra.mxu0 %v5998_v19  ;;  %4625 = vmatpush1.bf16.msra.mxu1 %v6002_v5 }
 0x4cb   :  { %4595 = vmatprep.subr.bf16.mxu0 %v6004_v21  ;;  %4627 = vmatprep.subr.bf16.mxu1 %v6007_v48 }
 0x4ce   :  { %v5285_v57 = vpop.eup %5284  ;;  %4597 = vmatpush1.bf16.msra.mxu0 %v6010_v60  ;;  %4629 = vmatpush1.bf16.msra.mxu1 %v6014_v59 }
 0x4cf   :  { %v2336_v4 = vmul.f32 %v5285_v57, %v5283_v30  ;;  %4631 = vmatprep.subr.bf16.mxu0 %v5763_v53  ;;  %4663 = vmatprep.subr.bf16.mxu1 %v5766_v56  ;;  %v6929_v30 = vld [vmem:[#allocation42_spill] sm:$0xff]  ;;  %v6930_v57 = vld [vmem:[#allocation43_spill] sm:$0xff] }
 0x4d1   :  { %2344 = vst [vmem:[#allocation18 + $0x20] sm:$0xff] %v2336_v4  ;;  %2570 = vmatmul.mubr.f32.vlgmr.msra.gmra.mrb[22].mxu0 %v2336_v4  ;;  %2641 = vmatmul.mubr.f32.vlgmr.msra.gmra.mrb[22].mxu1 %v2336_v4  ;;  %v6931_v4 = vld [vmem:[#allocation44_spill] sm:$0xff] }
 0x4d2   :  { %4633 = vmatpush1.bf16.msra.mxu0 %v5796_v7  ;;  %4665 = vmatpush1.bf16.msra.mxu1 %v5799_v10 }
 0x4d3   :  { %4635 = vmatprep.subr.bf16.mxu0 %v5801_v13  ;;  %4667 = vmatprep.subr.bf16.mxu1 %v5804_v16 }
 0x4d4   :  { %2780 = vmatprep.mubr.f32.mxu0 %v6829_v3  ;;  %2851 = vmatprep.mubr.f32.mxu1 %v6829_v3 }
 0x4d6   :  { %4637 = vmatpush1.bf16.msra.mxu0 %v5808_v20  ;;  %4669 = vmatpush1.bf16.msra.mxu1 %v5812_v23 }
 0x4d7   :  { %4639 = vmatprep.subr.bf16.mxu0 %v6916_v8  ;;  %4671 = vmatprep.subr.bf16.mxu1 %v6917_v41 }
 0x4da   :  { %4641 = vmatpush1.bf16.msra.mxu0 %v6918_v42  ;;  %4673 = vmatpush1.bf16.msra.mxu1 %v6919_v29 }
 0x4db   :  { %4643 = vmatprep.subr.bf16.mxu0 %v6920_v14  ;;  %4675 = vmatprep.subr.bf16.mxu1 %v6921_v6  ;;  %v6932_v6 = vld [vmem:[#allocation45_spill] sm:$0xff] }
 0x4dc   :  { %v6942_v14 = vld [vmem:[#allocation65_spill] sm:$0xff] }
 0x4de   :  { %4645 = vmatpush1.bf16.msra.mxu0 %v6922_v51  ;;  %4677 = vmatpush1.bf16.msra.mxu1 %v6923_v26  ;;  %v6933_v51 = vld [vmem:[#allocation46_spill] sm:$0xff]  ;;  %v6934_v26 = vld [vmem:[#allocation47_spill] sm:$0xff] }
 0x4df   :  { %4647 = vmatprep.subr.bf16.mxu0 %v6924_v1  ;;  %4679 = vmatprep.subr.bf16.mxu1 %v6925_v39  ;;  %v6935_v1 = vld [vmem:[#allocation48_spill] sm:$0xff]  ;;  %v6936_v39 = vld [vmem:[#allocation49_spill] sm:$0xff] }
 0x4e2   :  { %4649 = vmatpush1.bf16.msra.mxu0 %v6926_v28  ;;  %4681 = vmatpush1.bf16.msra.mxu1 %v6927_v49  ;;  %v6937_v28 = vld [vmem:[#allocation50_spill] sm:$0xff]  ;;  %v6938_v49 = vld [vmem:[#allocation51_spill] sm:$0xff] }
 0x4e3   :  { %4651 = vmatprep.subr.bf16.mxu0 %v6928_v34  ;;  %4683 = vmatprep.subr.bf16.mxu1 %v6929_v30  ;;  %v6939_v34 = vld [vmem:[#allocation52_spill] sm:$0xff]  ;;  %v6940_v30 = vld [vmem:[#allocation53_spill] sm:$0xff] }
 0x4e6   :  { %4653 = vmatpush1.bf16.msra.mxu0 %v6930_v57  ;;  %4685 = vmatpush1.bf16.msra.mxu1 %v6931_v4  ;;  %v6941_v57 = vld [vmem:[#allocation54_spill] sm:$0xff] }
 0x4e7   :  { %4655 = vmatprep.subr.bf16.mxu0 %v6932_v6  ;;  %4687 = vmatprep.subr.bf16.mxu1 %v6933_v51 }
 0x4ea   :  { %4657 = vmatpush1.bf16.msra.mxu0 %v6934_v26  ;;  %4689 = vmatpush1.bf16.msra.mxu1 %v6935_v1 }
 0x4eb   :  { %4659 = vmatprep.subr.bf16.mxu0 %v6936_v39  ;;  %4691 = vmatprep.subr.bf16.mxu1 %v6937_v28 }
 0x4ee   :  { %4661 = vmatpush1.bf16.msra.mxu0 %v6938_v49  ;;  %4693 = vmatpush1.bf16.msra.mxu1 %v6939_v34 }
 0x4ef   :  { %4695 = vmatprep.subr.bf16.mxu0 %v6940_v30  ;;  %4727 = vmatprep.subr.bf16.mxu1 %v6941_v57 }
 0x584   :  { %v2420_v4 = vpop.f32.mrb[8].mxu0  ;;  %v2491_v6 = vpop.f32.mrb[8].mxu1 }
 0x585   :  { %v5022_v51 = vadd.f32 %v2420_v4, %v6942_v14  ;;  %v2422_v29 = vpop.f32.mrb[9].mxu0  ;;  %v2493_v26 = vpop.f32.mrb[9].mxu1  ;;  %v5038_v34 = vadd.f32 %v2491_v6, %v6888_v52 }
 0x586   :  { %v5023_v1 = vadd.f32 %v2422_v29, %v6859_v46  ;;  %v5039_v49 = vadd.f32 %v2493_v26, %v6860_v61 }
 0x587   :  { %v3934_v42 = vmul.f32 -1.442695, %v5022_v51 }
 0x588   :  { %v3935_v39 = vmul.f32 -1.442695, %v5023_v1  ;;  %v3936_v28 = vmul.f32 -1.442695, %v5039_v49 }
 0x589   :  { %5286 = vpow2.f32 %v3934_v42 }
 0x58a   :  { %5288 = vpow2.f32 %v3935_v39 }
 0x58b   :  { %5290 = vpow2.f32 %v3936_v28 }
 0x58c   :  { %5292 = vtanh.f32 %v5038_v34 }
 0x593   :  { %v5287_v30 = vpop.eup %5286 }
 0x594   :  { %v5289_v41 = vpop.eup %5288  ;;  %v2654_v57 = vadd.f32 1.0, %v5287_v30 }
 0x595   :  { %v2660_v8 = vadd.f32 1.0, %v5289_v41  ;;  %v5291_v4 = vpop.eup %5290 }
 0x596   :  { %5294 = vrcp.f32 %v2654_v57  ;;  %v5293_v14 = vpop.eup %5292  ;;  %v2667_v42 = vadd.f32 1.0, %v5291_v4 }
 0x597   :  { %5296 = vrcp.f32 %v2660_v8 }
 0x598   :  { %5298 = vrcp.f32 %v2667_v42 }
 0x5a0   :  { %v5295_v29 = vpop.eup %5294 }
 0x5a1   :  { %v5297_v51 = vpop.eup %5296  ;;  %v2671_v1 = vmul.f32 %v5295_v29, %v5293_v14 }
 0x5a2   :  { %v2670_v39 = vmul.f32 %v5297_v51, %v6328_v33  ;;  %v5299_v33 = vpop.eup %5298 }
 0x5a4   :  { %v6412_v26 = vadd.f32 %v2671_v1, %v2670_v39  ;;  %v2571_v49 = vpop.f32.mrb[22].mxu0  ;;  %v2642_v6 = vpop.f32.mrb[22].mxu1 }
 0x5a5   :  { %v5052_v30 = vadd.f32 %v2571_v49, %v6861_v22  ;;  %v2573_v28 = vpop.f32.mrb[23].mxu0  ;;  %v2644_v34 = vpop.f32.mrb[23].mxu1  ;;  %v5068_v51 = vadd.f32 %v2642_v6, %v6081_v35 }
 0x5a6   :  { %v5053_v41 = vadd.f32 %v2573_v28, %v6071_v32  ;;  %5300 = vtanh.f32 %v6412_v26  ;;  %v5069_v14 = vadd.f32 %v2644_v34, %v6078_v62 }
 0x5a7   :  { %v3937_v8 = vmul.f32 -1.442695, %v5052_v30 }
 0x5a8   :  { %v3938_v57 = vmul.f32 -1.442695, %v5053_v41  ;;  %v3939_v29 = vmul.f32 -1.442695, %v5069_v14 }
 0x5a9   :  { %5302 = vpow2.f32 %v3937_v8 }
 0x5aa   :  { %5304 = vpow2.f32 %v3938_v57 }
 0x5ab   :  { %5306 = vpow2.f32 %v3939_v29 }
 0x5ac   :  { %5308 = vtanh.f32 %v5068_v51  ;;  %v6943_v51 = vld [vmem:[#allocation29_spill] sm:$0xff] }
 0x5b0   :  { %v5301_v4 = vpop.eup %5300 }
 0x5b1   :  { %v2674_v1 = vmul.f32 %v5301_v4, %v5299_v33 }
 0x5b3   :  { %v5303_v42 = vpop.eup %5302  ;;  %2704 = vst [vmem:[#allocation17 + $0x20] sm:$0xff] %v2674_v1  ;;  %2781 = vmatmul.mubr.f32.vlgmr.msra.gmra.mrb[10].mxu0 %v2674_v1  ;;  %2852 = vmatmul.mubr.f32.vlgmr.msra.gmra.mrb[10].mxu1 %v2674_v1  ;;  %v6944_v1 = vld [vmem:[#allocation30_spill] sm:$0xff] }
 0x5b4   :  { %v5305_v39 = vpop.eup %5304  ;;  %v2678_v49 = vadd.f32 1.0, %v5303_v42  ;;  %4697 = vmatpush1.bf16.msra.mxu0 %v5920_v12  ;;  %4729 = vmatpush1.bf16.msra.mxu1 %v5924_v15  ;;  %v6945_v42 = vld [vmem:[#allocation31_spill] sm:$0xff] }
 0x5b5   :  { %v2684_v30 = vadd.f32 1.0, %v5305_v39  ;;  %4699 = vmatprep.subr.bf16.mxu0 %v5926_v17  ;;  %4731 = vmatprep.subr.bf16.mxu1 %v5930_v25  ;;  %v5307_v6 = vpop.eup %5306  ;;  %v6946_v39 = vld [vmem:[#allocation32_spill] sm:$0xff] }
 0x5b6   :  { %5310 = vrcp.f32 %v2678_v49  ;;  %2931 = vmatprep.mubr.f32.mxu0 %v6829_v3  ;;  %3002 = vmatprep.mubr.f32.mxu1 %v6829_v3  ;;  %v5309_v28 = vpop.eup %5308  ;;  %v2691_v57 = vadd.f32 1.0, %v5307_v6  ;;  %v6947_v49 = vld [vmem:[#allocation33_spill] sm:$0xff]  ;;  %v6949_v6 = vld [vmem:[#allocation35_spill] sm:$0xff] }
 0x5b7   :  { %5312 = vrcp.f32 %v2684_v30  ;;  %v6948_v30 = vld [vmem:[#allocation34_spill] sm:$0xff] }
 0x5b8   :  { %4701 = vmatpush1.bf16.msra.mxu0 %v5936_v38  ;;  %4733 = vmatpush1.bf16.msra.mxu1 %v5940_v40  ;;  %5314 = vrcp.f32 %v2691_v57  ;;  %v6954_v57 = vld [vmem:[#allocation40_spill] sm:$0xff] }
 0x5b9   :  { %4703 = vmatprep.subr.bf16.mxu0 %v5942_v43  ;;  %4735 = vmatprep.subr.bf16.mxu1 %v5945_v50 }
 0x5bc   :  { %4705 = vmatpush1.bf16.msra.mxu0 %v5950_v2  ;;  %4737 = vmatpush1.bf16.msra.mxu1 %v6835_v47 }
 0x5bd   :  { %4707 = vmatprep.subr.bf16.mxu0 %v6836_v58  ;;  %4739 = vmatprep.subr.bf16.mxu1 %v6837_v9 }
 0x5c0   :  { %v5311_v34 = vpop.eup %5310  ;;  %4709 = vmatpush1.bf16.msra.mxu0 %v6862_v36  ;;  %4741 = vmatpush1.bf16.msra.mxu1 %v6839_v45 }
 0x5c1   :  { %v5313_v41 = vpop.eup %5312  ;;  %v2695_v8 = vmul.f32 %v5311_v34, %v5309_v28  ;;  %4711 = vmatprep.subr.bf16.mxu0 %v6840_v63  ;;  %4743 = vmatprep.subr.bf16.mxu1 %v6841_v27  ;;  %v6950_v28 = vld [vmem:[#allocation36_spill] sm:$0xff]  ;;  %v6951_v34 = vld [vmem:[#allocation37_spill] sm:$0xff] }
 0x5c2   :  { %v2694_v14 = vmul.f32 %v5313_v41, %v6354_v31  ;;  %v5315_v31 = vpop.eup %5314  ;;  %v6952_v41 = vld [vmem:[#allocation38_spill] sm:$0xff] }
 0x5c4   :  { %v6438_v33 = vadd.f32 %v2695_v8, %v2694_v14  ;;  %4713 = vmatpush1.bf16.msra.mxu0 %v6842_v18  ;;  %4745 = vmatpush1.bf16.msra.mxu1 %v6843_v54  ;;  %v6953_v8 = vld [vmem:[#allocation39_spill] sm:$0xff]  ;;  %v6955_v14 = vld [vmem:[#allocation41_spill] sm:$0xff] }
 0x5c5   :  { %4715 = vmatprep.subr.bf16.mxu0 %v5980_v24  ;;  %4747 = vmatprep.subr.bf16.mxu1 %v6844_v37 }
 0x5c6   :  { %5316 = vtanh.f32 %v6438_v33 }
 0x5c8   :  { %4717 = vmatpush1.bf16.msra.mxu0 %v5986_v44  ;;  %4749 = vmatpush1.bf16.msra.mxu1 %v5990_v0 }
 0x5c9   :  { %4719 = vmatprep.subr.bf16.mxu0 %v5992_v55  ;;  %4751 = vmatprep.subr.bf16.mxu1 %v5995_v11 }
 0x5cc   :  { %4721 = vmatpush1.bf16.msra.mxu0 %v5998_v19  ;;  %4753 = vmatpush1.bf16.msra.mxu1 %v6002_v5 }
 0x5cd   :  { %4723 = vmatprep.subr.bf16.mxu0 %v6004_v21  ;;  %4755 = vmatprep.subr.bf16.mxu1 %v6007_v48 }
 0x5d0   :  { %v5317_v4 = vpop.eup %5316  ;;  %4725 = vmatpush1.bf16.msra.mxu0 %v6010_v60  ;;  %4757 = vmatpush1.bf16.msra.mxu1 %v6014_v59 }
 0x5d1   :  { %v2698_v29 = vmul.f32 %v5317_v4, %v5315_v31  ;;  %4759 = vmatprep.subr.bf16.mxu0 %v5763_v53  ;;  %4791 = vmatprep.subr.bf16.mxu1 %v5766_v56  ;;  %v6956_v31 = vld [vmem:[#allocation42_spill] sm:$0xff]  ;;  %v6957_v4 = vld [vmem:[#allocation43_spill] sm:$0xff] }
 0x5d3   :  { %2706 = vst [vmem:[#allocation18 + $0x18] sm:$0xff] %v2698_v29  ;;  %2932 = vmatmul.mubr.f32.vlgmr.msra.gmra.mrb[20].mxu0 %v2698_v29  ;;  %3003 = vmatmul.mubr.f32.vlgmr.msra.gmra.mrb[20].mxu1 %v2698_v29  ;;  %v6958_v29 = vld [vmem:[#allocation44_spill] sm:$0xff] }
 0x5d4   :  { %4761 = vmatpush1.bf16.msra.mxu0 %v5796_v7  ;;  %4793 = vmatpush1.bf16.msra.mxu1 %v5799_v10 }
 0x5d5   :  { %4763 = vmatprep.subr.bf16.mxu0 %v5801_v13  ;;  %4795 = vmatprep.subr.bf16.mxu1 %v5804_v16 }
 0x5d6   :  { %3142 = vmatprep.mubr.f32.mxu0 %v6829_v3  ;;  %3213 = vmatprep.mubr.f32.mxu1 %v6829_v3 }
 0x5d8   :  { %4765 = vmatpush1.bf16.msra.mxu0 %v5808_v20  ;;  %4797 = vmatpush1.bf16.msra.mxu1 %v5812_v23 }
 0x5d9   :  { %4767 = vmatprep.subr.bf16.mxu0 %v6943_v51  ;;  %4799 = vmatprep.subr.bf16.mxu1 %v6944_v1 }
 0x5dc   :  { %4769 = vmatpush1.bf16.msra.mxu0 %v6945_v42  ;;  %4801 = vmatpush1.bf16.msra.mxu1 %v6946_v39 }
 0x5dd   :  { %4771 = vmatprep.subr.bf16.mxu0 %v6947_v49  ;;  %4803 = vmatprep.subr.bf16.mxu1 %v6948_v30  ;;  %v6959_v30 = vld [vmem:[#allocation45_spill] sm:$0xff] }
 0x5de   :  { %v6969_v49 = vld [vmem:[#allocation65_spill] sm:$0xff] }
 0x5e0   :  { %4773 = vmatpush1.bf16.msra.mxu0 %v6949_v6  ;;  %4805 = vmatpush1.bf16.msra.mxu1 %v6950_v28  ;;  %v6960_v6 = vld [vmem:[#allocation46_spill] sm:$0xff]  ;;  %v6961_v28 = vld [vmem:[#allocation47_spill] sm:$0xff] }
 0x5e1   :  { %4775 = vmatprep.subr.bf16.mxu0 %v6951_v34  ;;  %4807 = vmatprep.subr.bf16.mxu1 %v6952_v41  ;;  %v6962_v34 = vld [vmem:[#allocation48_spill] sm:$0xff]  ;;  %v6963_v41 = vld [vmem:[#allocation49_spill] sm:$0xff] }
 0x5e4   :  { %4777 = vmatpush1.bf16.msra.mxu0 %v6953_v8  ;;  %4809 = vmatpush1.bf16.msra.mxu1 %v6954_v57  ;;  %v6964_v8 = vld [vmem:[#allocation50_spill] sm:$0xff]  ;;  %v6965_v57 = vld [vmem:[#allocation51_spill] sm:$0xff] }
 0x5e5   :  { %4779 = vmatprep.subr.bf16.mxu0 %v6955_v14  ;;  %4811 = vmatprep.subr.bf16.mxu1 %v6956_v31  ;;  %v6966_v14 = vld [vmem:[#allocation52_spill] sm:$0xff]  ;;  %v6967_v31 = vld [vmem:[#allocation53_spill] sm:$0xff] }
 0x5e8   :  { %4781 = vmatpush1.bf16.msra.mxu0 %v6957_v4  ;;  %4813 = vmatpush1.bf16.msra.mxu1 %v6958_v29  ;;  %v6968_v4 = vld [vmem:[#allocation54_spill] sm:$0xff] }
 0x5e9   :  { %4783 = vmatprep.subr.bf16.mxu0 %v6959_v30  ;;  %4815 = vmatprep.subr.bf16.mxu1 %v6960_v6 }
 0x5ec   :  { %4785 = vmatpush1.bf16.msra.mxu0 %v6961_v28  ;;  %4817 = vmatpush1.bf16.msra.mxu1 %v6962_v34 }
 0x5ed   :  { %4787 = vmatprep.subr.bf16.mxu0 %v6963_v41  ;;  %4819 = vmatprep.subr.bf16.mxu1 %v6964_v8 }
 0x5f0   :  { %4789 = vmatpush1.bf16.msra.mxu0 %v6965_v57  ;;  %4821 = vmatpush1.bf16.msra.mxu1 %v6966_v14 }
 0x5f1   :  { %4823 = vmatprep.subr.bf16.mxu0 %v6967_v31  ;;  %4855 = vmatprep.subr.bf16.mxu1 %v6968_v4 }
 0x686   :  { %v2782_v29 = vpop.f32.mrb[10].mxu0  ;;  %v2853_v30 = vpop.f32.mrb[10].mxu1 }
 0x687   :  { %v5024_v6 = vadd.f32 %v2782_v29, %v6969_v49  ;;  %v2784_v39 = vpop.f32.mrb[11].mxu0  ;;  %v2855_v28 = vpop.f32.mrb[11].mxu1  ;;  %v5040_v14 = vadd.f32 %v2853_v30, %v6888_v52 }
 0x688   :  { %v5025_v34 = vadd.f32 %v2784_v39, %v6859_v46  ;;  %v5041_v57 = vadd.f32 %v2855_v28, %v6860_v61 }
 0x689   :  { %v3940_v42 = vmul.f32 -1.442695, %v5024_v6 }
 0x68a   :  { %v3941_v41 = vmul.f32 -1.442695, %v5025_v34  ;;  %v3942_v8 = vmul.f32 -1.442695, %v5041_v57 }
 0x68b   :  { %5318 = vpow2.f32 %v3940_v42 }
 0x68c   :  { %5320 = vpow2.f32 %v3941_v41 }
 0x68d   :  { %5322 = vpow2.f32 %v3942_v8 }
 0x68e   :  { %5324 = vtanh.f32 %v5040_v14 }
 0x695   :  { %v5319_v31 = vpop.eup %5318 }
 0x696   :  { %v5321_v1 = vpop.eup %5320  ;;  %v3016_v4 = vadd.f32 1.0, %v5319_v31 }
 0x697   :  { %v3022_v51 = vadd.f32 1.0, %v5321_v1  ;;  %v5323_v29 = vpop.eup %5322 }
 0x698   :  { %5326 = vrcp.f32 %v3016_v4  ;;  %v5325_v49 = vpop.eup %5324  ;;  %v3029_v42 = vadd.f32 1.0, %v5323_v29 }
 0x699   :  { %5328 = vrcp.f32 %v3022_v51 }
 0x69a   :  { %5330 = vrcp.f32 %v3029_v42 }
 0x6a2   :  { %v5327_v39 = vpop.eup %5326 }
 0x6a3   :  { %v5329_v6 = vpop.eup %5328  ;;  %v3033_v34 = vmul.f32 %v5327_v39, %v5325_v49 }
 0x6a4   :  { %v3032_v41 = vmul.f32 %v5329_v6, %v6412_v26  ;;  %v5331_v26 = vpop.eup %5330 }
 0x6a6   :  { %v6496_v28 = vadd.f32 %v3033_v34, %v3032_v41  ;;  %v2933_v57 = vpop.f32.mrb[20].mxu0  ;;  %v3004_v30 = vpop.f32.mrb[20].mxu1 }
 0x6a7   :  { %v5050_v31 = vadd.f32 %v2933_v57, %v6861_v22  ;;  %v2935_v8 = vpop.f32.mrb[21].mxu0  ;;  %v3006_v14 = vpop.f32.mrb[21].mxu1  ;;  %v5066_v6 = vadd.f32 %v3004_v30, %v6081_v35 }
 0x6a8   :  { %v5051_v1 = vadd.f32 %v2935_v8, %v6071_v32  ;;  %5332 = vtanh.f32 %v6496_v28  ;;  %v5067_v49 = vadd.f32 %v3006_v14, %v6078_v62 }
 0x6a9   :  { %v3943_v51 = vmul.f32 -1.442695, %v5050_v31 }
 0x6aa   :  { %v3944_v4 = vmul.f32 -1.442695, %v5051_v1  ;;  %v3945_v39 = vmul.f32 -1.442695, %v5067_v49 }
 0x6ab   :  { %5334 = vpow2.f32 %v3943_v51 }
 0x6ac   :  { %5336 = vpow2.f32 %v3944_v4 }
 0x6ad   :  { %5338 = vpow2.f32 %v3945_v39 }
 0x6ae   :  { %5340 = vtanh.f32 %v5066_v6  ;;  %v6972_v6 = vld [vmem:[#allocation31_spill] sm:$0xff] }
 0x6b2   :  { %v5333_v29 = vpop.eup %5332 }
 0x6b3   :  { %v3036_v34 = vmul.f32 %v5333_v29, %v5331_v26 }
 0x6b5   :  { %v5335_v42 = vpop.eup %5334  ;;  %3066 = vst [vmem:[#allocation17 + $0x28] sm:$0xff] %v3036_v34  ;;  %3143 = vmatmul.mubr.f32.vlgmr.msra.gmra.mrb[12].mxu0 %v3036_v34  ;;  %3214 = vmatmul.mubr.f32.vlgmr.msra.gmra.mrb[12].mxu1 %v3036_v34  ;;  %v6977_v34 = vld [vmem:[#allocation36_spill] sm:$0xff] }
 0x6b6   :  { %v5337_v41 = vpop.eup %5336  ;;  %v3040_v57 = vadd.f32 1.0, %v5335_v42  ;;  %4825 = vmatpush1.bf16.msra.mxu0 %v5920_v12  ;;  %4857 = vmatpush1.bf16.msra.mxu1 %v5924_v15  ;;  %v6978_v42 = vld [vmem:[#allocation37_spill] sm:$0xff] }
 0x6b7   :  { %v3046_v31 = vadd.f32 1.0, %v5337_v41  ;;  %4827 = vmatprep.subr.bf16.mxu0 %v5926_v17  ;;  %4859 = vmatprep.subr.bf16.mxu1 %v5930_v25  ;;  %v5339_v30 = vpop.eup %5338  ;;  %v6981_v41 = vld [vmem:[#allocation40_spill] sm:$0xff] }
 0x6b8   :  { %5342 = vrcp.f32 %v3040_v57  ;;  %3293 = vmatprep.mubr.f32.mxu0 %v6829_v3  ;;  %3364 = vmatprep.mubr.f32.mxu1 %v6829_v3  ;;  %v5341_v8 = vpop.eup %5340  ;;  %v3053_v4 = vadd.f32 1.0, %v5339_v30  ;;  %v6982_v57 = vld [vmem:[#allocation41_spill] sm:$0xff]  ;;  %v6984_v30 = vld [vmem:[#allocation43_spill] sm:$0xff] }
 0x6b9   :  { %5344 = vrcp.f32 %v3046_v31  ;;  %v6983_v31 = vld [vmem:[#allocation42_spill] sm:$0xff] }
 0x6ba   :  { %4829 = vmatpush1.bf16.msra.mxu0 %v5936_v38  ;;  %4861 = vmatpush1.bf16.msra.mxu1 %v5940_v40  ;;  %5346 = vrcp.f32 %v3053_v4  ;;  %v6989_v4 = vld [vmem:[#allocation48_spill] sm:$0xff] }
 0x6bb   :  { %4831 = vmatprep.subr.bf16.mxu0 %v5942_v43  ;;  %4863 = vmatprep.subr.bf16.mxu1 %v5945_v50 }
 0x6be   :  { %4833 = vmatpush1.bf16.msra.mxu0 %v5950_v2  ;;  %4865 = vmatpush1.bf16.msra.mxu1 %v6835_v47 }
 0x6bf   :  { %4835 = vmatprep.subr.bf16.mxu0 %v6836_v58  ;;  %4867 = vmatprep.subr.bf16.mxu1 %v6837_v9 }
 0x6c2   :  { %v5343_v14 = vpop.eup %5342  ;;  %4837 = vmatpush1.bf16.msra.mxu0 %v6862_v36  ;;  %4869 = vmatpush1.bf16.msra.mxu1 %v6839_v45 }
 0x6c3   :  { %v5345_v1 = vpop.eup %5344  ;;  %v3057_v51 = vmul.f32 %v5343_v14, %v5341_v8  ;;  %4839 = vmatprep.subr.bf16.mxu0 %v6840_v63  ;;  %4871 = vmatprep.subr.bf16.mxu1 %v6841_v27  ;;  %v6985_v8 = vld [vmem:[#allocation44_spill] sm:$0xff]  ;;  %v6986_v14 = vld [vmem:[#allocation45_spill] sm:$0xff] }
 0x6c4   :  { %v3056_v49 = vmul.f32 %v5345_v1, %v6438_v33  ;;  %v5347_v33 = vpop.eup %5346  ;;  %v6987_v1 = vld [vmem:[#allocation46_spill] sm:$0xff] }
 0x6c6   :  { %v6522_v26 = vadd.f32 %v3057_v51, %v3056_v49  ;;  %4841 = vmatpush1.bf16.msra.mxu0 %v6842_v18  ;;  %4873 = vmatpush1.bf16.msra.mxu1 %v6843_v54  ;;  %v6988_v51 = vld [vmem:[#allocation47_spill] sm:$0xff]  ;;  %v6990_v49 = vld [vmem:[#allocation49_spill] sm:$0xff] }
 0x6c7   :  { %4843 = vmatprep.subr.bf16.mxu0 %v5980_v24  ;;  %4875 = vmatprep.subr.bf16.mxu1 %v6844_v37 }
 0x6c8   :  { %5348 = vtanh.f32 %v6522_v26 }
 0x6ca   :  { %4845 = vmatpush1.bf16.msra.mxu0 %v5986_v44  ;;  %4877 = vmatpush1.bf16.msra.mxu1 %v5990_v0 }
 0x6cb   :  { %4847 = vmatprep.subr.bf16.mxu0 %v5992_v55  ;;  %4879 = vmatprep.subr.bf16.mxu1 %v5995_v11 }
 0x6ce   :  { %4849 = vmatpush1.bf16.msra.mxu0 %v5998_v19  ;;  %4881 = vmatpush1.bf16.msra.mxu1 %v6002_v5 }
 0x6cf   :  { %4851 = vmatprep.subr.bf16.mxu0 %v6004_v21  ;;  %4883 = vmatprep.subr.bf16.mxu1 %v6007_v48 }
 0x6d2   :  { %v5349_v29 = vpop.eup %5348  ;;  %4853 = vmatpush1.bf16.msra.mxu0 %v6010_v60  ;;  %4885 = vmatpush1.bf16.msra.mxu1 %v6014_v59 }
 0x6d3   :  { %v3060_v39 = vmul.f32 %v5349_v29, %v5347_v33  ;;  %4887 = vmatprep.subr.bf16.mxu0 %v5763_v53  ;;  %4919 = vmatprep.subr.bf16.mxu1 %v5766_v56  ;;  %v6970_v53 = vld [vmem:[#allocation29_spill] sm:$0xff]  ;;  %v6971_v56 = vld [vmem:[#allocation30_spill] sm:$0xff]  ;;  %v6992_v29 = vld [vmem:[#allocation51_spill] sm:$0xff] }
 0x6d4   :  { %v6991_v33 = vld [vmem:[#allocation50_spill] sm:$0xff] }
 0x6d5   :  { %3068 = vst [vmem:[#allocation18 + $0x10] sm:$0xff] %v3060_v39  ;;  %3294 = vmatmul.mubr.f32.vlgmr.msra.gmra.mrb[18].mxu0 %v3060_v39  ;;  %3365 = vmatmul.mubr.f32.vlgmr.msra.gmra.mrb[18].mxu1 %v3060_v39  ;;  %v6993_v39 = vld [vmem:[#allocation52_spill] sm:$0xff] }
 0x6d6   :  { %4889 = vmatpush1.bf16.msra.mxu0 %v5796_v7  ;;  %4921 = vmatpush1.bf16.msra.mxu1 %v5799_v10  ;;  %v6973_v7 = vld [vmem:[#allocation32_spill] sm:$0xff]  ;;  %v6974_v10 = vld [vmem:[#allocation33_spill] sm:$0xff] }
 0x6d7   :  { %4891 = vmatprep.subr.bf16.mxu0 %v5801_v13  ;;  %4923 = vmatprep.subr.bf16.mxu1 %v5804_v16  ;;  %v6975_v13 = vld [vmem:[#allocation34_spill] sm:$0xff]  ;;  %v6976_v16 = vld [vmem:[#allocation35_spill] sm:$0xff] }
 0x6d8   :  { %3504 = vmatprep.mubr.f32.mxu0 %v6829_v3  ;;  %3575 = vmatprep.mubr.f32.mxu1 %v6829_v3 }
 0x6da   :  { %4893 = vmatpush1.bf16.msra.mxu0 %v5808_v20  ;;  %4925 = vmatpush1.bf16.msra.mxu1 %v5812_v23  ;;  %v6979_v20 = vld [vmem:[#allocation38_spill] sm:$0xff]  ;;  %v6980_v23 = vld [vmem:[#allocation39_spill] sm:$0xff] }
 0x6db   :  { %4895 = vmatprep.subr.bf16.mxu0 %v6970_v53  ;;  %4927 = vmatprep.subr.bf16.mxu1 %v6971_v56  ;;  %v6994_v53 = vld [vmem:[#allocation53_spill] sm:$0xff]  ;;  %v6995_v56 = vld [vmem:[#allocation54_spill] sm:$0xff] }
 0x6de   :  { %4897 = vmatpush1.bf16.msra.mxu0 %v6972_v6  ;;  %4929 = vmatpush1.bf16.msra.mxu1 %v6973_v7 }
 0x6df   :  { %4899 = vmatprep.subr.bf16.mxu0 %v6974_v10  ;;  %4931 = vmatprep.subr.bf16.mxu1 %v6975_v13  ;;  %v6996_v10 = vld [vmem:[#allocation65_spill] sm:$0xff] }
 0x6e2   :  { %4901 = vmatpush1.bf16.msra.mxu0 %v6976_v16  ;;  %4933 = vmatpush1.bf16.msra.mxu1 %v6977_v34 }
 0x6e3   :  { %4903 = vmatprep.subr.bf16.mxu0 %v6978_v42  ;;  %4935 = vmatprep.subr.bf16.mxu1 %v6979_v20 }
 0x6e6   :  { %4905 = vmatpush1.bf16.msra.mxu0 %v6980_v23  ;;  %4937 = vmatpush1.bf16.msra.mxu1 %v6981_v41 }
 0x6e7   :  { %4907 = vmatprep.subr.bf16.mxu0 %v6982_v57  ;;  %4939 = vmatprep.subr.bf16.mxu1 %v6983_v31 }
 0x6ea   :  { %4909 = vmatpush1.bf16.msra.mxu0 %v6984_v30  ;;  %4941 = vmatpush1.bf16.msra.mxu1 %v6985_v8 }
 0x6eb   :  { %4911 = vmatprep.subr.bf16.mxu0 %v6986_v14  ;;  %4943 = vmatprep.subr.bf16.mxu1 %v6987_v1 }
 0x6ee   :  { %4913 = vmatpush1.bf16.msra.mxu0 %v6988_v51  ;;  %4945 = vmatpush1.bf16.msra.mxu1 %v6989_v4 }
 0x6ef   :  { %4915 = vmatprep.subr.bf16.mxu0 %v6990_v49  ;;  %4947 = vmatprep.subr.bf16.mxu1 %v6991_v33 }
 0x6f2   :  { %4917 = vmatpush1.bf16.msra.mxu0 %v6992_v29  ;;  %4949 = vmatpush1.bf16.msra.mxu1 %v6993_v39 }
 0x6f3   :  { %4951 = vmatprep.subr.bf16.mxu0 %v6994_v53  ;;  %4983 = vmatprep.subr.bf16.mxu1 %v6995_v56 }
 0x788   :  { %v3144_v6 = vpop.f32.mrb[12].mxu0  ;;  %v3215_v7 = vpop.f32.mrb[12].mxu1 }
 0x789   :  { %v5026_v13 = vadd.f32 %v3144_v6, %v6996_v10  ;;  %v3146_v16 = vpop.f32.mrb[13].mxu0  ;;  %v3217_v34 = vpop.f32.mrb[13].mxu1  ;;  %v5042_v31 = vadd.f32 %v3215_v7, %v6888_v52 }
 0x78a   :  { %v5027_v42 = vadd.f32 %v3146_v16, %v6859_v46  ;;  %v5043_v41 = vadd.f32 %v3217_v34, %v6860_v61 }
 0x78b   :  { %v3946_v20 = vmul.f32 -1.442695, %v5026_v13 }
 0x78c   :  { %v3947_v23 = vmul.f32 -1.442695, %v5027_v42  ;;  %v3948_v57 = vmul.f32 -1.442695, %v5043_v41 }
 0x78d   :  { %5350 = vpow2.f32 %v3946_v20 }
 0x78e   :  { %5352 = vpow2.f32 %v3947_v23 }
 0x78f   :  { %5354 = vpow2.f32 %v3948_v57 }
 0x790   :  { %5356 = vtanh.f32 %v5042_v31 }
 0x797   :  { %v5351_v30 = vpop.eup %5350 }
 0x798   :  { %v5353_v8 = vpop.eup %5352  ;;  %v3378_v14 = vadd.f32 1.0, %v5351_v30 }
 0x799   :  { %v3384_v1 = vadd.f32 1.0, %v5353_v8  ;;  %v5355_v51 = vpop.eup %5354 }
 0x79a   :  { %5358 = vrcp.f32 %v3378_v14  ;;  %v5357_v4 = vpop.eup %5356  ;;  %v3391_v39 = vadd.f32 1.0, %v5355_v51 }
 0x79b   :  { %5360 = vrcp.f32 %v3384_v1 }
 0x79c   :  { %5362 = vrcp.f32 %v3391_v39 }
 0x7a4   :  { %v5359_v49 = vpop.eup %5358 }
 0x7a5   :  { %v5361_v33 = vpop.eup %5360  ;;  %v3395_v29 = vmul.f32 %v5359_v49, %v5357_v4 }
 0x7a6   :  { %v3394_v53 = vmul.f32 %v5361_v33, %v6496_v28  ;;  %v5363_v28 = vpop.eup %5362 }
 0x7a8   :  { %v6580_v56 = vadd.f32 %v3395_v29, %v3394_v53  ;;  %v3295_v6 = vpop.f32.mrb[18].mxu0  ;;  %v3366_v7 = vpop.f32.mrb[18].mxu1 }
 0x7a9   :  { %v5048_v13 = vadd.f32 %v3295_v6, %v6861_v22  ;;  %v3297_v16 = vpop.f32.mrb[19].mxu0  ;;  %v3368_v34 = vpop.f32.mrb[19].mxu1  ;;  %v5064_v30 = vadd.f32 %v3366_v7, %v6081_v35 }
 0x7aa   :  { %v5049_v42 = vadd.f32 %v3297_v16, %v6071_v32  ;;  %5364 = vtanh.f32 %v6580_v56  ;;  %v5065_v41 = vadd.f32 %v3368_v34, %v6078_v62 }
 0x7ab   :  { %v3949_v20 = vmul.f32 -1.442695, %v5048_v13 }
 0x7ac   :  { %v3950_v23 = vmul.f32 -1.442695, %v5049_v42  ;;  %v3951_v31 = vmul.f32 -1.442695, %v5065_v41 }
 0x7ad   :  { %5366 = vpow2.f32 %v3949_v20 }
 0x7ae   :  { %5368 = vpow2.f32 %v3950_v23 }
 0x7af   :  { %5370 = vpow2.f32 %v3951_v31 }
 0x7b0   :  { %5372 = vtanh.f32 %v5064_v30 }
 0x7b4   :  { %v5365_v57 = vpop.eup %5364 }
 0x7b5   :  { %v3398_v8 = vmul.f32 %v5365_v57, %v5363_v28 }
 0x7b7   :  { %v5367_v14 = vpop.eup %5366  ;;  %3428 = vst [vmem:[#allocation17 + $0x30] sm:$0xff] %v3398_v8  ;;  %3505 = vmatmul.mubr.f32.vlgmr.msra.gmra.mrb[14].mxu0 %v3398_v8  ;;  %3576 = vmatmul.mubr.f32.vlgmr.msra.gmra.mrb[14].mxu1 %v3398_v8 }
 0x7b8   :  { %v5369_v1 = vpop.eup %5368  ;;  %v3402_v51 = vadd.f32 1.0, %v5367_v14  ;;  %4953 = vmatpush1.bf16.msra.mxu0 %v5920_v12  ;;  %4985 = vmatpush1.bf16.msra.mxu1 %v5924_v15 }
 0x7b9   :  { %v3408_v4 = vadd.f32 1.0, %v5369_v1  ;;  %4955 = vmatprep.subr.bf16.mxu0 %v5926_v17  ;;  %4987 = vmatprep.subr.bf16.mxu1 %v5930_v25  ;;  %v5371_v12 = vpop.eup %5370 }
 0x7ba   :  { %5374 = vrcp.f32 %v3402_v51  ;;  %3654 = vmatprep.mubr.f32.mxu0 %v6829_v3  ;;  %3725 = vmatprep.mubr.f32.mxu1 %v6829_v3  ;;  %v5373_v15 = vpop.eup %5372 }
 0x7bb   :  { %5376 = vrcp.f32 %v3408_v4 }
 0x7bc   :  { %4957 = vmatpush1.bf16.msra.mxu0 %v5936_v38  ;;  %4989 = vmatpush1.bf16.msra.mxu1 %v5940_v40  ;;  %v3415_v40 = vadd.f32 1.0, %v5371_v12 }
 0x7bd   :  { %4959 = vmatprep.subr.bf16.mxu0 %v5942_v43  ;;  %4991 = vmatprep.subr.bf16.mxu1 %v5945_v50 }
 0x7be   :  { %5378 = vrcp.f32 %v3415_v40 }
 0x7c0   :  { %4961 = vmatpush1.bf16.msra.mxu0 %v5950_v2  ;;  %4993 = vmatpush1.bf16.msra.mxu1 %v6835_v47 }
 0x7c1   :  { %4963 = vmatprep.subr.bf16.mxu0 %v6836_v58  ;;  %4995 = vmatprep.subr.bf16.mxu1 %v6837_v9 }
 0x7c4   :  { %v5375_v17 = vpop.eup %5374  ;;  %4965 = vmatpush1.bf16.msra.mxu0 %v6862_v36  ;;  %4997 = vmatpush1.bf16.msra.mxu1 %v6839_v45 }
 0x7c5   :  { %v5377_v25 = vpop.eup %5376  ;;  %v3419_v38 = vmul.f32 %v5375_v17, %v5373_v15  ;;  %4967 = vmatprep.subr.bf16.mxu0 %v6840_v63  ;;  %4999 = vmatprep.subr.bf16.mxu1 %v6841_v27 }
 0x7c6   :  { %v3418_v43 = vmul.f32 %v5377_v25, %v6522_v26 }
 0x7c8   :  { %v6606_v50 = vadd.f32 %v3419_v38, %v3418_v43  ;;  %4969 = vmatpush1.bf16.msra.mxu0 %v6842_v18  ;;  %5001 = vmatpush1.bf16.msra.mxu1 %v6843_v54  ;;  %v5379_v2 = vpop.eup %5378 }
 0x7c9   :  { %4971 = vmatprep.subr.bf16.mxu0 %v5980_v24  ;;  %5003 = vmatprep.subr.bf16.mxu1 %v6844_v37 }
 0x7ca   :  { %5380 = vtanh.f32 %v6606_v50 }
 0x7cc   :  { %4973 = vmatpush1.bf16.msra.mxu0 %v5986_v44  ;;  %5005 = vmatpush1.bf16.msra.mxu1 %v5990_v0 }
 0x7cd   :  { %4975 = vmatprep.subr.bf16.mxu0 %v5992_v55  ;;  %5007 = vmatprep.subr.bf16.mxu1 %v5995_v11 }
 0x7d0   :  { %4977 = vmatpush1.bf16.msra.mxu0 %v5998_v19  ;;  %5009 = vmatpush1.bf16.msra.mxu1 %v6002_v5 }
 0x7d1   :  { %4979 = vmatprep.subr.bf16.mxu0 %v6004_v21  ;;  %5011 = vmatprep.subr.bf16.mxu1 %v6007_v48 }
 0x7d4   :  { %v5381_v24 = vpop.eup %5380  ;;  %4981 = vmatpush1.bf16.msra.mxu0 %v6010_v60  ;;  %5013 = vmatpush1.bf16.msra.mxu1 %v6014_v59 }
 0x7d5   :  { %v3422_v44 = vmul.f32 %v5381_v24, %v5379_v2 }
 0x7d7   :  { %3430 = vst [vmem:[#allocation18 + $0x8] sm:$0xff] %v3422_v44  ;;  %3655 = vmatmul.mubr.f32.vlgmr.msra.gmra.mrb[16].mxu0 %v3422_v44  ;;  %3726 = vmatmul.mubr.f32.vlgmr.msra.gmra.mrb[16].mxu1 %v3422_v44 }
 0x88a   :  { %v3506_v0 = vpop.f32.mrb[14].mxu0  ;;  %v3577_v55 = vpop.f32.mrb[14].mxu1 }
 0x88b   :  { %v5028_v19 = vadd.f32 %v3506_v0, %v6996_v10  ;;  %v3508_v11 = vpop.f32.mrb[15].mxu0  ;;  %v3579_v5 = vpop.f32.mrb[15].mxu1  ;;  %v5044_v59 = vadd.f32 %v3577_v55, %v6888_v52 }
 0x88c   :  { %v5029_v21 = vadd.f32 %v3508_v11, %v6859_v46  ;;  %v5045_v60 = vadd.f32 %v3579_v5, %v6860_v61 }
 0x88d   :  { %v3952_v3 = vmul.f32 -1.442695, %v5028_v19 }
 0x88e   :  { %v3953_v48 = vmul.f32 -1.442695, %v5029_v21  ;;  %v3954_v47 = vmul.f32 -1.442695, %v5045_v60 }
 0x88f   :  { %5382 = vpow2.f32 %v3952_v3 }
 0x890   :  { %5384 = vpow2.f32 %v3953_v48 }
 0x891   :  { %5386 = vpow2.f32 %v3954_v47 }
 0x892   :  { %5388 = vtanh.f32 %v5044_v59 }
 0x899   :  { %v5383_v58 = vpop.eup %5382 }
 0x89a   :  { %v5385_v9 = vpop.eup %5384  ;;  %v3739_v37 = vadd.f32 1.0, %v5383_v58 }
 0x89b   :  { %v3745_v45 = vadd.f32 1.0, %v5385_v9  ;;  %v5387_v63 = vpop.eup %5386 }
 0x89c   :  { %5390 = vrcp.f32 %v3739_v37  ;;  %v5389_v27 = vpop.eup %5388  ;;  %v3752_v36 = vadd.f32 1.0, %v5387_v63 }
 0x89d   :  { %5392 = vrcp.f32 %v3745_v45 }
 0x89e   :  { %5394 = vrcp.f32 %v3752_v36 }
 0x8a6   :  { %v5391_v46 = vpop.eup %5390 }
 0x8a7   :  { %v5393_v18 = vpop.eup %5392  ;;  %v3756_v54 = vmul.f32 %v5391_v46, %v5389_v27 }
 0x8a8   :  { %v3755_v26 = vmul.f32 %v5393_v18, %v6580_v56  ;;  %v5395_v56 = vpop.eup %5394 }
 0x8aa   :  { %v3757_v61 = vadd.f32 %v3756_v54, %v3755_v26  ;;  %v3656_v10 = vpop.f32.mrb[16].mxu0  ;;  %v3727_v49 = vpop.f32.mrb[16].mxu1 }
 0x8ab   :  { %v5046_v52 = vadd.f32 %v3656_v10, %v6861_v22  ;;  %v3658_v33 = vpop.f32.mrb[17].mxu0  ;;  %v3729_v29 = vpop.f32.mrb[17].mxu1  ;;  %v5062_v22 = vadd.f32 %v3727_v49, %v6081_v35 }
 0x8ac   :  { %5396 = vtanh.f32 %v3757_v61  ;;  %3800 = vst [vmem:[#allocation21] sm:$0xff] %v3757_v61  ;;  %v5047_v39 = vadd.f32 %v3658_v33, %v6071_v32  ;;  %v5063_v7 = vadd.f32 %v3729_v29, %v6078_v62 }
 0x8ad   :  { %v3955_v53 = vmul.f32 -1.442695, %v5046_v52 }
 0x8ae   :  { %v3956_v6 = vmul.f32 -1.442695, %v5047_v39  ;;  %v3957_v16 = vmul.f32 -1.442695, %v5063_v7 }
 0x8af   :  { %5398 = vpow2.f32 %v3955_v53 }
 0x8b0   :  { %5400 = vpow2.f32 %v3956_v6 }
 0x8b1   :  { %5402 = vpow2.f32 %v3957_v16 }
 0x8b6   :  { %v5397_v13 = vpop.eup %5396 }
 0x8b7   :  { %v3759_v34 = vmul.f32 %v5397_v13, %v5395_v56 }
 0x8b9   :  { %v5399_v42 = vpop.eup %5398  ;;  %3789 = vst [vmem:[#allocation17 + $0x38] sm:$0xff] %v3759_v34  ;;  %3795 = vst [vmem:[#allocation20] sm:$0xff] %v3759_v34 }
 0x8ba   :  { %v5401_v20 = vpop.eup %5400  ;;  %v3763_v32 = vadd.f32 1.0, %v5399_v42 }
 0x8bb   :  { %5535 = shalt.err (!%p5532_p2)
}
 0x8bc   :  { %s5536_s1 = scalar_lea.hbm %s6705_s5, 1024 }
 0x8bd   :  { %p5537_p3 = scmp.ne.s32.totalorder %s6705_s5, %s5536_s1  ;;  %p5540_p4 = scmp.lt.u32.totalorder %s5536_s1, %s6705_s5 }
 0x8bf   :  { %p5542_p5 = pnand %p5540_p4, %p5537_p3 }
 0x8c1   :  { %5545 = shalt.err (!%p5542_p5)
}
 0x8c2   :  { %3815 = dma.vmem_to_hbm [thread:$0]  %s3810_s26, 1024, %s6705_s5, [#allocation10], %s5625_s15, %s5625_s15, %s5626_s16   ;;  %5404 = vtanh.f32 %v5062_v22  ;;  %v3769_v62 = vadd.f32 1.0, %v5401_v20  ;;  %v5403_v35 = vpop.eup %5402 }
 0x8c3   :  { %5406 = vrcp.f32 %v3763_v32  ;;  %v3776_v31 = vadd.f32 1.0, %v5403_v35  ;;  %s5637_s14 = smov [#allocation21]  }
 0x8c4   :  { %5408 = vrcp.f32 %v3769_v62  ;;  %s3849_s17 = sshll.u32 %s5637_s14, 4  ;;  %s3850_s17 = int_to_ptr.vmem [resolvable:$true] %s3849_s17 }
 0x8c5   :  { %5410 = vrcp.f32 %v3776_v31  ;;  %s5546_s5 = scalar_lea.vmem %s3850_s17, 256  ;;  %p5551_p7 = scmp.lt.s32.totalorder %s3850_s17, %s3850_s17 }
 0x8c6   :  { %p5547_p6 = scmp.ne.s32.totalorder %s3850_s17, %s5546_s5  ;;  %p5552_p8 = scmp.lt.s32.totalorder %s5546_s5, %s5546_s5 }
 0x8c8   :  { %p5553_p9 = por %p5552_p8, %p5551_p7 }
 0x8ca   :  { %p5554_p10 = pnand %p5553_p9, %p5547_p6 }
 0x8cc   :  { %v5405_v23 = vpop.eup %5404 }
 0x8cd   :  { %v5407_v41 = vpop.eup %5406 }
 0x8ce   :  { %v5409_v28 = vpop.eup %5408  ;;  %v3780_v57 = vmul.f32 %v5407_v41, %v5405_v23 }
 0x8cf   :  { %v3779_v30 = vmul.f32 %v5409_v28, %v6606_v50 }
 0x8d1   :  { %v3781_v8 = vadd.f32 %v3780_v57, %v3779_v30 }
 0x8d3   :  { %5412 = vtanh.f32 %v3781_v8  ;;  %3803 = vst [vmem:[#allocation21 + $0x8] sm:$0xff] %v3781_v8 }
 0x8d4   :  { %5557 = shalt.err (!%p5554_p10)
}
 0x8d5   :  { %s5558_s21 = scalar_lea.hbm %s6708_s8, 256 }
 0x8d6   :  { %p5559_p11 = scmp.ne.s32.totalorder %s6708_s8, %s5558_s21  ;;  %p5562_p12 = scmp.lt.u32.totalorder %s5558_s21, %s6708_s8 }
 0x8d8   :  { %p5564_p13 = pnand %p5562_p12, %p5559_p11 }
 0x8da   :  { %5567 = shalt.err (!%p5564_p13)
}
 0x8db   :  { %3855 = dma.vmem_to_hbm [thread:$0]  %s3850_s17, 256, %s6708_s8, [#allocation22], %s5625_s15, %s5625_s15, %s5626_s16   ;;  %v5411_v14 = vpop.eup %5410 }
 0x8dc   :  { %s5638_s9 = smov [#allocation18]   ;;  %s5639_s4 = smov [#allocation20]  }
 0x8dd   :  { %s3825_s25 = sshll.u32 %s5638_s9, 4  ;;  %s3837_s26 = sshll.u32 %s5639_s4, 4  ;;  %v5413_v1 = vpop.eup %5412  ;;  %s3826_s25 = int_to_ptr.vmem [resolvable:$true] %s3825_s25  ;;  %s6663_s26 = int_to_ptr.vmem [resolvable:$true] %s3837_s26 }
 0x8de   :  { %v3783_v51 = vmul.f32 %v5413_v1, %v5411_v14  ;;  %s5568_s27 = scalar_lea.vmem %s3826_s25, 1024  ;;  %p5573_p1 = scmp.lt.s32.totalorder %s3826_s25, %s3826_s25 }
 0x8df   :  { %p5569_p0 = scmp.ne.s32.totalorder %s3826_s25, %s5568_s27  ;;  %p5574_p2 = scmp.lt.s32.totalorder %s5568_s27, %s5568_s27 }
 0x8e0   :  { %3790 = vst [vmem:[#allocation18] sm:$0xff] %v3783_v51  ;;  %3798 = vst [vmem:[#allocation20 + $0x8] sm:$0xff] %v3783_v51 }
 0x8e1   :  { %p5575_p3 = por %p5574_p2, %p5573_p1 }
 0x8e3   :  { %p5576_p4 = pnand %p5575_p3, %p5569_p0 }
 0x8e5   :  { %5579 = shalt.err (!%p5576_p4)
}
 0x8e6   :  { %s5580_s30 = scalar_lea.hbm %s6706_s6, 1024 }
 0x8e7   :  { %p5581_p5 = scmp.ne.s32.totalorder %s6706_s6, %s5580_s30  ;;  %p5584_p6 = scmp.lt.u32.totalorder %s5580_s30, %s6706_s6 }
 0x8e9   :  { %p5586_p7 = pnand %p5584_p6, %p5581_p5 }
 0x8eb   :  { %5589 = shalt.err (!%p5586_p7)
}
 0x8ec   :  { %3831 = dma.vmem_to_hbm [thread:$0]  %s3826_s25, 1024, %s6706_s6, [#allocation19], %s5625_s15, %s5625_s15, %s5626_s16  }
 0x8ed   :  { %s5590_s22 = scalar_lea.vmem %s6663_s26, 256  ;;  %p5595_p9 = scmp.lt.s32.totalorder %s6663_s26, %s6663_s26 }
 0x8ee   :  { %p5591_p8 = scmp.ne.s32.totalorder %s6663_s26, %s5590_s22  ;;  %p5596_p10 = scmp.lt.s32.totalorder %s5590_s22, %s5590_s22 }
 0x8f0   :  { %p5597_p11 = por %p5596_p10, %p5595_p9 }
 0x8f2   :  { %p5598_p12 = pnand %p5597_p11, %p5591_p8 }
 0x8f4   :  { %5601 = shalt.err (!%p5598_p12)
}
 0x8f5   :  { %s5602_s5 = scalar_lea.hbm %s6707_s7, 256 }
 0x8f6   :  { %p5603_p13 = scmp.ne.s32.totalorder %s6707_s7, %s5602_s5  ;;  %p5606_p0 = scmp.lt.u32.totalorder %s5602_s5, %s6707_s7 }
 0x8f8   :  { %p5608_p1 = pnand %p5606_p0, %p5603_p13 }
 0x8fa   :  { %5611 = shalt.err (!%p5608_p1)
}
 0x8fb   :  { %3843 = dma.vmem_to_hbm [thread:$0]  %s6663_s26, 256, %s6707_s7, [#allocation19], %s5625_s15, %s5625_s15, %s5626_s16  }
 0x8fc   :  { %5618 = dma.done.wait [#allocation10], 1024  }
 0x8fd   :  { %5619 = vsyncadd [#allocation10], 4294966272 }
 0x8fe   :  { %5620 = dma.done.wait [#allocation19], 1280  }
 0x8ff   :  { %5621 = vsyncadd [#allocation19], 4294966016 }
 0x900   :  { %5622 = dma.done.wait [#allocation22], 256  }
 0x901   :  { %5623 = vsyncadd [#allocation22], 4294967040 }
 0x902   :  { %3868 = vsyncpa [#allocation9], 1 }
 0x903   :  { %3869 = vsyncpa [#allocation12], 1 }
 0x904   :  { %3870 = vsyncpa [#allocation15], 1 }
 0x905   :  { %3871 = vsyncpa [#allocation10], 1 }
 0x906   :  { %3872 = vsyncpa [#allocation19], 1 }
 0x907   :  { %3873 = vsyncpa [#allocation22], 1 }

// kernel: blstm_forward.4
= control target key start
LH: loop header
LB: loop body
LE: loop exit
PB: predicated region body
PF: predicated region fallthrough
CT: control target
= control target key end

     0   :  { %17 = vsyncpa [#allocation9], 0  ;;  %s7888_s0 = inlined_call_operand.hbm [shape: f32[8,8,128], index: 0, kind: input, shape index: {}, may-alias: {0,2}]   ;;  %s7889_s1 = inlined_call_operand.hbm [shape: f32[8,8,128], index: 1, kind: input, shape index: {}, may-alias: {1,3}]   ;;  %s7890_s2 = inlined_call_operand.hbm [shape: f32[8,8,128], index: 2, kind: input, shape index: {}, may-alias: {0,2}]   ;;  %s7891_s3 = inlined_call_operand.hbm [shape: f32[8,8,128], index: 3, kind: input, shape index: {}, may-alias: {1,3}]   ;;  %s7892_s4 = inlined_call_operand.hbm [shape: f32[2,128,512], index: 4, kind: input, shape index: {}]   ;;  %s7893_s5 = inlined_call_operand.hbm [shape: f32[2,128,512], index: 5, kind: input, shape index: {}]   ;;  %s7894_s6 = inlined_call_operand.hbm [shape: f32[2,128,512], index: 6, kind: input, shape index: {}]   ;;  %s7895_s7 = inlined_call_operand.hbm [shape: f32[2,1,512], index: 7, kind: input, shape index: {}]   ;;  %s7896_s8 = inlined_call_operand.hbm [shape: f32[8,8,128], index: 8, kind: output, shape index: {0}]   ;;  %s7897_s9 = inlined_call_operand.hbm [shape: f32[8,8,128], index: 9, kind: output, shape index: {1}]   ;;  %s7898_s10 = inlined_call_operand.hbm [shape: f32[2,8,128], index: 10, kind: output, shape index: {2}]   ;;  %s7899_s11 = inlined_call_operand.hbm [shape: f32[2,8,128], index: 11, kind: output, shape index: {3}]  }
   0x1   :  { %18 = vsyncpa [#allocation12], 0 }
   0x2   :  { %19 = vsyncpa [#allocation15], 0 }
   0x3   :  { %20 = vsyncpa [#allocation18], 0 }
   0x4   :  { %21 = vsyncpa [#allocation21], 0 }
   0x5   :  { %22 = vsyncpa [#allocation10], 0 }
   0x6   :  { %23 = vsyncpa [#allocation24], 0 }
   0x7   :  { %24 = vsyncpa [#allocation27], 0  ;;  %s6721_s17 = smov [#allocation11]   ;;  %s6722_s19 = smov [#allocation14]  }
   0x8   :  { %s42_s18 = sshll.u32 %s6721_s17, 4  ;;  %s74_s20 = sshll.u32 %s6722_s19, 4  ;;  %s43_s18 = int_to_ptr.vmem [resolvable:$true] %s42_s18  ;;  %s6800_s20 = int_to_ptr.vmem [resolvable:$true] %s74_s20 }
   0x9   :  { %s6441_s23 = scalar_lea.hbm %s7889_s1, 1024 }
   0xa   :  { %p6442_p0 = scmp.ne.s32.totalorder %s7889_s1, %s6441_s23  ;;  %p6445_p1 = scmp.lt.u32.totalorder %s6441_s23, %s7889_s1 }
   0xc   :  { %p6447_p2 = pnand %p6445_p1, %p6442_p0 }
   0xe   :  { %6450 = shalt.err (!%p6447_p2)
}
   0xf   :  { %s6451_s28 = scalar_lea.vmem %s43_s18, 1024  ;;  %p6456_p4 = scmp.lt.s32.totalorder %s43_s18, %s43_s18 }
  0x10   :  { %p6452_p3 = scmp.ne.s32.totalorder %s43_s18, %s6451_s28  ;;  %p6457_p5 = scmp.lt.s32.totalorder %s6451_s28, %s6451_s28 }
  0x12   :  { %p6458_p6 = por %p6457_p5, %p6456_p4 }
  0x14   :  { %p6459_p7 = pnand %p6458_p6, %p6452_p3 }
  0x16   :  { %6462 = shalt.err (!%p6459_p7)
}
  0x17   :  { %s6723_s29 = smov 128   ;;  %s6724_s30 = smov 8  }
  0x18   :  { %48 = dma.hbm_to_vmem [thread:$0]  %s7889_s1, 1024, %s43_s18, [#allocation12], %s6723_s29, %s6723_s29, %s6724_s30  }
  0x19   :  { %s6463_s16 = scalar_lea.hbm %s7891_s3, 1024 }
  0x1a   :  { %p6464_p8 = scmp.ne.s32.totalorder %s7891_s3, %s6463_s16  ;;  %p6467_p9 = scmp.lt.u32.totalorder %s6463_s16, %s7891_s3 }
  0x1c   :  { %p6469_p10 = pnand %p6467_p9, %p6464_p8 }
  0x1e   :  { %6472 = shalt.err (!%p6469_p10)
}
  0x1f   :  { %s6473_s23 = scalar_lea.vmem %s6800_s20, 1024  ;;  %p6478_p12 = scmp.lt.s32.totalorder %s6800_s20, %s6800_s20 }
  0x20   :  { %p6474_p11 = scmp.ne.s32.totalorder %s6800_s20, %s6473_s23  ;;  %p6479_p13 = scmp.lt.s32.totalorder %s6473_s23, %s6473_s23 }
  0x22   :  { %p6480_p0 = por %p6479_p13, %p6478_p12 }
  0x24   :  { %p6481_p1 = pnand %p6480_p0, %p6474_p11 }
  0x26   :  { %6484 = shalt.err (!%p6481_p1)
}
  0x27   :  { %80 = dma.hbm_to_vmem [thread:$0]  %s7891_s3, 1024, %s6800_s20, [#allocation15], %s6723_s29, %s6723_s29, %s6724_s30  }
  0x28   :  { %s6725_s24 = smov [#allocation17]   ;;  %s6726_s26 = smov [#allocation8]  }
  0x29   :  { %s98_s25 = sshll.u32 %s6725_s24, 4  ;;  %s30_s27 = sshll.u32 %s6726_s26, 4  ;;  %s99_s25 = int_to_ptr.vmem [resolvable:$true] %s98_s25  ;;  %s6837_s27 = int_to_ptr.vmem [resolvable:$true] %s30_s27 }
  0x2a   :  { %s6485_s13 = scalar_lea.hbm %s7893_s5, 16384 }
  0x2b   :  { %p6486_p2 = scmp.ne.s32.totalorder %s7893_s5, %s6485_s13  ;;  %p6489_p3 = scmp.lt.u32.totalorder %s6485_s13, %s7893_s5 }
  0x2d   :  { %p6491_p4 = pnand %p6489_p3, %p6486_p2 }
  0x2f   :  { %6494 = shalt.err (!%p6491_p4)
}
  0x30   :  { %s6495_s3 = scalar_lea.vmem %s99_s25, 16384  ;;  %p6500_p6 = scmp.lt.s32.totalorder %s99_s25, %s99_s25 }
  0x31   :  { %p6496_p5 = scmp.ne.s32.totalorder %s99_s25, %s6495_s3  ;;  %p6501_p7 = scmp.lt.s32.totalorder %s6495_s3, %s6495_s3 }
  0x33   :  { %p6502_p8 = por %p6501_p7, %p6500_p6 }
  0x35   :  { %p6503_p9 = pnand %p6502_p8, %p6496_p5 }
  0x37   :  { %6506 = shalt.err (!%p6503_p9)
}
  0x38   :  { %s6727_s20 = smov 512   ;;  %s6728_s19 = smov 32  }
  0x39   :  { %104 = dma.hbm_to_vmem [thread:$0]  %s7893_s5, 16384, %s99_s25, [#allocation18], %s6727_s20, %s6727_s20, %s6728_s19  }
  0x3a   :  { %s6507_s18 = scalar_lea.hbm %s7888_s0, 1024 }
  0x3b   :  { %p6508_p10 = scmp.ne.s32.totalorder %s7888_s0, %s6507_s18  ;;  %p6511_p11 = scmp.lt.u32.totalorder %s6507_s18, %s7888_s0 }
  0x3d   :  { %p6513_p12 = pnand %p6511_p11, %p6508_p10 }
  0x3f   :  { %6516 = shalt.err (!%p6513_p12)
}
  0x40   :  { %s6517_s13 = scalar_lea.vmem %s6837_s27, 1024  ;;  %p6522_p0 = scmp.lt.s32.totalorder %s6837_s27, %s6837_s27 }
  0x41   :  { %p6518_p13 = scmp.ne.s32.totalorder %s6837_s27, %s6517_s13  ;;  %p6523_p1 = scmp.lt.s32.totalorder %s6517_s13, %s6517_s13 }
  0x43   :  { %p6524_p2 = por %p6523_p1, %p6522_p0 }
  0x45   :  { %p6525_p3 = pnand %p6524_p2, %p6518_p13 }
  0x47   :  { %6528 = shalt.err (!%p6525_p3)
}
  0x48   :  { %36 = dma.hbm_to_vmem [thread:$0]  %s7888_s0, 1024, %s6837_s27, [#allocation9], %s6723_s29, %s6723_s29, %s6724_s30  }
  0x49   :  { %s6729_s14 = smov [#allocation13]   ;;  %s6730_s16 = smov [#allocation16]  }
  0x4a   :  { %s58_s15 = sshll.u32 %s6729_s14, 4  ;;  %s86_s17 = sshll.u32 %s6730_s16, 4  ;;  %s59_s15 = int_to_ptr.vmem [resolvable:$true] %s58_s15  ;;  %s6874_s17 = int_to_ptr.vmem [resolvable:$true] %s86_s17 }
  0x4b   :  { %s6529_s22 = scalar_lea.hbm %s7890_s2, 1024 }
  0x4c   :  { %p6530_p4 = scmp.ne.s32.totalorder %s7890_s2, %s6529_s22  ;;  %p6533_p5 = scmp.lt.u32.totalorder %s6529_s22, %s7890_s2 }
  0x4e   :  { %p6535_p6 = pnand %p6533_p5, %p6530_p4 }
  0x50   :  { %6538 = shalt.err (!%p6535_p6)
}
  0x51   :  { %s6539_s0 = scalar_lea.vmem %s59_s15, 1024  ;;  %p6544_p8 = scmp.lt.s32.totalorder %s59_s15, %s59_s15 }
  0x52   :  { %p6540_p7 = scmp.ne.s32.totalorder %s59_s15, %s6539_s0  ;;  %p6545_p9 = scmp.lt.s32.totalorder %s6539_s0, %s6539_s0 }
  0x54   :  { %p6546_p10 = por %p6545_p9, %p6544_p8 }
  0x56   :  { %p6547_p11 = pnand %p6546_p10, %p6540_p7 }
  0x58   :  { %6550 = shalt.err (!%p6547_p11)
}
  0x59   :  { %64 = dma.hbm_to_vmem [thread:$0]  %s7890_s2, 1024, %s59_s15, [#allocation12], %s6723_s29, %s6723_s29, %s6724_s30  }
  0x5a   :  { %s6551_s13 = scalar_lea.hbm %s7892_s4, 16384 }
  0x5b   :  { %p6552_p12 = scmp.ne.s32.totalorder %s7892_s4, %s6551_s13  ;;  %p6555_p13 = scmp.lt.u32.totalorder %s6551_s13, %s7892_s4 }
  0x5d   :  { %p6557_p0 = pnand %p6555_p13, %p6552_p12 }
  0x5f   :  { %6560 = shalt.err (!%p6557_p0)
}
  0x60   :  { %s6561_s3 = scalar_lea.vmem %s6874_s17, 16384  ;;  %p6566_p2 = scmp.lt.s32.totalorder %s6874_s17, %s6874_s17 }
  0x61   :  { %p6562_p1 = scmp.ne.s32.totalorder %s6874_s17, %s6561_s3  ;;  %p6567_p3 = scmp.lt.s32.totalorder %s6561_s3, %s6561_s3 }
  0x63   :  { %p6568_p4 = por %p6567_p3, %p6566_p2 }
  0x65   :  { %p6569_p5 = pnand %p6568_p4, %p6562_p1 }
  0x67   :  { %6572 = shalt.err (!%p6569_p5)
}
  0x68   :  { %92 = dma.hbm_to_vmem [thread:$0]  %s7892_s4, 16384, %s6874_s17, [#allocation15], %s6727_s20, %s6727_s20, %s6728_s19  }
  0x69   :  { %s6731_s21 = smov [#allocation19]   ;;  %s6732_s23 = smov [#allocation20]  }
  0x6a   :  { %s110_s22 = sshll.u32 %s6731_s21, 4  ;;  %s122_s1 = sshll.u32 %s6732_s23, 4  ;;  %s111_s22 = int_to_ptr.vmem [resolvable:$true] %s110_s22  ;;  %s6911_s1 = int_to_ptr.vmem [resolvable:$true] %s122_s1 }
  0x6b   :  { %s6573_s0 = scalar_lea.hbm %s7894_s6, 16384 }
  0x6c   :  { %p6574_p6 = scmp.ne.s32.totalorder %s7894_s6, %s6573_s0  ;;  %p6577_p7 = scmp.lt.u32.totalorder %s6573_s0, %s7894_s6 }
  0x6e   :  { %p6579_p8 = pnand %p6577_p7, %p6574_p6 }
  0x70   :  { %6582 = shalt.err (!%p6579_p8)
}
  0x71   :  { %s6583_s4 = scalar_lea.vmem %s111_s22, 16384  ;;  %p6588_p10 = scmp.lt.s32.totalorder %s111_s22, %s111_s22 }
  0x72   :  { %p6584_p9 = scmp.ne.s32.totalorder %s111_s22, %s6583_s4  ;;  %p6589_p11 = scmp.lt.s32.totalorder %s6583_s4, %s6583_s4 }
  0x74   :  { %p6590_p12 = por %p6589_p11, %p6588_p10 }
  0x76   :  { %p6591_p13 = pnand %p6590_p12, %p6584_p9 }
  0x78   :  { %6594 = shalt.err (!%p6591_p13)
}
  0x79   :  { %116 = dma.hbm_to_vmem [thread:$0]  %s7894_s6, 16384, %s111_s22, [#allocation18], %s6727_s20, %s6727_s20, %s6728_s19  }
  0x7a   :  { %s6595_s14 = scalar_lea.hbm %s7895_s7, 128 }
  0x7b   :  { %p6596_p0 = scmp.ne.s32.totalorder %s7895_s7, %s6595_s14  ;;  %p6599_p1 = scmp.lt.u32.totalorder %s6595_s14, %s7895_s7 }
  0x7d   :  { %p6601_p2 = pnand %p6599_p1, %p6596_p0 }
  0x7f   :  { %6604 = shalt.err (!%p6601_p2)
}
  0x80   :  { %s6605_s21 = scalar_lea.vmem %s6911_s1, 128  ;;  %p6610_p4 = scmp.lt.s32.totalorder %s6911_s1, %s6911_s1 }
  0x81   :  { %p6606_p3 = scmp.ne.s32.totalorder %s6911_s1, %s6605_s21  ;;  %p6611_p5 = scmp.lt.s32.totalorder %s6605_s21, %s6605_s21 }
  0x83   :  { %p6612_p6 = por %p6611_p5, %p6610_p4 }
  0x85   :  { %p6613_p7 = pnand %p6612_p6, %p6606_p3 }
  0x87   :  { %6616 = shalt.err (!%p6613_p7)
}
  0x88   :  { %s6733_s6 = smov 64   ;;  %s6734_s20 = smov 4  }
  0x89   :  { %128 = dma.hbm_to_vmem [thread:$0]  %s7895_s7, 128, %s6911_s1, [#allocation21], %s6733_s6, %s6733_s6, %s6734_s20  }
  0x8a   :  { %6705 = dma.done.wait [#allocation9], 1024  }
  0x8b   :  { %6706 = vsyncadd [#allocation9], 4294966272 }
  0x8c   :  { %6707 = dma.done.wait [#allocation12], 2048  }
  0x8d   :  { %6708 = vsyncadd [#allocation12], 4294965248 }
  0x8e   :  { %6709 = dma.done.wait [#allocation15], 17408  }
  0x8f   :  { %6710 = vsyncadd [#allocation15], 4294949888 }
  0x90   :  { %6711 = dma.done.wait [#allocation18], 32768  }
  0x91   :  { %6712 = vsyncadd [#allocation18], 4294934528 }
  0x92   :  { %6713 = dma.done.wait [#allocation21], 128  }
  0x93   :  { %6714 = vsyncadd [#allocation21], 4294967168  ;;  %v7900_v0 = vmov 0.0   ;;  %v248_v1 = vld [vmem:[#allocation17 + $0x8] sm:$0xff]  ;;  %v250_v3 = vld [vmem:[#allocation17 + $0x18] sm:$0xff]  ;;  %s6736_s7 = smov [#allocation22]  }
  0x94   :  { %375 = vmatprep.mubr.f32.mxu0 %v7900_v0  ;;  %488 = vmatprep.mubr.f32.mxu1 %v7900_v0  ;;  %v252_v2 = vld [vmem:[#allocation17 + $0x28] sm:$0xff]  ;;  %v254_v5 = vld [vmem:[#allocation17 + $0x38] sm:$0xff]  ;;  %v247_v6 = vld [vmem:[#allocation17] sm:$0xff]  ;;  %s4573_s23 = sshll.u32 %s6736_s7, 4  ;;  %s4574_s23 = int_to_ptr.vmem [resolvable:$true] %s4573_s23 }
  0x95   :  { %v4694_v4 = vpack.c.bf16 %v252_v2, %v248_v1  ;;  %v251_v7 = vld [vmem:[#allocation17 + $0x20] sm:$0xff]  ;;  %v4726_v8 = vpack.c.bf16 %v254_v5, %v250_v3  ;;  %v249_v10 = vld [vmem:[#allocation17 + $0x10] sm:$0xff]  ;;  %v256_v12 = vld [vmem:[#allocation17 + $0x48] sm:$0xff]  ;;  %s6617_s1 = scalar_lea.vmem %s4574_s23, 1024  ;;  %p6622_p9 = scmp.lt.s32.totalorder %s4574_s23, %s4574_s23 }
  0x96   :  { %v4696_v9 = vpack.c.bf16 %v251_v7, %v247_v6  ;;  %v253_v11 = vld [vmem:[#allocation17 + $0x30] sm:$0xff]  ;;  %v260_v14 = vld [vmem:[#allocation17 + $0x68] sm:$0xff]  ;;  %v258_v15 = vld [vmem:[#allocation17 + $0x58] sm:$0xff]  ;;  %p6618_p8 = scmp.ne.s32.totalorder %s4574_s23, %s6617_s1  ;;  %p6623_p10 = scmp.lt.s32.totalorder %s6617_s1, %s6617_s1 }
  0x97   :  { %4695 = vmatprep.subr.bf16.mxu0 %v4694_v4  ;;  %v4728_v13 = vpack.c.bf16 %v253_v11, %v249_v10  ;;  %v262_v16 = vld [vmem:[#allocation17 + $0x78] sm:$0xff]  ;;  %4727 = vmatprep.subr.bf16.mxu1 %v4726_v8  ;;  %v4698_v17 = vpack.c.bf16 %v260_v14, %v256_v12  ;;  %v255_v19 = vld [vmem:[#allocation17 + $0x40] sm:$0xff]  ;;  %v257_v21 = vld [vmem:[#allocation17 + $0x50] sm:$0xff] }
  0x98   :  { %4697 = vmatpush1.bf16.msra.mxu0 %v4696_v9  ;;  %v4730_v18 = vpack.c.bf16 %v262_v16, %v258_v15  ;;  %v259_v20 = vld [vmem:[#allocation17 + $0x60] sm:$0xff]  ;;  %v261_v23 = vld [vmem:[#allocation17 + $0x70] sm:$0xff]  ;;  %v264_v24 = vld [vmem:[#allocation17 + $0x88] sm:$0xff]  ;;  %p6624_p11 = por %p6623_p10, %p6622_p9 }
  0x99   :  { %4729 = vmatpush1.bf16.msra.mxu1 %v4728_v13  ;;  %v4700_v22 = vpack.c.bf16 %v259_v20, %v255_v19  ;;  %v268_v25 = vld [vmem:[#allocation17 + $0xa8] sm:$0xff]  ;;  %4699 = vmatprep.subr.bf16.mxu0 %v4698_v17  ;;  %v4732_v26 = vpack.c.bf16 %v261_v23, %v257_v21  ;;  %v266_v28 = vld [vmem:[#allocation17 + $0x98] sm:$0xff]  ;;  %v263_v30 = vld [vmem:[#allocation17 + $0x80] sm:$0xff] }
  0x9a   :  { %4731 = vmatprep.subr.bf16.mxu1 %v4730_v18  ;;  %v4702_v27 = vpack.c.bf16 %v268_v25, %v264_v24  ;;  %v270_v29 = vld [vmem:[#allocation17 + $0xb8] sm:$0xff]  ;;  %v267_v32 = vld [vmem:[#allocation17 + $0xa0] sm:$0xff]  ;;  %v265_v33 = vld [vmem:[#allocation17 + $0x90] sm:$0xff]  ;;  %p6625_p12 = pnand %p6624_p11, %p6618_p8 }
  0x9b   :  { %v4734_v31 = vpack.c.bf16 %v270_v29, %v266_v28  ;;  %v269_v34 = vld [vmem:[#allocation17 + $0xb0] sm:$0xff]  ;;  %v4704_v35 = vpack.c.bf16 %v267_v32, %v263_v30  ;;  %v272_v36 = vld [vmem:[#allocation17 + $0xc8] sm:$0xff]  ;;  %v274_v38 = vld [vmem:[#allocation17 + $0xd8] sm:$0xff] }
  0x9c   :  { %4701 = vmatpush1.bf16.msra.mxu0 %v4700_v22  ;;  %v276_v37 = vld [vmem:[#allocation17 + $0xe8] sm:$0xff]  ;;  %v4736_v39 = vpack.c.bf16 %v269_v34, %v265_v33  ;;  %v278_v41 = vld [vmem:[#allocation17 + $0xf8] sm:$0xff]  ;;  %v271_v42 = vld [vmem:[#allocation17 + $0xc0] sm:$0xff] }
  0x9d   :  { %4733 = vmatpush1.bf16.msra.mxu1 %v4732_v26  ;;  %4703 = vmatprep.subr.bf16.mxu0 %v4702_v27  ;;  %v4706_v40 = vpack.c.bf16 %v276_v37, %v272_v36  ;;  %v275_v43 = vld [vmem:[#allocation17 + $0xe0] sm:$0xff]  ;;  %v4738_v44 = vpack.c.bf16 %v278_v41, %v274_v38  ;;  %v273_v45 = vld [vmem:[#allocation17 + $0xd0] sm:$0xff]  ;;  %v280_v47 = vld [vmem:[#allocation17 + $0x108] sm:$0xff] }
  0x9e   :  { %4735 = vmatprep.subr.bf16.mxu1 %v4734_v31  ;;  %v277_v46 = vld [vmem:[#allocation17 + $0xf0] sm:$0xff]  ;;  %v284_v48 = vld [vmem:[#allocation17 + $0x128] sm:$0xff]  ;;  %v282_v49 = vld [vmem:[#allocation17 + $0x118] sm:$0xff]  ;;  %v4708_v51 = vpack.c.bf16 %v275_v43, %v271_v42 }
  0x9f   :  { %v286_v50 = vld [vmem:[#allocation17 + $0x138] sm:$0xff]  ;;  %v4740_v52 = vpack.c.bf16 %v277_v46, %v273_v45  ;;  %v4710_v53 = vpack.c.bf16 %v284_v48, %v280_v47  ;;  %v279_v54 = vld [vmem:[#allocation17 + $0x100] sm:$0xff]  ;;  %v281_v56 = vld [vmem:[#allocation17 + $0x110] sm:$0xff] }
  0xa0   :  { %4705 = vmatpush1.bf16.msra.mxu0 %v4704_v35  ;;  %v283_v55 = vld [vmem:[#allocation17 + $0x120] sm:$0xff]  ;;  %v4742_v57 = vpack.c.bf16 %v286_v50, %v282_v49  ;;  %v285_v58 = vld [vmem:[#allocation17 + $0x130] sm:$0xff]  ;;  %v288_v59 = vld [vmem:[#allocation17 + $0x148] sm:$0xff] }
  0xa1   :  { %4737 = vmatpush1.bf16.msra.mxu1 %v4736_v39  ;;  %4707 = vmatprep.subr.bf16.mxu0 %v4706_v40  ;;  %v292_v60 = vld [vmem:[#allocation17 + $0x168] sm:$0xff]  ;;  %v290_v61 = vld [vmem:[#allocation17 + $0x158] sm:$0xff]  ;;  %v4712_v63 = vpack.c.bf16 %v283_v55, %v279_v54  ;;  %v4744_v1 = vpack.c.bf16 %v285_v58, %v281_v56  ;;  %v287_v3 = vld [vmem:[#allocation17 + $0x140] sm:$0xff] }
  0xa2   :  { %4739 = vmatprep.subr.bf16.mxu1 %v4738_v44  ;;  %v294_v62 = vld [vmem:[#allocation17 + $0x178] sm:$0xff]  ;;  %v4714_v2 = vpack.c.bf16 %v292_v60, %v288_v59  ;;  %v291_v4 = vld [vmem:[#allocation17 + $0x160] sm:$0xff]  ;;  %v289_v5 = vld [vmem:[#allocation17 + $0x150] sm:$0xff] }
  0xa3   :  { %v4746_v6 = vpack.c.bf16 %v294_v62, %v290_v61  ;;  %v293_v7 = vld [vmem:[#allocation17 + $0x170] sm:$0xff]  ;;  %v296_v8 = vld [vmem:[#allocation17 + $0x188] sm:$0xff]  ;;  %v298_v10 = vld [vmem:[#allocation17 + $0x198] sm:$0xff]  ;;  %v4716_v12 = vpack.c.bf16 %v291_v4, %v287_v3 }
  0xa4   :  { %4709 = vmatpush1.bf16.msra.mxu0 %v4708_v51  ;;  %v300_v9 = vld [vmem:[#allocation17 + $0x1a8] sm:$0xff]  ;;  %v302_v11 = vld [vmem:[#allocation17 + $0x1b8] sm:$0xff]  ;;  %v4748_v13 = vpack.c.bf16 %v293_v7, %v289_v5  ;;  %v295_v15 = vld [vmem:[#allocation17 + $0x180] sm:$0xff] }
  0xa5   :  { %4741 = vmatpush1.bf16.msra.mxu1 %v4740_v52  ;;  %4711 = vmatprep.subr.bf16.mxu0 %v4710_v53  ;;  %v4718_v14 = vpack.c.bf16 %v300_v9, %v296_v8  ;;  %v299_v16 = vld [vmem:[#allocation17 + $0x1a0] sm:$0xff]  ;;  %v297_v17 = vld [vmem:[#allocation17 + $0x190] sm:$0xff]  ;;  %v4750_v18 = vpack.c.bf16 %v302_v11, %v298_v10  ;;  %v304_v20 = vld [vmem:[#allocation17 + $0x1c8] sm:$0xff] }
  0xa6   :  { %4743 = vmatprep.subr.bf16.mxu1 %v4742_v57  ;;  %v301_v19 = vld [vmem:[#allocation17 + $0x1b0] sm:$0xff]  ;;  %v308_v21 = vld [vmem:[#allocation17 + $0x1e8] sm:$0xff]  ;;  %v306_v22 = vld [vmem:[#allocation17 + $0x1d8] sm:$0xff]  ;;  %v4720_v24 = vpack.c.bf16 %v299_v16, %v295_v15 }
  0xa7   :  { %v310_v23 = vld [vmem:[#allocation17 + $0x1f8] sm:$0xff]  ;;  %v4752_v25 = vpack.c.bf16 %v301_v19, %v297_v17  ;;  %v4722_v26 = vpack.c.bf16 %v308_v21, %v304_v20  ;;  %v303_v27 = vld [vmem:[#allocation17 + $0x1c0] sm:$0xff]  ;;  %v305_v29 = vld [vmem:[#allocation17 + $0x1d0] sm:$0xff] }
  0xa8   :  { %4713 = vmatpush1.bf16.msra.mxu0 %v4712_v63  ;;  %v307_v28 = vld [vmem:[#allocation17 + $0x1e0] sm:$0xff]  ;;  %v4754_v30 = vpack.c.bf16 %v310_v23, %v306_v22  ;;  %v309_v31 = vld [vmem:[#allocation17 + $0x1f0] sm:$0xff]  ;;  %v176_v32 = vld [vmem:[#allocation16 + $0x8] sm:$0xff] }
  0xa9   :  { %4745 = vmatpush1.bf16.msra.mxu1 %v4744_v1  ;;  %4715 = vmatprep.subr.bf16.mxu0 %v4714_v2  ;;  %v180_v33 = vld [vmem:[#allocation16 + $0x28] sm:$0xff]  ;;  %v178_v34 = vld [vmem:[#allocation16 + $0x18] sm:$0xff]  ;;  %v4724_v36 = vpack.c.bf16 %v307_v28, %v303_v27  ;;  %v4756_v37 = vpack.c.bf16 %v309_v31, %v305_v29  ;;  %v175_v39 = vld [vmem:[#allocation16] sm:$0xff] }
  0xaa   :  { %4747 = vmatprep.subr.bf16.mxu1 %v4746_v6  ;;  %v182_v35 = vld [vmem:[#allocation16 + $0x38] sm:$0xff]  ;;  %v4758_v38 = vpack.c.bf16 %v180_v33, %v176_v32  ;;  %v179_v40 = vld [vmem:[#allocation16 + $0x20] sm:$0xff]  ;;  %v177_v42 = vld [vmem:[#allocation16 + $0x10] sm:$0xff] }
  0xab   :  { %v4790_v41 = vpack.c.bf16 %v182_v35, %v178_v34  ;;  %v181_v43 = vld [vmem:[#allocation16 + $0x30] sm:$0xff]  ;;  %v184_v44 = vld [vmem:[#allocation16 + $0x48] sm:$0xff]  ;;  %v239_v46 = vld [vmem:[#allocation11] sm:$0xff]  ;;  %v4760_v47 = vpack.c.bf16 %v179_v40, %v175_v39 }
  0xac   :  { %4717 = vmatpush1.bf16.msra.mxu0 %v4716_v12  ;;  %v188_v45 = vld [vmem:[#allocation16 + $0x68] sm:$0xff]  ;;  %v186_v48 = vld [vmem:[#allocation16 + $0x58] sm:$0xff]  ;;  %v4792_v50 = vpack.c.bf16 %v181_v43, %v177_v42  ;;  %v183_v51 = vld [vmem:[#allocation16 + $0x40] sm:$0xff] }
  0xad   :  { %4749 = vmatpush1.bf16.msra.mxu1 %v4748_v13  ;;  %4719 = vmatprep.subr.bf16.mxu0 %v4718_v14  ;;  %v190_v49 = vld [vmem:[#allocation16 + $0x78] sm:$0xff]  ;;  %v187_v52 = vld [vmem:[#allocation16 + $0x60] sm:$0xff]  ;;  %v4762_v53 = vpack.c.bf16 %v188_v45, %v184_v44  ;;  %v185_v54 = vld [vmem:[#allocation16 + $0x50] sm:$0xff] }
  0xae   :  { %4751 = vmatprep.subr.bf16.mxu1 %v4750_v18  ;;  %v189_v55 = vld [vmem:[#allocation16 + $0x70] sm:$0xff]  ;;  %v4794_v56 = vpack.c.bf16 %v190_v49, %v186_v48  ;;  %v192_v57 = vld [vmem:[#allocation16 + $0x88] sm:$0xff]  ;;  %v4764_v60 = vpack.c.bf16 %v187_v52, %v183_v51  ;;  %v194_v61 = vld [vmem:[#allocation16 + $0x98] sm:$0xff] }
  0xaf   :  { %v196_v58 = vld [vmem:[#allocation16 + $0xa8] sm:$0xff]  ;;  %v198_v62 = vld [vmem:[#allocation16 + $0xb8] sm:$0xff]  ;;  %v4796_v63 = vpack.c.bf16 %v189_v55, %v185_v54  ;;  %v191_v1 = vld [vmem:[#allocation16 + $0x80] sm:$0xff] }
  0xb0   :  { %4721 = vmatpush1.bf16.msra.mxu0 %v4720_v24  ;;  %v240_v59 = vld [vmem:[#allocation11 + $0x8] sm:$0xff]  ;;  %v195_v2 = vld [vmem:[#allocation16 + $0xa0] sm:$0xff]  ;;  %v4766_v3 = vpack.c.bf16 %v196_v58, %v192_v57  ;;  %v193_v4 = vld [vmem:[#allocation16 + $0x90] sm:$0xff]  ;;  %v4798_v6 = vpack.c.bf16 %v198_v62, %v194_v61 }
  0xb1   :  { %4753 = vmatpush1.bf16.msra.mxu1 %v4752_v25  ;;  %4723 = vmatprep.subr.bf16.mxu0 %v4722_v26  ;;  %v197_v5 = vld [vmem:[#allocation16 + $0xb0] sm:$0xff]  ;;  %v200_v7 = vld [vmem:[#allocation16 + $0xc8] sm:$0xff]  ;;  %v4768_v10 = vpack.c.bf16 %v195_v2, %v191_v1  ;;  %v202_v11 = vld [vmem:[#allocation16 + $0xd8] sm:$0xff] }
  0xb2   :  { %4755 = vmatprep.subr.bf16.mxu1 %v4754_v30  ;;  %v204_v8 = vld [vmem:[#allocation16 + $0xe8] sm:$0xff]  ;;  %v241_v9 = vld [vmem:[#allocation11 + $0x10] sm:$0xff]  ;;  %v206_v12 = vld [vmem:[#allocation16 + $0xf8] sm:$0xff]  ;;  %v4800_v13 = vpack.c.bf16 %v197_v5, %v193_v4 }
  0xb3   :  { %v199_v14 = vld [vmem:[#allocation16 + $0xc0] sm:$0xff]  ;;  %v4770_v16 = vpack.c.bf16 %v204_v8, %v200_v7  ;;  %v201_v17 = vld [vmem:[#allocation16 + $0xd0] sm:$0xff]  ;;  %v4802_v19 = vpack.c.bf16 %v206_v12, %v202_v11  ;;  %v208_v20 = vld [vmem:[#allocation16 + $0x108] sm:$0xff] }
  0xb4   :  { %4725 = vmatpush1.bf16.msra.mxu0 %v4724_v36  ;;  %v203_v15 = vld [vmem:[#allocation16 + $0xe0] sm:$0xff]  ;;  %v205_v18 = vld [vmem:[#allocation16 + $0xf0] sm:$0xff]  ;;  %v212_v21 = vld [vmem:[#allocation16 + $0x128] sm:$0xff] }
  0xb5   :  { %4757 = vmatpush1.bf16.msra.mxu1 %v4756_v37  ;;  %4759 = vmatprep.subr.bf16.mxu0 %v4758_v38  ;;  %v242_v22 = vld [vmem:[#allocation11 + $0x18] sm:$0xff]  ;;  %v4772_v23 = vpack.c.bf16 %v203_v15, %v199_v14  ;;  %v4804_v26 = vpack.c.bf16 %v205_v18, %v201_v17  ;;  %v207_v27 = vld [vmem:[#allocation16 + $0x100] sm:$0xff]  ;;  %v4774_v29 = vpack.c.bf16 %v212_v21, %v208_v20  ;;  %v209_v30 = vld [vmem:[#allocation16 + $0x110] sm:$0xff] }
  0xb6   :  { %4791 = vmatprep.subr.bf16.mxu1 %v4790_v41  ;;  %v210_v24 = vld [vmem:[#allocation16 + $0x118] sm:$0xff]  ;;  %v211_v28 = vld [vmem:[#allocation16 + $0x120] sm:$0xff]  ;;  %v213_v31 = vld [vmem:[#allocation16 + $0x130] sm:$0xff] }
  0xb7   :  { %376 = vmatmul.mubr.f32.vlgmr.msra.gmra.mrb[0].mxu0 %v239_v46  ;;  %v214_v25 = vld [vmem:[#allocation16 + $0x138] sm:$0xff]  ;;  %v216_v33 = vld [vmem:[#allocation16 + $0x148] sm:$0xff]  ;;  %v243_v35 = vld [vmem:[#allocation11 + $0x20] sm:$0xff]  ;;  %v4776_v36 = vpack.c.bf16 %v211_v28, %v207_v27  ;;  %v4808_v39 = vpack.c.bf16 %v213_v31, %v209_v30 }
  0xb8   :  { %489 = vmatmul.mubr.f32.vlgmr.msra.gmra.mrb[0].mxu1 %v239_v46  ;;  %4761 = vmatpush1.bf16.msra.mxu0 %v4760_v47  ;;  %v4806_v32 = vpack.c.bf16 %v214_v25, %v210_v24  ;;  %v220_v34 = vld [vmem:[#allocation16 + $0x168] sm:$0xff]  ;;  %v218_v37 = vld [vmem:[#allocation16 + $0x158] sm:$0xff]  ;;  %v215_v40 = vld [vmem:[#allocation16 + $0x140] sm:$0xff] }
  0xb9   :  { %4793 = vmatpush1.bf16.msra.mxu1 %v4792_v50  ;;  %381 = vmatprep.mubr.f32.mxu0 %v7900_v0  ;;  %v222_v38 = vld [vmem:[#allocation16 + $0x178] sm:$0xff]  ;;  %v219_v41 = vld [vmem:[#allocation16 + $0x160] sm:$0xff]  ;;  %v4778_v42 = vpack.c.bf16 %v220_v34, %v216_v33  ;;  %v217_v43 = vld [vmem:[#allocation16 + $0x150] sm:$0xff] }
  0xba   :  { %494 = vmatprep.mubr.f32.mxu1 %v7900_v0  ;;  %4763 = vmatprep.subr.bf16.mxu0 %v4762_v53  ;;  %v221_v44 = vld [vmem:[#allocation16 + $0x170] sm:$0xff]  ;;  %v4810_v45 = vpack.c.bf16 %v222_v38, %v218_v37  ;;  %v224_v46 = vld [vmem:[#allocation16 + $0x188] sm:$0xff]  ;;  %v4780_v49 = vpack.c.bf16 %v219_v41, %v215_v40  ;;  %v226_v50 = vld [vmem:[#allocation16 + $0x198] sm:$0xff] }
  0xbb   :  { %382 = vmatmul.mubr.f32.gmra.mrb[2].mxu0 %v240_v59  ;;  %4795 = vmatprep.subr.bf16.mxu1 %v4794_v56  ;;  %v228_v47 = vld [vmem:[#allocation16 + $0x1a8] sm:$0xff]  ;;  %v230_v51 = vld [vmem:[#allocation16 + $0x1b8] sm:$0xff]  ;;  %v4812_v52 = vpack.c.bf16 %v221_v44, %v217_v43  ;;  %v223_v53 = vld [vmem:[#allocation16 + $0x180] sm:$0xff] }
  0xbc   :  { %495 = vmatmul.mubr.f32.gmra.mrb[2].mxu1 %v240_v59  ;;  %4765 = vmatpush1.bf16.msra.mxu0 %v4764_v60  ;;  %v244_v48 = vld [vmem:[#allocation11 + $0x28] sm:$0xff]  ;;  %v227_v54 = vld [vmem:[#allocation16 + $0x1a0] sm:$0xff]  ;;  %v4782_v55 = vpack.c.bf16 %v228_v47, %v224_v46  ;;  %v225_v56 = vld [vmem:[#allocation16 + $0x190] sm:$0xff]  ;;  %v4814_v58 = vpack.c.bf16 %v230_v51, %v226_v50 }
  0xbd   :  { %4797 = vmatpush1.bf16.msra.mxu1 %v4796_v63  ;;  %387 = vmatprep.mubr.f32.mxu0 %v7900_v0  ;;  %v229_v57 = vld [vmem:[#allocation16 + $0x1b0] sm:$0xff]  ;;  %v232_v59 = vld [vmem:[#allocation16 + $0x1c8] sm:$0xff]  ;;  %v4784_v62 = vpack.c.bf16 %v227_v54, %v223_v53  ;;  %v234_v63 = vld [vmem:[#allocation16 + $0x1d8] sm:$0xff] }
  0xbe   :  { %500 = vmatprep.mubr.f32.mxu1 %v7900_v0  ;;  %4767 = vmatprep.subr.bf16.mxu0 %v4766_v3  ;;  %v236_v60 = vld [vmem:[#allocation16 + $0x1e8] sm:$0xff]  ;;  %v245_v61 = vld [vmem:[#allocation11 + $0x30] sm:$0xff]  ;;  %v238_v1 = vld [vmem:[#allocation16 + $0x1f8] sm:$0xff]  ;;  %v4816_v2 = vpack.c.bf16 %v229_v57, %v225_v56 }
  0xbf   :  { %388 = vmatmul.mubr.f32.gmra.mrb[4].mxu0 %v241_v9  ;;  %4799 = vmatprep.subr.bf16.mxu1 %v4798_v6  ;;  %v231_v3 = vld [vmem:[#allocation16 + $0x1c0] sm:$0xff]  ;;  %v4786_v5 = vpack.c.bf16 %v236_v60, %v232_v59  ;;  %v233_v6 = vld [vmem:[#allocation16 + $0x1d0] sm:$0xff]  ;;  %v4818_v8 = vpack.c.bf16 %v238_v1, %v234_v63  ;;  %v246_v11 = vld [vmem:[#allocation11 + $0x38] sm:$0xff] }
  0xc0   :  { %501 = vmatmul.mubr.f32.gmra.mrb[4].mxu1 %v241_v9  ;;  %4769 = vmatpush1.bf16.msra.mxu0 %v4768_v10  ;;  %v235_v4 = vld [vmem:[#allocation16 + $0x1e0] sm:$0xff]  ;;  %v237_v7 = vld [vmem:[#allocation16 + $0x1f0] sm:$0xff]  ;;  %v932_v9 = vld [vmem:[#allocation17 + $0x208] sm:$0xff] }
  0xc1   :  { %4801 = vmatpush1.bf16.msra.mxu1 %v4800_v13  ;;  %393 = vmatprep.mubr.f32.mxu0 %v7900_v0  ;;  %v936_v10 = vld [vmem:[#allocation17 + $0x228] sm:$0xff]  ;;  %v4788_v12 = vpack.c.bf16 %v235_v4, %v231_v3  ;;  %v934_v13 = vld [vmem:[#allocation17 + $0x218] sm:$0xff]  ;;  %v4820_v15 = vpack.c.bf16 %v237_v7, %v233_v6  ;;  %v935_v17 = vld [vmem:[#allocation17 + $0x220] sm:$0xff] }
  0xc2   :  { %506 = vmatprep.mubr.f32.mxu1 %v7900_v0  ;;  %4771 = vmatprep.subr.bf16.mxu0 %v4770_v16  ;;  %v938_v14 = vld [vmem:[#allocation17 + $0x238] sm:$0xff]  ;;  %v931_v16 = vld [vmem:[#allocation17 + $0x200] sm:$0xff]  ;;  %v4822_v18 = vpack.c.bf16 %v936_v10, %v932_v9  ;;  %v937_v20 = vld [vmem:[#allocation17 + $0x230] sm:$0xff] }
  0xc3   :  { %394 = vmatmul.mubr.f32.gmra.mrb[6].mxu0 %v242_v22  ;;  %4803 = vmatprep.subr.bf16.mxu1 %v4802_v19  ;;  %v933_v19 = vld [vmem:[#allocation17 + $0x210] sm:$0xff]  ;;  %v4854_v21 = vpack.c.bf16 %v938_v14, %v934_v13  ;;  %v167_v24 = vld [vmem:[#allocation8] sm:$0xff]  ;;  %v4824_v25 = vpack.c.bf16 %v935_v17, %v931_v16  ;;  %v946_v27 = vld [vmem:[#allocation17 + $0x278] sm:$0xff] }
  0xc4   :  { %507 = vmatmul.mubr.f32.gmra.mrb[6].mxu1 %v242_v22  ;;  %4773 = vmatpush1.bf16.msra.mxu0 %v4772_v23  ;;  %v940_v22 = vld [vmem:[#allocation17 + $0x248] sm:$0xff]  ;;  %v4856_v28 = vpack.c.bf16 %v937_v20, %v933_v19  ;;  %v943_v30 = vld [vmem:[#allocation17 + $0x260] sm:$0xff]  ;;  %v945_v33 = vld [vmem:[#allocation17 + $0x270] sm:$0xff] }
  0xc5   :  { %4805 = vmatpush1.bf16.msra.mxu1 %v4804_v26  ;;  %399 = vmatprep.mubr.f32.mxu0 %v7900_v0  ;;  %v944_v23 = vld [vmem:[#allocation17 + $0x268] sm:$0xff]  ;;  %v942_v26 = vld [vmem:[#allocation17 + $0x258] sm:$0xff]  ;;  %v951_v43 = vld [vmem:[#allocation17 + $0x2a0] sm:$0xff] }
  0xc6   :  { %512 = vmatprep.mubr.f32.mxu1 %v7900_v0  ;;  %4775 = vmatprep.subr.bf16.mxu0 %v4774_v29  ;;  %v939_v29 = vld [vmem:[#allocation17 + $0x240] sm:$0xff]  ;;  %v4826_v31 = vpack.c.bf16 %v944_v23, %v940_v22  ;;  %v4858_v34 = vpack.c.bf16 %v946_v27, %v942_v26  ;;  %v168_v37 = vld [vmem:[#allocation8 + $0x8] sm:$0xff]  ;;  %v954_v40 = vld [vmem:[#allocation17 + $0x2b8] sm:$0xff] }
  0xc7   :  { %400 = vmatmul.mubr.f32.gmra.mrb[8].mxu0 %v243_v35  ;;  %4807 = vmatprep.subr.bf16.mxu1 %v4806_v32  ;;  %v941_v32 = vld [vmem:[#allocation17 + $0x250] sm:$0xff]  ;;  %v4828_v38 = vpack.c.bf16 %v943_v30, %v939_v29  ;;  %v962_v53 = vld [vmem:[#allocation17 + $0x2f8] sm:$0xff]  ;;  %v959_v56 = vld [vmem:[#allocation17 + $0x2e0] sm:$0xff] }
  0xc8   :  { %513 = vmatmul.mubr.f32.gmra.mrb[8].mxu1 %v243_v35  ;;  %4777 = vmatpush1.bf16.msra.mxu0 %v4776_v36  ;;  %v948_v35 = vld [vmem:[#allocation17 + $0x288] sm:$0xff]  ;;  %v4860_v41 = vpack.c.bf16 %v945_v33, %v941_v32  ;;  %v953_v46 = vld [vmem:[#allocation17 + $0x2b0] sm:$0xff]  ;;  %v170_v63 = vld [vmem:[#allocation8 + $0x18] sm:$0xff] }
  0xc9   :  { %4809 = vmatpush1.bf16.msra.mxu1 %v4808_v39  ;;  %405 = vmatprep.mubr.f32.mxu0 %v7900_v0  ;;  %v952_v36 = vld [vmem:[#allocation17 + $0x2a8] sm:$0xff]  ;;  %v950_v39 = vld [vmem:[#allocation17 + $0x298] sm:$0xff]  ;;  %v169_v50 = vld [vmem:[#allocation8 + $0x10] sm:$0xff] }
  0xca   :  { %518 = vmatprep.mubr.f32.mxu1 %v7900_v0  ;;  %4779 = vmatprep.subr.bf16.mxu0 %v4778_v42  ;;  %v947_v42 = vld [vmem:[#allocation17 + $0x280] sm:$0xff]  ;;  %v4830_v44 = vpack.c.bf16 %v952_v36, %v948_v35  ;;  %v4862_v47 = vpack.c.bf16 %v954_v40, %v950_v39  ;;  %v961_v59 = vld [vmem:[#allocation17 + $0x2f0] sm:$0xff]  ;;  %v970_v3 = vld [vmem:[#allocation17 + $0x338] sm:$0xff] }
  0xcb   :  { %406 = vmatmul.mubr.f32.gmra.mrb[10].mxu0 %v244_v48  ;;  %4811 = vmatprep.subr.bf16.mxu1 %v4810_v45  ;;  %v949_v45 = vld [vmem:[#allocation17 + $0x290] sm:$0xff]  ;;  %v4832_v51 = vpack.c.bf16 %v951_v43, %v947_v42  ;;  %v967_v6 = vld [vmem:[#allocation17 + $0x320] sm:$0xff]  ;;  %v978_v16 = vld [vmem:[#allocation17 + $0x378] sm:$0xff] }
  0xcc   :  { %519 = vmatmul.mubr.f32.gmra.mrb[10].mxu1 %v244_v48  ;;  %4781 = vmatpush1.bf16.msra.mxu0 %v4780_v49  ;;  %v956_v48 = vld [vmem:[#allocation17 + $0x2c8] sm:$0xff]  ;;  %v4864_v54 = vpack.c.bf16 %v953_v46, %v949_v45  ;;  %v969_v9 = vld [vmem:[#allocation17 + $0x330] sm:$0xff]  ;;  %v171_v13 = vld [vmem:[#allocation8 + $0x20] sm:$0xff] }
  0xcd   :  { %4813 = vmatpush1.bf16.msra.mxu1 %v4812_v52  ;;  %411 = vmatprep.mubr.f32.mxu0 %v7900_v0  ;;  %v960_v49 = vld [vmem:[#allocation17 + $0x2e8] sm:$0xff]  ;;  %v958_v52 = vld [vmem:[#allocation17 + $0x2d8] sm:$0xff]  ;;  %v975_v19 = vld [vmem:[#allocation17 + $0x360] sm:$0xff] }
  0xce   :  { %524 = vmatprep.mubr.f32.mxu1 %v7900_v0  ;;  %4783 = vmatprep.subr.bf16.mxu0 %v4782_v55  ;;  %v955_v55 = vld [vmem:[#allocation17 + $0x2c0] sm:$0xff]  ;;  %v4834_v57 = vpack.c.bf16 %v960_v49, %v956_v48  ;;  %v4866_v60 = vpack.c.bf16 %v962_v53, %v958_v52  ;;  %v977_v22 = vld [vmem:[#allocation17 + $0x370] sm:$0xff]  ;;  %v172_v26 = vld [vmem:[#allocation8 + $0x28] sm:$0xff] }
  0xcf   :  { %412 = vmatmul.mubr.f32.gmra.mrb[12].mxu0 %v245_v61  ;;  %4815 = vmatprep.subr.bf16.mxu1 %v4814_v58  ;;  %v957_v58 = vld [vmem:[#allocation17 + $0x2d0] sm:$0xff]  ;;  %v4836_v1 = vpack.c.bf16 %v959_v56, %v955_v55  ;;  %v986_v29 = vld [vmem:[#allocation17 + $0x3b8] sm:$0xff]  ;;  %v983_v32 = vld [vmem:[#allocation17 + $0x3a0] sm:$0xff] }
  0xd0   :  { %525 = vmatmul.mubr.f32.gmra.mrb[12].mxu1 %v245_v61  ;;  %4785 = vmatpush1.bf16.msra.mxu0 %v4784_v62  ;;  %v964_v61 = vld [vmem:[#allocation17 + $0x308] sm:$0xff]  ;;  %v4868_v4 = vpack.c.bf16 %v961_v59, %v957_v58  ;;  %v985_v35 = vld [vmem:[#allocation17 + $0x3b0] sm:$0xff]  ;;  %v994_v42 = vld [vmem:[#allocation17 + $0x3f8] sm:$0xff] }
  0xd1   :  { %4817 = vmatpush1.bf16.msra.mxu1 %v4816_v2  ;;  %417 = vmatprep.mubr.f32.mxu0 %v7900_v0  ;;  %v968_v62 = vld [vmem:[#allocation17 + $0x328] sm:$0xff]  ;;  %v966_v2 = vld [vmem:[#allocation17 + $0x318] sm:$0xff]  ;;  %v173_v39 = vld [vmem:[#allocation8 + $0x30] sm:$0xff] }
  0xd2   :  { %530 = vmatprep.mubr.f32.mxu1 %v7900_v0  ;;  %4787 = vmatprep.subr.bf16.mxu0 %v4786_v5  ;;  %v963_v5 = vld [vmem:[#allocation17 + $0x300] sm:$0xff]  ;;  %v4838_v7 = vpack.c.bf16 %v968_v62, %v964_v61  ;;  %v4870_v10 = vpack.c.bf16 %v970_v3, %v966_v2  ;;  %v993_v48 = vld [vmem:[#allocation17 + $0x3f0] sm:$0xff]  ;;  %v174_v52 = vld [vmem:[#allocation8 + $0x38] sm:$0xff] }
  0xd3   :  { %418 = vmatmul.mubr.f32.gmra.mrb[14].mxu0 %v246_v11  ;;  %4819 = vmatprep.subr.bf16.mxu1 %v4818_v8  ;;  %v965_v8 = vld [vmem:[#allocation17 + $0x310] sm:$0xff]  ;;  %v4840_v14 = vpack.c.bf16 %v967_v6, %v963_v5  ;;  %v991_v45 = vld [vmem:[#allocation17 + $0x3e0] sm:$0xff]  ;;  %v865_v55 = vld [vmem:[#allocation16 + $0x238] sm:$0xff] }
  0xd4   :  { %531 = vmatmul.mubr.f32.gmra.mrb[14].mxu1 %v246_v11  ;;  %4789 = vmatpush1.bf16.msra.mxu0 %v4788_v12  ;;  %v972_v11 = vld [vmem:[#allocation17 + $0x348] sm:$0xff]  ;;  %v4872_v17 = vpack.c.bf16 %v969_v9, %v965_v8  ;;  %v862_v58 = vld [vmem:[#allocation16 + $0x220] sm:$0xff]  ;;  %v864_v61 = vld [vmem:[#allocation16 + $0x230] sm:$0xff] }
  0xd5   :  { %4821 = vmatpush1.bf16.msra.mxu1 %v4820_v15  ;;  %601 = vmatprep.mubr.f32.mxu0 %v7900_v0  ;;  %v976_v12 = vld [vmem:[#allocation17 + $0x368] sm:$0xff]  ;;  %v974_v15 = vld [vmem:[#allocation17 + $0x358] sm:$0xff]  ;;  %v922_v2 = vld [vmem:[#allocation14] sm:$0xff] }
  0xd6   :  { %714 = vmatprep.mubr.f32.mxu1 %v7900_v0  ;;  %4823 = vmatprep.subr.bf16.mxu0 %v4822_v18  ;;  %v971_v18 = vld [vmem:[#allocation17 + $0x340] sm:$0xff]  ;;  %v4842_v20 = vpack.c.bf16 %v976_v12, %v972_v11  ;;  %v4874_v23 = vpack.c.bf16 %v978_v16, %v974_v15  ;;  %v873_v5 = vld [vmem:[#allocation16 + $0x278] sm:$0xff]  ;;  %v872_v11 = vld [vmem:[#allocation16 + $0x270] sm:$0xff] }
  0xd7   :  { %602 = vmatmul.mubr.f32.vlgmr.msra.gmra.mrb[0].mxu0 %v167_v24  ;;  %4855 = vmatprep.subr.bf16.mxu1 %v4854_v21  ;;  %v973_v21 = vld [vmem:[#allocation17 + $0x350] sm:$0xff]  ;;  %v4844_v27 = vpack.c.bf16 %v975_v19, %v971_v18  ;;  %v870_v8 = vld [vmem:[#allocation16 + $0x260] sm:$0xff]  ;;  %v923_v15 = vld [vmem:[#allocation14 + $0x8] sm:$0xff] }
  0xd8   :  { %715 = vmatmul.mubr.f32.vlgmr.msra.gmra.mrb[0].mxu1 %v167_v24  ;;  %4825 = vmatpush1.bf16.msra.mxu0 %v4824_v25  ;;  %v980_v24 = vld [vmem:[#allocation17 + $0x388] sm:$0xff]  ;;  %v4876_v30 = vpack.c.bf16 %v977_v22, %v973_v21  ;;  %v881_v18 = vld [vmem:[#allocation16 + $0x2b8] sm:$0xff]  ;;  %v878_v21 = vld [vmem:[#allocation16 + $0x2a0] sm:$0xff] }
  0xd9   :  { %4857 = vmatpush1.bf16.msra.mxu1 %v4856_v28  ;;  %607 = vmatprep.mubr.f32.mxu0 %v7900_v0  ;;  %v984_v25 = vld [vmem:[#allocation17 + $0x3a8] sm:$0xff]  ;;  %v982_v28 = vld [vmem:[#allocation17 + $0x398] sm:$0xff] }
  0xda   :  { %720 = vmatprep.mubr.f32.mxu1 %v7900_v0  ;;  %4827 = vmatprep.subr.bf16.mxu0 %v4826_v31  ;;  %v979_v31 = vld [vmem:[#allocation17 + $0x380] sm:$0xff]  ;;  %v4846_v33 = vpack.c.bf16 %v984_v25, %v980_v24  ;;  %v4878_v36 = vpack.c.bf16 %v986_v29, %v982_v28  ;;  %v880_v24 = vld [vmem:[#allocation16 + $0x2b0] sm:$0xff] }
  0xdb   :  { %608 = vmatmul.mubr.f32.gmra.mrb[2].mxu0 %v168_v37  ;;  %4859 = vmatprep.subr.bf16.mxu1 %v4858_v34  ;;  %v981_v34 = vld [vmem:[#allocation17 + $0x390] sm:$0xff]  ;;  %v4848_v40 = vpack.c.bf16 %v983_v32, %v979_v31  ;;  %v889_v31 = vld [vmem:[#allocation16 + $0x2f8] sm:$0xff] }
  0xdc   :  { %721 = vmatmul.mubr.f32.gmra.mrb[2].mxu1 %v168_v37  ;;  %4829 = vmatpush1.bf16.msra.mxu0 %v4828_v38  ;;  %v988_v37 = vld [vmem:[#allocation17 + $0x3c8] sm:$0xff]  ;;  %v4880_v43 = vpack.c.bf16 %v985_v35, %v981_v34  ;;  %v924_v28 = vld [vmem:[#allocation14 + $0x10] sm:$0xff]  ;;  %v886_v34 = vld [vmem:[#allocation16 + $0x2e0] sm:$0xff] }
  0xdd   :  { %4861 = vmatpush1.bf16.msra.mxu1 %v4860_v41  ;;  %613 = vmatprep.mubr.f32.mxu0 %v7900_v0  ;;  %v992_v38 = vld [vmem:[#allocation17 + $0x3e8] sm:$0xff]  ;;  %v990_v41 = vld [vmem:[#allocation17 + $0x3d8] sm:$0xff] }
  0xde   :  { %726 = vmatprep.mubr.f32.mxu1 %v7900_v0  ;;  %4831 = vmatprep.subr.bf16.mxu0 %v4830_v44  ;;  %v987_v44 = vld [vmem:[#allocation17 + $0x3c0] sm:$0xff]  ;;  %v4850_v46 = vpack.c.bf16 %v992_v38, %v988_v37  ;;  %v4882_v49 = vpack.c.bf16 %v994_v42, %v990_v41  ;;  %v888_v37 = vld [vmem:[#allocation16 + $0x2f0] sm:$0xff]  ;;  %v925_v41 = vld [vmem:[#allocation14 + $0x18] sm:$0xff] }
  0xdf   :  { %614 = vmatmul.mubr.f32.gmra.mrb[4].mxu0 %v169_v50  ;;  %4863 = vmatprep.subr.bf16.mxu1 %v4862_v47  ;;  %v989_v47 = vld [vmem:[#allocation17 + $0x3d0] sm:$0xff]  ;;  %v4852_v53 = vpack.c.bf16 %v991_v45, %v987_v44  ;;  %v897_v44 = vld [vmem:[#allocation16 + $0x338] sm:$0xff] }
  0xe0   :  { %727 = vmatmul.mubr.f32.gmra.mrb[4].mxu1 %v169_v50  ;;  %4833 = vmatpush1.bf16.msra.mxu0 %v4832_v51  ;;  %v859_v50 = vld [vmem:[#allocation16 + $0x208] sm:$0xff]  ;;  %v4884_v56 = vpack.c.bf16 %v993_v48, %v989_v47  ;;  %v894_v47 = vld [vmem:[#allocation16 + $0x320] sm:$0xff] }
  0xe1   :  { %4865 = vmatpush1.bf16.msra.mxu1 %v4864_v54  ;;  %619 = vmatprep.mubr.f32.mxu0 %v7900_v0  ;;  %v863_v51 = vld [vmem:[#allocation16 + $0x228] sm:$0xff]  ;;  %v861_v54 = vld [vmem:[#allocation16 + $0x218] sm:$0xff] }
  0xe2   :  { %732 = vmatprep.mubr.f32.mxu1 %v7900_v0  ;;  %4835 = vmatprep.subr.bf16.mxu0 %v4834_v57  ;;  %v858_v57 = vld [vmem:[#allocation16 + $0x200] sm:$0xff]  ;;  %v4886_v59 = vpack.c.bf16 %v863_v51, %v859_v50  ;;  %v4918_v62 = vpack.c.bf16 %v865_v55, %v861_v54  ;;  %v896_v50 = vld [vmem:[#allocation16 + $0x330] sm:$0xff] }
  0xe3   :  { %620 = vmatmul.mubr.f32.gmra.mrb[6].mxu0 %v170_v63  ;;  %4867 = vmatprep.subr.bf16.mxu1 %v4866_v60  ;;  %v860_v60 = vld [vmem:[#allocation16 + $0x210] sm:$0xff]  ;;  %v4888_v3 = vpack.c.bf16 %v862_v58, %v858_v57  ;;  %v926_v54 = vld [vmem:[#allocation14 + $0x20] sm:$0xff]  ;;  %v905_v57 = vld [vmem:[#allocation16 + $0x378] sm:$0xff] }
  0xe4   :  { %733 = vmatmul.mubr.f32.gmra.mrb[6].mxu1 %v170_v63  ;;  %4837 = vmatpush1.bf16.msra.mxu0 %v4836_v1  ;;  %v867_v63 = vld [vmem:[#allocation16 + $0x248] sm:$0xff]  ;;  %v4920_v6 = vpack.c.bf16 %v864_v61, %v860_v60  ;;  %v902_v60 = vld [vmem:[#allocation16 + $0x360] sm:$0xff] }
  0xe5   :  { %4869 = vmatpush1.bf16.msra.mxu1 %v4868_v4  ;;  %625 = vmatprep.mubr.f32.mxu0 %v7900_v0  ;;  %v871_v1 = vld [vmem:[#allocation16 + $0x268] sm:$0xff]  ;;  %v869_v4 = vld [vmem:[#allocation16 + $0x258] sm:$0xff] }
  0xe6   :  { %738 = vmatprep.mubr.f32.mxu1 %v7900_v0  ;;  %4839 = vmatprep.subr.bf16.mxu0 %v4838_v7  ;;  %v866_v7 = vld [vmem:[#allocation16 + $0x240] sm:$0xff]  ;;  %v4890_v9 = vpack.c.bf16 %v871_v1, %v867_v63  ;;  %v4922_v12 = vpack.c.bf16 %v873_v5, %v869_v4  ;;  %v904_v63 = vld [vmem:[#allocation16 + $0x370] sm:$0xff]  ;;  %v927_v4 = vld [vmem:[#allocation14 + $0x28] sm:$0xff] }
  0xe7   :  { %626 = vmatmul.mubr.f32.gmra.mrb[8].mxu0 %v171_v13  ;;  %4871 = vmatprep.subr.bf16.mxu1 %v4870_v10  ;;  %v868_v10 = vld [vmem:[#allocation16 + $0x250] sm:$0xff]  ;;  %v4892_v16 = vpack.c.bf16 %v870_v8, %v866_v7  ;;  %v913_v7 = vld [vmem:[#allocation16 + $0x3b8] sm:$0xff] }
  0xe8   :  { %739 = vmatmul.mubr.f32.gmra.mrb[8].mxu1 %v171_v13  ;;  %4841 = vmatpush1.bf16.msra.mxu0 %v4840_v14  ;;  %v875_v13 = vld [vmem:[#allocation16 + $0x288] sm:$0xff]  ;;  %v4924_v19 = vpack.c.bf16 %v872_v11, %v868_v10  ;;  %v910_v10 = vld [vmem:[#allocation16 + $0x3a0] sm:$0xff] }
  0xe9   :  { %4873 = vmatpush1.bf16.msra.mxu1 %v4872_v17  ;;  %631 = vmatprep.mubr.f32.mxu0 %v7900_v0  ;;  %v879_v14 = vld [vmem:[#allocation16 + $0x2a8] sm:$0xff]  ;;  %v877_v17 = vld [vmem:[#allocation16 + $0x298] sm:$0xff] }
  0xea   :  { %744 = vmatprep.mubr.f32.mxu1 %v7900_v0  ;;  %4843 = vmatprep.subr.bf16.mxu0 %v4842_v20  ;;  %v874_v20 = vld [vmem:[#allocation16 + $0x280] sm:$0xff]  ;;  %v4894_v22 = vpack.c.bf16 %v879_v14, %v875_v13  ;;  %v4926_v25 = vpack.c.bf16 %v881_v18, %v877_v17  ;;  %v912_v13 = vld [vmem:[#allocation16 + $0x3b0] sm:$0xff] }
  0xeb   :  { %632 = vmatmul.mubr.f32.gmra.mrb[10].mxu0 %v172_v26  ;;  %4875 = vmatprep.subr.bf16.mxu1 %v4874_v23  ;;  %v876_v23 = vld [vmem:[#allocation16 + $0x290] sm:$0xff]  ;;  %v4896_v29 = vpack.c.bf16 %v878_v21, %v874_v20  ;;  %v921_v20 = vld [vmem:[#allocation16 + $0x3f8] sm:$0xff] }
  0xec   :  { %745 = vmatmul.mubr.f32.gmra.mrb[10].mxu1 %v172_v26  ;;  %4845 = vmatpush1.bf16.msra.mxu0 %v4844_v27  ;;  %v883_v26 = vld [vmem:[#allocation16 + $0x2c8] sm:$0xff]  ;;  %v4928_v32 = vpack.c.bf16 %v880_v24, %v876_v23  ;;  %v928_v17 = vld [vmem:[#allocation14 + $0x30] sm:$0xff]  ;;  %v918_v23 = vld [vmem:[#allocation16 + $0x3e0] sm:$0xff] }
  0xed   :  { %4877 = vmatpush1.bf16.msra.mxu1 %v4876_v30  ;;  %637 = vmatprep.mubr.f32.mxu0 %v7900_v0  ;;  %v887_v27 = vld [vmem:[#allocation16 + $0x2e8] sm:$0xff]  ;;  %v885_v30 = vld [vmem:[#allocation16 + $0x2d8] sm:$0xff] }
  0xee   :  { %750 = vmatprep.mubr.f32.mxu1 %v7900_v0  ;;  %4847 = vmatprep.subr.bf16.mxu0 %v4846_v33  ;;  %v882_v33 = vld [vmem:[#allocation16 + $0x2c0] sm:$0xff]  ;;  %v4898_v35 = vpack.c.bf16 %v887_v27, %v883_v26  ;;  %v4930_v38 = vpack.c.bf16 %v889_v31, %v885_v30  ;;  %v920_v26 = vld [vmem:[#allocation16 + $0x3f0] sm:$0xff]  ;;  %v929_v30 = vld [vmem:[#allocation14 + $0x38] sm:$0xff] }
  0xef   :  { %638 = vmatmul.mubr.f32.gmra.mrb[12].mxu0 %v173_v39  ;;  %4879 = vmatprep.subr.bf16.mxu1 %v4878_v36  ;;  %v884_v36 = vld [vmem:[#allocation16 + $0x2d0] sm:$0xff]  ;;  %v4900_v42 = vpack.c.bf16 %v886_v34, %v882_v33  ;;  %v1541_v33 = vld [vmem:[#allocation19 + $0x38] sm:$0xff] }
  0xf0   :  { %751 = vmatmul.mubr.f32.gmra.mrb[12].mxu1 %v173_v39  ;;  %4849 = vmatpush1.bf16.msra.mxu0 %v4848_v40  ;;  %v891_v39 = vld [vmem:[#allocation16 + $0x308] sm:$0xff]  ;;  %v4932_v45 = vpack.c.bf16 %v888_v37, %v884_v36  ;;  %v1538_v36 = vld [vmem:[#allocation19 + $0x20] sm:$0xff] }
  0xf1   :  { %4881 = vmatpush1.bf16.msra.mxu1 %v4880_v43  ;;  %643 = vmatprep.mubr.f32.mxu0 %v7900_v0  ;;  %v895_v40 = vld [vmem:[#allocation16 + $0x328] sm:$0xff]  ;;  %v893_v43 = vld [vmem:[#allocation16 + $0x318] sm:$0xff] }
  0xf2   :  { %756 = vmatprep.mubr.f32.mxu1 %v7900_v0  ;;  %4851 = vmatprep.subr.bf16.mxu0 %v4850_v46  ;;  %v890_v46 = vld [vmem:[#allocation16 + $0x300] sm:$0xff]  ;;  %v4902_v48 = vpack.c.bf16 %v895_v40, %v891_v39  ;;  %v4934_v51 = vpack.c.bf16 %v897_v44, %v893_v43  ;;  %v1540_v39 = vld [vmem:[#allocation19 + $0x30] sm:$0xff] }
  0xf3   :  { %644 = vmatmul.mubr.f32.gmra.mrb[14].mxu0 %v174_v52  ;;  %4883 = vmatprep.subr.bf16.mxu1 %v4882_v49  ;;  %v892_v49 = vld [vmem:[#allocation16 + $0x310] sm:$0xff]  ;;  %v4904_v55 = vpack.c.bf16 %v894_v47, %v890_v46  ;;  %v849_v43 = vld [vmem:[#allocation13] sm:$0xff]  ;;  %v1549_v46 = vld [vmem:[#allocation19 + $0x78] sm:$0xff] }
  0xf4   :  { %757 = vmatmul.mubr.f32.gmra.mrb[14].mxu1 %v174_v52  ;;  %4853 = vmatpush1.bf16.msra.mxu0 %v4852_v53  ;;  %v899_v52 = vld [vmem:[#allocation16 + $0x348] sm:$0xff]  ;;  %v4936_v58 = vpack.c.bf16 %v896_v50, %v892_v49  ;;  %v1546_v49 = vld [vmem:[#allocation19 + $0x60] sm:$0xff] }
  0xf5   :  { %4885 = vmatpush1.bf16.msra.mxu1 %v4884_v56  ;;  %1059 = vmatprep.mubr.f32.mxu0 %v7900_v0  ;;  %v903_v53 = vld [vmem:[#allocation16 + $0x368] sm:$0xff]  ;;  %v901_v56 = vld [vmem:[#allocation16 + $0x358] sm:$0xff] }
  0xf6   :  { %1172 = vmatprep.mubr.f32.mxu1 %v7900_v0  ;;  %4887 = vmatprep.subr.bf16.mxu0 %v4886_v59  ;;  %v898_v59 = vld [vmem:[#allocation16 + $0x340] sm:$0xff]  ;;  %v4906_v61 = vpack.c.bf16 %v903_v53, %v899_v52  ;;  %v4938_v1 = vpack.c.bf16 %v905_v57, %v901_v56  ;;  %v1548_v52 = vld [vmem:[#allocation19 + $0x70] sm:$0xff]  ;;  %v850_v56 = vld [vmem:[#allocation13 + $0x8] sm:$0xff] }
  0xf7   :  { %1060 = vmatmul.mubr.f32.vlgmr.msra.gmra.mrb[16].mxu0 %v922_v2  ;;  %4919 = vmatprep.subr.bf16.mxu1 %v4918_v62  ;;  %v900_v62 = vld [vmem:[#allocation16 + $0x350] sm:$0xff]  ;;  %v4908_v5 = vpack.c.bf16 %v902_v60, %v898_v59  ;;  %v1557_v59 = vld [vmem:[#allocation19 + $0xb8] sm:$0xff] }
  0xf8   :  { %1173 = vmatmul.mubr.f32.vlgmr.msra.gmra.mrb[16].mxu1 %v922_v2  ;;  %4889 = vmatpush1.bf16.msra.mxu0 %v4888_v3  ;;  %v907_v2 = vld [vmem:[#allocation16 + $0x388] sm:$0xff]  ;;  %v4940_v8 = vpack.c.bf16 %v904_v63, %v900_v62  ;;  %v1554_v62 = vld [vmem:[#allocation19 + $0xa0] sm:$0xff] }
  0xf9   :  { %4921 = vmatpush1.bf16.msra.mxu1 %v4920_v6  ;;  %1065 = vmatprep.mubr.f32.mxu0 %v7900_v0  ;;  %v911_v3 = vld [vmem:[#allocation16 + $0x3a8] sm:$0xff]  ;;  %v909_v6 = vld [vmem:[#allocation16 + $0x398] sm:$0xff] }
  0xfa   :  { %1178 = vmatprep.mubr.f32.mxu1 %v7900_v0  ;;  %4891 = vmatprep.subr.bf16.mxu0 %v4890_v9  ;;  %v906_v9 = vld [vmem:[#allocation16 + $0x380] sm:$0xff]  ;;  %v4910_v11 = vpack.c.bf16 %v911_v3, %v907_v2  ;;  %v4942_v14 = vpack.c.bf16 %v913_v7, %v909_v6  ;;  %v1556_v2 = vld [vmem:[#allocation19 + $0xb0] sm:$0xff] }
  0xfb   :  { %1066 = vmatmul.mubr.f32.gmra.mrb[18].mxu0 %v923_v15  ;;  %4923 = vmatprep.subr.bf16.mxu1 %v4922_v12  ;;  %v908_v12 = vld [vmem:[#allocation16 + $0x390] sm:$0xff]  ;;  %v4912_v18 = vpack.c.bf16 %v910_v10, %v906_v9  ;;  %v1565_v9 = vld [vmem:[#allocation19 + $0xf8] sm:$0xff] }
  0xfc   :  { %1179 = vmatmul.mubr.f32.gmra.mrb[18].mxu1 %v923_v15  ;;  %4893 = vmatpush1.bf16.msra.mxu0 %v4892_v16  ;;  %v915_v15 = vld [vmem:[#allocation16 + $0x3c8] sm:$0xff]  ;;  %v4944_v21 = vpack.c.bf16 %v912_v13, %v908_v12  ;;  %v851_v6 = vld [vmem:[#allocation13 + $0x10] sm:$0xff]  ;;  %v1562_v12 = vld [vmem:[#allocation19 + $0xe0] sm:$0xff] }
  0xfd   :  { %4925 = vmatpush1.bf16.msra.mxu1 %v4924_v19  ;;  %1071 = vmatprep.mubr.f32.mxu0 %v7900_v0  ;;  %v919_v16 = vld [vmem:[#allocation16 + $0x3e8] sm:$0xff]  ;;  %v917_v19 = vld [vmem:[#allocation16 + $0x3d8] sm:$0xff] }
  0xfe   :  { %1184 = vmatprep.mubr.f32.mxu1 %v7900_v0  ;;  %4895 = vmatprep.subr.bf16.mxu0 %v4894_v22  ;;  %v914_v22 = vld [vmem:[#allocation16 + $0x3c0] sm:$0xff]  ;;  %v4914_v24 = vpack.c.bf16 %v919_v16, %v915_v15  ;;  %v4946_v27 = vpack.c.bf16 %v921_v20, %v917_v19  ;;  %v1564_v15 = vld [vmem:[#allocation19 + $0xf0] sm:$0xff]  ;;  %v852_v19 = vld [vmem:[#allocation13 + $0x18] sm:$0xff] }
  0xff   :  { %1072 = vmatmul.mubr.f32.gmra.mrb[20].mxu0 %v924_v28  ;;  %4927 = vmatprep.subr.bf16.mxu1 %v4926_v25  ;;  %v916_v25 = vld [vmem:[#allocation16 + $0x3d0] sm:$0xff]  ;;  %v4916_v31 = vpack.c.bf16 %v918_v23, %v914_v22  ;;  %v1573_v22 = vld [vmem:[#allocation19 + $0x138] sm:$0xff] }
 0x100   :  { %1185 = vmatmul.mubr.f32.gmra.mrb[20].mxu1 %v924_v28  ;;  %4897 = vmatpush1.bf16.msra.mxu0 %v4896_v29  ;;  %v1535_v28 = vld [vmem:[#allocation19 + $0x8] sm:$0xff]  ;;  %v4948_v34 = vpack.c.bf16 %v920_v26, %v916_v25  ;;  %v1570_v25 = vld [vmem:[#allocation19 + $0x120] sm:$0xff] }
 0x101   :  { %4929 = vmatpush1.bf16.msra.mxu1 %v4928_v32  ;;  %1077 = vmatprep.mubr.f32.mxu0 %v7900_v0  ;;  %v1539_v29 = vld [vmem:[#allocation19 + $0x28] sm:$0xff]  ;;  %v1537_v32 = vld [vmem:[#allocation19 + $0x18] sm:$0xff] }
 0x102   :  { %1190 = vmatprep.mubr.f32.mxu1 %v7900_v0  ;;  %4899 = vmatprep.subr.bf16.mxu0 %v4898_v35  ;;  %v1534_v35 = vld [vmem:[#allocation19] sm:$0xff]  ;;  %v6993_v37 = vpack.c.bf16 %v1539_v29, %v1535_v28  ;;  %v6995_v40 = vpack.c.bf16 %v1541_v33, %v1537_v32  ;;  %v1572_v28 = vld [vmem:[#allocation19 + $0x130] sm:$0xff] }
 0x103   :  { %1078 = vmatmul.mubr.f32.gmra.mrb[22].mxu0 %v925_v41  ;;  %4931 = vmatprep.subr.bf16.mxu1 %v4930_v38  ;;  %v1536_v38 = vld [vmem:[#allocation19 + $0x10] sm:$0xff]  ;;  %v6997_v44 = vpack.c.bf16 %v1538_v36, %v1534_v35  ;;  %v853_v32 = vld [vmem:[#allocation13 + $0x20] sm:$0xff]  ;;  %v1581_v35 = vld [vmem:[#allocation19 + $0x178] sm:$0xff] }
 0x104   :  { %1191 = vmatmul.mubr.f32.gmra.mrb[22].mxu1 %v925_v41  ;;  %4901 = vmatpush1.bf16.msra.mxu0 %v4900_v42  ;;  %v1543_v41 = vld [vmem:[#allocation19 + $0x48] sm:$0xff]  ;;  %v7000_v47 = vpack.c.bf16 %v1540_v39, %v1536_v38  ;;  %v1574_v38 = vld [vmem:[#allocation19 + $0x140] sm:$0xff] }
 0x105   :  { %4933 = vmatpush1.bf16.msra.mxu1 %v4932_v45  ;;  %1083 = vmatprep.mubr.f32.mxu0 %v7900_v0  ;;  %v1547_v42 = vld [vmem:[#allocation19 + $0x68] sm:$0xff]  ;;  %v1545_v45 = vld [vmem:[#allocation19 + $0x58] sm:$0xff]  ;;  %v1578_v39 = vld [vmem:[#allocation19 + $0x160] sm:$0xff] }
 0x106   :  { %1196 = vmatprep.mubr.f32.mxu1 %v7900_v0  ;;  %4903 = vmatprep.subr.bf16.mxu0 %v4902_v48  ;;  %v1542_v48 = vld [vmem:[#allocation19 + $0x40] sm:$0xff]  ;;  %v7004_v50 = vpack.c.bf16 %v1547_v42, %v1543_v41  ;;  %v7007_v53 = vpack.c.bf16 %v1549_v46, %v1545_v45  ;;  %v1576_v42 = vld [vmem:[#allocation19 + $0x150] sm:$0xff]  ;;  %v1583_v46 = vld [vmem:[#allocation19 + $0x188] sm:$0xff] }
 0x107   :  { %1084 = vmatmul.mubr.f32.gmra.mrb[24].mxu0 %v926_v54  ;;  %4935 = vmatprep.subr.bf16.mxu1 %v4934_v51  ;;  %v1544_v51 = vld [vmem:[#allocation19 + $0x50] sm:$0xff]  ;;  %v7010_v57 = vpack.c.bf16 %v1546_v49, %v1542_v48  ;;  %v1587_v48 = vld [vmem:[#allocation19 + $0x1a8] sm:$0xff] }
 0x108   :  { %1197 = vmatmul.mubr.f32.gmra.mrb[24].mxu1 %v926_v54  ;;  %4905 = vmatpush1.bf16.msra.mxu0 %v4904_v55  ;;  %v1551_v54 = vld [vmem:[#allocation19 + $0x88] sm:$0xff]  ;;  %v7014_v60 = vpack.c.bf16 %v1548_v52, %v1544_v51  ;;  %v7066_v51 = vpack.c.bf16 %v1578_v39, %v1574_v38  ;;  %v1585_v52 = vld [vmem:[#allocation19 + $0x198] sm:$0xff]  ;;  %v1605_v38 = vld [vmem:[#allocation19 + $0x230] sm:$0xff] }
 0x109   :  { %4937 = vmatpush1.bf16.msra.mxu1 %v4936_v58  ;;  %1089 = vmatprep.mubr.f32.mxu0 %v7900_v0  ;;  %v1555_v55 = vld [vmem:[#allocation19 + $0xa8] sm:$0xff]  ;;  %v1553_v58 = vld [vmem:[#allocation19 + $0x98] sm:$0xff] }
 0x10a   :  { %1202 = vmatprep.mubr.f32.mxu1 %v7900_v0  ;;  %4907 = vmatprep.subr.bf16.mxu0 %v4906_v61  ;;  %v1550_v61 = vld [vmem:[#allocation19 + $0x80] sm:$0xff]  ;;  %v7018_v63 = vpack.c.bf16 %v1555_v55, %v1551_v54  ;;  %v7021_v3 = vpack.c.bf16 %v1557_v59, %v1553_v58  ;;  %v854_v49 = vld [vmem:[#allocation13 + $0x28] sm:$0xff]  ;;  %7998 = vst [vmem:[#allocation50_spill] sm:$0xff] %v7066_v51  ;;  %v1589_v54 = vld [vmem:[#allocation19 + $0x1b8] sm:$0xff] }
 0x10b   :  { %1090 = vmatmul.mubr.f32.gmra.mrb[26].mxu0 %v927_v4  ;;  %4939 = vmatprep.subr.bf16.mxu1 %v4938_v1  ;;  %v1552_v1 = vld [vmem:[#allocation19 + $0x90] sm:$0xff]  ;;  %v7024_v7 = vpack.c.bf16 %v1554_v62, %v1550_v61  ;;  %v1586_v58 = vld [vmem:[#allocation19 + $0x1a0] sm:$0xff]  ;;  %v7074_v59 = vpack.c.bf16 %v1587_v48, %v1583_v46  ;;  %v1608_v39 = vld [vmem:[#allocation19 + $0x248] sm:$0xff] }
 0x10c   :  { %1203 = vmatmul.mubr.f32.gmra.mrb[26].mxu1 %v927_v4  ;;  %4909 = vmatpush1.bf16.msra.mxu0 %v4908_v5  ;;  %7984 = vst [vmem:[#allocation36_spill] sm:$0xff] %v7018_v63  ;;  %7985 = vst [vmem:[#allocation37_spill] sm:$0xff] %v7021_v3  ;;  %v1559_v4 = vld [vmem:[#allocation19 + $0xc8] sm:$0xff]  ;;  %v7028_v10 = vpack.c.bf16 %v1556_v2, %v1552_v1  ;;  %v1584_v61 = vld [vmem:[#allocation19 + $0x190] sm:$0xff]  ;;  %v7077_v1 = vpack.c.bf16 %v1589_v54, %v1585_v52 }
 0x10d   :  { %4941 = vmatpush1.bf16.msra.mxu1 %v4940_v8  ;;  %1095 = vmatprep.mubr.f32.mxu0 %v7900_v0  ;;  %v1563_v5 = vld [vmem:[#allocation19 + $0xe8] sm:$0xff]  ;;  %7986 = vst [vmem:[#allocation38_spill] sm:$0xff] %v7024_v7  ;;  %v1561_v8 = vld [vmem:[#allocation19 + $0xd8] sm:$0xff]  ;;  %8000 = vst [vmem:[#allocation52_spill] sm:$0xff] %v7074_v59 }
 0x10e   :  { %1208 = vmatprep.mubr.f32.mxu1 %v7900_v0  ;;  %4911 = vmatprep.subr.bf16.mxu0 %v4910_v11  ;;  %7987 = vst [vmem:[#allocation39_spill] sm:$0xff] %v7028_v10  ;;  %v1558_v11 = vld [vmem:[#allocation19 + $0xc0] sm:$0xff]  ;;  %v7032_v13 = vpack.c.bf16 %v1563_v5, %v1559_v4  ;;  %v7035_v16 = vpack.c.bf16 %v1565_v9, %v1561_v8  ;;  %v1588_v62 = vld [vmem:[#allocation19 + $0x1b0] sm:$0xff]  ;;  %8001 = vst [vmem:[#allocation53_spill] sm:$0xff] %v7077_v1 }
 0x10f   :  { %1096 = vmatmul.mubr.f32.gmra.mrb[28].mxu0 %v928_v17  ;;  %4943 = vmatprep.subr.bf16.mxu1 %v4942_v14  ;;  %v1560_v14 = vld [vmem:[#allocation19 + $0xd0] sm:$0xff]  ;;  %v7038_v20 = vpack.c.bf16 %v1562_v12, %v1558_v11  ;;  %v1591_v2 = vld [vmem:[#allocation19 + $0x1c8] sm:$0xff]  ;;  %v1593_v8 = vld [vmem:[#allocation19 + $0x1d8] sm:$0xff]  ;;  %v7084_v11 = vpack.c.bf16 %v1588_v62, %v1584_v61 }
 0x110   :  { %1209 = vmatmul.mubr.f32.gmra.mrb[28].mxu1 %v928_v17  ;;  %4913 = vmatpush1.bf16.msra.mxu0 %v4912_v18  ;;  %7988 = vst [vmem:[#allocation40_spill] sm:$0xff] %v7032_v13  ;;  %7989 = vst [vmem:[#allocation41_spill] sm:$0xff] %v7035_v16  ;;  %v1567_v17 = vld [vmem:[#allocation19 + $0x108] sm:$0xff]  ;;  %v7042_v23 = vpack.c.bf16 %v1564_v15, %v1560_v14  ;;  %v855_v5 = vld [vmem:[#allocation13 + $0x30] sm:$0xff] }
 0x111   :  { %4945 = vmatpush1.bf16.msra.mxu1 %v4944_v21  ;;  %1101 = vmatprep.mubr.f32.mxu0 %v7900_v0  ;;  %v1571_v18 = vld [vmem:[#allocation19 + $0x128] sm:$0xff]  ;;  %7990 = vst [vmem:[#allocation42_spill] sm:$0xff] %v7038_v20  ;;  %v1569_v21 = vld [vmem:[#allocation19 + $0x118] sm:$0xff]  ;;  %8003 = vst [vmem:[#allocation55_spill] sm:$0xff] %v7084_v11 }
 0x112   :  { %1214 = vmatprep.mubr.f32.mxu1 %v7900_v0  ;;  %4915 = vmatprep.subr.bf16.mxu0 %v4914_v24  ;;  %7991 = vst [vmem:[#allocation43_spill] sm:$0xff] %v7042_v23  ;;  %v1566_v24 = vld [vmem:[#allocation19 + $0x100] sm:$0xff]  ;;  %v7046_v26 = vpack.c.bf16 %v1571_v18, %v1567_v17  ;;  %v7049_v29 = vpack.c.bf16 %v1573_v22, %v1569_v21  ;;  %v1595_v4 = vld [vmem:[#allocation19 + $0x1e8] sm:$0xff]  ;;  %v1597_v9 = vld [vmem:[#allocation19 + $0x1f8] sm:$0xff] }
 0x113   :  { %1102 = vmatmul.mubr.f32.gmra.mrb[30].mxu0 %v929_v30  ;;  %4947 = vmatprep.subr.bf16.mxu1 %v4946_v27  ;;  %v1568_v27 = vld [vmem:[#allocation19 + $0x110] sm:$0xff]  ;;  %v7052_v33 = vpack.c.bf16 %v1570_v25, %v1566_v24  ;;  %v1590_v12 = vld [vmem:[#allocation19 + $0x1c0] sm:$0xff]  ;;  %v7088_v15 = vpack.c.bf16 %v1595_v4, %v1591_v2  ;;  %v1600_v21 = vld [vmem:[#allocation19 + $0x208] sm:$0xff] }
 0x114   :  { %1215 = vmatmul.mubr.f32.gmra.mrb[30].mxu1 %v929_v30  ;;  %4917 = vmatpush1.bf16.msra.mxu0 %v4916_v31  ;;  %7992 = vst [vmem:[#allocation44_spill] sm:$0xff] %v7046_v26  ;;  %7993 = vst [vmem:[#allocation45_spill] sm:$0xff] %v7049_v29  ;;  %v1575_v30 = vld [vmem:[#allocation19 + $0x148] sm:$0xff]  ;;  %v7056_v36 = vpack.c.bf16 %v1572_v28, %v1568_v27  ;;  %v1594_v14 = vld [vmem:[#allocation19 + $0x1e0] sm:$0xff] }
 0x115   :  { %4949 = vmatpush1.bf16.msra.mxu1 %v4948_v34  ;;  %1285 = vmatprep.mubr.f32.mxu0 %v7900_v0  ;;  %v1579_v31 = vld [vmem:[#allocation19 + $0x168] sm:$0xff]  ;;  %7994 = vst [vmem:[#allocation46_spill] sm:$0xff] %v7052_v33  ;;  %v1577_v34 = vld [vmem:[#allocation19 + $0x158] sm:$0xff]  ;;  %8004 = vst [vmem:[#allocation56_spill] sm:$0xff] %v7088_v15  ;;  %v7094_v25 = vpack.c.bf16 %v1594_v14, %v1590_v12 }
 0x116   :  { %1398 = vmatprep.mubr.f32.mxu1 %v7900_v0  ;;  %4951 = vmatprep.subr.bf16.mxu0 %v6993_v37  ;;  %7995 = vst [vmem:[#allocation47_spill] sm:$0xff] %v7056_v36  ;;  %v7060_v41 = vpack.c.bf16 %v1579_v31, %v1575_v30  ;;  %v7063_v45 = vpack.c.bf16 %v1581_v35, %v1577_v34  ;;  %v1592_v17 = vld [vmem:[#allocation19 + $0x1d0] sm:$0xff]  ;;  %v1604_v22 = vld [vmem:[#allocation19 + $0x228] sm:$0xff]  ;;  %v856_v24 = vld [vmem:[#allocation13 + $0x38] sm:$0xff] }
 0x117   :  { %1286 = vmatmul.mubr.f32.vlgmr.msra.gmra.mrb[16].mxu0 %v849_v43  ;;  %4983 = vmatprep.subr.bf16.mxu1 %v6995_v40  ;;  %v1596_v18 = vld [vmem:[#allocation19 + $0x1f0] sm:$0xff]  ;;  %8006 = vst [vmem:[#allocation58_spill] sm:$0xff] %v7094_v25  ;;  %v1602_v27 = vld [vmem:[#allocation19 + $0x218] sm:$0xff]  ;;  %v1599_v31 = vld [vmem:[#allocation19 + $0x200] sm:$0xff]  ;;  %v7102_v35 = vpack.c.bf16 %v1604_v22, %v1600_v21 }
 0x118   :  { %1399 = vmatmul.mubr.f32.vlgmr.msra.gmra.mrb[16].mxu1 %v849_v43  ;;  %4953 = vmatpush1.bf16.msra.mxu0 %v6997_v44  ;;  %7996 = vst [vmem:[#allocation48_spill] sm:$0xff] %v7060_v41  ;;  %v1580_v43 = vld [vmem:[#allocation19 + $0x170] sm:$0xff]  ;;  %7997 = vst [vmem:[#allocation49_spill] sm:$0xff] %v7063_v45  ;;  %v1606_v28 = vld [vmem:[#allocation19 + $0x238] sm:$0xff]  ;;  %v7098_v30 = vpack.c.bf16 %v1596_v18, %v1592_v17 }
 0x119   :  { %4985 = vmatpush1.bf16.msra.mxu1 %v7000_v47  ;;  %1291 = vmatprep.mubr.f32.mxu0 %v7900_v0  ;;  %v7070_v55 = vpack.c.bf16 %v1580_v43, %v1576_v42  ;;  %v1601_v34 = vld [vmem:[#allocation19 + $0x210] sm:$0xff]  ;;  %8008 = vst [vmem:[#allocation60_spill] sm:$0xff] %v7102_v35  ;;  %v1612_v42 = vld [vmem:[#allocation19 + $0x268] sm:$0xff]  ;;  %v7105_v43 = vpack.c.bf16 %v1606_v28, %v1602_v27  ;;  %v1610_v46 = vld [vmem:[#allocation19 + $0x258] sm:$0xff] }
 0x11a   :  { %1404 = vmatprep.mubr.f32.mxu1 %v7900_v0  ;;  %4955 = vmatprep.subr.bf16.mxu0 %v7004_v50  ;;  %8007 = vst [vmem:[#allocation59_spill] sm:$0xff] %v7098_v30  ;;  %v1614_v48 = vld [vmem:[#allocation19 + $0x278] sm:$0xff]  ;;  %v7112_v52 = vpack.c.bf16 %v1605_v38, %v1601_v34  ;;  %v7114_v54 = vpack.c.bf16 %v1612_v42, %v1608_v39  ;;  %v1609_v61 = vld [vmem:[#allocation19 + $0x250] sm:$0xff]  ;;  %v1616_v4 = vld [vmem:[#allocation19 + $0x288] sm:$0xff] }
 0x11b   :  { %1292 = vmatmul.mubr.f32.gmra.mrb[18].mxu0 %v850_v56  ;;  %4987 = vmatprep.subr.bf16.mxu1 %v7007_v53  ;;  %7999 = vst [vmem:[#allocation51_spill] sm:$0xff] %v7070_v55  ;;  %8009 = vst [vmem:[#allocation61_spill] sm:$0xff] %v7105_v43  ;;  %v7118_v62 = vpack.c.bf16 %v1614_v48, %v1610_v46  ;;  %v1613_v2 = vld [vmem:[#allocation19 + $0x270] sm:$0xff]  ;;  %v1615_v18 = vld [vmem:[#allocation19 + $0x280] sm:$0xff] }
 0x11c   :  { %1405 = vmatmul.mubr.f32.gmra.mrb[18].mxu1 %v850_v56  ;;  %4957 = vmatpush1.bf16.msra.mxu0 %v7010_v57  ;;  %v1582_v56 = vld [vmem:[#allocation19 + $0x180] sm:$0xff]  ;;  %v7128_v14 = vpack.c.bf16 %v1613_v2, %v1609_v61  ;;  %v1617_v22 = vld [vmem:[#allocation19 + $0x290] sm:$0xff]  ;;  %v1624_v28 = vld [vmem:[#allocation19 + $0x2c8] sm:$0xff] }
 0x11d   :  { %4989 = vmatpush1.bf16.msra.mxu1 %v7014_v60  ;;  %1297 = vmatprep.mubr.f32.mxu0 %v7900_v0  ;;  %v1619_v21 = vld [vmem:[#allocation19 + $0x2a0] sm:$0xff]  ;;  %v1621_v27 = vld [vmem:[#allocation19 + $0x2b0] sm:$0xff]  ;;  %v1630_v34 = vld [vmem:[#allocation19 + $0x2f8] sm:$0xff] }
 0x11e   :  { %1410 = vmatprep.mubr.f32.mxu1 %v7900_v0  ;;  %4959 = vmatprep.subr.bf16.mxu0 %v7018_v63  ;;  %v7138_v38 = vpack.c.bf16 %v1619_v21, %v1615_v18  ;;  %v7142_v39 = vpack.c.bf16 %v1621_v27, %v1617_v22  ;;  %v1623_v46 = vld [vmem:[#allocation19 + $0x2c0] sm:$0xff]  ;;  %v1629_v61 = vld [vmem:[#allocation19 + $0x2f0] sm:$0xff]  ;;  %v1632_v2 = vld [vmem:[#allocation19 + $0x308] sm:$0xff] }
 0x11f   :  { %1298 = vmatmul.mubr.f32.gmra.mrb[20].mxu0 %v851_v6  ;;  %4991 = vmatprep.subr.bf16.mxu1 %v7021_v3  ;;  %v1627_v48 = vld [vmem:[#allocation19 + $0x2e0] sm:$0xff] }
 0x120   :  { %1411 = vmatmul.mubr.f32.gmra.mrb[20].mxu1 %v851_v6  ;;  %4961 = vmatpush1.bf16.msra.mxu0 %v7024_v7  ;;  %v7080_v6 = vpack.c.bf16 %v1586_v58, %v1582_v56  ;;  %v1607_v56 = vld [vmem:[#allocation19 + $0x240] sm:$0xff]  ;;  %8010 = vst [vmem:[#allocation62_spill] sm:$0xff] %v7142_v39 }
 0x121   :  { %4993 = vmatpush1.bf16.msra.mxu1 %v7028_v10  ;;  %1303 = vmatprep.mubr.f32.mxu0 %v7900_v0  ;;  %v1611_v58 = vld [vmem:[#allocation19 + $0x260] sm:$0xff] }
 0x122   :  { %1416 = vmatprep.mubr.f32.mxu1 %v7900_v0  ;;  %4963 = vmatprep.subr.bf16.mxu0 %v7032_v13  ;;  %8002 = vst [vmem:[#allocation54_spill] sm:$0xff] %v7080_v6  ;;  %v7124_v12 = vpack.c.bf16 %v1611_v58, %v1607_v56  ;;  %v1625_v56 = vld [vmem:[#allocation19 + $0x2d0] sm:$0xff]  ;;  %v1631_v22 = vld [vmem:[#allocation19 + $0x300] sm:$0xff] }
 0x123   :  { %1304 = vmatmul.mubr.f32.gmra.mrb[22].mxu0 %v852_v19  ;;  %4995 = vmatprep.subr.bf16.mxu1 %v7035_v16  ;;  %v7154_v18 = vpack.c.bf16 %v1629_v61, %v1625_v56  ;;  %v1635_v27 = vld [vmem:[#allocation19 + $0x320] sm:$0xff] }
 0x124   :  { %1417 = vmatmul.mubr.f32.gmra.mrb[22].mxu1 %v852_v19  ;;  %4965 = vmatpush1.bf16.msra.mxu0 %v7038_v20  ;;  %v7091_v19 = vpack.c.bf16 %v1597_v9, %v1593_v8  ;;  %v1618_v8 = vld [vmem:[#allocation19 + $0x298] sm:$0xff] }
 0x125   :  { %4997 = vmatpush1.bf16.msra.mxu1 %v7042_v23  ;;  %1309 = vmatprep.mubr.f32.mxu0 %v7900_v0  ;;  %v1622_v9 = vld [vmem:[#allocation19 + $0x2b8] sm:$0xff]  ;;  %8014 = vst [vmem:[#allocation66_spill] sm:$0xff] %v7154_v18 }
 0x126   :  { %1422 = vmatprep.mubr.f32.mxu1 %v7900_v0  ;;  %4967 = vmatprep.subr.bf16.mxu0 %v7046_v26  ;;  %8005 = vst [vmem:[#allocation57_spill] sm:$0xff] %v7091_v19 }
 0x127   :  { %1310 = vmatmul.mubr.f32.gmra.mrb[24].mxu0 %v853_v32  ;;  %4999 = vmatprep.subr.bf16.mxu1 %v7049_v29 }
 0x128   :  { %1423 = vmatmul.mubr.f32.gmra.mrb[24].mxu1 %v853_v32  ;;  %4969 = vmatpush1.bf16.msra.mxu0 %v7052_v33  ;;  %v1603_v32 = vld [vmem:[#allocation19 + $0x220] sm:$0xff] }
 0x129   :  { %5001 = vmatpush1.bf16.msra.mxu1 %v7056_v36  ;;  %1315 = vmatprep.mubr.f32.mxu0 %v7900_v0 }
 0x12a   :  { %1428 = vmatprep.mubr.f32.mxu1 %v7900_v0  ;;  %4971 = vmatprep.subr.bf16.mxu0 %v7060_v41 }
 0x12b   :  { %1316 = vmatmul.mubr.f32.gmra.mrb[26].mxu0 %v854_v49  ;;  %5003 = vmatprep.subr.bf16.mxu1 %v7063_v45 }
 0x12c   :  { %1429 = vmatmul.mubr.f32.gmra.mrb[26].mxu1 %v854_v49  ;;  %4973 = vmatpush1.bf16.msra.mxu0 %v7066_v51  ;;  %v7108_v49 = vpack.c.bf16 %v1603_v32, %v1599_v31  ;;  %v1628_v31 = vld [vmem:[#allocation19 + $0x2e8] sm:$0xff]  ;;  %v1626_v32 = vld [vmem:[#allocation19 + $0x2d8] sm:$0xff] }
 0x12d   :  { %5005 = vmatpush1.bf16.msra.mxu1 %v7070_v55  ;;  %1321 = vmatprep.mubr.f32.mxu0 %v7900_v0  ;;  %v7144_v42 = vpack.c.bf16 %v1628_v31, %v1624_v28  ;;  %v7147_v58 = vpack.c.bf16 %v1630_v34, %v1626_v32  ;;  %v1633_v28 = vld [vmem:[#allocation19 + $0x310] sm:$0xff]  ;;  %v1640_v34 = vld [vmem:[#allocation19 + $0x348] sm:$0xff] }
 0x12e   :  { %1434 = vmatprep.mubr.f32.mxu1 %v7900_v0  ;;  %4975 = vmatprep.subr.bf16.mxu0 %v7074_v59  ;;  %v1637_v32 = vld [vmem:[#allocation19 + $0x330] sm:$0xff] }
 0x12f   :  { %1322 = vmatmul.mubr.f32.gmra.mrb[28].mxu0 %v855_v5  ;;  %5007 = vmatprep.subr.bf16.mxu1 %v7077_v1  ;;  %8011 = vst [vmem:[#allocation63_spill] sm:$0xff] %v7144_v42  ;;  %8012 = vst [vmem:[#allocation64_spill] sm:$0xff] %v7147_v58  ;;  %v7166_v56 = vpack.c.bf16 %v1637_v32, %v1633_v28  ;;  %v1647_v32 = vld [vmem:[#allocation19 + $0x380] sm:$0xff] }
 0x130   :  { %1435 = vmatmul.mubr.f32.gmra.mrb[28].mxu1 %v855_v5  ;;  %4977 = vmatpush1.bf16.msra.mxu0 %v7080_v6  ;;  %v1620_v5 = vld [vmem:[#allocation19 + $0x2a8] sm:$0xff] }
 0x131   :  { %5009 = vmatpush1.bf16.msra.mxu1 %v7084_v11  ;;  %1327 = vmatprep.mubr.f32.mxu0 %v7900_v0  ;;  %v7130_v17 = vpack.c.bf16 %v1620_v5, %v1616_v4  ;;  %v1636_v4 = vld [vmem:[#allocation19 + $0x328] sm:$0xff]  ;;  %v1634_v5 = vld [vmem:[#allocation19 + $0x318] sm:$0xff]  ;;  %8018 = vst [vmem:[#allocation70_spill] sm:$0xff] %v7166_v56 }
 0x132   :  { %1440 = vmatprep.mubr.f32.mxu1 %v7900_v0  ;;  %4979 = vmatprep.subr.bf16.mxu0 %v7088_v15  ;;  %v7156_v21 = vpack.c.bf16 %v1636_v4, %v1632_v2  ;;  %v1639_v2 = vld [vmem:[#allocation19 + $0x340] sm:$0xff] }
 0x133   :  { %1328 = vmatmul.mubr.f32.gmra.mrb[30].mxu0 %v856_v24  ;;  %5011 = vmatprep.subr.bf16.mxu1 %v7091_v19  ;;  %v1643_v4 = vld [vmem:[#allocation19 + $0x360] sm:$0xff] }
 0x134   :  { %1441 = vmatmul.mubr.f32.gmra.mrb[30].mxu1 %v856_v24  ;;  %4981 = vmatpush1.bf16.msra.mxu0 %v7094_v25  ;;  %v7133_v24 = vpack.c.bf16 %v1622_v9, %v1618_v8  ;;  %v1638_v8 = vld [vmem:[#allocation19 + $0x338] sm:$0xff]  ;;  %v7150_v9 = vpack.c.bf16 %v1627_v48, %v1623_v46  ;;  %8015 = vst [vmem:[#allocation67_spill] sm:$0xff] %v7156_v21 }
 0x135   :  { %5013 = vmatpush1.bf16.msra.mxu1 %v7098_v30  ;;  %1735 = vmatprep.mubr.f32.mxu0 %v7900_v0  ;;  %v7159_v31 = vpack.c.bf16 %v1638_v8, %v1634_v5  ;;  %v1642_v46 = vld [vmem:[#allocation19 + $0x358] sm:$0xff]  ;;  %v1641_v5 = vld [vmem:[#allocation19 + $0x350] sm:$0xff] }
 0x136   :  { %1806 = vmatprep.mubr.f32.mxu1 %v7900_v0  ;;  %5015 = vmatprep.subr.bf16.mxu0 %v7102_v35  ;;  %8013 = vst [vmem:[#allocation65_spill] sm:$0xff] %v7150_v9  ;;  %v1646_v48 = vld [vmem:[#allocation19 + $0x378] sm:$0xff] }
 0x137   :  { %1736 = vmatmul.mubr.f32.vlgmr.msra.gmra.mrb[0].mxu0 %v7900_v0  ;;  %5047 = vmatprep.subr.bf16.mxu1 %v7105_v43  ;;  %8016 = vst [vmem:[#allocation68_spill] sm:$0xff] %v7159_v31  ;;  %v7171_v8 = vpack.c.bf16 %v1646_v48, %v1642_v46  ;;  %v1649_v46 = vld [vmem:[#allocation19 + $0x390] sm:$0xff] }
 0x138   :  { %1807 = vmatmul.mubr.f32.vlgmr.msra.gmra.mrb[0].mxu1 %v7900_v0  ;;  %5017 = vmatpush1.bf16.msra.mxu0 %v7108_v49 }
 0x139   :  { %5049 = vmatpush1.bf16.msra.mxu1 %v7112_v52  ;;  %5019 = vmatprep.subr.bf16.mxu0 %v7114_v54  ;;  %8019 = vst [vmem:[#allocation71_spill] sm:$0xff] %v7171_v8 }
 0x13a   :  { %5051 = vmatprep.subr.bf16.mxu1 %v7118_v62  ;;  %1886 = vmatprep.mubr.f32.mxu0 %v7900_v0 }
 0x13b   :  { %1957 = vmatprep.mubr.f32.mxu1 %v7900_v0  ;;  %v1644_v0 = vld [vmem:[#allocation19 + $0x368] sm:$0xff] }
 0x13c   :  { %5021 = vmatpush1.bf16.msra.mxu0 %v7124_v12  ;;  %v7168_v61 = vpack.c.bf16 %v1644_v0, %v1640_v34  ;;  %v1651_v34 = vld [vmem:[#allocation19 + $0x3a0] sm:$0xff] }
 0x13d   :  { %5053 = vmatpush1.bf16.msra.mxu1 %v7128_v14  ;;  %5023 = vmatprep.subr.bf16.mxu0 %v7130_v17 }
 0x13e   :  { %5055 = vmatprep.subr.bf16.mxu1 %v7133_v24 }
 0x140   :  { %5025 = vmatpush1.bf16.msra.mxu0 %v7138_v38 }
 0x141   :  { %5057 = vmatpush1.bf16.msra.mxu1 %v7142_v39  ;;  %5027 = vmatprep.subr.bf16.mxu0 %v7144_v42  ;;  %v7162_v39 = vpack.c.bf16 %v1635_v27, %v1631_v22  ;;  %v1648_v42 = vld [vmem:[#allocation19 + $0x388] sm:$0xff]  ;;  %v1650_v22 = vld [vmem:[#allocation19 + $0x398] sm:$0xff] }
 0x142   :  { %5059 = vmatprep.subr.bf16.mxu1 %v7147_v58  ;;  %v1645_v58 = vld [vmem:[#allocation19 + $0x370] sm:$0xff]  ;;  %v1654_v27 = vld [vmem:[#allocation19 + $0x3b8] sm:$0xff] }
 0x143   :  { %8017 = vst [vmem:[#allocation69_spill] sm:$0xff] %v7162_v39  ;;  %v7178_v0 = vpack.c.bf16 %v1645_v58, %v1641_v5  ;;  %v7183_v48 = vpack.c.bf16 %v1654_v27, %v1650_v22  ;;  %v1659_v5 = vld [vmem:[#allocation19 + $0x3e0] sm:$0xff]  ;;  %v1657_v27 = vld [vmem:[#allocation19 + $0x3d0] sm:$0xff] }
 0x144   :  { %5029 = vmatpush1.bf16.msra.mxu0 %v7150_v9  ;;  %v1652_v9 = vld [vmem:[#allocation19 + $0x3a8] sm:$0xff] }
 0x145   :  { %5061 = vmatpush1.bf16.msra.mxu1 %v7154_v18  ;;  %5031 = vmatprep.subr.bf16.mxu0 %v7156_v21  ;;  %v7174_v18 = vpack.c.bf16 %v1643_v4, %v1639_v2  ;;  %v7180_v28 = vpack.c.bf16 %v1652_v9, %v1648_v42  ;;  %v1656_v21 = vld [vmem:[#allocation19 + $0x3c8] sm:$0xff]  ;;  %v1658_v2 = vld [vmem:[#allocation19 + $0x3d8] sm:$0xff]  ;;  %v1655_v9 = vld [vmem:[#allocation19 + $0x3c0] sm:$0xff] }
 0x146   :  { %5063 = vmatprep.subr.bf16.mxu1 %v7159_v31  ;;  %v1653_v31 = vld [vmem:[#allocation19 + $0x3b0] sm:$0xff]  ;;  %v1662_v4 = vld [vmem:[#allocation19 + $0x3f8] sm:$0xff] }
 0x147   :  { %v7190_v42 = vpack.c.bf16 %v1653_v31, %v1649_v46  ;;  %v7195_v22 = vpack.c.bf16 %v1662_v4, %v1658_v2  ;;  %v763_v46 = vld [vmem:[#allocation20] sm:$0xf] }
 0x148   :  { %5033 = vmatpush1.bf16.msra.mxu0 %v7162_v39  ;;  %v1660_v39 = vld [vmem:[#allocation19 + $0x3e8] sm:$0xff] }
 0x149   :  { %5065 = vmatpush1.bf16.msra.mxu1 %v7166_v56  ;;  %5035 = vmatprep.subr.bf16.mxu0 %v7168_v61  ;;  %v7186_v56 = vpack.c.bf16 %v1651_v34, %v1647_v32  ;;  %v7192_v58 = vpack.c.bf16 %v1660_v39, %v1656_v21  ;;  %v7198_v32 = vpack.c.bf16 %v1659_v5, %v1655_v9  ;;  %v8020_v39 = vmov 0.0  }
 0x14a   :  { %5067 = vmatprep.subr.bf16.mxu1 %v7171_v8  ;;  %v1661_v8 = vld [vmem:[#allocation19 + $0x3f0] sm:$0xff]  ;;  %v765_v21 = vlaneseq }
 0x14b   :  { %v7202_v31 = vpack.c.bf16 %v1661_v8, %v1657_v27 }
 0x14c   :  { %5037 = vmatpush1.bf16.msra.mxu0 %v7174_v18  ;;  %v766_v8 = vshrl.u32 %v765_v21, 7 }
 0x14d   :  { %5069 = vmatpush1.bf16.msra.mxu1 %v7178_v0  ;;  %5039 = vmatprep.subr.bf16.mxu0 %v7180_v28 }
 0x14e   :  { %5071 = vmatprep.subr.bf16.mxu1 %v7183_v48  ;;  %v767_v34 = vsub.s32 0, %v766_v8  ;;  %v771_v2 = vsub.s32 1, %v766_v8  ;;  %v779_v27 = vsub.s32 3, %v766_v8  ;;  %v775_v21 = vsub.s32 2, %v766_v8 }
 0x150   :  { %5041 = vmatpush1.bf16.msra.mxu0 %v7186_v56  ;;  %v7245_v4 = vrot.slane %v763_v46, %v767_v34  ;;  %v7247_v9 = vrot.slane %v763_v46, %v771_v2 }
 0x151   :  { %5073 = vmatpush1.bf16.msra.mxu1 %v7190_v42  ;;  %5043 = vmatprep.subr.bf16.mxu0 %v7192_v58 }
 0x152   :  { %5075 = vmatprep.subr.bf16.mxu1 %v7195_v22  ;;  %8021 = vst [vmem:[#allocation72_spill] sm:$0xff] %v7245_v4  ;;  %8022 = vst [vmem:[#allocation73_spill] sm:$0xff] %v7247_v9 }
 0x154   :  { %5045 = vmatpush1.bf16.msra.mxu0 %v7198_v32 }
 0x155   :  { %5077 = vmatpush1.bf16.msra.mxu1 %v7202_v31  ;;  %5079 = vmatprep.subr.bf16.mxu0 %v6993_v37 }
 0x156   :  { %5111 = vmatprep.subr.bf16.mxu1 %v6995_v40 }
 0x157   :  { %1887 = vmatmul.mubr.f32.vlgmr.msra.gmra.mrb[30].mxu0 %v8020_v39 }
 0x158   :  { %1958 = vmatmul.mubr.f32.vlgmr.msra.gmra.mrb[30].mxu1 %v8020_v39  ;;  %5081 = vmatpush1.bf16.msra.mxu0 %v6997_v44 }
 0x159   :  { %5113 = vmatpush1.bf16.msra.mxu1 %v7000_v47  ;;  %5083 = vmatprep.subr.bf16.mxu0 %v7004_v50 }
 0x15a   :  { %5115 = vmatprep.subr.bf16.mxu1 %v7007_v53  ;;  %2096 = vmatprep.mubr.f32.mxu0 %v8020_v39 }
 0x15b   :  { %2167 = vmatprep.mubr.f32.mxu1 %v8020_v39 }
 0x15c   :  { %5085 = vmatpush1.bf16.msra.mxu0 %v7010_v57 }
 0x15d   :  { %5117 = vmatpush1.bf16.msra.mxu1 %v7014_v60  ;;  %5087 = vmatprep.subr.bf16.mxu0 %v7018_v63 }
 0x15e   :  { %5119 = vmatprep.subr.bf16.mxu1 %v7021_v3 }
 0x160   :  { %5089 = vmatpush1.bf16.msra.mxu0 %v7024_v7 }
 0x161   :  { %5121 = vmatpush1.bf16.msra.mxu1 %v7028_v10  ;;  %5091 = vmatprep.subr.bf16.mxu0 %v7032_v13 }
 0x162   :  { %5123 = vmatprep.subr.bf16.mxu1 %v7035_v16 }
 0x164   :  { %5093 = vmatpush1.bf16.msra.mxu0 %v7038_v20 }
 0x165   :  { %5125 = vmatpush1.bf16.msra.mxu1 %v7042_v23  ;;  %5095 = vmatprep.subr.bf16.mxu0 %v7046_v26 }
 0x166   :  { %5127 = vmatprep.subr.bf16.mxu1 %v7049_v29 }
 0x168   :  { %5097 = vmatpush1.bf16.msra.mxu0 %v7052_v33 }
 0x169   :  { %5129 = vmatpush1.bf16.msra.mxu1 %v7056_v36  ;;  %5099 = vmatprep.subr.bf16.mxu0 %v7060_v41 }
 0x16a   :  { %5131 = vmatprep.subr.bf16.mxu1 %v7063_v45 }
 0x16c   :  { %5101 = vmatpush1.bf16.msra.mxu0 %v7066_v51 }
 0x16d   :  { %5133 = vmatpush1.bf16.msra.mxu1 %v7070_v55  ;;  %5103 = vmatprep.subr.bf16.mxu0 %v7074_v59  ;;  %v7254_v59 = vrot.slane %v763_v46, %v775_v21 }
 0x16e   :  { %5135 = vmatprep.subr.bf16.mxu1 %v7077_v1 }
 0x16f   :  { %8024 = vst [vmem:[#allocation75_spill] sm:$0xff] %v7254_v59 }
 0x170   :  { %5105 = vmatpush1.bf16.msra.mxu0 %v7080_v6  ;;  %v7251_v6 = vrot.slane %v763_v46, %v779_v27 }
 0x171   :  { %5137 = vmatpush1.bf16.msra.mxu1 %v7084_v11  ;;  %5107 = vmatprep.subr.bf16.mxu0 %v7088_v15 }
 0x172   :  { %5139 = vmatprep.subr.bf16.mxu1 %v7091_v19  ;;  %8023 = vst [vmem:[#allocation74_spill] sm:$0xff] %v7251_v6 }
 0x174   :  { %5109 = vmatpush1.bf16.msra.mxu0 %v7094_v25 }
 0x175   :  { %5141 = vmatpush1.bf16.msra.mxu1 %v7098_v30  ;;  %5143 = vmatprep.subr.bf16.mxu0 %v7102_v35 }
 0x176   :  { %5175 = vmatprep.subr.bf16.mxu1 %v7105_v43 }
 0x20a   :  { %v1737_v5 = vpop.f32.mrb[0].mxu0 }
 0x20b   :  { %v5974_v19 = vadd.f32 %v1737_v5, %v7245_v4  ;;  %v1808_v25 = vpop.f32.mrb[0].mxu1  ;;  %v1739_v15 = vpop.f32.mrb[1].mxu0 }
 0x20c   :  { %v5975_v30 = vadd.f32 %v1739_v15, %v7247_v9  ;;  %v1810_v35 = vpop.f32.mrb[1].mxu1  ;;  %v5990_v51 = vadd.f32 %v1808_v25, %v7254_v59 }
 0x20d   :  { %v4646_v11 = vmul.f32 -1.442695, %v5974_v19  ;;  %v5991_v1 = vadd.f32 %v1810_v35, %v7251_v6 }
 0x20e   :  { %v4647_v43 = vmul.f32 -1.442695, %v5975_v30  ;;  %v1448_v30 = vld [vmem:[#allocation20 + $0x4] sm:$0xf] }
 0x20f   :  { %6185 = vpow2.f32 %v4646_v11  ;;  %v4648_v55 = vmul.f32 -1.442695, %v5991_v1  ;;  %v7257_v46 = vrot.slane %v1448_v30, %v767_v34  ;;  %v7259_v6 = vrot.slane %v1448_v30, %v771_v2 }
 0x210   :  { %6187 = vpow2.f32 %v4647_v43  ;;  %v7266_v34 = vrot.slane %v1448_v30, %v779_v27 }
 0x211   :  { %6189 = vpow2.f32 %v4648_v55  ;;  %8025 = vst [vmem:[#allocation76_spill] sm:$0xff] %v7257_v46 }
 0x212   :  { %6191 = vtanh.f32 %v5990_v51 }
 0x219   :  { %v6186_v5 = vpop.eup %6185 }
 0x21a   :  { %v6188_v4 = vpop.eup %6187  ;;  %v1971_v45 = vadd.f32 1.0, %v6186_v5 }
 0x21b   :  { %v1977_v15 = vadd.f32 1.0, %v6188_v4  ;;  %v6190_v19 = vpop.eup %6189 }
 0x21c   :  { %6193 = vrcp.f32 %v1971_v45  ;;  %v6192_v11 = vpop.eup %6191  ;;  %v1984_v35 = vadd.f32 1.0, %v6190_v19 }
 0x21d   :  { %6195 = vrcp.f32 %v1977_v15 }
 0x21e   :  { %6197 = vrcp.f32 %v1984_v35 }
 0x226   :  { %v6194_v8 = vpop.eup %6193 }
 0x227   :  { %v6196_v43 = vpop.eup %6195  ;;  %v1988_v9 = vmul.f32 %v6194_v8, %v6192_v11 }
 0x228   :  { %v1987_v1 = vmul.f32 0.0, %v6196_v43  ;;  %v6198_v8 = vpop.eup %6197 }
 0x22a   :  { %v7261_v25 = vadd.f32 %v1988_v9, %v1987_v1  ;;  %v1888_v5 = vpop.f32.mrb[30].mxu0  ;;  %v7269_v9 = vrot.slane %v1448_v30, %v775_v21  ;;  %v8026_v21 = vld [vmem:[#allocation62_spill] sm:$0xff]  ;;  %v8027_v30 = vld [vmem:[#allocation63_spill] sm:$0xff] }
 0x22b   :  { %v6020_v51 = vadd.f32 %v1888_v5, %v7257_v46  ;;  %v1959_v45 = vpop.f32.mrb[30].mxu1  ;;  %v1890_v55 = vpop.f32.mrb[31].mxu0 }
 0x22c   :  { %6199 = vtanh.f32 %v7261_v25  ;;  %v6021_v4 = vadd.f32 %v1890_v55, %v7259_v6  ;;  %v1961_v15 = vpop.f32.mrb[31].mxu1  ;;  %v6036_v1 = vadd.f32 %v1959_v45, %v7269_v9 }
 0x22d   :  { %v4649_v11 = vmul.f32 -1.442695, %v6020_v51  ;;  %v6037_v2 = vadd.f32 %v1961_v15, %v7266_v34 }
 0x22e   :  { %v4650_v19 = vmul.f32 -1.442695, %v6021_v4 }
 0x22f   :  { %6201 = vpow2.f32 %v4649_v11  ;;  %v4651_v35 = vmul.f32 -1.442695, %v6037_v2  ;;  %v8029_v11 = vld [vmem:[#allocation65_spill] sm:$0xff] }
 0x230   :  { %6203 = vpow2.f32 %v4650_v19  ;;  %v8030_v19 = vld [vmem:[#allocation66_spill] sm:$0xff] }
 0x231   :  { %6205 = vpow2.f32 %v4651_v35  ;;  %v8031_v35 = vld [vmem:[#allocation67_spill] sm:$0xff] }
 0x232   :  { %6207 = vtanh.f32 %v6036_v1  ;;  %v8032_v1 = vld [vmem:[#allocation68_spill] sm:$0xff] }
 0x236   :  { %v6200_v43 = vpop.eup %6199 }
 0x237   :  { %v1991_v5 = vmul.f32 %v6200_v43, %v6198_v8 }
 0x239   :  { %v6202_v46 = vpop.eup %6201  ;;  %2020 = vst [vmem:[#allocation22] sm:$0xff] %v1991_v5  ;;  %2097 = vmatmul.mubr.f32.vlgmr.msra.gmra.mrb[2].mxu0 %v1991_v5  ;;  %2168 = vmatmul.mubr.f32.vlgmr.msra.gmra.mrb[2].mxu1 %v1991_v5 }
 0x23a   :  { %v6204_v51 = vpop.eup %6203  ;;  %v1995_v55 = vadd.f32 1.0, %v6202_v46  ;;  %5145 = vmatpush1.bf16.msra.mxu0 %v7108_v49  ;;  %5177 = vmatpush1.bf16.msra.mxu1 %v7112_v52  ;;  %v8028_v46 = vld [vmem:[#allocation64_spill] sm:$0xff] }
 0x23b   :  { %v2001_v27 = vadd.f32 1.0, %v6204_v51  ;;  %5147 = vmatprep.subr.bf16.mxu0 %v7114_v54  ;;  %5179 = vmatprep.subr.bf16.mxu1 %v7118_v62  ;;  %v6206_v45 = vpop.eup %6205 }
 0x23c   :  { %6209 = vrcp.f32 %v1995_v55  ;;  %2247 = vmatprep.mubr.f32.mxu0 %v8020_v39  ;;  %2318 = vmatprep.mubr.f32.mxu1 %v8020_v39  ;;  %v6208_v4 = vpop.eup %6207  ;;  %v2008_v43 = vadd.f32 1.0, %v6206_v45  ;;  %v8033_v55 = vld [vmem:[#allocation69_spill] sm:$0xff] }
 0x23d   :  { %6211 = vrcp.f32 %v2001_v27  ;;  %v8034_v27 = vld [vmem:[#allocation70_spill] sm:$0xff] }
 0x23e   :  { %5149 = vmatpush1.bf16.msra.mxu0 %v7124_v12  ;;  %5181 = vmatpush1.bf16.msra.mxu1 %v7128_v14  ;;  %6213 = vrcp.f32 %v2008_v43  ;;  %v8038_v43 = vld [vmem:[#allocation51_spill] sm:$0xff] }
 0x23f   :  { %5151 = vmatprep.subr.bf16.mxu0 %v7130_v17  ;;  %5183 = vmatprep.subr.bf16.mxu1 %v7133_v24 }
 0x242   :  { %5153 = vmatpush1.bf16.msra.mxu0 %v7138_v38  ;;  %5185 = vmatpush1.bf16.msra.mxu1 %v8026_v21 }
 0x243   :  { %5155 = vmatprep.subr.bf16.mxu0 %v8027_v30  ;;  %5187 = vmatprep.subr.bf16.mxu1 %v8028_v46 }
 0x246   :  { %v6210_v15 = vpop.eup %6209  ;;  %5157 = vmatpush1.bf16.msra.mxu0 %v8029_v11  ;;  %5189 = vmatpush1.bf16.msra.mxu1 %v8030_v19  ;;  %v8035_v11 = vld [vmem:[#allocation71_spill] sm:$0xff] }
 0x247   :  { %v6212_v2 = vpop.eup %6211  ;;  %v2012_v8 = vmul.f32 %v6210_v15, %v6208_v4  ;;  %5159 = vmatprep.subr.bf16.mxu0 %v8031_v35  ;;  %5191 = vmatprep.subr.bf16.mxu1 %v8032_v1 }
 0x248   :  { %v2011_v5 = vmul.f32 0.0, %v6212_v2  ;;  %v6214_v45 = vpop.eup %6213  ;;  %v8036_v2 = vld [vmem:[#allocation49_spill] sm:$0xff] }
 0x24a   :  { %v7290_v51 = vadd.f32 %v2012_v8, %v2011_v5  ;;  %5161 = vmatpush1.bf16.msra.mxu0 %v8033_v55  ;;  %5193 = vmatpush1.bf16.msra.mxu1 %v8034_v27  ;;  %v8037_v8 = vld [vmem:[#allocation50_spill] sm:$0xff]  ;;  %v8039_v5 = vld [vmem:[#allocation52_spill] sm:$0xff] }
 0x24b   :  { %5163 = vmatprep.subr.bf16.mxu0 %v7168_v61  ;;  %5195 = vmatprep.subr.bf16.mxu1 %v8035_v11 }
 0x24c   :  { %6215 = vtanh.f32 %v7290_v51 }
 0x24e   :  { %5165 = vmatpush1.bf16.msra.mxu0 %v7174_v18  ;;  %5197 = vmatpush1.bf16.msra.mxu1 %v7178_v0 }
 0x24f   :  { %5167 = vmatprep.subr.bf16.mxu0 %v7180_v28  ;;  %5199 = vmatprep.subr.bf16.mxu1 %v7183_v48 }
 0x252   :  { %5169 = vmatpush1.bf16.msra.mxu0 %v7186_v56  ;;  %5201 = vmatpush1.bf16.msra.mxu1 %v7190_v42 }
 0x253   :  { %5171 = vmatprep.subr.bf16.mxu0 %v7192_v58  ;;  %5203 = vmatprep.subr.bf16.mxu1 %v7195_v22 }
 0x256   :  { %v6216_v4 = vpop.eup %6215  ;;  %5173 = vmatpush1.bf16.msra.mxu0 %v7198_v32  ;;  %5205 = vmatpush1.bf16.msra.mxu1 %v7202_v31 }
 0x257   :  { %v2015_v15 = vmul.f32 %v6216_v4, %v6214_v45  ;;  %5207 = vmatprep.subr.bf16.mxu0 %v6993_v37  ;;  %5239 = vmatprep.subr.bf16.mxu1 %v6995_v40  ;;  %v8040_v45 = vld [vmem:[#allocation53_spill] sm:$0xff]  ;;  %v8041_v4 = vld [vmem:[#allocation54_spill] sm:$0xff] }
 0x259   :  { %2022 = vst [vmem:[#allocation23 + $0x38] sm:$0xff] %v2015_v15  ;;  %2248 = vmatmul.mubr.f32.vlgmr.msra.gmra.mrb[28].mxu0 %v2015_v15  ;;  %2319 = vmatmul.mubr.f32.vlgmr.msra.gmra.mrb[28].mxu1 %v2015_v15  ;;  %v8042_v15 = vld [vmem:[#allocation55_spill] sm:$0xff] }
 0x25a   :  { %5209 = vmatpush1.bf16.msra.mxu0 %v6997_v44  ;;  %5241 = vmatpush1.bf16.msra.mxu1 %v7000_v47 }
 0x25b   :  { %5211 = vmatprep.subr.bf16.mxu0 %v7004_v50  ;;  %5243 = vmatprep.subr.bf16.mxu1 %v7007_v53 }
 0x25c   :  { %2458 = vmatprep.mubr.f32.mxu0 %v8020_v39  ;;  %2529 = vmatprep.mubr.f32.mxu1 %v8020_v39 }
 0x25e   :  { %5213 = vmatpush1.bf16.msra.mxu0 %v7010_v57  ;;  %5245 = vmatpush1.bf16.msra.mxu1 %v7014_v60 }
 0x25f   :  { %5215 = vmatprep.subr.bf16.mxu0 %v7018_v63  ;;  %5247 = vmatprep.subr.bf16.mxu1 %v7021_v3 }
 0x262   :  { %5217 = vmatpush1.bf16.msra.mxu0 %v7024_v7  ;;  %5249 = vmatpush1.bf16.msra.mxu1 %v7028_v10 }
 0x263   :  { %5219 = vmatprep.subr.bf16.mxu0 %v7032_v13  ;;  %5251 = vmatprep.subr.bf16.mxu1 %v7035_v16 }
 0x266   :  { %5221 = vmatpush1.bf16.msra.mxu0 %v7038_v20  ;;  %5253 = vmatpush1.bf16.msra.mxu1 %v7042_v23  ;;  %v8050_v20 = vld [vmem:[#allocation73_spill] sm:$0xff] }
 0x267   :  { %5223 = vmatprep.subr.bf16.mxu0 %v7046_v26  ;;  %5255 = vmatprep.subr.bf16.mxu1 %v7049_v29  ;;  %v8043_v29 = vld [vmem:[#allocation56_spill] sm:$0xff] }
 0x268   :  { %v8049_v26 = vld [vmem:[#allocation72_spill] sm:$0xff] }
 0x26a   :  { %5225 = vmatpush1.bf16.msra.mxu0 %v7052_v33  ;;  %5257 = vmatpush1.bf16.msra.mxu1 %v7056_v36  ;;  %v8044_v33 = vld [vmem:[#allocation57_spill] sm:$0xff]  ;;  %v8045_v36 = vld [vmem:[#allocation58_spill] sm:$0xff] }
 0x26b   :  { %5227 = vmatprep.subr.bf16.mxu0 %v7060_v41  ;;  %5259 = vmatprep.subr.bf16.mxu1 %v8036_v2  ;;  %v8046_v41 = vld [vmem:[#allocation59_spill] sm:$0xff]  ;;  %v8047_v2 = vld [vmem:[#allocation60_spill] sm:$0xff] }
 0x26e   :  { %5229 = vmatpush1.bf16.msra.mxu0 %v8037_v8  ;;  %5261 = vmatpush1.bf16.msra.mxu1 %v8038_v43  ;;  %v8048_v8 = vld [vmem:[#allocation61_spill] sm:$0xff] }
 0x26f   :  { %5231 = vmatprep.subr.bf16.mxu0 %v8039_v5  ;;  %5263 = vmatprep.subr.bf16.mxu1 %v8040_v45 }
 0x272   :  { %5233 = vmatpush1.bf16.msra.mxu0 %v8041_v4  ;;  %5265 = vmatpush1.bf16.msra.mxu1 %v8042_v15 }
 0x273   :  { %5235 = vmatprep.subr.bf16.mxu0 %v8043_v29  ;;  %5267 = vmatprep.subr.bf16.mxu1 %v8044_v33  ;;  %v8051_v33 = vld [vmem:[#allocation74_spill] sm:$0xff] }
 0x276   :  { %5237 = vmatpush1.bf16.msra.mxu0 %v8045_v36  ;;  %5269 = vmatpush1.bf16.msra.mxu1 %v8046_v41 }
 0x277   :  { %5271 = vmatprep.subr.bf16.mxu0 %v8047_v2  ;;  %5303 = vmatprep.subr.bf16.mxu1 %v8048_v8 }
 0x30c   :  { %v2098_v43 = vpop.f32.mrb[2].mxu0  ;;  %v2169_v5 = vpop.f32.mrb[2].mxu1 }
 0x30d   :  { %v5976_v45 = vadd.f32 %v2098_v43, %v8049_v26  ;;  %v2100_v23 = vpop.f32.mrb[3].mxu0  ;;  %v2171_v4 = vpop.f32.mrb[3].mxu1  ;;  %v5992_v41 = vadd.f32 %v2169_v5, %v7254_v59  ;;  %v8052_v59 = vld [vmem:[#allocation76_spill] sm:$0xff] }
 0x30e   :  { %v5977_v15 = vadd.f32 %v2100_v23, %v8050_v20  ;;  %v5993_v36 = vadd.f32 %v2171_v4, %v8051_v33 }
 0x30f   :  { %v4652_v16 = vmul.f32 -1.442695, %v5976_v45 }
 0x310   :  { %v4653_v29 = vmul.f32 -1.442695, %v5977_v15  ;;  %v4654_v13 = vmul.f32 -1.442695, %v5993_v36 }
 0x311   :  { %6217 = vpow2.f32 %v4652_v16 }
 0x312   :  { %6219 = vpow2.f32 %v4653_v29 }
 0x313   :  { %6221 = vpow2.f32 %v4654_v13 }
 0x314   :  { %6223 = vtanh.f32 %v5992_v41 }
 0x31b   :  { %v6218_v2 = vpop.eup %6217 }
 0x31c   :  { %v6220_v10 = vpop.eup %6219  ;;  %v2332_v8 = vadd.f32 1.0, %v6218_v2 }
 0x31d   :  { %v2338_v7 = vadd.f32 1.0, %v6220_v10  ;;  %v6222_v43 = vpop.eup %6221 }
 0x31e   :  { %6225 = vrcp.f32 %v2332_v8  ;;  %v6224_v26 = vpop.eup %6223  ;;  %v2345_v16 = vadd.f32 1.0, %v6222_v43 }
 0x31f   :  { %6227 = vrcp.f32 %v2338_v7 }
 0x320   :  { %6229 = vrcp.f32 %v2345_v16 }
 0x328   :  { %v6226_v23 = vpop.eup %6225 }
 0x329   :  { %v6228_v45 = vpop.eup %6227  ;;  %v2349_v15 = vmul.f32 %v6226_v23, %v6224_v26 }
 0x32a   :  { %v2348_v29 = vmul.f32 %v6228_v45, %v7261_v25  ;;  %v6230_v25 = vpop.eup %6229 }
 0x32c   :  { %v7348_v4 = vadd.f32 %v2349_v15, %v2348_v29  ;;  %v2249_v36 = vpop.f32.mrb[28].mxu0  ;;  %v2320_v5 = vpop.f32.mrb[28].mxu1 }
 0x32d   :  { %v6018_v2 = vadd.f32 %v2249_v36, %v8052_v59  ;;  %v2251_v13 = vpop.f32.mrb[29].mxu0  ;;  %v2322_v41 = vpop.f32.mrb[29].mxu1  ;;  %v6034_v45 = vadd.f32 %v2320_v5, %v7269_v9 }
 0x32e   :  { %v6019_v10 = vadd.f32 %v2251_v13, %v7259_v6  ;;  %6231 = vtanh.f32 %v7348_v4  ;;  %v6035_v26 = vadd.f32 %v2322_v41, %v7266_v34 }
 0x32f   :  { %v4655_v7 = vmul.f32 -1.442695, %v6018_v2 }
 0x330   :  { %v4656_v8 = vmul.f32 -1.442695, %v6019_v10  ;;  %v4657_v23 = vmul.f32 -1.442695, %v6035_v26  ;;  %v8053_v10 = vld [vmem:[#allocation65_spill] sm:$0xff] }
 0x331   :  { %6233 = vpow2.f32 %v4655_v7 }
 0x332   :  { %6235 = vpow2.f32 %v4656_v8 }
 0x333   :  { %6237 = vpow2.f32 %v4657_v23 }
 0x334   :  { %6239 = vtanh.f32 %v6034_v45 }
 0x338   :  { %v6232_v43 = vpop.eup %6231 }
 0x339   :  { %v2352_v15 = vmul.f32 %v6232_v43, %v6230_v25 }
 0x33b   :  { %v6234_v16 = vpop.eup %6233  ;;  %2382 = vst [vmem:[#allocation22 + $0x8] sm:$0xff] %v2352_v15  ;;  %2459 = vmatmul.mubr.f32.vlgmr.msra.gmra.mrb[4].mxu0 %v2352_v15  ;;  %2530 = vmatmul.mubr.f32.vlgmr.msra.gmra.mrb[4].mxu1 %v2352_v15  ;;  %v8054_v15 = vld [vmem:[#allocation38_spill] sm:$0xff] }
 0x33c   :  { %v6236_v29 = vpop.eup %6235  ;;  %v2356_v36 = vadd.f32 1.0, %v6234_v16  ;;  %5273 = vmatpush1.bf16.msra.mxu0 %v7108_v49  ;;  %5305 = vmatpush1.bf16.msra.mxu1 %v7112_v52  ;;  %v8055_v16 = vld [vmem:[#allocation39_spill] sm:$0xff] }
 0x33d   :  { %v2362_v2 = vadd.f32 1.0, %v6236_v29  ;;  %5275 = vmatprep.subr.bf16.mxu0 %v7114_v54  ;;  %5307 = vmatprep.subr.bf16.mxu1 %v7118_v62  ;;  %v6238_v5 = vpop.eup %6237  ;;  %v8056_v29 = vld [vmem:[#allocation40_spill] sm:$0xff] }
 0x33e   :  { %6241 = vrcp.f32 %v2356_v36  ;;  %2609 = vmatprep.mubr.f32.mxu0 %v8020_v39  ;;  %2680 = vmatprep.mubr.f32.mxu1 %v8020_v39  ;;  %v6240_v13 = vpop.eup %6239  ;;  %v2369_v26 = vadd.f32 1.0, %v6238_v5  ;;  %v8057_v36 = vld [vmem:[#allocation41_spill] sm:$0xff]  ;;  %v8059_v5 = vld [vmem:[#allocation43_spill] sm:$0xff] }
 0x33f   :  { %6243 = vrcp.f32 %v2362_v2  ;;  %v8058_v2 = vld [vmem:[#allocation42_spill] sm:$0xff] }
 0x340   :  { %5277 = vmatpush1.bf16.msra.mxu0 %v7124_v12  ;;  %5309 = vmatpush1.bf16.msra.mxu1 %v7128_v14  ;;  %6245 = vrcp.f32 %v2369_v26  ;;  %v8064_v26 = vld [vmem:[#allocation48_spill] sm:$0xff] }
 0x341   :  { %5279 = vmatprep.subr.bf16.mxu0 %v7130_v17  ;;  %5311 = vmatprep.subr.bf16.mxu1 %v7133_v24 }
 0x344   :  { %5281 = vmatpush1.bf16.msra.mxu0 %v7138_v38  ;;  %5313 = vmatpush1.bf16.msra.mxu1 %v8026_v21 }
 0x345   :  { %5283 = vmatprep.subr.bf16.mxu0 %v8027_v30  ;;  %5315 = vmatprep.subr.bf16.mxu1 %v8028_v46 }
 0x348   :  { %v6242_v41 = vpop.eup %6241  ;;  %5285 = vmatpush1.bf16.msra.mxu0 %v8053_v10  ;;  %5317 = vmatpush1.bf16.msra.mxu1 %v8030_v19 }
 0x349   :  { %v6244_v7 = vpop.eup %6243  ;;  %v2373_v8 = vmul.f32 %v6242_v41, %v6240_v13  ;;  %5287 = vmatprep.subr.bf16.mxu0 %v8031_v35  ;;  %5319 = vmatprep.subr.bf16.mxu1 %v8032_v1  ;;  %v8060_v13 = vld [vmem:[#allocation44_spill] sm:$0xff]  ;;  %v8061_v41 = vld [vmem:[#allocation45_spill] sm:$0xff] }
 0x34a   :  { %v2372_v25 = vmul.f32 %v6244_v7, %v7290_v51  ;;  %v6246_v51 = vpop.eup %6245  ;;  %v8062_v7 = vld [vmem:[#allocation46_spill] sm:$0xff] }
 0x34c   :  { %v7374_v43 = vadd.f32 %v2373_v8, %v2372_v25  ;;  %5289 = vmatpush1.bf16.msra.mxu0 %v8033_v55  ;;  %5321 = vmatpush1.bf16.msra.mxu1 %v8034_v27  ;;  %v8063_v8 = vld [vmem:[#allocation47_spill] sm:$0xff]  ;;  %v8065_v25 = vld [vmem:[#allocation49_spill] sm:$0xff] }
 0x34d   :  { %5291 = vmatprep.subr.bf16.mxu0 %v7168_v61  ;;  %5323 = vmatprep.subr.bf16.mxu1 %v8035_v11 }
 0x34e   :  { %6247 = vtanh.f32 %v7374_v43 }
 0x350   :  { %5293 = vmatpush1.bf16.msra.mxu0 %v7174_v18  ;;  %5325 = vmatpush1.bf16.msra.mxu1 %v7178_v0 }
 0x351   :  { %5295 = vmatprep.subr.bf16.mxu0 %v7180_v28  ;;  %5327 = vmatprep.subr.bf16.mxu1 %v7183_v48 }
 0x354   :  { %5297 = vmatpush1.bf16.msra.mxu0 %v7186_v56  ;;  %5329 = vmatpush1.bf16.msra.mxu1 %v7190_v42 }
 0x355   :  { %5299 = vmatprep.subr.bf16.mxu0 %v7192_v58  ;;  %5331 = vmatprep.subr.bf16.mxu1 %v7195_v22 }
 0x358   :  { %v6248_v23 = vpop.eup %6247  ;;  %5301 = vmatpush1.bf16.msra.mxu0 %v7198_v32  ;;  %5333 = vmatpush1.bf16.msra.mxu1 %v7202_v31 }
 0x359   :  { %v2376_v45 = vmul.f32 %v6248_v23, %v6246_v51  ;;  %5335 = vmatprep.subr.bf16.mxu0 %v6993_v37  ;;  %5367 = vmatprep.subr.bf16.mxu1 %v6995_v40  ;;  %v8066_v51 = vld [vmem:[#allocation50_spill] sm:$0xff]  ;;  %v8067_v23 = vld [vmem:[#allocation51_spill] sm:$0xff] }
 0x35b   :  { %2384 = vst [vmem:[#allocation23 + $0x30] sm:$0xff] %v2376_v45  ;;  %2610 = vmatmul.mubr.f32.vlgmr.msra.gmra.mrb[26].mxu0 %v2376_v45  ;;  %2681 = vmatmul.mubr.f32.vlgmr.msra.gmra.mrb[26].mxu1 %v2376_v45  ;;  %v8068_v45 = vld [vmem:[#allocation52_spill] sm:$0xff] }
 0x35c   :  { %5337 = vmatpush1.bf16.msra.mxu0 %v6997_v44  ;;  %5369 = vmatpush1.bf16.msra.mxu1 %v7000_v47 }
 0x35d   :  { %5339 = vmatprep.subr.bf16.mxu0 %v7004_v50  ;;  %5371 = vmatprep.subr.bf16.mxu1 %v7007_v53 }
 0x35e   :  { %2820 = vmatprep.mubr.f32.mxu0 %v8020_v39  ;;  %2891 = vmatprep.mubr.f32.mxu1 %v8020_v39 }
 0x360   :  { %5341 = vmatpush1.bf16.msra.mxu0 %v7010_v57  ;;  %5373 = vmatpush1.bf16.msra.mxu1 %v7014_v60 }
 0x361   :  { %5343 = vmatprep.subr.bf16.mxu0 %v7018_v63  ;;  %5375 = vmatprep.subr.bf16.mxu1 %v7021_v3 }
 0x364   :  { %5345 = vmatpush1.bf16.msra.mxu0 %v8054_v15  ;;  %5377 = vmatpush1.bf16.msra.mxu1 %v8055_v16 }
 0x365   :  { %5347 = vmatprep.subr.bf16.mxu0 %v8056_v29  ;;  %5379 = vmatprep.subr.bf16.mxu1 %v8057_v36  ;;  %v8078_v36 = vld [vmem:[#allocation72_spill] sm:$0xff] }
 0x368   :  { %5349 = vmatpush1.bf16.msra.mxu0 %v8058_v2  ;;  %5381 = vmatpush1.bf16.msra.mxu1 %v8059_v5  ;;  %v8069_v2 = vld [vmem:[#allocation53_spill] sm:$0xff]  ;;  %v8070_v5 = vld [vmem:[#allocation54_spill] sm:$0xff] }
 0x369   :  { %5351 = vmatprep.subr.bf16.mxu0 %v8060_v13  ;;  %5383 = vmatprep.subr.bf16.mxu1 %v8061_v41  ;;  %v8071_v13 = vld [vmem:[#allocation55_spill] sm:$0xff]  ;;  %v8072_v41 = vld [vmem:[#allocation56_spill] sm:$0xff] }
 0x36c   :  { %5353 = vmatpush1.bf16.msra.mxu0 %v8062_v7  ;;  %5385 = vmatpush1.bf16.msra.mxu1 %v8063_v8  ;;  %v8073_v7 = vld [vmem:[#allocation57_spill] sm:$0xff]  ;;  %v8074_v8 = vld [vmem:[#allocation58_spill] sm:$0xff] }
 0x36d   :  { %5355 = vmatprep.subr.bf16.mxu0 %v8064_v26  ;;  %5387 = vmatprep.subr.bf16.mxu1 %v8065_v25  ;;  %v8075_v26 = vld [vmem:[#allocation59_spill] sm:$0xff]  ;;  %v8076_v25 = vld [vmem:[#allocation60_spill] sm:$0xff] }
 0x370   :  { %5357 = vmatpush1.bf16.msra.mxu0 %v8066_v51  ;;  %5389 = vmatpush1.bf16.msra.mxu1 %v8067_v23  ;;  %v8077_v51 = vld [vmem:[#allocation61_spill] sm:$0xff] }
 0x371   :  { %5359 = vmatprep.subr.bf16.mxu0 %v8068_v45  ;;  %5391 = vmatprep.subr.bf16.mxu1 %v8069_v2 }
 0x374   :  { %5361 = vmatpush1.bf16.msra.mxu0 %v8070_v5  ;;  %5393 = vmatpush1.bf16.msra.mxu1 %v8071_v13 }
 0x375   :  { %5363 = vmatprep.subr.bf16.mxu0 %v8072_v41  ;;  %5395 = vmatprep.subr.bf16.mxu1 %v8073_v7 }
 0x378   :  { %5365 = vmatpush1.bf16.msra.mxu0 %v8074_v8  ;;  %5397 = vmatpush1.bf16.msra.mxu1 %v8075_v26  ;;  %v8079_v26 = vld [vmem:[#allocation75_spill] sm:$0xff] }
 0x379   :  { %5399 = vmatprep.subr.bf16.mxu0 %v8076_v25  ;;  %5431 = vmatprep.subr.bf16.mxu1 %v8077_v51 }
 0x40e   :  { %v2460_v23 = vpop.f32.mrb[4].mxu0  ;;  %v2531_v45 = vpop.f32.mrb[4].mxu1 }
 0x40f   :  { %v5978_v2 = vadd.f32 %v2460_v23, %v8078_v36  ;;  %v2462_v29 = vpop.f32.mrb[5].mxu0  ;;  %v2533_v5 = vpop.f32.mrb[5].mxu1  ;;  %v5994_v15 = vadd.f32 %v2531_v45, %v8079_v26 }
 0x410   :  { %v5979_v13 = vadd.f32 %v2462_v29, %v8050_v20  ;;  %v5995_v8 = vadd.f32 %v2533_v5, %v8051_v33 }
 0x411   :  { %v4658_v16 = vmul.f32 -1.442695, %v5978_v2 }
 0x412   :  { %v4659_v41 = vmul.f32 -1.442695, %v5979_v13  ;;  %v4660_v7 = vmul.f32 -1.442695, %v5995_v8 }
 0x413   :  { %6249 = vpow2.f32 %v4658_v16 }
 0x414   :  { %6251 = vpow2.f32 %v4659_v41 }
 0x415   :  { %6253 = vpow2.f32 %v4660_v7 }
 0x416   :  { %6255 = vtanh.f32 %v5994_v15 }
 0x41d   :  { %v6250_v25 = vpop.eup %6249 }
 0x41e   :  { %v6252_v3 = vpop.eup %6251  ;;  %v2694_v51 = vadd.f32 1.0, %v6250_v25 }
 0x41f   :  { %v2700_v63 = vadd.f32 1.0, %v6252_v3  ;;  %v6254_v23 = vpop.eup %6253 }
 0x420   :  { %6257 = vrcp.f32 %v2694_v51  ;;  %v6256_v36 = vpop.eup %6255  ;;  %v2707_v16 = vadd.f32 1.0, %v6254_v23 }
 0x421   :  { %6259 = vrcp.f32 %v2700_v63 }
 0x422   :  { %6261 = vrcp.f32 %v2707_v16 }
 0x42a   :  { %v6258_v29 = vpop.eup %6257 }
 0x42b   :  { %v6260_v2 = vpop.eup %6259  ;;  %v2711_v13 = vmul.f32 %v6258_v29, %v6256_v36 }
 0x42c   :  { %v2710_v41 = vmul.f32 %v6260_v2, %v7348_v4  ;;  %v6262_v4 = vpop.eup %6261 }
 0x42e   :  { %v7432_v5 = vadd.f32 %v2711_v13, %v2710_v41  ;;  %v2611_v8 = vpop.f32.mrb[26].mxu0  ;;  %v2682_v45 = vpop.f32.mrb[26].mxu1 }
 0x42f   :  { %v6016_v25 = vadd.f32 %v2611_v8, %v8052_v59  ;;  %v2613_v7 = vpop.f32.mrb[27].mxu0  ;;  %v2684_v15 = vpop.f32.mrb[27].mxu1  ;;  %v6032_v2 = vadd.f32 %v2682_v45, %v7269_v9 }
 0x430   :  { %v6017_v3 = vadd.f32 %v2613_v7, %v7259_v6  ;;  %6263 = vtanh.f32 %v7432_v5  ;;  %v6033_v36 = vadd.f32 %v2684_v15, %v7266_v34 }
 0x431   :  { %v4661_v63 = vmul.f32 -1.442695, %v6016_v25 }
 0x432   :  { %v4662_v51 = vmul.f32 -1.442695, %v6017_v3  ;;  %v4663_v29 = vmul.f32 -1.442695, %v6033_v36 }
 0x433   :  { %6265 = vpow2.f32 %v4661_v63 }
 0x434   :  { %6267 = vpow2.f32 %v4662_v51 }
 0x435   :  { %6269 = vpow2.f32 %v4663_v29 }
 0x436   :  { %6271 = vtanh.f32 %v6032_v2  ;;  %v8080_v2 = vld [vmem:[#allocation36_spill] sm:$0xff] }
 0x43a   :  { %v6264_v23 = vpop.eup %6263 }
 0x43b   :  { %v2714_v13 = vmul.f32 %v6264_v23, %v6262_v4 }
 0x43d   :  { %v6266_v16 = vpop.eup %6265  ;;  %2744 = vst [vmem:[#allocation22 + $0x10] sm:$0xff] %v2714_v13  ;;  %2821 = vmatmul.mubr.f32.vlgmr.msra.gmra.mrb[6].mxu0 %v2714_v13  ;;  %2892 = vmatmul.mubr.f32.vlgmr.msra.gmra.mrb[6].mxu1 %v2714_v13  ;;  %v8081_v13 = vld [vmem:[#allocation37_spill] sm:$0xff] }
 0x43e   :  { %v6268_v41 = vpop.eup %6267  ;;  %v2718_v8 = vadd.f32 1.0, %v6266_v16  ;;  %5401 = vmatpush1.bf16.msra.mxu0 %v7108_v49  ;;  %5433 = vmatpush1.bf16.msra.mxu1 %v7112_v52  ;;  %v8082_v16 = vld [vmem:[#allocation38_spill] sm:$0xff] }
 0x43f   :  { %v2724_v25 = vadd.f32 1.0, %v6268_v41  ;;  %5403 = vmatprep.subr.bf16.mxu0 %v7114_v54  ;;  %5435 = vmatprep.subr.bf16.mxu1 %v7118_v62  ;;  %v6270_v45 = vpop.eup %6269  ;;  %v8083_v41 = vld [vmem:[#allocation39_spill] sm:$0xff] }
 0x440   :  { %6273 = vrcp.f32 %v2718_v8  ;;  %2971 = vmatprep.mubr.f32.mxu0 %v8020_v39  ;;  %3042 = vmatprep.mubr.f32.mxu1 %v8020_v39  ;;  %v6272_v7 = vpop.eup %6271  ;;  %v2731_v51 = vadd.f32 1.0, %v6270_v45  ;;  %v8084_v8 = vld [vmem:[#allocation40_spill] sm:$0xff]  ;;  %v8086_v45 = vld [vmem:[#allocation42_spill] sm:$0xff] }
 0x441   :  { %6275 = vrcp.f32 %v2724_v25  ;;  %v8085_v25 = vld [vmem:[#allocation41_spill] sm:$0xff] }
 0x442   :  { %5405 = vmatpush1.bf16.msra.mxu0 %v7124_v12  ;;  %5437 = vmatpush1.bf16.msra.mxu1 %v7128_v14  ;;  %6277 = vrcp.f32 %v2731_v51  ;;  %v8091_v51 = vld [vmem:[#allocation47_spill] sm:$0xff] }
 0x443   :  { %5407 = vmatprep.subr.bf16.mxu0 %v7130_v17  ;;  %5439 = vmatprep.subr.bf16.mxu1 %v7133_v24 }
 0x446   :  { %5409 = vmatpush1.bf16.msra.mxu0 %v7138_v38  ;;  %5441 = vmatpush1.bf16.msra.mxu1 %v8026_v21 }
 0x447   :  { %5411 = vmatprep.subr.bf16.mxu0 %v8027_v30  ;;  %5443 = vmatprep.subr.bf16.mxu1 %v8028_v46 }
 0x44a   :  { %v6274_v15 = vpop.eup %6273  ;;  %5413 = vmatpush1.bf16.msra.mxu0 %v8053_v10  ;;  %5445 = vmatpush1.bf16.msra.mxu1 %v8030_v19 }
 0x44b   :  { %v6276_v3 = vpop.eup %6275  ;;  %v2735_v63 = vmul.f32 %v6274_v15, %v6272_v7  ;;  %5415 = vmatprep.subr.bf16.mxu0 %v8031_v35  ;;  %5447 = vmatprep.subr.bf16.mxu1 %v8032_v1  ;;  %v8087_v7 = vld [vmem:[#allocation43_spill] sm:$0xff]  ;;  %v8088_v15 = vld [vmem:[#allocation44_spill] sm:$0xff] }
 0x44c   :  { %v2734_v36 = vmul.f32 %v6276_v3, %v7374_v43  ;;  %v6278_v43 = vpop.eup %6277  ;;  %v8089_v3 = vld [vmem:[#allocation45_spill] sm:$0xff] }
 0x44e   :  { %v7458_v4 = vadd.f32 %v2735_v63, %v2734_v36  ;;  %5417 = vmatpush1.bf16.msra.mxu0 %v8033_v55  ;;  %5449 = vmatpush1.bf16.msra.mxu1 %v8034_v27  ;;  %v8090_v63 = vld [vmem:[#allocation46_spill] sm:$0xff]  ;;  %v8092_v36 = vld [vmem:[#allocation48_spill] sm:$0xff] }
 0x44f   :  { %5419 = vmatprep.subr.bf16.mxu0 %v7168_v61  ;;  %5451 = vmatprep.subr.bf16.mxu1 %v8035_v11 }
 0x450   :  { %6279 = vtanh.f32 %v7458_v4 }
 0x452   :  { %5421 = vmatpush1.bf16.msra.mxu0 %v7174_v18  ;;  %5453 = vmatpush1.bf16.msra.mxu1 %v7178_v0 }
 0x453   :  { %5423 = vmatprep.subr.bf16.mxu0 %v7180_v28  ;;  %5455 = vmatprep.subr.bf16.mxu1 %v7183_v48 }
 0x456   :  { %5425 = vmatpush1.bf16.msra.mxu0 %v7186_v56  ;;  %5457 = vmatpush1.bf16.msra.mxu1 %v7190_v42 }
 0x457   :  { %5427 = vmatprep.subr.bf16.mxu0 %v7192_v58  ;;  %5459 = vmatprep.subr.bf16.mxu1 %v7195_v22 }
 0x45a   :  { %v6280_v23 = vpop.eup %6279  ;;  %5429 = vmatpush1.bf16.msra.mxu0 %v7198_v32  ;;  %5461 = vmatpush1.bf16.msra.mxu1 %v7202_v31 }
 0x45b   :  { %v2738_v29 = vmul.f32 %v6280_v23, %v6278_v43  ;;  %5463 = vmatprep.subr.bf16.mxu0 %v6993_v37  ;;  %5495 = vmatprep.subr.bf16.mxu1 %v6995_v40  ;;  %v8093_v43 = vld [vmem:[#allocation49_spill] sm:$0xff]  ;;  %v8094_v23 = vld [vmem:[#allocation50_spill] sm:$0xff] }
 0x45d   :  { %2746 = vst [vmem:[#allocation23 + $0x28] sm:$0xff] %v2738_v29  ;;  %2972 = vmatmul.mubr.f32.vlgmr.msra.gmra.mrb[24].mxu0 %v2738_v29  ;;  %3043 = vmatmul.mubr.f32.vlgmr.msra.gmra.mrb[24].mxu1 %v2738_v29  ;;  %v8095_v29 = vld [vmem:[#allocation51_spill] sm:$0xff] }
 0x45e   :  { %5465 = vmatpush1.bf16.msra.mxu0 %v6997_v44  ;;  %5497 = vmatpush1.bf16.msra.mxu1 %v7000_v47 }
 0x45f   :  { %5467 = vmatprep.subr.bf16.mxu0 %v7004_v50  ;;  %5499 = vmatprep.subr.bf16.mxu1 %v7007_v53 }
 0x460   :  { %3182 = vmatprep.mubr.f32.mxu0 %v8020_v39  ;;  %3253 = vmatprep.mubr.f32.mxu1 %v8020_v39 }
 0x462   :  { %5469 = vmatpush1.bf16.msra.mxu0 %v7010_v57  ;;  %5501 = vmatpush1.bf16.msra.mxu1 %v7014_v60 }
 0x463   :  { %5471 = vmatprep.subr.bf16.mxu0 %v8080_v2  ;;  %5503 = vmatprep.subr.bf16.mxu1 %v8081_v13 }
 0x466   :  { %5473 = vmatpush1.bf16.msra.mxu0 %v8082_v16  ;;  %5505 = vmatpush1.bf16.msra.mxu1 %v8083_v41 }
 0x467   :  { %5475 = vmatprep.subr.bf16.mxu0 %v8084_v8  ;;  %5507 = vmatprep.subr.bf16.mxu1 %v8085_v25  ;;  %v8096_v25 = vld [vmem:[#allocation52_spill] sm:$0xff] }
 0x468   :  { %v8106_v8 = vld [vmem:[#allocation72_spill] sm:$0xff] }
 0x46a   :  { %5477 = vmatpush1.bf16.msra.mxu0 %v8086_v45  ;;  %5509 = vmatpush1.bf16.msra.mxu1 %v8087_v7  ;;  %v8097_v45 = vld [vmem:[#allocation53_spill] sm:$0xff]  ;;  %v8098_v7 = vld [vmem:[#allocation54_spill] sm:$0xff] }
 0x46b   :  { %5479 = vmatprep.subr.bf16.mxu0 %v8088_v15  ;;  %5511 = vmatprep.subr.bf16.mxu1 %v8089_v3  ;;  %v8099_v15 = vld [vmem:[#allocation55_spill] sm:$0xff]  ;;  %v8100_v3 = vld [vmem:[#allocation56_spill] sm:$0xff] }
 0x46e   :  { %5481 = vmatpush1.bf16.msra.mxu0 %v8090_v63  ;;  %5513 = vmatpush1.bf16.msra.mxu1 %v8091_v51  ;;  %v8101_v63 = vld [vmem:[#allocation57_spill] sm:$0xff]  ;;  %v8102_v51 = vld [vmem:[#allocation58_spill] sm:$0xff] }
 0x46f   :  { %5483 = vmatprep.subr.bf16.mxu0 %v8092_v36  ;;  %5515 = vmatprep.subr.bf16.mxu1 %v8093_v43  ;;  %v8103_v36 = vld [vmem:[#allocation59_spill] sm:$0xff]  ;;  %v8104_v43 = vld [vmem:[#allocation60_spill] sm:$0xff] }
 0x472   :  { %5485 = vmatpush1.bf16.msra.mxu0 %v8094_v23  ;;  %5517 = vmatpush1.bf16.msra.mxu1 %v8095_v29  ;;  %v8105_v23 = vld [vmem:[#allocation61_spill] sm:$0xff] }
 0x473   :  { %5487 = vmatprep.subr.bf16.mxu0 %v8096_v25  ;;  %5519 = vmatprep.subr.bf16.mxu1 %v8097_v45 }
 0x476   :  { %5489 = vmatpush1.bf16.msra.mxu0 %v8098_v7  ;;  %5521 = vmatpush1.bf16.msra.mxu1 %v8099_v15 }
 0x477   :  { %5491 = vmatprep.subr.bf16.mxu0 %v8100_v3  ;;  %5523 = vmatprep.subr.bf16.mxu1 %v8101_v63 }
 0x47a   :  { %5493 = vmatpush1.bf16.msra.mxu0 %v8102_v51  ;;  %5525 = vmatpush1.bf16.msra.mxu1 %v8103_v36 }
 0x47b   :  { %5527 = vmatprep.subr.bf16.mxu0 %v8104_v43  ;;  %5559 = vmatprep.subr.bf16.mxu1 %v8105_v23 }
 0x510   :  { %v2822_v29 = vpop.f32.mrb[6].mxu0  ;;  %v2893_v25 = vpop.f32.mrb[6].mxu1 }
 0x511   :  { %v5980_v45 = vadd.f32 %v2822_v29, %v8106_v8  ;;  %v2824_v41 = vpop.f32.mrb[7].mxu0  ;;  %v2895_v7 = vpop.f32.mrb[7].mxu1  ;;  %v5996_v36 = vadd.f32 %v2893_v25, %v8079_v26 }
 0x512   :  { %v5981_v15 = vadd.f32 %v2824_v41, %v8050_v20  ;;  %v5997_v51 = vadd.f32 %v2895_v7, %v8051_v33 }
 0x513   :  { %v4664_v16 = vmul.f32 -1.442695, %v5980_v45 }
 0x514   :  { %v4665_v3 = vmul.f32 -1.442695, %v5981_v15  ;;  %v4666_v63 = vmul.f32 -1.442695, %v5997_v51 }
 0x515   :  { %6281 = vpow2.f32 %v4664_v16 }
 0x516   :  { %6283 = vpow2.f32 %v4665_v3 }
 0x517   :  { %6285 = vpow2.f32 %v4666_v63 }
 0x518   :  { %6287 = vtanh.f32 %v5996_v36 }
 0x51f   :  { %v6282_v43 = vpop.eup %6281 }
 0x520   :  { %v6284_v13 = vpop.eup %6283  ;;  %v3056_v23 = vadd.f32 1.0, %v6282_v43 }
 0x521   :  { %v3062_v2 = vadd.f32 1.0, %v6284_v13  ;;  %v6286_v29 = vpop.eup %6285 }
 0x522   :  { %6289 = vrcp.f32 %v3056_v23  ;;  %v6288_v8 = vpop.eup %6287  ;;  %v3069_v16 = vadd.f32 1.0, %v6286_v29 }
 0x523   :  { %6291 = vrcp.f32 %v3062_v2 }
 0x524   :  { %6293 = vrcp.f32 %v3069_v16 }
 0x52c   :  { %v6290_v41 = vpop.eup %6289 }
 0x52d   :  { %v6292_v45 = vpop.eup %6291  ;;  %v3073_v15 = vmul.f32 %v6290_v41, %v6288_v8 }
 0x52e   :  { %v3072_v3 = vmul.f32 %v6292_v45, %v7432_v5  ;;  %v6294_v5 = vpop.eup %6293 }
 0x530   :  { %v7516_v7 = vadd.f32 %v3073_v15, %v3072_v3  ;;  %v2973_v51 = vpop.f32.mrb[24].mxu0  ;;  %v3044_v25 = vpop.f32.mrb[24].mxu1 }
 0x531   :  { %v6014_v43 = vadd.f32 %v2973_v51, %v8052_v59  ;;  %v2975_v63 = vpop.f32.mrb[25].mxu0  ;;  %v3046_v36 = vpop.f32.mrb[25].mxu1  ;;  %v6030_v45 = vadd.f32 %v3044_v25, %v7269_v9 }
 0x532   :  { %v6015_v13 = vadd.f32 %v2975_v63, %v7259_v6  ;;  %6295 = vtanh.f32 %v7516_v7  ;;  %v6031_v8 = vadd.f32 %v3046_v36, %v7266_v34 }
 0x533   :  { %v4667_v2 = vmul.f32 -1.442695, %v6014_v43 }
 0x534   :  { %v4668_v23 = vmul.f32 -1.442695, %v6015_v13  ;;  %v4669_v41 = vmul.f32 -1.442695, %v6031_v8 }
 0x535   :  { %6297 = vpow2.f32 %v4667_v2 }
 0x536   :  { %6299 = vpow2.f32 %v4668_v23 }
 0x537   :  { %6301 = vpow2.f32 %v4669_v41 }
 0x538   :  { %6303 = vtanh.f32 %v6030_v45  ;;  %v8107_v45 = vld [vmem:[#allocation36_spill] sm:$0xff] }
 0x53c   :  { %v6296_v29 = vpop.eup %6295 }
 0x53d   :  { %v3076_v15 = vmul.f32 %v6296_v29, %v6294_v5 }
 0x53f   :  { %v6298_v16 = vpop.eup %6297  ;;  %3106 = vst [vmem:[#allocation22 + $0x18] sm:$0xff] %v3076_v15  ;;  %3183 = vmatmul.mubr.f32.vlgmr.msra.gmra.mrb[8].mxu0 %v3076_v15  ;;  %3254 = vmatmul.mubr.f32.vlgmr.msra.gmra.mrb[8].mxu1 %v3076_v15  ;;  %v8108_v15 = vld [vmem:[#allocation37_spill] sm:$0xff] }
 0x540   :  { %v6300_v3 = vpop.eup %6299  ;;  %v3080_v51 = vadd.f32 1.0, %v6298_v16  ;;  %5529 = vmatpush1.bf16.msra.mxu0 %v7108_v49  ;;  %5561 = vmatpush1.bf16.msra.mxu1 %v7112_v52  ;;  %v8109_v16 = vld [vmem:[#allocation38_spill] sm:$0xff] }
 0x541   :  { %v3086_v43 = vadd.f32 1.0, %v6300_v3  ;;  %5531 = vmatprep.subr.bf16.mxu0 %v7114_v54  ;;  %5563 = vmatprep.subr.bf16.mxu1 %v7118_v62  ;;  %v6302_v25 = vpop.eup %6301  ;;  %v8110_v3 = vld [vmem:[#allocation39_spill] sm:$0xff] }
 0x542   :  { %6305 = vrcp.f32 %v3080_v51  ;;  %3333 = vmatprep.mubr.f32.mxu0 %v8020_v39  ;;  %3404 = vmatprep.mubr.f32.mxu1 %v8020_v39  ;;  %v6304_v63 = vpop.eup %6303  ;;  %v3093_v23 = vadd.f32 1.0, %v6302_v25  ;;  %v8111_v51 = vld [vmem:[#allocation40_spill] sm:$0xff]  ;;  %v8113_v25 = vld [vmem:[#allocation42_spill] sm:$0xff] }
 0x543   :  { %6307 = vrcp.f32 %v3086_v43  ;;  %v8112_v43 = vld [vmem:[#allocation41_spill] sm:$0xff] }
 0x544   :  { %5533 = vmatpush1.bf16.msra.mxu0 %v7124_v12  ;;  %5565 = vmatpush1.bf16.msra.mxu1 %v7128_v14  ;;  %6309 = vrcp.f32 %v3093_v23  ;;  %v8118_v23 = vld [vmem:[#allocation47_spill] sm:$0xff] }
 0x545   :  { %5535 = vmatprep.subr.bf16.mxu0 %v7130_v17  ;;  %5567 = vmatprep.subr.bf16.mxu1 %v7133_v24 }
 0x548   :  { %5537 = vmatpush1.bf16.msra.mxu0 %v7138_v38  ;;  %5569 = vmatpush1.bf16.msra.mxu1 %v8026_v21 }
 0x549   :  { %5539 = vmatprep.subr.bf16.mxu0 %v8027_v30  ;;  %5571 = vmatprep.subr.bf16.mxu1 %v8028_v46 }
 0x54c   :  { %v6306_v36 = vpop.eup %6305  ;;  %5541 = vmatpush1.bf16.msra.mxu0 %v8053_v10  ;;  %5573 = vmatpush1.bf16.msra.mxu1 %v8030_v19 }
 0x54d   :  { %v6308_v13 = vpop.eup %6307  ;;  %v3097_v2 = vmul.f32 %v6306_v36, %v6304_v63  ;;  %5543 = vmatprep.subr.bf16.mxu0 %v8031_v35  ;;  %5575 = vmatprep.subr.bf16.mxu1 %v8032_v1  ;;  %v8114_v63 = vld [vmem:[#allocation43_spill] sm:$0xff]  ;;  %v8115_v36 = vld [vmem:[#allocation44_spill] sm:$0xff] }
 0x54e   :  { %v3096_v8 = vmul.f32 %v6308_v13, %v7458_v4  ;;  %v6310_v4 = vpop.eup %6309  ;;  %v8116_v13 = vld [vmem:[#allocation45_spill] sm:$0xff] }
 0x550   :  { %v7542_v5 = vadd.f32 %v3097_v2, %v3096_v8  ;;  %5545 = vmatpush1.bf16.msra.mxu0 %v8033_v55  ;;  %5577 = vmatpush1.bf16.msra.mxu1 %v8034_v27  ;;  %v8117_v2 = vld [vmem:[#allocation46_spill] sm:$0xff]  ;;  %v8119_v8 = vld [vmem:[#allocation48_spill] sm:$0xff] }
 0x551   :  { %5547 = vmatprep.subr.bf16.mxu0 %v7168_v61  ;;  %5579 = vmatprep.subr.bf16.mxu1 %v8035_v11 }
 0x552   :  { %6311 = vtanh.f32 %v7542_v5 }
 0x554   :  { %5549 = vmatpush1.bf16.msra.mxu0 %v7174_v18  ;;  %5581 = vmatpush1.bf16.msra.mxu1 %v7178_v0 }
 0x555   :  { %5551 = vmatprep.subr.bf16.mxu0 %v7180_v28  ;;  %5583 = vmatprep.subr.bf16.mxu1 %v7183_v48 }
 0x558   :  { %5553 = vmatpush1.bf16.msra.mxu0 %v7186_v56  ;;  %5585 = vmatpush1.bf16.msra.mxu1 %v7190_v42 }
 0x559   :  { %5555 = vmatprep.subr.bf16.mxu0 %v7192_v58  ;;  %5587 = vmatprep.subr.bf16.mxu1 %v7195_v22 }
 0x55c   :  { %v6312_v29 = vpop.eup %6311  ;;  %5557 = vmatpush1.bf16.msra.mxu0 %v7198_v32  ;;  %5589 = vmatpush1.bf16.msra.mxu1 %v7202_v31 }
 0x55d   :  { %v3100_v41 = vmul.f32 %v6312_v29, %v6310_v4  ;;  %5591 = vmatprep.subr.bf16.mxu0 %v6993_v37  ;;  %5623 = vmatprep.subr.bf16.mxu1 %v6995_v40  ;;  %v8120_v4 = vld [vmem:[#allocation49_spill] sm:$0xff]  ;;  %v8121_v29 = vld [vmem:[#allocation50_spill] sm:$0xff] }
 0x55f   :  { %3108 = vst [vmem:[#allocation23 + $0x20] sm:$0xff] %v3100_v41  ;;  %3334 = vmatmul.mubr.f32.vlgmr.msra.gmra.mrb[22].mxu0 %v3100_v41  ;;  %3405 = vmatmul.mubr.f32.vlgmr.msra.gmra.mrb[22].mxu1 %v3100_v41  ;;  %v8122_v41 = vld [vmem:[#allocation51_spill] sm:$0xff] }
 0x560   :  { %5593 = vmatpush1.bf16.msra.mxu0 %v6997_v44  ;;  %5625 = vmatpush1.bf16.msra.mxu1 %v7000_v47 }
 0x561   :  { %5595 = vmatprep.subr.bf16.mxu0 %v7004_v50  ;;  %5627 = vmatprep.subr.bf16.mxu1 %v7007_v53 }
 0x562   :  { %3544 = vmatprep.mubr.f32.mxu0 %v8020_v39  ;;  %3615 = vmatprep.mubr.f32.mxu1 %v8020_v39 }
 0x564   :  { %5597 = vmatpush1.bf16.msra.mxu0 %v7010_v57  ;;  %5629 = vmatpush1.bf16.msra.mxu1 %v7014_v60 }
 0x565   :  { %5599 = vmatprep.subr.bf16.mxu0 %v8107_v45  ;;  %5631 = vmatprep.subr.bf16.mxu1 %v8108_v15 }
 0x568   :  { %5601 = vmatpush1.bf16.msra.mxu0 %v8109_v16  ;;  %5633 = vmatpush1.bf16.msra.mxu1 %v8110_v3 }
 0x569   :  { %5603 = vmatprep.subr.bf16.mxu0 %v8111_v51  ;;  %5635 = vmatprep.subr.bf16.mxu1 %v8112_v43  ;;  %v8123_v43 = vld [vmem:[#allocation52_spill] sm:$0xff] }
 0x56a   :  { %v8133_v51 = vld [vmem:[#allocation72_spill] sm:$0xff] }
 0x56c   :  { %5605 = vmatpush1.bf16.msra.mxu0 %v8113_v25  ;;  %5637 = vmatpush1.bf16.msra.mxu1 %v8114_v63  ;;  %v8124_v25 = vld [vmem:[#allocation53_spill] sm:$0xff]  ;;  %v8125_v63 = vld [vmem:[#allocation54_spill] sm:$0xff] }
 0x56d   :  { %5607 = vmatprep.subr.bf16.mxu0 %v8115_v36  ;;  %5639 = vmatprep.subr.bf16.mxu1 %v8116_v13  ;;  %v8126_v36 = vld [vmem:[#allocation55_spill] sm:$0xff]  ;;  %v8127_v13 = vld [vmem:[#allocation56_spill] sm:$0xff] }
 0x570   :  { %5609 = vmatpush1.bf16.msra.mxu0 %v8117_v2  ;;  %5641 = vmatpush1.bf16.msra.mxu1 %v8118_v23  ;;  %v8128_v2 = vld [vmem:[#allocation57_spill] sm:$0xff]  ;;  %v8129_v23 = vld [vmem:[#allocation58_spill] sm:$0xff] }
 0x571   :  { %5611 = vmatprep.subr.bf16.mxu0 %v8119_v8  ;;  %5643 = vmatprep.subr.bf16.mxu1 %v8120_v4  ;;  %v8130_v8 = vld [vmem:[#allocation59_spill] sm:$0xff]  ;;  %v8131_v4 = vld [vmem:[#allocation60_spill] sm:$0xff] }
 0x574   :  { %5613 = vmatpush1.bf16.msra.mxu0 %v8121_v29  ;;  %5645 = vmatpush1.bf16.msra.mxu1 %v8122_v41  ;;  %v8132_v29 = vld [vmem:[#allocation61_spill] sm:$0xff] }
 0x575   :  { %5615 = vmatprep.subr.bf16.mxu0 %v8123_v43  ;;  %5647 = vmatprep.subr.bf16.mxu1 %v8124_v25 }
 0x578   :  { %5617 = vmatpush1.bf16.msra.mxu0 %v8125_v63  ;;  %5649 = vmatpush1.bf16.msra.mxu1 %v8126_v36 }
 0x579   :  { %5619 = vmatprep.subr.bf16.mxu0 %v8127_v13  ;;  %5651 = vmatprep.subr.bf16.mxu1 %v8128_v2 }
 0x57c   :  { %5621 = vmatpush1.bf16.msra.mxu0 %v8129_v23  ;;  %5653 = vmatpush1.bf16.msra.mxu1 %v8130_v8 }
 0x57d   :  { %5655 = vmatprep.subr.bf16.mxu0 %v8131_v4  ;;  %5687 = vmatprep.subr.bf16.mxu1 %v8132_v29 }
 0x612   :  { %v3184_v41 = vpop.f32.mrb[8].mxu0  ;;  %v3255_v43 = vpop.f32.mrb[8].mxu1 }
 0x613   :  { %v5982_v25 = vadd.f32 %v3184_v41, %v8133_v51  ;;  %v3186_v3 = vpop.f32.mrb[9].mxu0  ;;  %v3257_v63 = vpop.f32.mrb[9].mxu1  ;;  %v5998_v8 = vadd.f32 %v3255_v43, %v8079_v26 }
 0x614   :  { %v5983_v36 = vadd.f32 %v3186_v3, %v8050_v20  ;;  %v5999_v23 = vadd.f32 %v3257_v63, %v8051_v33 }
 0x615   :  { %v4670_v16 = vmul.f32 -1.442695, %v5982_v25 }
 0x616   :  { %v4671_v13 = vmul.f32 -1.442695, %v5983_v36  ;;  %v4672_v2 = vmul.f32 -1.442695, %v5999_v23 }
 0x617   :  { %6313 = vpow2.f32 %v4670_v16 }
 0x618   :  { %6315 = vpow2.f32 %v4671_v13 }
 0x619   :  { %6317 = vpow2.f32 %v4672_v2 }
 0x61a   :  { %6319 = vtanh.f32 %v5998_v8 }
 0x621   :  { %v6314_v4 = vpop.eup %6313 }
 0x622   :  { %v6316_v15 = vpop.eup %6315  ;;  %v3418_v29 = vadd.f32 1.0, %v6314_v4 }
 0x623   :  { %v3424_v45 = vadd.f32 1.0, %v6316_v15  ;;  %v6318_v41 = vpop.eup %6317 }
 0x624   :  { %6321 = vrcp.f32 %v3418_v29  ;;  %v6320_v51 = vpop.eup %6319  ;;  %v3431_v16 = vadd.f32 1.0, %v6318_v41 }
 0x625   :  { %6323 = vrcp.f32 %v3424_v45 }
 0x626   :  { %6325 = vrcp.f32 %v3431_v16 }
 0x62e   :  { %v6322_v3 = vpop.eup %6321 }
 0x62f   :  { %v6324_v25 = vpop.eup %6323  ;;  %v3435_v36 = vmul.f32 %v6322_v3, %v6320_v51 }
 0x630   :  { %v3434_v13 = vmul.f32 %v6324_v25, %v7516_v7  ;;  %v6326_v7 = vpop.eup %6325 }
 0x632   :  { %v7600_v63 = vadd.f32 %v3435_v36, %v3434_v13  ;;  %v3335_v23 = vpop.f32.mrb[22].mxu0  ;;  %v3406_v43 = vpop.f32.mrb[22].mxu1 }
 0x633   :  { %v6012_v4 = vadd.f32 %v3335_v23, %v8052_v59  ;;  %v3337_v2 = vpop.f32.mrb[23].mxu0  ;;  %v3408_v8 = vpop.f32.mrb[23].mxu1  ;;  %v6028_v25 = vadd.f32 %v3406_v43, %v7269_v9 }
 0x634   :  { %v6013_v15 = vadd.f32 %v3337_v2, %v7259_v6  ;;  %6327 = vtanh.f32 %v7600_v63  ;;  %v6029_v51 = vadd.f32 %v3408_v8, %v7266_v34 }
 0x635   :  { %v4673_v45 = vmul.f32 -1.442695, %v6012_v4 }
 0x636   :  { %v4674_v29 = vmul.f32 -1.442695, %v6013_v15  ;;  %v4675_v3 = vmul.f32 -1.442695, %v6029_v51 }
 0x637   :  { %6329 = vpow2.f32 %v4673_v45 }
 0x638   :  { %6331 = vpow2.f32 %v4674_v29 }
 0x639   :  { %6333 = vpow2.f32 %v4675_v3 }
 0x63a   :  { %6335 = vtanh.f32 %v6028_v25  ;;  %v8134_v25 = vld [vmem:[#allocation36_spill] sm:$0xff] }
 0x63e   :  { %v6328_v41 = vpop.eup %6327 }
 0x63f   :  { %v3438_v36 = vmul.f32 %v6328_v41, %v6326_v7 }
 0x641   :  { %v6330_v16 = vpop.eup %6329  ;;  %3468 = vst [vmem:[#allocation22 + $0x20] sm:$0xff] %v3438_v36  ;;  %3545 = vmatmul.mubr.f32.vlgmr.msra.gmra.mrb[10].mxu0 %v3438_v36  ;;  %3616 = vmatmul.mubr.f32.vlgmr.msra.gmra.mrb[10].mxu1 %v3438_v36  ;;  %v8135_v36 = vld [vmem:[#allocation37_spill] sm:$0xff] }
 0x642   :  { %v6332_v13 = vpop.eup %6331  ;;  %v3442_v23 = vadd.f32 1.0, %v6330_v16  ;;  %5657 = vmatpush1.bf16.msra.mxu0 %v7108_v49  ;;  %5689 = vmatpush1.bf16.msra.mxu1 %v7112_v52  ;;  %v8136_v16 = vld [vmem:[#allocation38_spill] sm:$0xff] }
 0x643   :  { %v3448_v4 = vadd.f32 1.0, %v6332_v13  ;;  %5659 = vmatprep.subr.bf16.mxu0 %v7114_v54  ;;  %5691 = vmatprep.subr.bf16.mxu1 %v7118_v62  ;;  %v6334_v43 = vpop.eup %6333  ;;  %v8137_v13 = vld [vmem:[#allocation39_spill] sm:$0xff] }
 0x644   :  { %6337 = vrcp.f32 %v3442_v23  ;;  %3695 = vmatprep.mubr.f32.mxu0 %v8020_v39  ;;  %3766 = vmatprep.mubr.f32.mxu1 %v8020_v39  ;;  %v6336_v2 = vpop.eup %6335  ;;  %v3455_v29 = vadd.f32 1.0, %v6334_v43  ;;  %v8138_v23 = vld [vmem:[#allocation40_spill] sm:$0xff]  ;;  %v8140_v43 = vld [vmem:[#allocation42_spill] sm:$0xff] }
 0x645   :  { %6339 = vrcp.f32 %v3448_v4  ;;  %v8139_v4 = vld [vmem:[#allocation41_spill] sm:$0xff] }
 0x646   :  { %5661 = vmatpush1.bf16.msra.mxu0 %v7124_v12  ;;  %5693 = vmatpush1.bf16.msra.mxu1 %v7128_v14  ;;  %6341 = vrcp.f32 %v3455_v29  ;;  %v8145_v29 = vld [vmem:[#allocation47_spill] sm:$0xff] }
 0x647   :  { %5663 = vmatprep.subr.bf16.mxu0 %v7130_v17  ;;  %5695 = vmatprep.subr.bf16.mxu1 %v7133_v24 }
 0x64a   :  { %5665 = vmatpush1.bf16.msra.mxu0 %v7138_v38  ;;  %5697 = vmatpush1.bf16.msra.mxu1 %v8026_v21 }
 0x64b   :  { %5667 = vmatprep.subr.bf16.mxu0 %v8027_v30  ;;  %5699 = vmatprep.subr.bf16.mxu1 %v8028_v46 }
 0x64e   :  { %v6338_v8 = vpop.eup %6337  ;;  %5669 = vmatpush1.bf16.msra.mxu0 %v8053_v10  ;;  %5701 = vmatpush1.bf16.msra.mxu1 %v8030_v19 }
 0x64f   :  { %v6340_v15 = vpop.eup %6339  ;;  %v3459_v45 = vmul.f32 %v6338_v8, %v6336_v2  ;;  %5671 = vmatprep.subr.bf16.mxu0 %v8031_v35  ;;  %5703 = vmatprep.subr.bf16.mxu1 %v8032_v1  ;;  %v8141_v2 = vld [vmem:[#allocation43_spill] sm:$0xff]  ;;  %v8142_v8 = vld [vmem:[#allocation44_spill] sm:$0xff] }
 0x650   :  { %v3458_v51 = vmul.f32 %v6340_v15, %v7542_v5  ;;  %v6342_v5 = vpop.eup %6341  ;;  %v8143_v15 = vld [vmem:[#allocation45_spill] sm:$0xff] }
 0x652   :  { %v7626_v7 = vadd.f32 %v3459_v45, %v3458_v51  ;;  %5673 = vmatpush1.bf16.msra.mxu0 %v8033_v55  ;;  %5705 = vmatpush1.bf16.msra.mxu1 %v8034_v27  ;;  %v8144_v45 = vld [vmem:[#allocation46_spill] sm:$0xff]  ;;  %v8146_v51 = vld [vmem:[#allocation48_spill] sm:$0xff] }
 0x653   :  { %5675 = vmatprep.subr.bf16.mxu0 %v7168_v61  ;;  %5707 = vmatprep.subr.bf16.mxu1 %v8035_v11 }
 0x654   :  { %6343 = vtanh.f32 %v7626_v7 }
 0x656   :  { %5677 = vmatpush1.bf16.msra.mxu0 %v7174_v18  ;;  %5709 = vmatpush1.bf16.msra.mxu1 %v7178_v0 }
 0x657   :  { %5679 = vmatprep.subr.bf16.mxu0 %v7180_v28  ;;  %5711 = vmatprep.subr.bf16.mxu1 %v7183_v48 }
 0x65a   :  { %5681 = vmatpush1.bf16.msra.mxu0 %v7186_v56  ;;  %5713 = vmatpush1.bf16.msra.mxu1 %v7190_v42 }
 0x65b   :  { %5683 = vmatprep.subr.bf16.mxu0 %v7192_v58  ;;  %5715 = vmatprep.subr.bf16.mxu1 %v7195_v22 }
 0x65e   :  { %v6344_v41 = vpop.eup %6343  ;;  %5685 = vmatpush1.bf16.msra.mxu0 %v7198_v32  ;;  %5717 = vmatpush1.bf16.msra.mxu1 %v7202_v31 }
 0x65f   :  { %v3462_v3 = vmul.f32 %v6344_v41, %v6342_v5  ;;  %5719 = vmatprep.subr.bf16.mxu0 %v6993_v37  ;;  %5751 = vmatprep.subr.bf16.mxu1 %v6995_v40  ;;  %v8147_v5 = vld [vmem:[#allocation49_spill] sm:$0xff]  ;;  %v8148_v41 = vld [vmem:[#allocation50_spill] sm:$0xff] }
 0x661   :  { %3470 = vst [vmem:[#allocation23 + $0x18] sm:$0xff] %v3462_v3  ;;  %3696 = vmatmul.mubr.f32.vlgmr.msra.gmra.mrb[20].mxu0 %v3462_v3  ;;  %3767 = vmatmul.mubr.f32.vlgmr.msra.gmra.mrb[20].mxu1 %v3462_v3  ;;  %v8149_v3 = vld [vmem:[#allocation51_spill] sm:$0xff] }
 0x662   :  { %5721 = vmatpush1.bf16.msra.mxu0 %v6997_v44  ;;  %5753 = vmatpush1.bf16.msra.mxu1 %v7000_v47 }
 0x663   :  { %5723 = vmatprep.subr.bf16.mxu0 %v7004_v50  ;;  %5755 = vmatprep.subr.bf16.mxu1 %v7007_v53 }
 0x664   :  { %3906 = vmatprep.mubr.f32.mxu0 %v8020_v39  ;;  %3977 = vmatprep.mubr.f32.mxu1 %v8020_v39 }
 0x666   :  { %5725 = vmatpush1.bf16.msra.mxu0 %v7010_v57  ;;  %5757 = vmatpush1.bf16.msra.mxu1 %v7014_v60 }
 0x667   :  { %5727 = vmatprep.subr.bf16.mxu0 %v8134_v25  ;;  %5759 = vmatprep.subr.bf16.mxu1 %v8135_v36 }
 0x66a   :  { %5729 = vmatpush1.bf16.msra.mxu0 %v8136_v16  ;;  %5761 = vmatpush1.bf16.msra.mxu1 %v8137_v13 }
 0x66b   :  { %5731 = vmatprep.subr.bf16.mxu0 %v8138_v23  ;;  %5763 = vmatprep.subr.bf16.mxu1 %v8139_v4  ;;  %v8150_v4 = vld [vmem:[#allocation52_spill] sm:$0xff] }
 0x66c   :  { %v8160_v23 = vld [vmem:[#allocation72_spill] sm:$0xff] }
 0x66e   :  { %5733 = vmatpush1.bf16.msra.mxu0 %v8140_v43  ;;  %5765 = vmatpush1.bf16.msra.mxu1 %v8141_v2  ;;  %v8151_v43 = vld [vmem:[#allocation53_spill] sm:$0xff]  ;;  %v8152_v2 = vld [vmem:[#allocation54_spill] sm:$0xff] }
 0x66f   :  { %5735 = vmatprep.subr.bf16.mxu0 %v8142_v8  ;;  %5767 = vmatprep.subr.bf16.mxu1 %v8143_v15  ;;  %v8153_v8 = vld [vmem:[#allocation55_spill] sm:$0xff]  ;;  %v8154_v15 = vld [vmem:[#allocation56_spill] sm:$0xff] }
 0x672   :  { %5737 = vmatpush1.bf16.msra.mxu0 %v8144_v45  ;;  %5769 = vmatpush1.bf16.msra.mxu1 %v8145_v29  ;;  %v8155_v45 = vld [vmem:[#allocation57_spill] sm:$0xff]  ;;  %v8156_v29 = vld [vmem:[#allocation58_spill] sm:$0xff] }
 0x673   :  { %5739 = vmatprep.subr.bf16.mxu0 %v8146_v51  ;;  %5771 = vmatprep.subr.bf16.mxu1 %v8147_v5  ;;  %v8157_v51 = vld [vmem:[#allocation59_spill] sm:$0xff]  ;;  %v8158_v5 = vld [vmem:[#allocation60_spill] sm:$0xff] }
 0x676   :  { %5741 = vmatpush1.bf16.msra.mxu0 %v8148_v41  ;;  %5773 = vmatpush1.bf16.msra.mxu1 %v8149_v3  ;;  %v8159_v41 = vld [vmem:[#allocation61_spill] sm:$0xff] }
 0x677   :  { %5743 = vmatprep.subr.bf16.mxu0 %v8150_v4  ;;  %5775 = vmatprep.subr.bf16.mxu1 %v8151_v43 }
 0x67a   :  { %5745 = vmatpush1.bf16.msra.mxu0 %v8152_v2  ;;  %5777 = vmatpush1.bf16.msra.mxu1 %v8153_v8 }
 0x67b   :  { %5747 = vmatprep.subr.bf16.mxu0 %v8154_v15  ;;  %5779 = vmatprep.subr.bf16.mxu1 %v8155_v45 }
 0x67e   :  { %5749 = vmatpush1.bf16.msra.mxu0 %v8156_v29  ;;  %5781 = vmatpush1.bf16.msra.mxu1 %v8157_v51 }
 0x67f   :  { %5783 = vmatprep.subr.bf16.mxu0 %v8158_v5  ;;  %5815 = vmatprep.subr.bf16.mxu1 %v8159_v41 }
 0x714   :  { %v3546_v3 = vpop.f32.mrb[10].mxu0  ;;  %v3617_v4 = vpop.f32.mrb[10].mxu1 }
 0x715   :  { %v5984_v43 = vadd.f32 %v3546_v3, %v8160_v23  ;;  %v3548_v13 = vpop.f32.mrb[11].mxu0  ;;  %v3619_v2 = vpop.f32.mrb[11].mxu1  ;;  %v6000_v51 = vadd.f32 %v3617_v4, %v8079_v26 }
 0x716   :  { %v5985_v8 = vadd.f32 %v3548_v13, %v8050_v20  ;;  %v6001_v29 = vadd.f32 %v3619_v2, %v8051_v33 }
 0x717   :  { %v4676_v16 = vmul.f32 -1.442695, %v5984_v43 }
 0x718   :  { %v4677_v15 = vmul.f32 -1.442695, %v5985_v8  ;;  %v4678_v45 = vmul.f32 -1.442695, %v6001_v29 }
 0x719   :  { %6345 = vpow2.f32 %v4676_v16 }
 0x71a   :  { %6347 = vpow2.f32 %v4677_v15 }
 0x71b   :  { %6349 = vpow2.f32 %v4678_v45 }
 0x71c   :  { %6351 = vtanh.f32 %v6000_v51 }
 0x723   :  { %v6346_v5 = vpop.eup %6345 }
 0x724   :  { %v6348_v36 = vpop.eup %6347  ;;  %v3780_v41 = vadd.f32 1.0, %v6346_v5 }
 0x725   :  { %v3786_v25 = vadd.f32 1.0, %v6348_v36  ;;  %v6350_v3 = vpop.eup %6349 }
 0x726   :  { %6353 = vrcp.f32 %v3780_v41  ;;  %v6352_v23 = vpop.eup %6351  ;;  %v3793_v16 = vadd.f32 1.0, %v6350_v3 }
 0x727   :  { %6355 = vrcp.f32 %v3786_v25 }
 0x728   :  { %6357 = vrcp.f32 %v3793_v16 }
 0x730   :  { %v6354_v13 = vpop.eup %6353 }
 0x731   :  { %v6356_v43 = vpop.eup %6355  ;;  %v3797_v8 = vmul.f32 %v6354_v13, %v6352_v23 }
 0x732   :  { %v3796_v15 = vmul.f32 %v6356_v43, %v7600_v63  ;;  %v6358_v63 = vpop.eup %6357 }
 0x734   :  { %v7684_v2 = vadd.f32 %v3797_v8, %v3796_v15  ;;  %v3697_v29 = vpop.f32.mrb[20].mxu0  ;;  %v3768_v4 = vpop.f32.mrb[20].mxu1 }
 0x735   :  { %v6010_v5 = vadd.f32 %v3697_v29, %v8052_v59  ;;  %v3699_v45 = vpop.f32.mrb[21].mxu0  ;;  %v3770_v51 = vpop.f32.mrb[21].mxu1  ;;  %v6026_v43 = vadd.f32 %v3768_v4, %v7269_v9 }
 0x736   :  { %v6011_v36 = vadd.f32 %v3699_v45, %v7259_v6  ;;  %6359 = vtanh.f32 %v7684_v2  ;;  %v6027_v23 = vadd.f32 %v3770_v51, %v7266_v34 }
 0x737   :  { %v4679_v25 = vmul.f32 -1.442695, %v6010_v5 }
 0x738   :  { %v4680_v41 = vmul.f32 -1.442695, %v6011_v36  ;;  %v4681_v13 = vmul.f32 -1.442695, %v6027_v23 }
 0x739   :  { %6361 = vpow2.f32 %v4679_v25 }
 0x73a   :  { %6363 = vpow2.f32 %v4680_v41 }
 0x73b   :  { %6365 = vpow2.f32 %v4681_v13 }
 0x73c   :  { %6367 = vtanh.f32 %v6026_v43  ;;  %v8163_v43 = vld [vmem:[#allocation38_spill] sm:$0xff] }
 0x740   :  { %v6360_v3 = vpop.eup %6359 }
 0x741   :  { %v3800_v8 = vmul.f32 %v6360_v3, %v6358_v63 }
 0x743   :  { %v6362_v16 = vpop.eup %6361  ;;  %3830 = vst [vmem:[#allocation22 + $0x28] sm:$0xff] %v3800_v8  ;;  %3907 = vmatmul.mubr.f32.vlgmr.msra.gmra.mrb[12].mxu0 %v3800_v8  ;;  %3978 = vmatmul.mubr.f32.vlgmr.msra.gmra.mrb[12].mxu1 %v3800_v8  ;;  %v8168_v8 = vld [vmem:[#allocation43_spill] sm:$0xff] }
 0x744   :  { %v6364_v15 = vpop.eup %6363  ;;  %v3804_v29 = vadd.f32 1.0, %v6362_v16  ;;  %5785 = vmatpush1.bf16.msra.mxu0 %v7108_v49  ;;  %5817 = vmatpush1.bf16.msra.mxu1 %v7112_v52  ;;  %v8169_v16 = vld [vmem:[#allocation44_spill] sm:$0xff] }
 0x745   :  { %v3810_v5 = vadd.f32 1.0, %v6364_v15  ;;  %5787 = vmatprep.subr.bf16.mxu0 %v7114_v54  ;;  %5819 = vmatprep.subr.bf16.mxu1 %v7118_v62  ;;  %v6366_v4 = vpop.eup %6365  ;;  %v8172_v15 = vld [vmem:[#allocation47_spill] sm:$0xff] }
 0x746   :  { %6369 = vrcp.f32 %v3804_v29  ;;  %4057 = vmatprep.mubr.f32.mxu0 %v8020_v39  ;;  %4128 = vmatprep.mubr.f32.mxu1 %v8020_v39  ;;  %v6368_v45 = vpop.eup %6367  ;;  %v3817_v41 = vadd.f32 1.0, %v6366_v4  ;;  %v8173_v29 = vld [vmem:[#allocation48_spill] sm:$0xff]  ;;  %v8175_v4 = vld [vmem:[#allocation50_spill] sm:$0xff] }
 0x747   :  { %6371 = vrcp.f32 %v3810_v5  ;;  %v8174_v5 = vld [vmem:[#allocation49_spill] sm:$0xff] }
 0x748   :  { %5789 = vmatpush1.bf16.msra.mxu0 %v7124_v12  ;;  %5821 = vmatpush1.bf16.msra.mxu1 %v7128_v14  ;;  %6373 = vrcp.f32 %v3817_v41  ;;  %v8180_v41 = vld [vmem:[#allocation55_spill] sm:$0xff] }
 0x749   :  { %5791 = vmatprep.subr.bf16.mxu0 %v7130_v17  ;;  %5823 = vmatprep.subr.bf16.mxu1 %v7133_v24 }
 0x74c   :  { %5793 = vmatpush1.bf16.msra.mxu0 %v7138_v38  ;;  %5825 = vmatpush1.bf16.msra.mxu1 %v8026_v21 }
 0x74d   :  { %5795 = vmatprep.subr.bf16.mxu0 %v8027_v30  ;;  %5827 = vmatprep.subr.bf16.mxu1 %v8028_v46 }
 0x750   :  { %v6370_v51 = vpop.eup %6369  ;;  %5797 = vmatpush1.bf16.msra.mxu0 %v8053_v10  ;;  %5829 = vmatpush1.bf16.msra.mxu1 %v8030_v19 }
 0x751   :  { %v6372_v36 = vpop.eup %6371  ;;  %v3821_v25 = vmul.f32 %v6370_v51, %v6368_v45  ;;  %5799 = vmatprep.subr.bf16.mxu0 %v8031_v35  ;;  %5831 = vmatprep.subr.bf16.mxu1 %v8032_v1  ;;  %v8176_v45 = vld [vmem:[#allocation51_spill] sm:$0xff]  ;;  %v8177_v51 = vld [vmem:[#allocation52_spill] sm:$0xff] }
 0x752   :  { %v3820_v23 = vmul.f32 %v6372_v36, %v7626_v7  ;;  %v6374_v7 = vpop.eup %6373  ;;  %v8178_v36 = vld [vmem:[#allocation53_spill] sm:$0xff] }
 0x754   :  { %v7710_v63 = vadd.f32 %v3821_v25, %v3820_v23  ;;  %5801 = vmatpush1.bf16.msra.mxu0 %v8033_v55  ;;  %5833 = vmatpush1.bf16.msra.mxu1 %v8034_v27  ;;  %v8179_v25 = vld [vmem:[#allocation54_spill] sm:$0xff]  ;;  %v8181_v23 = vld [vmem:[#allocation56_spill] sm:$0xff] }
 0x755   :  { %5803 = vmatprep.subr.bf16.mxu0 %v7168_v61  ;;  %5835 = vmatprep.subr.bf16.mxu1 %v8035_v11 }
 0x756   :  { %6375 = vtanh.f32 %v7710_v63 }
 0x758   :  { %5805 = vmatpush1.bf16.msra.mxu0 %v7174_v18  ;;  %5837 = vmatpush1.bf16.msra.mxu1 %v7178_v0 }
 0x759   :  { %5807 = vmatprep.subr.bf16.mxu0 %v7180_v28  ;;  %5839 = vmatprep.subr.bf16.mxu1 %v7183_v48 }
 0x75c   :  { %5809 = vmatpush1.bf16.msra.mxu0 %v7186_v56  ;;  %5841 = vmatpush1.bf16.msra.mxu1 %v7190_v42 }
 0x75d   :  { %5811 = vmatprep.subr.bf16.mxu0 %v7192_v58  ;;  %5843 = vmatprep.subr.bf16.mxu1 %v7195_v22 }
 0x760   :  { %v6376_v3 = vpop.eup %6375  ;;  %5813 = vmatpush1.bf16.msra.mxu0 %v7198_v32  ;;  %5845 = vmatpush1.bf16.msra.mxu1 %v7202_v31 }
 0x761   :  { %v3824_v13 = vmul.f32 %v6376_v3, %v6374_v7  ;;  %5847 = vmatprep.subr.bf16.mxu0 %v6993_v37  ;;  %5879 = vmatprep.subr.bf16.mxu1 %v6995_v40  ;;  %v8161_v37 = vld [vmem:[#allocation36_spill] sm:$0xff]  ;;  %v8162_v40 = vld [vmem:[#allocation37_spill] sm:$0xff]  ;;  %v8183_v3 = vld [vmem:[#allocation58_spill] sm:$0xff] }
 0x762   :  { %v8182_v7 = vld [vmem:[#allocation57_spill] sm:$0xff] }
 0x763   :  { %3832 = vst [vmem:[#allocation23 + $0x10] sm:$0xff] %v3824_v13  ;;  %4058 = vmatmul.mubr.f32.vlgmr.msra.gmra.mrb[18].mxu0 %v3824_v13  ;;  %4129 = vmatmul.mubr.f32.vlgmr.msra.gmra.mrb[18].mxu1 %v3824_v13  ;;  %v8184_v13 = vld [vmem:[#allocation59_spill] sm:$0xff] }
 0x764   :  { %5849 = vmatpush1.bf16.msra.mxu0 %v6997_v44  ;;  %5881 = vmatpush1.bf16.msra.mxu1 %v7000_v47  ;;  %v8164_v44 = vld [vmem:[#allocation39_spill] sm:$0xff]  ;;  %v8165_v47 = vld [vmem:[#allocation40_spill] sm:$0xff] }
 0x765   :  { %5851 = vmatprep.subr.bf16.mxu0 %v7004_v50  ;;  %5883 = vmatprep.subr.bf16.mxu1 %v7007_v53  ;;  %v8166_v50 = vld [vmem:[#allocation41_spill] sm:$0xff]  ;;  %v8167_v53 = vld [vmem:[#allocation42_spill] sm:$0xff] }
 0x766   :  { %4268 = vmatprep.mubr.f32.mxu0 %v8020_v39  ;;  %4339 = vmatprep.mubr.f32.mxu1 %v8020_v39 }
 0x768   :  { %5853 = vmatpush1.bf16.msra.mxu0 %v7010_v57  ;;  %5885 = vmatpush1.bf16.msra.mxu1 %v7014_v60  ;;  %v8170_v57 = vld [vmem:[#allocation45_spill] sm:$0xff]  ;;  %v8171_v60 = vld [vmem:[#allocation46_spill] sm:$0xff] }
 0x769   :  { %5855 = vmatprep.subr.bf16.mxu0 %v8161_v37  ;;  %5887 = vmatprep.subr.bf16.mxu1 %v8162_v40  ;;  %v8185_v37 = vld [vmem:[#allocation60_spill] sm:$0xff]  ;;  %v8186_v40 = vld [vmem:[#allocation61_spill] sm:$0xff] }
 0x76c   :  { %5857 = vmatpush1.bf16.msra.mxu0 %v8163_v43  ;;  %5889 = vmatpush1.bf16.msra.mxu1 %v8164_v44 }
 0x76d   :  { %5859 = vmatprep.subr.bf16.mxu0 %v8165_v47  ;;  %5891 = vmatprep.subr.bf16.mxu1 %v8166_v50  ;;  %v8187_v47 = vld [vmem:[#allocation72_spill] sm:$0xff] }
 0x770   :  { %5861 = vmatpush1.bf16.msra.mxu0 %v8167_v53  ;;  %5893 = vmatpush1.bf16.msra.mxu1 %v8168_v8 }
 0x771   :  { %5863 = vmatprep.subr.bf16.mxu0 %v8169_v16  ;;  %5895 = vmatprep.subr.bf16.mxu1 %v8170_v57 }
 0x774   :  { %5865 = vmatpush1.bf16.msra.mxu0 %v8171_v60  ;;  %5897 = vmatpush1.bf16.msra.mxu1 %v8172_v15 }
 0x775   :  { %5867 = vmatprep.subr.bf16.mxu0 %v8173_v29  ;;  %5899 = vmatprep.subr.bf16.mxu1 %v8174_v5 }
 0x778   :  { %5869 = vmatpush1.bf16.msra.mxu0 %v8175_v4  ;;  %5901 = vmatpush1.bf16.msra.mxu1 %v8176_v45 }
 0x779   :  { %5871 = vmatprep.subr.bf16.mxu0 %v8177_v51  ;;  %5903 = vmatprep.subr.bf16.mxu1 %v8178_v36 }
 0x77c   :  { %5873 = vmatpush1.bf16.msra.mxu0 %v8179_v25  ;;  %5905 = vmatpush1.bf16.msra.mxu1 %v8180_v41 }
 0x77d   :  { %5875 = vmatprep.subr.bf16.mxu0 %v8181_v23  ;;  %5907 = vmatprep.subr.bf16.mxu1 %v8182_v7 }
 0x780   :  { %5877 = vmatpush1.bf16.msra.mxu0 %v8183_v3  ;;  %5909 = vmatpush1.bf16.msra.mxu1 %v8184_v13 }
 0x781   :  { %5911 = vmatprep.subr.bf16.mxu0 %v8185_v37  ;;  %5943 = vmatprep.subr.bf16.mxu1 %v8186_v40 }
 0x816   :  { %v3908_v43 = vpop.f32.mrb[12].mxu0  ;;  %v3979_v44 = vpop.f32.mrb[12].mxu1 }
 0x817   :  { %v5986_v50 = vadd.f32 %v3908_v43, %v8187_v47  ;;  %v3910_v53 = vpop.f32.mrb[13].mxu0  ;;  %v3981_v8 = vpop.f32.mrb[13].mxu1  ;;  %v6002_v5 = vadd.f32 %v3979_v44, %v8079_v26 }
 0x818   :  { %v5987_v16 = vadd.f32 %v3910_v53, %v8050_v20  ;;  %v6003_v15 = vadd.f32 %v3981_v8, %v8051_v33 }
 0x819   :  { %v4682_v57 = vmul.f32 -1.442695, %v5986_v50 }
 0x81a   :  { %v4683_v60 = vmul.f32 -1.442695, %v5987_v16  ;;  %v4684_v29 = vmul.f32 -1.442695, %v6003_v15 }
 0x81b   :  { %6377 = vpow2.f32 %v4682_v57 }
 0x81c   :  { %6379 = vpow2.f32 %v4683_v60 }
 0x81d   :  { %6381 = vpow2.f32 %v4684_v29 }
 0x81e   :  { %6383 = vtanh.f32 %v6002_v5 }
 0x825   :  { %v6378_v4 = vpop.eup %6377 }
 0x826   :  { %v6380_v45 = vpop.eup %6379  ;;  %v4142_v51 = vadd.f32 1.0, %v6378_v4 }
 0x827   :  { %v4148_v36 = vadd.f32 1.0, %v6380_v45  ;;  %v6382_v25 = vpop.eup %6381 }
 0x828   :  { %6385 = vrcp.f32 %v4142_v51  ;;  %v6384_v41 = vpop.eup %6383  ;;  %v4155_v13 = vadd.f32 1.0, %v6382_v25 }
 0x829   :  { %6387 = vrcp.f32 %v4148_v36 }
 0x82a   :  { %6389 = vrcp.f32 %v4155_v13 }
 0x832   :  { %v6386_v23 = vpop.eup %6385 }
 0x833   :  { %v6388_v7 = vpop.eup %6387  ;;  %v4159_v3 = vmul.f32 %v6386_v23, %v6384_v41 }
 0x834   :  { %v4158_v37 = vmul.f32 %v6388_v7, %v7684_v2  ;;  %v6390_v2 = vpop.eup %6389 }
 0x836   :  { %v7768_v40 = vadd.f32 %v4159_v3, %v4158_v37  ;;  %v4059_v43 = vpop.f32.mrb[18].mxu0  ;;  %v4130_v44 = vpop.f32.mrb[18].mxu1 }
 0x837   :  { %v6008_v50 = vadd.f32 %v4059_v43, %v8052_v59  ;;  %v4061_v53 = vpop.f32.mrb[19].mxu0  ;;  %v4132_v8 = vpop.f32.mrb[19].mxu1  ;;  %v6024_v4 = vadd.f32 %v4130_v44, %v7269_v9 }
 0x838   :  { %v6009_v16 = vadd.f32 %v4061_v53, %v7259_v6  ;;  %6391 = vtanh.f32 %v7768_v40  ;;  %v6025_v15 = vadd.f32 %v4132_v8, %v7266_v34 }
 0x839   :  { %v4685_v57 = vmul.f32 -1.442695, %v6008_v50 }
 0x83a   :  { %v4686_v60 = vmul.f32 -1.442695, %v6009_v16  ;;  %v4687_v5 = vmul.f32 -1.442695, %v6025_v15 }
 0x83b   :  { %6393 = vpow2.f32 %v4685_v57 }
 0x83c   :  { %6395 = vpow2.f32 %v4686_v60 }
 0x83d   :  { %6397 = vpow2.f32 %v4687_v5 }
 0x83e   :  { %6399 = vtanh.f32 %v6024_v4 }
 0x842   :  { %v6392_v29 = vpop.eup %6391 }
 0x843   :  { %v4162_v45 = vmul.f32 %v6392_v29, %v6390_v2 }
 0x845   :  { %v6394_v51 = vpop.eup %6393  ;;  %4192 = vst [vmem:[#allocation22 + $0x30] sm:$0xff] %v4162_v45  ;;  %4269 = vmatmul.mubr.f32.vlgmr.msra.gmra.mrb[14].mxu0 %v4162_v45  ;;  %4340 = vmatmul.mubr.f32.vlgmr.msra.gmra.mrb[14].mxu1 %v4162_v45 }
 0x846   :  { %v6396_v36 = vpop.eup %6395  ;;  %v4166_v25 = vadd.f32 1.0, %v6394_v51  ;;  %5913 = vmatpush1.bf16.msra.mxu0 %v7108_v49  ;;  %5945 = vmatpush1.bf16.msra.mxu1 %v7112_v52 }
 0x847   :  { %v4172_v41 = vadd.f32 1.0, %v6396_v36  ;;  %5915 = vmatprep.subr.bf16.mxu0 %v7114_v54  ;;  %5947 = vmatprep.subr.bf16.mxu1 %v7118_v62  ;;  %v6398_v49 = vpop.eup %6397 }
 0x848   :  { %6401 = vrcp.f32 %v4166_v25  ;;  %4418 = vmatprep.mubr.f32.mxu0 %v8020_v39  ;;  %4489 = vmatprep.mubr.f32.mxu1 %v8020_v39  ;;  %v6400_v52 = vpop.eup %6399 }
 0x849   :  { %6403 = vrcp.f32 %v4172_v41 }
 0x84a   :  { %5917 = vmatpush1.bf16.msra.mxu0 %v7124_v12  ;;  %5949 = vmatpush1.bf16.msra.mxu1 %v7128_v14  ;;  %v4179_v14 = vadd.f32 1.0, %v6398_v49 }
 0x84b   :  { %5919 = vmatprep.subr.bf16.mxu0 %v7130_v17  ;;  %5951 = vmatprep.subr.bf16.mxu1 %v7133_v24 }
 0x84c   :  { %6405 = vrcp.f32 %v4179_v14 }
 0x84e   :  { %5921 = vmatpush1.bf16.msra.mxu0 %v7138_v38  ;;  %5953 = vmatpush1.bf16.msra.mxu1 %v8026_v21 }
 0x84f   :  { %5923 = vmatprep.subr.bf16.mxu0 %v8027_v30  ;;  %5955 = vmatprep.subr.bf16.mxu1 %v8028_v46 }
 0x852   :  { %v6402_v54 = vpop.eup %6401  ;;  %5925 = vmatpush1.bf16.msra.mxu0 %v8053_v10  ;;  %5957 = vmatpush1.bf16.msra.mxu1 %v8030_v19 }
 0x853   :  { %v6404_v62 = vpop.eup %6403  ;;  %v4183_v12 = vmul.f32 %v6402_v54, %v6400_v52  ;;  %5927 = vmatprep.subr.bf16.mxu0 %v8031_v35  ;;  %5959 = vmatprep.subr.bf16.mxu1 %v8032_v1 }
 0x854   :  { %v4182_v17 = vmul.f32 %v6404_v62, %v7710_v63 }
 0x856   :  { %v7794_v24 = vadd.f32 %v4183_v12, %v4182_v17  ;;  %5929 = vmatpush1.bf16.msra.mxu0 %v8033_v55  ;;  %5961 = vmatpush1.bf16.msra.mxu1 %v8034_v27  ;;  %v6406_v38 = vpop.eup %6405 }
 0x857   :  { %5931 = vmatprep.subr.bf16.mxu0 %v7168_v61  ;;  %5963 = vmatprep.subr.bf16.mxu1 %v8035_v11 }
 0x858   :  { %6407 = vtanh.f32 %v7794_v24 }
 0x85a   :  { %5933 = vmatpush1.bf16.msra.mxu0 %v7174_v18  ;;  %5965 = vmatpush1.bf16.msra.mxu1 %v7178_v0 }
 0x85b   :  { %5935 = vmatprep.subr.bf16.mxu0 %v7180_v28  ;;  %5967 = vmatprep.subr.bf16.mxu1 %v7183_v48 }
 0x85e   :  { %5937 = vmatpush1.bf16.msra.mxu0 %v7186_v56  ;;  %5969 = vmatpush1.bf16.msra.mxu1 %v7190_v42 }
 0x85f   :  { %5939 = vmatprep.subr.bf16.mxu0 %v7192_v58  ;;  %5971 = vmatprep.subr.bf16.mxu1 %v7195_v22 }
 0x862   :  { %v6408_v61 = vpop.eup %6407  ;;  %5941 = vmatpush1.bf16.msra.mxu0 %v7198_v32  ;;  %5973 = vmatpush1.bf16.msra.mxu1 %v7202_v31 }
 0x863   :  { %v4186_v18 = vmul.f32 %v6408_v61, %v6406_v38 }
 0x865   :  { %4194 = vst [vmem:[#allocation23 + $0x8] sm:$0xff] %v4186_v18  ;;  %4419 = vmatmul.mubr.f32.vlgmr.msra.gmra.mrb[16].mxu0 %v4186_v18  ;;  %4490 = vmatmul.mubr.f32.vlgmr.msra.gmra.mrb[16].mxu1 %v4186_v18 }
 0x918   :  { %v4270_v0 = vpop.f32.mrb[14].mxu0  ;;  %v4341_v28 = vpop.f32.mrb[14].mxu1 }
 0x919   :  { %v5988_v56 = vadd.f32 %v4270_v0, %v8187_v47  ;;  %v4272_v48 = vpop.f32.mrb[15].mxu0  ;;  %v4343_v42 = vpop.f32.mrb[15].mxu1  ;;  %v6004_v31 = vadd.f32 %v4341_v28, %v8079_v26 }
 0x91a   :  { %v5989_v58 = vadd.f32 %v4272_v48, %v8050_v20  ;;  %v6005_v32 = vadd.f32 %v4343_v42, %v8051_v33 }
 0x91b   :  { %v4688_v39 = vmul.f32 -1.442695, %v5988_v56 }
 0x91c   :  { %v4689_v22 = vmul.f32 -1.442695, %v5989_v58  ;;  %v4690_v21 = vmul.f32 -1.442695, %v6005_v32 }
 0x91d   :  { %6409 = vpow2.f32 %v4688_v39 }
 0x91e   :  { %6411 = vpow2.f32 %v4689_v22 }
 0x91f   :  { %6413 = vpow2.f32 %v4690_v21 }
 0x920   :  { %6415 = vtanh.f32 %v6004_v31 }
 0x927   :  { %v6410_v30 = vpop.eup %6409 }
 0x928   :  { %v6412_v46 = vpop.eup %6411  ;;  %v4503_v11 = vadd.f32 1.0, %v6410_v30 }
 0x929   :  { %v4509_v19 = vadd.f32 1.0, %v6412_v46  ;;  %v6414_v35 = vpop.eup %6413 }
 0x92a   :  { %6417 = vrcp.f32 %v4503_v11  ;;  %v6416_v1 = vpop.eup %6415  ;;  %v4516_v10 = vadd.f32 1.0, %v6414_v35 }
 0x92b   :  { %6419 = vrcp.f32 %v4509_v19 }
 0x92c   :  { %6421 = vrcp.f32 %v4516_v10 }
 0x934   :  { %v6418_v20 = vpop.eup %6417 }
 0x935   :  { %v6420_v55 = vpop.eup %6419  ;;  %v4520_v27 = vmul.f32 %v6418_v20, %v6416_v1 }
 0x936   :  { %v4519_v63 = vmul.f32 %v6420_v55, %v7768_v40  ;;  %v6422_v40 = vpop.eup %6421 }
 0x938   :  { %v4521_v33 = vadd.f32 %v4520_v27, %v4519_v63  ;;  %v4420_v47 = vpop.f32.mrb[16].mxu0  ;;  %v4491_v23 = vpop.f32.mrb[16].mxu1 }
 0x939   :  { %v6006_v26 = vadd.f32 %v4420_v47, %v8052_v59  ;;  %v4422_v7 = vpop.f32.mrb[17].mxu0  ;;  %v4493_v3 = vpop.f32.mrb[17].mxu1  ;;  %v6022_v59 = vadd.f32 %v4491_v23, %v7269_v9 }
 0x93a   :  { %6423 = vtanh.f32 %v4521_v33  ;;  %4564 = vst [vmem:[#allocation26] sm:$0xff] %v4521_v33  ;;  %v6007_v13 = vadd.f32 %v4422_v7, %v7259_v6  ;;  %v6023_v44 = vadd.f32 %v4493_v3, %v7266_v34 }
 0x93b   :  { %v4691_v37 = vmul.f32 -1.442695, %v6006_v26 }
 0x93c   :  { %v4692_v43 = vmul.f32 -1.442695, %v6007_v13  ;;  %v4693_v53 = vmul.f32 -1.442695, %v6023_v44 }
 0x93d   :  { %6425 = vpow2.f32 %v4691_v37 }
 0x93e   :  { %6427 = vpow2.f32 %v4692_v43 }
 0x93f   :  { %6429 = vpow2.f32 %v4693_v53 }
 0x944   :  { %v6424_v50 = vpop.eup %6423 }
 0x945   :  { %v4523_v8 = vmul.f32 %v6424_v50, %v6422_v40 }
 0x947   :  { %v6426_v16 = vpop.eup %6425  ;;  %4553 = vst [vmem:[#allocation22 + $0x38] sm:$0xff] %v4523_v8  ;;  %4559 = vst [vmem:[#allocation25] sm:$0xff] %v4523_v8 }
 0x948   :  { %v6428_v57 = vpop.eup %6427  ;;  %v4527_v6 = vadd.f32 1.0, %v6426_v16 }
 0x949   :  { %6628 = shalt.err (!%p6625_p12)
}
 0x94a   :  { %s6629_s0 = scalar_lea.hbm %s7896_s8, 1024 }
 0x94b   :  { %p6630_p13 = scmp.ne.s32.totalorder %s7896_s8, %s6629_s0  ;;  %p6633_p0 = scmp.lt.u32.totalorder %s6629_s0, %s7896_s8 }
 0x94d   :  { %p6635_p1 = pnand %p6633_p0, %p6630_p13 }
 0x94f   :  { %6638 = shalt.err (!%p6635_p1)
}
 0x950   :  { %4579 = dma.vmem_to_hbm [thread:$0]  %s4574_s23, 1024, %s7896_s8, [#allocation10], %s6723_s29, %s6723_s29, %s6724_s30   ;;  %6431 = vtanh.f32 %v6022_v59  ;;  %v4533_v34 = vadd.f32 1.0, %v6428_v57  ;;  %v6430_v9 = vpop.eup %6429 }
 0x951   :  { %6433 = vrcp.f32 %v4527_v6  ;;  %v4540_v5 = vadd.f32 1.0, %v6430_v9  ;;  %s6737_s13 = smov [#allocation26]  }
 0x952   :  { %6435 = vrcp.f32 %v4533_v34  ;;  %s4613_s5 = sshll.u32 %s6737_s13, 4  ;;  %s4614_s5 = int_to_ptr.vmem [resolvable:$true] %s4613_s5 }
 0x953   :  { %6437 = vrcp.f32 %v4540_v5  ;;  %s6639_s8 = scalar_lea.vmem %s4614_s5, 256  ;;  %p6644_p3 = scmp.lt.s32.totalorder %s4614_s5, %s4614_s5 }
 0x954   :  { %p6640_p2 = scmp.ne.s32.totalorder %s4614_s5, %s6639_s8  ;;  %p6645_p4 = scmp.lt.s32.totalorder %s6639_s8, %s6639_s8 }
 0x956   :  { %p6646_p5 = por %p6645_p4, %p6644_p3 }
 0x958   :  { %p6647_p6 = pnand %p6646_p5, %p6640_p2 }
 0x95a   :  { %v6432_v60 = vpop.eup %6431 }
 0x95b   :  { %v6434_v15 = vpop.eup %6433 }
 0x95c   :  { %v6436_v2 = vpop.eup %6435  ;;  %v4544_v29 = vmul.f32 %v6434_v15, %v6432_v60 }
 0x95d   :  { %v4543_v4 = vmul.f32 %v6436_v2, %v7794_v24 }
 0x95f   :  { %v4545_v45 = vadd.f32 %v4544_v29, %v4543_v4 }
 0x961   :  { %6439 = vtanh.f32 %v4545_v45  ;;  %4567 = vst [vmem:[#allocation26 + $0x8] sm:$0xff] %v4545_v45 }
 0x962   :  { %6650 = shalt.err (!%p6647_p6)
}
 0x963   :  { %s6651_s16 = scalar_lea.hbm %s7899_s11, 256 }
 0x964   :  { %p6652_p7 = scmp.ne.s32.totalorder %s7899_s11, %s6651_s16  ;;  %p6655_p8 = scmp.lt.u32.totalorder %s6651_s16, %s7899_s11 }
 0x966   :  { %p6657_p9 = pnand %p6655_p8, %p6652_p7 }
 0x968   :  { %6660 = shalt.err (!%p6657_p9)
}
 0x969   :  { %4619 = dma.vmem_to_hbm [thread:$0]  %s4614_s5, 256, %s7899_s11, [#allocation27], %s6723_s29, %s6723_s29, %s6724_s30   ;;  %v6438_v51 = vpop.eup %6437 }
 0x96a   :  { %s6738_s19 = smov [#allocation23]   ;;  %s6739_s7 = smov [#allocation25]  }
 0x96b   :  { %s4589_s22 = sshll.u32 %s6738_s19, 4  ;;  %s4601_s23 = sshll.u32 %s6739_s7, 4  ;;  %v6440_v36 = vpop.eup %6439  ;;  %s4590_s22 = int_to_ptr.vmem [resolvable:$true] %s4589_s22  ;;  %s7851_s23 = int_to_ptr.vmem [resolvable:$true] %s4601_s23 }
 0x96c   :  { %v4547_v25 = vmul.f32 %v6440_v36, %v6438_v51  ;;  %s6661_s1 = scalar_lea.vmem %s4590_s22, 1024  ;;  %p6666_p11 = scmp.lt.s32.totalorder %s4590_s22, %s4590_s22 }
 0x96d   :  { %p6662_p10 = scmp.ne.s32.totalorder %s4590_s22, %s6661_s1  ;;  %p6667_p12 = scmp.lt.s32.totalorder %s6661_s1, %s6661_s1 }
 0x96e   :  { %4554 = vst [vmem:[#allocation23] sm:$0xff] %v4547_v25  ;;  %4562 = vst [vmem:[#allocation25 + $0x8] sm:$0xff] %v4547_v25 }
 0x96f   :  { %p6668_p13 = por %p6667_p12, %p6666_p11 }
 0x971   :  { %p6669_p0 = pnand %p6668_p13, %p6662_p10 }
 0x973   :  { %6672 = shalt.err (!%p6669_p0)
}
 0x974   :  { %s6673_s24 = scalar_lea.hbm %s7897_s9, 1024 }
 0x975   :  { %p6674_p1 = scmp.ne.s32.totalorder %s7897_s9, %s6673_s24  ;;  %p6677_p2 = scmp.lt.u32.totalorder %s6673_s24, %s7897_s9 }
 0x977   :  { %p6679_p3 = pnand %p6677_p2, %p6674_p1 }
 0x979   :  { %6682 = shalt.err (!%p6679_p3)
}
 0x97a   :  { %4595 = dma.vmem_to_hbm [thread:$0]  %s4590_s22, 1024, %s7897_s9, [#allocation24], %s6723_s29, %s6723_s29, %s6724_s30  }
 0x97b   :  { %s6683_s17 = scalar_lea.vmem %s7851_s23, 256  ;;  %p6688_p5 = scmp.lt.s32.totalorder %s7851_s23, %s7851_s23 }
 0x97c   :  { %p6684_p4 = scmp.ne.s32.totalorder %s7851_s23, %s6683_s17  ;;  %p6689_p6 = scmp.lt.s32.totalorder %s6683_s17, %s6683_s17 }
 0x97e   :  { %p6690_p7 = por %p6689_p6, %p6688_p5 }
 0x980   :  { %p6691_p8 = pnand %p6690_p7, %p6684_p4 }
 0x982   :  { %6694 = shalt.err (!%p6691_p8)
}
 0x983   :  { %s6695_s8 = scalar_lea.hbm %s7898_s10, 256 }
 0x984   :  { %p6696_p9 = scmp.ne.s32.totalorder %s7898_s10, %s6695_s8  ;;  %p6699_p10 = scmp.lt.u32.totalorder %s6695_s8, %s7898_s10 }
 0x986   :  { %p6701_p11 = pnand %p6699_p10, %p6696_p9 }
 0x988   :  { %6704 = shalt.err (!%p6701_p11)
}
 0x989   :  { %4607 = dma.vmem_to_hbm [thread:$0]  %s7851_s23, 256, %s7898_s10, [#allocation24], %s6723_s29, %s6723_s29, %s6724_s30  }
 0x98a   :  { %6715 = dma.done.wait [#allocation10], 1024  }
 0x98b   :  { %6716 = vsyncadd [#allocation10], 4294966272 }
 0x98c   :  { %6717 = dma.done.wait [#allocation24], 1280  }
 0x98d   :  { %6718 = vsyncadd [#allocation24], 4294966016 }
 0x98e   :  { %6719 = dma.done.wait [#allocation27], 256  }
 0x98f   :  { %6720 = vsyncadd [#allocation27], 4294967040 }
 0x990   :  { %4632 = vsyncpa [#allocation9], 1 }
 0x991   :  { %4633 = vsyncpa [#allocation12], 1 }
 0x992   :  { %4634 = vsyncpa [#allocation15], 1 }
 0x993   :  { %4635 = vsyncpa [#allocation18], 1 }
 0x994   :  { %4636 = vsyncpa [#allocation21], 1 }
 0x995   :  { %4637 = vsyncpa [#allocation10], 1 }
 0x996   :  { %4638 = vsyncpa [#allocation24], 1 }
 0x997   :  { %4639 = vsyncpa [#allocation27], 1 }

</bundles_post_ra>
